<compile_context>
chip_gen: v5e
topology: v5e:2x2
jax: 0.10.0
libtpu: 0.0.40
codegen_flags: <defaults>
</compile_context>

<pallas_src>
import jax
import jax.numpy as jnp
from jax.experimental import pallas as pl
from jax.experimental.pallas import tpu as pltpu


def basic_block_fixup_kernel(scal_ref, x_ref, w1_ref, w2_ref, o_ref, hp_ref):
    # scalars (SMEM): [bias1a, bias1b, bias2a, scale, bias2b]
    b1a = scal_ref[0]
    b1b = scal_ref[1]
    b2a = scal_ref[2]
    scale = scal_ref[3]
    b2b = scal_ref[4]

    B_T, H, W, Cin = x_ref.shape
    P = w1_ref.shape[-1]           # w1_ref: (9*Cin, P)
    Cout = w2_ref.shape[-1]        # w2_ref: (9*P, Cout)
    C = hp_ref.shape[-1]
    cdt = x_ref.dtype              # compute/staging dtype (bf16 in prod, f32 in this demo)

    # (Re)zero ONLY the 1-pixel halo strips of the padded scratch.  The interior is fully
    # overwritten before every use.  Done every step (4 tiny masked strip stores) so the
    # kernel stays correct when the batch axis is split across v7x's two TensorCores.
    hp_ref[:, 0:1, :, :] = jnp.zeros((B_T, 1, W + 2, C), cdt)
    hp_ref[:, H + 1:H + 2, :, :] = jnp.zeros((B_T, 1, W + 2, C), cdt)
    hp_ref[:, :, 0:1, :] = jnp.zeros((B_T, H + 2, 1, C), cdt)
    hp_ref[:, :, W + 1:W + 2, :] = jnp.zeros((B_T, H + 2, 1, C), cdt)

    x_in = x_ref[...]              # (B_T, H, W, Cin) in native dtype (kept for the shortcut)

    def conv3x3(stage, w_flat_ref, cout):
        # `stage`: (B_T, H, W, C) already biased, in the compute dtype.
        # Zero-padding happens AFTER the bias add (matches conv(x + bias)).
        hp_ref[:, 1:H + 1, 1:W + 1, :] = stage
        # im2col: 9 shifted windows concatenated on the lane axis -> (B_T*H*W, 9*C),
        # then ONE folded MXU matmul with f32 accumulation (K = 9*C fills the MXU far
        # better than 9 separate K=C dots and drops 8 full-size VPU accumulator adds).
        cols = [
            hp_ref[:, ky:ky + H, kx:kx + W, :].reshape(B_T * H * W, C)
            for ky in range(3) for kx in range(3)
        ]
        slab = jnp.concatenate(cols, axis=-1)                       # (B_T*H*W, 9*C)
        acc = jnp.dot(slab, w_flat_ref[...],
                      preferred_element_type=jnp.float32)           # (B_T*H*W, cout) f32
        return acc.reshape(B_T, H, W, cout)

    # conv1: bias add in the staging dtype (bf16 on v6e/v7x -> no f32 round trip)
    h = conv3x3(x_in + b1a.astype(cdt), w1_ref, P)
    h = jnp.maximum(h + b1b, 0.0)                                   # act1 (ReLU), f32
    h = conv3x3((h + b2a).astype(cdt), w2_ref, Cout)                # conv2
    h = h * scale + b2b + x_in.astype(jnp.float32)                  # fixup scale/bias + shortcut
    o_ref[...] = jnp.maximum(h, 0.0).astype(o_ref.dtype)            # act2 (ReLU)


def _pick_batch_tile(N, H, W, C, itemsize, budget_bytes=24 * 1024 * 1024):
    """Largest divisor of N whose per-step VMEM footprint fits the budget
    (conservative so the same tiling also fits v7x's 64 MiB VMEM with headroom)."""
    per_img = (
        2 * H * W * C * itemsize            # x tile (double buffered)
        + 2 * H * W * C * itemsize          # out tile (double buffered)
        + (H + 2) * (W + 2) * C * itemsize  # padded staging scratch
        + 9 * H * W * C * itemsize          # im2col slab value
        + 3 * H * W * C * 4                 # f32 intermediates (rough upper bound)
    )
    bt = max(1, min(N, budget_bytes // max(per_img, 1)))
    while N % bt:
        bt -= 1
    return bt


def basic_block_fixup(x, w1, w2, scalars):
    """Fused BasicBlockFixup forward (stride=1, downsample=None).

    x:       (N, H, W, C)  NHWC activations
    w1:      (3, 3, C, P)  HWIO conv1 weight (P == planes)
    w2:      (3, 3, P, P)  HWIO conv2 weight (expansion == 1)
    scalars: (5,) float32  [bias1a, bias1b, bias2a, scale, bias2b]
    """
    N, H, W, Cin = x.shape
    P = w1.shape[-1]
    Cout = w2.shape[-1]
    assert P == Cin and Cout == Cin, (
        "identity shortcut requires in_planes == planes (stride=1, downsample=None)")

    cdt = x.dtype
    # Fold the 3x3 taps into the contraction dim and pre-cast to the compute dtype so the
    # matmul RHS is a single resident contiguous (9C, Cout) block.
    w1_flat = w1.reshape(9 * Cin, P).astype(cdt)
    w2_flat = w2.reshape(9 * P, Cout).astype(cdt)

    B_T = _pick_batch_tile(N, H, W, Cin, jnp.dtype(cdt).itemsize)

    flops = 2 * N * H * W * 9 * (Cin * P + P * Cout)
    bytes_accessed = (x.size * x.dtype.itemsize
                      + N * H * W * Cout * x.dtype.itemsize
                      + w1_flat.size * w1_flat.dtype.itemsize
                      + w2_flat.size * w2_flat.dtype.itemsize
                      + scalars.size * scalars.dtype.itemsize)

    return pl.pallas_call(
        basic_block_fixup_kernel,
        out_shape=jax.ShapeDtypeStruct((N, H, W, Cout), x.dtype),
        grid_spec=pltpu.PrefetchScalarGridSpec(
            num_scalar_prefetch=0,
            grid=(N // B_T,),                                            # B_T images / step
            in_specs=[
                pl.BlockSpec(memory_space=pltpu.MemorySpace.SMEM),       # fixup scalars
                pl.BlockSpec((B_T, H, W, Cin), lambda n: (n, 0, 0, 0)),  # x tile (pipelined)
                pl.BlockSpec((9 * Cin, P), lambda n: (0, 0)),            # w1 flat: resident
                pl.BlockSpec((9 * P, Cout), lambda n: (0, 0)),           # w2 flat: resident
            ],
            out_specs=pl.BlockSpec((B_T, H, W, Cout), lambda n: (n, 0, 0, 0)),
            scratch_shapes=[pltpu.VMEM((B_T, H + 2, W + 2, Cin), cdt)],  # zero-haloed pad buf
        ),
        compiler_params=pltpu.CompilerParams(
            dimension_semantics=("parallel",),        # batch axis shards across v7x's 2 TCs
            vmem_limit_bytes=48 * 1024 * 1024,        # headroom under v7x's 64 MiB VMEM
        ),
        cost_estimate=pl.CostEstimate(flops=flops, transcendentals=0,
                                      bytes_accessed=bytes_accessed),
    )(scalars, x, w1_flat, w2_flat)


def reference_forward(x, w1, w2, scalars):
    """Pure-JAX (XLA) reference of the same forward, NHWC / HWIO."""
    b1a, b1b, b2a, scale, b2b = [scalars[i] for i in range(5)]
    dn = ("NHWC", "HWIO", "NHWC")
    h = jax.lax.conv_general_dilated(x + b1a, w1, (1, 1), ((1, 1), (1, 1)),
                                     dimension_numbers=dn)
    h = jax.nn.relu(h + b1b)
    h = jax.lax.conv_general_dilated(h + b2a, w2, (1, 1), ((1, 1), (1, 1)),
                                     dimension_numbers=dn)
    h = h * scale + b2b
    return jax.nn.relu(h + x)


if __name__ == "__main__":
    # Small shapes consistent with the module: in_planes == planes (expansion=1, stride=1)
    N, H, W = 2, 16, 16
    planes = 16
    in_planes = planes

    key = jax.random.PRNGKey(0)
    kx_, k1, k2 = jax.random.split(key, 3)

    x = jax.random.normal(kx_, (N, H, W, in_planes), dtype=jnp.float32)
    w1 = 0.1 * jax.random.normal(k1, (3, 3, in_planes, planes), dtype=jnp.float32)  # conv1 3x3
    w2 = 0.1 * jax.random.normal(k2, (3, 3, planes, planes), dtype=jnp.float32)     # conv2 3x3
    # [bias1a, bias1b, bias2a, scale, bias2b] -- nonzero so every term is exercised
    scalars = jnp.array([0.1, -0.2, 0.15, 1.25, 0.05], dtype=jnp.float32)

    out = jax.block_until_ready(basic_block_fixup(x, w1, w2, scalars))
    ref = jax.block_until_ready(reference_forward(x, w1, w2, scalars))

    assert out.shape == ref.shape
    err = float(jnp.max(jnp.abs(out - ref)))
    assert jnp.allclose(out, ref, rtol=2e-2, atol=2e-2), err
    print("KERNEL_OK")
</pallas_src>

<mosaic_0001>
module attributes {stable_mosaic.version = 11 : i64} {
  func.func @basic_block_fixup_kernel(%arg0: i32, %arg1: memref<5xf32, #tpu.memory_space<smem>>, %arg2: memref<2x16x16x16xf32, #tpu.memory_space<vmem>>, %arg3: memref<144x16xf32, #tpu.memory_space<vmem>>, %arg4: memref<144x16xf32, #tpu.memory_space<vmem>>, %arg5: memref<2x16x16x16xf32, #tpu.memory_space<vmem>>, %arg6: memref<2x18x18x16xf32, #tpu.memory_space<vmem>>) attributes {dimension_semantics = [#tpu.dimension_semantics<parallel>], iteration_bounds = array<i64: 1>, scalar_prefetch = 0 : i64, scratch_operands = 1 : i64, tpu.core_type = #tpu.core_type<tc>, window_params = [{transform_indices = @transform_0, window_bounds = array<i64: 5>}, {transform_indices = @transform_1, window_bounds = array<i64: 2, 16, 16, 16>}, {pipeline_mode = #tpu.pipeline_mode<synchronous>, transform_indices = @transform_2, window_bounds = array<i64: 144, 16>}, {pipeline_mode = #tpu.pipeline_mode<synchronous>, transform_indices = @transform_3, window_bounds = array<i64: 144, 16>}, {transform_indices = @transform_4, window_bounds = array<i64: 2, 16, 16, 16>}]} {
    %c0 = arith.constant 0 : index
    %0 = memref.load %arg1[%c0] : memref<5xf32, #tpu.memory_space<smem>>
    %c1 = arith.constant 1 : index
    %1 = memref.load %arg1[%c1] : memref<5xf32, #tpu.memory_space<smem>>
    %c2 = arith.constant 2 : index
    %2 = memref.load %arg1[%c2] : memref<5xf32, #tpu.memory_space<smem>>
    %c3 = arith.constant 3 : index
    %3 = memref.load %arg1[%c3] : memref<5xf32, #tpu.memory_space<smem>>
    %c4 = arith.constant 4 : index
    %4 = memref.load %arg1[%c4] : memref<5xf32, #tpu.memory_space<smem>>
    %cst = arith.constant 0.000000e+00 : f32
    %5 = vector.broadcast %cst : f32 to vector<2x1x18x16xf32>
    %c0_0 = arith.constant 0 : index
    %c0_1 = arith.constant 0 : index
    %c0_2 = arith.constant 0 : index
    %c0_3 = arith.constant 0 : index
    %6 = vector.load %arg6[%c0_0, %c0_1, %c0_2, %c0_3] : memref<2x18x18x16xf32, #tpu.memory_space<vmem>>, vector<2x1x18x16xf32>
    tpu.vector_store %arg6[%c0_0, %c0_1, %c0_2, %c0_3], %5 {strides = array<i32>} : memref<2x18x18x16xf32, #tpu.memory_space<vmem>>, vector<2x1x18x16xf32>,
    %cst_4 = arith.constant 0.000000e+00 : f32
    %7 = vector.broadcast %cst_4 : f32 to vector<2x1x18x16xf32>
    %c0_5 = arith.constant 0 : index
    %c17 = arith.constant 17 : index
    %c0_6 = arith.constant 0 : index
    %c0_7 = arith.constant 0 : index
    %8 = vector.load %arg6[%c0_5, %c17, %c0_6, %c0_7] : memref<2x18x18x16xf32, #tpu.memory_space<vmem>>, vector<2x1x18x16xf32>
    tpu.vector_store %arg6[%c0_5, %c17, %c0_6, %c0_7], %7 {strides = array<i32>} : memref<2x18x18x16xf32, #tpu.memory_space<vmem>>, vector<2x1x18x16xf32>,
    %cst_8 = arith.constant 0.000000e+00 : f32
    %9 = vector.broadcast %cst_8 : f32 to vector<2x18x1x16xf32>
    %c0_9 = arith.constant 0 : index
    %c0_10 = arith.constant 0 : index
    %c0_11 = arith.constant 0 : index
    %c0_12 = arith.constant 0 : index
    %10 = vector.load %arg6[%c0_9, %c0_10, %c0_11, %c0_12] : memref<2x18x18x16xf32, #tpu.memory_space<vmem>>, vector<2x18x1x16xf32>
    tpu.vector_store %arg6[%c0_9, %c0_10, %c0_11, %c0_12], %9 {strides = array<i32>} : memref<2x18x18x16xf32, #tpu.memory_space<vmem>>, vector<2x18x1x16xf32>,
    %cst_13 = arith.constant 0.000000e+00 : f32
    %11 = vector.broadcast %cst_13 : f32 to vector<2x18x1x16xf32>
    %c0_14 = arith.constant 0 : index
    %c0_15 = arith.constant 0 : index
    %c17_16 = arith.constant 17 : index
    %c0_17 = arith.constant 0 : index
    %12 = vector.load %arg6[%c0_14, %c0_15, %c17_16, %c0_17] : memref<2x18x18x16xf32, #tpu.memory_space<vmem>>, vector<2x18x1x16xf32>
    tpu.vector_store %arg6[%c0_14, %c0_15, %c17_16, %c0_17], %11 {strides = array<i32>} : memref<2x18x18x16xf32, #tpu.memory_space<vmem>>, vector<2x18x1x16xf32>,
    %c0_18 = arith.constant 0 : index
    %c0_19 = arith.constant 0 : index
    %c0_20 = arith.constant 0 : index
    %c0_21 = arith.constant 0 : index
    %13 = vector.load %arg2[%c0_18, %c0_19, %c0_20, %c0_21] : memref<2x16x16x16xf32, #tpu.memory_space<vmem>>, vector<2x16x16x16xf32>
    %14 = vector.broadcast %0 : f32 to vector<2x16x16x16xf32>
    %15 = arith.addf %13, %14 : vector<2x16x16x16xf32>
    %c0_22 = arith.constant 0 : index
    %c1_23 = arith.constant 1 : index
    %c1_24 = arith.constant 1 : index
    %c0_25 = arith.constant 0 : index
    %16 = vector.load %arg6[%c0_22, %c1_23, %c1_24, %c0_25] : memref<2x18x18x16xf32, #tpu.memory_space<vmem>>, vector<2x16x16x16xf32>
    tpu.vector_store %arg6[%c0_22, %c1_23, %c1_24, %c0_25], %15 {strides = array<i32>} : memref<2x18x18x16xf32, #tpu.memory_space<vmem>>, vector<2x16x16x16xf32>,
    %c0_26 = arith.constant 0 : index
    %c0_27 = arith.constant 0 : index
    %c0_28 = arith.constant 0 : index
    %c0_29 = arith.constant 0 : index
    %17 = vector.load %arg6[%c0_26, %c0_27, %c0_28, %c0_29] : memref<2x18x18x16xf32, #tpu.memory_space<vmem>>, vector<2x16x16x16xf32>
    %18 = vector.shape_cast %17 : vector<2x16x16x16xf32> to vector<512x16xf32>
    %c0_30 = arith.constant 0 : index
    %c0_31 = arith.constant 0 : index
    %c1_32 = arith.constant 1 : index
    %c0_33 = arith.constant 0 : index
    %19 = vector.load %arg6[%c0_30, %c0_31, %c1_32, %c0_33] : memref<2x18x18x16xf32, #tpu.memory_space<vmem>>, vector<2x16x16x16xf32>
    %20 = vector.shape_cast %19 : vector<2x16x16x16xf32> to vector<512x16xf32>
    %c0_34 = arith.constant 0 : index
    %c0_35 = arith.constant 0 : index
    %c2_36 = arith.constant 2 : index
    %c0_37 = arith.constant 0 : index
    %21 = vector.load %arg6[%c0_34, %c0_35, %c2_36, %c0_37] : memref<2x18x18x16xf32, #tpu.memory_space<vmem>>, vector<2x16x16x16xf32>
    %22 = vector.shape_cast %21 : vector<2x16x16x16xf32> to vector<512x16xf32>
    %c0_38 = arith.constant 0 : index
    %c1_39 = arith.constant 1 : index
    %c0_40 = arith.constant 0 : index
    %c0_41 = arith.constant 0 : index
    %23 = vector.load %arg6[%c0_38, %c1_39, %c0_40, %c0_41] : memref<2x18x18x16xf32, #tpu.memory_space<vmem>>, vector<2x16x16x16xf32>
    %24 = vector.shape_cast %23 : vector<2x16x16x16xf32> to vector<512x16xf32>
    %c0_42 = arith.constant 0 : index
    %c1_43 = arith.constant 1 : index
    %c1_44 = arith.constant 1 : index
    %c0_45 = arith.constant 0 : index
    %25 = vector.load %arg6[%c0_42, %c1_43, %c1_44, %c0_45] : memref<2x18x18x16xf32, #tpu.memory_space<vmem>>, vector<2x16x16x16xf32>
    %26 = vector.shape_cast %25 : vector<2x16x16x16xf32> to vector<512x16xf32>
    %c0_46 = arith.constant 0 : index
    %c1_47 = arith.constant 1 : index
    %c2_48 = arith.constant 2 : index
    %c0_49 = arith.constant 0 : index
    %27 = vector.load %arg6[%c0_46, %c1_47, %c2_48, %c0_49] : memref<2x18x18x16xf32, #tpu.memory_space<vmem>>, vector<2x16x16x16xf32>
    %28 = vector.shape_cast %27 : vector<2x16x16x16xf32> to vector<512x16xf32>
    %c0_50 = arith.constant 0 : index
    %c2_51 = arith.constant 2 : index
    %c0_52 = arith.constant 0 : index
    %c0_53 = arith.constant 0 : index
    %29 = vector.load %arg6[%c0_50, %c2_51, %c0_52, %c0_53] : memref<2x18x18x16xf32, #tpu.memory_space<vmem>>, vector<2x16x16x16xf32>
    %30 = vector.shape_cast %29 : vector<2x16x16x16xf32> to vector<512x16xf32>
    %c0_54 = arith.constant 0 : index
    %c2_55 = arith.constant 2 : index
    %c1_56 = arith.constant 1 : index
    %c0_57 = arith.constant 0 : index
    %31 = vector.load %arg6[%c0_54, %c2_55, %c1_56, %c0_57] : memref<2x18x18x16xf32, #tpu.memory_space<vmem>>, vector<2x16x16x16xf32>
    %32 = vector.shape_cast %31 : vector<2x16x16x16xf32> to vector<512x16xf32>
    %c0_58 = arith.constant 0 : index
    %c2_59 = arith.constant 2 : index
    %c2_60 = arith.constant 2 : index
    %c0_61 = arith.constant 0 : index
    %33 = vector.load %arg6[%c0_58, %c2_59, %c2_60, %c0_61] : memref<2x18x18x16xf32, #tpu.memory_space<vmem>>, vector<2x16x16x16xf32>
    %34 = vector.shape_cast %33 : vector<2x16x16x16xf32> to vector<512x16xf32>
    %35 = tpu.concatenate %18, %20, %22, %24, %26, %28, %30, %32, %34 in 1 : vector<512x16xf32>, vector<512x16xf32>, vector<512x16xf32>, vector<512x16xf32>, vector<512x16xf32>, vector<512x16xf32>, vector<512x16xf32>, vector<512x16xf32>, vector<512x16xf32> -> vector<512x144xf32>
    %c0_62 = arith.constant 0 : index
    %c0_63 = arith.constant 0 : index
    %36 = vector.load %arg3[%c0_62, %c0_63] : memref<144x16xf32, #tpu.memory_space<vmem>>, vector<144x16xf32>
    %cst_64 = arith.constant dense<0.000000e+00> : vector<512x16xf32>
    %37 = tpu.matmul %35, %36, %cst_64 {dimension_numbers = #tpu.dot_dimension_numbers<[1], [0], [0], [1], [0, 0, 1, 1], [], []>} : vector<512x144xf32>, vector<144x16xf32>, vector<512x16xf32> -> vector<512x16xf32>
    %38 = vector.shape_cast %37 : vector<512x16xf32> to vector<2x16x16x16xf32>
    %39 = vector.broadcast %1 : f32 to vector<2x16x16x16xf32>
    %40 = arith.addf %38, %39 : vector<2x16x16x16xf32>
    %cst_65 = arith.constant 0.000000e+00 : f32
    %41 = vector.broadcast %cst_65 : f32 to vector<2x16x16x16xf32>
    %42 = arith.maximumf %40, %41 : vector<2x16x16x16xf32>
    %43 = vector.broadcast %2 : f32 to vector<2x16x16x16xf32>
    %44 = arith.addf %42, %43 : vector<2x16x16x16xf32>
    %c0_66 = arith.constant 0 : index
    %c1_67 = arith.constant 1 : index
    %c1_68 = arith.constant 1 : index
    %c0_69 = arith.constant 0 : index
    %45 = vector.load %arg6[%c0_66, %c1_67, %c1_68, %c0_69] : memref<2x18x18x16xf32, #tpu.memory_space<vmem>>, vector<2x16x16x16xf32>
    tpu.vector_store %arg6[%c0_66, %c1_67, %c1_68, %c0_69], %44 {strides = array<i32>} : memref<2x18x18x16xf32, #tpu.memory_space<vmem>>, vector<2x16x16x16xf32>,
    %c0_70 = arith.constant 0 : index
    %c0_71 = arith.constant 0 : index
    %c0_72 = arith.constant 0 : index
    %c0_73 = arith.constant 0 : index
    %46 = vector.load %arg6[%c0_70, %c0_71, %c0_72, %c0_73] : memref<2x18x18x16xf32, #tpu.memory_space<vmem>>, vector<2x16x16x16xf32>
    %47 = vector.shape_cast %46 : vector<2x16x16x16xf32> to vector<512x16xf32>
    %c0_74 = arith.constant 0 : index
    %c0_75 = arith.constant 0 : index
    %c1_76 = arith.constant 1 : index
    %c0_77 = arith.constant 0 : index
    %48 = vector.load %arg6[%c0_74, %c0_75, %c1_76, %c0_77] : memref<2x18x18x16xf32, #tpu.memory_space<vmem>>, vector<2x16x16x16xf32>
    %49 = vector.shape_cast %48 : vector<2x16x16x16xf32> to vector<512x16xf32>
    %c0_78 = arith.constant 0 : index
    %c0_79 = arith.constant 0 : index
    %c2_80 = arith.constant 2 : index
    %c0_81 = arith.constant 0 : index
    %50 = vector.load %arg6[%c0_78, %c0_79, %c2_80, %c0_81] : memref<2x18x18x16xf32, #tpu.memory_space<vmem>>, vector<2x16x16x16xf32>
    %51 = vector.shape_cast %50 : vector<2x16x16x16xf32> to vector<512x16xf32>
    %c0_82 = arith.constant 0 : index
    %c1_83 = arith.constant 1 : index
    %c0_84 = arith.constant 0 : index
    %c0_85 = arith.constant 0 : index
    %52 = vector.load %arg6[%c0_82, %c1_83, %c0_84, %c0_85] : memref<2x18x18x16xf32, #tpu.memory_space<vmem>>, vector<2x16x16x16xf32>
    %53 = vector.shape_cast %52 : vector<2x16x16x16xf32> to vector<512x16xf32>
    %c0_86 = arith.constant 0 : index
    %c1_87 = arith.constant 1 : index
    %c1_88 = arith.constant 1 : index
    %c0_89 = arith.constant 0 : index
    %54 = vector.load %arg6[%c0_86, %c1_87, %c1_88, %c0_89] : memref<2x18x18x16xf32, #tpu.memory_space<vmem>>, vector<2x16x16x16xf32>
    %55 = vector.shape_cast %54 : vector<2x16x16x16xf32> to vector<512x16xf32>
    %c0_90 = arith.constant 0 : index
    %c1_91 = arith.constant 1 : index
    %c2_92 = arith.constant 2 : index
    %c0_93 = arith.constant 0 : index
    %56 = vector.load %arg6[%c0_90, %c1_91, %c2_92, %c0_93] : memref<2x18x18x16xf32, #tpu.memory_space<vmem>>, vector<2x16x16x16xf32>
    %57 = vector.shape_cast %56 : vector<2x16x16x16xf32> to vector<512x16xf32>
    %c0_94 = arith.constant 0 : index
    %c2_95 = arith.constant 2 : index
    %c0_96 = arith.constant 0 : index
    %c0_97 = arith.constant 0 : index
    %58 = vector.load %arg6[%c0_94, %c2_95, %c0_96, %c0_97] : memref<2x18x18x16xf32, #tpu.memory_space<vmem>>, vector<2x16x16x16xf32>
    %59 = vector.shape_cast %58 : vector<2x16x16x16xf32> to vector<512x16xf32>
    %c0_98 = arith.constant 0 : index
    %c2_99 = arith.constant 2 : index
    %c1_100 = arith.constant 1 : index
    %c0_101 = arith.constant 0 : index
    %60 = vector.load %arg6[%c0_98, %c2_99, %c1_100, %c0_101] : memref<2x18x18x16xf32, #tpu.memory_space<vmem>>, vector<2x16x16x16xf32>
    %61 = vector.shape_cast %60 : vector<2x16x16x16xf32> to vector<512x16xf32>
    %c0_102 = arith.constant 0 : index
    %c2_103 = arith.constant 2 : index
    %c2_104 = arith.constant 2 : index
    %c0_105 = arith.constant 0 : index
    %62 = vector.load %arg6[%c0_102, %c2_103, %c2_104, %c0_105] : memref<2x18x18x16xf32, #tpu.memory_space<vmem>>, vector<2x16x16x16xf32>
    %63 = vector.shape_cast %62 : vector<2x16x16x16xf32> to vector<512x16xf32>
    %64 = tpu.concatenate %47, %49, %51, %53, %55, %57, %59, %61, %63 in 1 : vector<512x16xf32>, vector<512x16xf32>, vector<512x16xf32>, vector<512x16xf32>, vector<512x16xf32>, vector<512x16xf32>, vector<512x16xf32>, vector<512x16xf32>, vector<512x16xf32> -> vector<512x144xf32>
    %c0_106 = arith.constant 0 : index
    %c0_107 = arith.constant 0 : index
    %65 = vector.load %arg4[%c0_106, %c0_107] : memref<144x16xf32, #tpu.memory_space<vmem>>, vector<144x16xf32>
    %cst_108 = arith.constant dense<0.000000e+00> : vector<512x16xf32>
    %66 = tpu.matmul %64, %65, %cst_108 {dimension_numbers = #tpu.dot_dimension_numbers<[1], [0], [0], [1], [0, 0, 1, 1], [], []>} : vector<512x144xf32>, vector<144x16xf32>, vector<512x16xf32> -> vector<512x16xf32>
    %67 = vector.shape_cast %66 : vector<512x16xf32> to vector<2x16x16x16xf32>
    %68 = vector.broadcast %3 : f32 to vector<2x16x16x16xf32>
    %69 = arith.mulf %67, %68 : vector<2x16x16x16xf32>
    %70 = vector.broadcast %4 : f32 to vector<2x16x16x16xf32>
    %71 = arith.addf %69, %70 : vector<2x16x16x16xf32>
    %72 = arith.addf %71, %13 : vector<2x16x16x16xf32>
    %cst_109 = arith.constant 0.000000e+00 : f32
    %73 = vector.broadcast %cst_109 : f32 to vector<2x16x16x16xf32>
    %74 = arith.maximumf %72, %73 : vector<2x16x16x16xf32>
    %c0_110 = arith.constant 0 : index
    %c0_111 = arith.constant 0 : index
    %c0_112 = arith.constant 0 : index
    %c0_113 = arith.constant 0 : index
    %75 = vector.load %arg5[%c0_110, %c0_111, %c0_112, %c0_113] : memref<2x16x16x16xf32, #tpu.memory_space<vmem>>, vector<2x16x16x16xf32>
    tpu.vector_store %arg5[%c0_110, %c0_111, %c0_112, %c0_113], %74 {strides = array<i32>} : memref<2x16x16x16xf32, #tpu.memory_space<vmem>>, vector<2x16x16x16xf32>,
    return
  }
  func.func @transform_0(%arg0: i32) -> i32 {
    %c0_i32 = arith.constant 0 : i32
    %c0_i32_0 = arith.constant 0 : i32
    return %c0_i32 : i32
  }
  func.func @transform_1(%arg0: i32) -> (i32, i32, i32, i32) {
    %c0_i32 = arith.constant 0 : i32
    %c0_i32_0 = arith.constant 0 : i32
    %c0_i32_1 = arith.constant 0 : i32
    %c0_i32_2 = arith.constant 0 : i32
    return %arg0, %c0_i32, %c0_i32_0, %c0_i32_1 : i32, i32, i32, i32
  }
  func.func @transform_2(%arg0: i32) -> (i32, i32) {
    %c0_i32 = arith.constant 0 : i32
    %c0_i32_0 = arith.constant 0 : i32
    %c0_i32_1 = arith.constant 0 : i32
    return %c0_i32, %c0_i32_0 : i32, i32
  }
  func.func @transform_3(%arg0: i32) -> (i32, i32) {
    %c0_i32 = arith.constant 0 : i32
    %c0_i32_0 = arith.constant 0 : i32
    %c0_i32_1 = arith.constant 0 : i32
    return %c0_i32, %c0_i32_0 : i32, i32
  }
  func.func @transform_4(%arg0: i32) -> (i32, i32, i32, i32) {
    %c0_i32 = arith.constant 0 : i32
    %c0_i32_0 = arith.constant 0 : i32
    %c0_i32_1 = arith.constant 0 : i32
    %c0_i32_2 = arith.constant 0 : i32
    return %arg0, %c0_i32, %c0_i32_0, %c0_i32_1 : i32, i32, i32, i32
  }
}

</mosaic_0001>

<bundles_post_ra>
// kernel: tpu_custom_call.1
= control target key start
LH: loop header
LB: loop body
LE: loop exit
PB: predicated region body
PF: predicated region fallthrough
CT: control target
= control target key end

     0   :  { %9 = vsyncpa [#allocation6], 0  ;;  %s14453_s0 = inlined_call_operand.vmem [shape: f32[5], index: 0, kind: input, shape index: {}]   ;;  %s14454_s1 = inlined_call_operand.hbm [shape: f32[2,16,16,16], index: 1, kind: input, shape index: {}]   ;;  %s14455_s2 = inlined_call_operand.vmem [shape: f32[144,16], index: 2, kind: input, shape index: {}]   ;;  %s14456_s3 = inlined_call_operand.vmem [shape: f32[144,16], index: 3, kind: input, shape index: {}]   ;;  %s14457_s4 = inlined_call_operand.hbm [shape: f32[2,16,16,16], index: 4, kind: output, shape index: {}]  }
   0x1   :  { %10 = vsyncpa [#allocation4], 0 }
   0x2   :  { %11 = vsyncpa [#allocation5], 0  ;;  %s17_s17 = sshll.u32 %s14453_s0, 4  ;;  %s25_s20 = sshll.u32 %s14454_s1, 4  ;;  %s18_s17 = int_to_ptr.vmem [resolvable:$true] %s17_s17  ;;  %s26_s20 = int_to_ptr.hbm [resolvable:$true] %s25_s20 }
   0x3   :  { %s10419_s21 = smov [#allocation3]   ;;  %s10420_s22 = smov [#allocation7]  }
   0x4   :  { %20 = dma.vmem_to_smem %s18_s17, 16, %s10419_s21, [#allocation6]  }
   0x5   :  { %s27_s23 = sshll.u32 %s10420_s22, 4  ;;  %s10421_s24 = smov 128   ;;  %s28_s23 = int_to_ptr.vmem [resolvable:$true] %s27_s23 }
   0x6   :  { %s10422_s25 = smov 8  }
   0x7   :  { %33 = dma.hbm_to_vmem [thread:$0]  %s26_s20, 8192, %s28_s23, [#allocation4], %s10421_s24, %s10421_s24, %s10422_s25  }
   0x8   :  { %10413 = dma.done.wait [#allocation6], 16  }
   0x9   :  { %10414 = vsyncadd [#allocation6], 4294967280 }
   0xa   :  { %10415 = dma.done.wait [#allocation4], 8192  }
   0xb   :  { %10416 = vsyncadd [#allocation4], 4294959104 }
   0xc   :  { %46 = sfence }
   0xd   :  { %vm52_vm0 = vcmask 130048   ;;  %vm55_vm1 = vcmask 123904   ;;  %s47_s0 = sld [smem:[#allocation3]]  ;;  %v10423_v0 = vmov 0.0   ;;  %v146_v1 = vld [vmem:[#allocation7 + $0x30] sm:$0xff]  ;;  %v147_v3 = vld [vmem:[#allocation7 + $0x38] sm:$0xff] }
   0xe   :  { %53 = vst.msk [vmem:[#allocation2] sm:$0xff] %vm52_vm0, %v10423_v0  ;;  %v142_v4 = vld [vmem:[#allocation7 + $0x10] sm:$0xff]  ;;  %v143_v7 = vld [vmem:[#allocation7 + $0x18] sm:$0xff]  ;;  %v140_v10 = vld [vmem:[#allocation7] sm:$0xff]  ;;  %s10424_s1 = smov 16   ;;  %vm67_vm2 = vcmask 122880  }
   0xf   :  { %54 = vst.msk [vmem:[#allocation2 + $0x8] sm:$0xff] %vm52_vm0, %v10423_v0  ;;  %v141_v13 = vld [vmem:[#allocation7 + $0x8] sm:$0xff]  ;;  %v148_v15 = vld [vmem:[#allocation7 + $0x40] sm:$0xff]  ;;  %v150_v23 = vld [vmem:[#allocation7 + $0x50] sm:$0xff]  ;;  %s10425_s26 = smov 32   ;;  %s10426_s27 = smov 48  }
  0x10   :  { %56 = vst.msk [vmem:[#allocation2 + $0x10] sm:$0x3] %vm55_vm1, %v10423_v0  ;;  %v149_v17 = vld [vmem:[#allocation7 + $0x48] sm:$0xff]  ;;  %v144_v19 = vld [vmem:[#allocation7 + $0x20] sm:$0xff]  ;;  %v151_v25 = vld [vmem:[#allocation7 + $0x58] sm:$0xff]  ;;  %s10427_s28 = smov 64  }
  0x11   :  { %57 = vst.msk [vmem:[#allocation2 + $0x1b0] sm:$0xff] %vm52_vm0, %v10423_v0  ;;  %v145_v21 = vld [vmem:[#allocation7 + $0x28] sm:$0xff]  ;;  %v154_v27 = vld [vmem:[#allocation7 + $0x70] sm:$0xff]  ;;  %v155_v29 = vld [vmem:[#allocation7 + $0x78] sm:$0xff]  ;;  %s10428_s29 = smov 80   ;;  %s10429_s30 = smov 96  }
  0x12   :  { %58 = vst.msk [vmem:[#allocation2 + $0x1b8] sm:$0xff] %vm52_vm0, %v10423_v0  ;;  %v152_v32 = vld [vmem:[#allocation7 + $0x60] sm:$0xff]  ;;  %v153_v35 = vld [vmem:[#allocation7 + $0x68] sm:$0xff]  ;;  %v158_v53 = vld [vmem:[#allocation7 + $0x90] sm:$0xff]  ;;  %s10430_s5 = smov 112   ;;  %vm2767_vm3 = vcmask 261120  }
  0x13   :  { %59 = vst.msk [vmem:[#allocation2 + $0x1c0] sm:$0x3] %vm55_vm1, %v10423_v0  ;;  %v10478_v2 = vstv %s47_s0  ;;  %v156_v39 = vld [vmem:[#allocation7 + $0x80] sm:$0xff]  ;;  %v157_v42 = vld [vmem:[#allocation7 + $0x88] sm:$0xff]  ;;  %v159_v56 = vld [vmem:[#allocation7 + $0x98] sm:$0xff]  ;;  %vm2832_vm4 = vcmask 392192  }
  0x14   :  { %61 = vst.msk [vmem:[#allocation2 + $0x198] sm:$0xff] %vm52_vm0, %v10423_v0  ;;  %v211_v6 = vadd.f32 %v10478_v2, %v146_v1  ;;  %v212_v9 = vadd.f32 %v10478_v2, %v147_v3  ;;  %v207_v12 = vadd.f32 %v10478_v2, %v142_v4  ;;  %v208_v14 = vadd.f32 %v10478_v2, %v143_v7  ;;  %v160_v46 = vld [vmem:[#allocation7 + $0xa0] sm:$0xff]  ;;  %v161_v49 = vld [vmem:[#allocation7 + $0xa8] sm:$0xff]  ;;  %v162_v60 = vld [vmem:[#allocation7 + $0xb0] sm:$0xff]  ;;  %s7830_s23 = sld [smem:[#allocation3 + $0x2]]  ;;  %s7815_s16 = sshll.u32 %s14457_s4, 4  ;;  %s7816_s16 = int_to_ptr.hbm [resolvable:$true] %s7815_s16 }
  0x15   :  { %62 = vst.msk [vmem:[#allocation2 + $0x1a0] sm:$0xff] %vm52_vm0, %v10423_v0  ;;  %v205_v16 = vadd.f32 %v10478_v2, %v140_v10  ;;  %v206_v18 = vadd.f32 %v10478_v2, %v141_v13  ;;  %v213_v20 = vadd.f32 %v10478_v2, %v148_v15  ;;  %v214_v22 = vadd.f32 %v10478_v2, %v149_v17  ;;  %v163_v63 = vld [vmem:[#allocation7 + $0xb8] sm:$0xff]  ;;  %v165_v15 = vld [vmem:[#allocation7 + $0xc8] sm:$0xff]  ;;  %v168_v17 = vld [vmem:[#allocation7 + $0xe0] sm:$0xff]  ;;  %s7832_s15 = sld [smem:[#allocation3 + $0x4]] }
  0x16   :  { %v398_v5 = vld [vmem:[#allocation2 + $0x1] sm:$0xff]  ;;  %63 = vst.msk [vmem:[#allocation2 + $0x1a8] sm:$0x3] %vm55_vm1, %v10423_v0  ;;  %v209_v24 = vadd.f32 %v10478_v2, %v144_v19  ;;  %v210_v26 = vadd.f32 %v10478_v2, %v145_v21  ;;  %v215_v28 = vadd.f32 %v10478_v2, %v150_v23  ;;  %v216_v31 = vadd.f32 %v10478_v2, %v151_v25 }
  0x17   :  { %v399_v8 = vld [vmem:[#allocation2 + $0x9] sm:$0xff]  ;;  %64 = vst.msk [vmem:[#allocation2 + $0x348] sm:$0xff] %vm52_vm0, %v10423_v0  ;;  %v219_v34 = vadd.f32 %v10478_v2, %v154_v27  ;;  %v220_v38 = vadd.f32 %v10478_v2, %v155_v29  ;;  %v217_v41 = vadd.f32 %v10478_v2, %v152_v32  ;;  %v218_v45 = vadd.f32 %v10478_v2, %v153_v35 }
  0x18   :  { %v7974_v11 = vpack.i.bf16 %v399_v8, %v398_v5  ;;  %65 = vst.msk [vmem:[#allocation2 + $0x350] sm:$0xff] %vm52_vm0, %v10423_v0  ;;  %v221_v48 = vadd.f32 %v10478_v2, %v156_v39  ;;  %v222_v52 = vadd.f32 %v10478_v2, %v157_v42  ;;  %v225_v55 = vadd.f32 %v10478_v2, %v160_v46  ;;  %v166_v5 = vld [vmem:[#allocation7 + $0xd0] sm:$0xff]  ;;  %v167_v8 = vld [vmem:[#allocation7 + $0xd8] sm:$0xff]  ;;  %v169_v21 = vld [vmem:[#allocation7 + $0xe8] sm:$0xff] }
  0x19   :  { %66 = vst.msk [vmem:[#allocation2 + $0x358] sm:$0x3] %vm55_vm1, %v10423_v0  ;;  %v226_v59 = vadd.f32 %v10478_v2, %v161_v49  ;;  %v223_v62 = vadd.f32 %v10478_v2, %v158_v53  ;;  %v224_v4 = vadd.f32 %v10478_v2, %v159_v56  ;;  %v227_v7 = vadd.f32 %v10478_v2, %v162_v60  ;;  %v176_v42 = vld [vmem:[#allocation7 + $0x120] sm:$0xff]  ;;  %v177_v46 = vld [vmem:[#allocation7 + $0x128] sm:$0xff] }
  0x1a   :  { %7975 = vrot.lane.b32.xlu0 %v7974_v11, %s10424_s1  ;;  %276 = vst.msk [vmem:[#allocation2 + $0x61] sm:$0xff] %vm52_vm0, %v211_v6  ;;  %v228_v10 = vadd.f32 %v10478_v2, %v163_v63  ;;  %v164_v11 = vld [vmem:[#allocation7 + $0xc0] sm:$0xff]  ;;  %v230_v23 = vadd.f32 %v10478_v2, %v165_v15  ;;  %v233_v27 = vadd.f32 %v10478_v2, %v168_v17  ;;  %v181_v53 = vld [vmem:[#allocation7 + $0x148] sm:$0xff]  ;;  %vm2962_vm5 = vcmask 654336  }
  0x1b   :  { %277 = vst.msk [vmem:[#allocation2 + $0x69] sm:$0xff] %vm52_vm0, %v212_v9  ;;  %v180_v49 = vld [vmem:[#allocation7 + $0x140] sm:$0xff]  ;;  %v246_v60 = vadd.f32 %v10478_v2, %v181_v53  ;;  %vm2897_vm6 = vcmask 523264   ;;  %vm3027_vm7 = vcmask 785408   ;;  %vm3092_vm8 = vcmask 916480  }
  0x1c   :  { %272 = vst.msk [vmem:[#allocation2 + $0x31] sm:$0xff] %vm52_vm0, %v207_v12  ;;  %v184_v56 = vld [vmem:[#allocation7 + $0x160] sm:$0xff] }
  0x1d   :  { %273 = vst.msk [vmem:[#allocation2 + $0x39] sm:$0xff] %vm52_vm0, %v208_v14  ;;  %v231_v14 = vadd.f32 %v10478_v2, %v166_v5  ;;  %v186_v5 = vld [vmem:[#allocation7 + $0x170] sm:$0xff] }
  0x1e   :  { %270 = vst.msk [vmem:[#allocation2 + $0x19] sm:$0xff] %vm52_vm0, %v205_v16  ;;  %v232_v16 = vadd.f32 %v10478_v2, %v167_v8  ;;  %v251_v15 = vadd.f32 %v10478_v2, %v186_v5 }
  0x1f   :  { %271 = vst.msk [vmem:[#allocation2 + $0x21] sm:$0xff] %vm52_vm0, %v206_v18 }
  0x20   :  { %278 = vst.msk [vmem:[#allocation2 + $0x79] sm:$0xff] %vm52_vm0, %v213_v20  ;;  %v229_v20 = vadd.f32 %v10478_v2, %v164_v11 }
  0x21   :  { %v406_v30 = vld [vmem:[#allocation2 + $0x61] sm:$0xff]  ;;  %279 = vst.msk [vmem:[#allocation2 + $0x81] sm:$0xff] %vm52_vm0, %v214_v22 }
  0x22   :  { %v407_v33 = vld [vmem:[#allocation2 + $0x69] sm:$0xff]  ;;  %274 = vst.msk [vmem:[#allocation2 + $0x49] sm:$0xff] %vm52_vm0, %v209_v24  ;;  %v172_v24 = vld [vmem:[#allocation7 + $0x100] sm:$0xff] }
  0x23   :  { %v7994_v36 = vpack.i.bf16 %v407_v33, %v406_v30  ;;  %v402_v37 = vld [vmem:[#allocation2 + $0x31] sm:$0xff]  ;;  %275 = vst.msk [vmem:[#allocation2 + $0x51] sm:$0xff] %vm52_vm0, %v210_v26  ;;  %v234_v30 = vadd.f32 %v10478_v2, %v169_v21  ;;  %v237_v32 = vadd.f32 %v10478_v2, %v172_v24  ;;  %v189_v21 = vld [vmem:[#allocation7 + $0x188] sm:$0xff]  ;;  %v192_v24 = vld [vmem:[#allocation7 + $0x1a0] sm:$0xff] }
  0x24   :  { %v403_v40 = vld [vmem:[#allocation2 + $0x39] sm:$0xff]  ;;  %280 = vst.msk [vmem:[#allocation2 + $0x91] sm:$0xff] %vm52_vm0, %v215_v28  ;;  %v173_v28 = vld [vmem:[#allocation7 + $0x108] sm:$0xff] }
  0x25   :  { %7995 = vrot.lane.b32.xlu2 %v7994_v36, %s10424_s1  ;;  %v7984_v43 = vpack.i.bf16 %v403_v40, %v402_v37  ;;  %v400_v44 = vld [vmem:[#allocation2 + $0x19] sm:$0xff]  ;;  %281 = vst.msk [vmem:[#allocation2 + $0x99] sm:$0xff] %vm52_vm0, %v216_v31  ;;  %v174_v31 = vld [vmem:[#allocation7 + $0x110] sm:$0xff]  ;;  %v238_v35 = vadd.f32 %v10478_v2, %v173_v28  ;;  %v193_v28 = vld [vmem:[#allocation7 + $0x1a8] sm:$0xff] }
  0x26   :  { %v401_v47 = vld [vmem:[#allocation2 + $0x21] sm:$0xff]  ;;  %284 = vst.msk [vmem:[#allocation2 + $0xc1] sm:$0xff] %vm52_vm0, %v219_v34  ;;  %v175_v33 = vld [vmem:[#allocation7 + $0x118] sm:$0xff]  ;;  %v178_v36 = vld [vmem:[#allocation7 + $0x130] sm:$0xff]  ;;  %v239_v39 = vadd.f32 %v10478_v2, %v174_v31 }
  0x27   :  { %7985 = vrot.lane.b32.xlu1 %v7984_v43, %s10424_s1  ;;  %v7979_v50 = vpack.i.bf16 %v401_v47, %v400_v44  ;;  %v408_v51 = vld [vmem:[#allocation2 + $0x79] sm:$0xff]  ;;  %285 = vst.msk [vmem:[#allocation2 + $0xc9] sm:$0xff] %vm52_vm0, %v220_v38  ;;  %v430_v31 = vld [vmem:[#allocation2 + $0x1b1] sm:$0xff] }
  0x28   :  { %v409_v54 = vld [vmem:[#allocation2 + $0x81] sm:$0xff]  ;;  %282 = vst.msk [vmem:[#allocation2 + $0xa9] sm:$0xff] %vm52_vm0, %v217_v41  ;;  %v179_v40 = vld [vmem:[#allocation7 + $0x138] sm:$0xff]  ;;  %v240_v41 = vadd.f32 %v10478_v2, %v175_v33  ;;  %v257_v33 = vadd.f32 %v10478_v2, %v192_v24 }
  0x29   :  { %7980 = vrot.lane.b32.xlu0 %v7979_v50, %s10424_s1  ;;  %v7999_v57 = vpack.i.bf16 %v409_v54, %v408_v51  ;;  %v404_v58 = vld [vmem:[#allocation2 + $0x49] sm:$0xff]  ;;  %283 = vst.msk [vmem:[#allocation2 + $0xb1] sm:$0xff] %vm52_vm0, %v218_v45  ;;  %v243_v45 = vadd.f32 %v10478_v2, %v178_v36  ;;  %v258_v36 = vadd.f32 %v10478_v2, %v193_v28  ;;  %v464_v28 = vld [vmem:[#allocation2 + $0x1a] sm:$0xff] }
  0x2a   :  { %v405_v61 = vld [vmem:[#allocation2 + $0x51] sm:$0xff]  ;;  %286 = vst.msk [vmem:[#allocation2 + $0xd9] sm:$0xff] %vm52_vm0, %v221_v48  ;;  %v244_v48 = vadd.f32 %v10478_v2, %v179_v40 }
  0x2b   :  { %v7989_v1 = vpack.i.bf16 %v405_v61, %v404_v58  ;;  %v410_v3 = vld [vmem:[#allocation2 + $0x91] sm:$0xff]  ;;  %287 = vst.msk [vmem:[#allocation2 + $0xe1] sm:$0xff] %vm52_vm0, %v222_v52  ;;  %v241_v52 = vadd.f32 %v10478_v2, %v176_v42  ;;  %v185_v58 = vld [vmem:[#allocation7 + $0x168] sm:$0xff] }
  0x2c   :  { %v411_v6 = vld [vmem:[#allocation2 + $0x99] sm:$0xff]  ;;  %290 = vst.msk [vmem:[#allocation2 + $0x109] sm:$0xff] %vm52_vm0, %v225_v55  ;;  %v242_v55 = vadd.f32 %v10478_v2, %v177_v46  ;;  %v182_v61 = vld [vmem:[#allocation7 + $0x150] sm:$0xff] }
  0x2d   :  { %8000 = vrot.lane.b32.xlu2 %v7999_v57, %s10424_s1  ;;  %v8004_v9 = vpack.i.bf16 %v411_v6, %v410_v3  ;;  %291 = vst.msk [vmem:[#allocation2 + $0x111] sm:$0xff] %vm52_vm0, %v226_v59  ;;  %v414_v12 = vld [vmem:[#allocation2 + $0xc1] sm:$0xff]  ;;  %v245_v57 = vadd.f32 %v10478_v2, %v180_v49  ;;  %v183_v3 = vld [vmem:[#allocation7 + $0x158] sm:$0xff]  ;;  %v247_v8 = vadd.f32 %v10478_v2, %v182_v61 }
  0x2e   :  { %v415_v13 = vld [vmem:[#allocation2 + $0xc9] sm:$0xff]  ;;  %288 = vst.msk [vmem:[#allocation2 + $0xf1] sm:$0xff] %vm52_vm0, %v223_v62  ;;  %v248_v11 = vadd.f32 %v10478_v2, %v183_v3  ;;  %v199_v46 = vld [vmem:[#allocation7 + $0x1d8] sm:$0xff] }
  0x2f   :  { %7990 = vrot.lane.b32.xlu1 %v7989_v1, %s10424_s1  ;;  %289 = vst.msk [vmem:[#allocation2 + $0xf9] sm:$0xff] %vm52_vm0, %v224_v4  ;;  %v412_v18 = vld [vmem:[#allocation2 + $0xa9] sm:$0xff]  ;;  %v8014_v22 = vpack.i.bf16 %v415_v13, %v414_v12  ;;  %v249_v1 = vadd.f32 %v10478_v2, %v184_v56  ;;  %v250_v4 = vadd.f32 %v10478_v2, %v185_v58 }
  0x30   :  { %v413_v19 = vld [vmem:[#allocation2 + $0xb1] sm:$0xff]  ;;  %292 = vst.msk [vmem:[#allocation2 + $0x121] sm:$0xff] %vm52_vm0, %v227_v7 }
  0x31   :  { %8005 = vrot.lane.b32.xlu0 %v8004_v9, %s10424_s1  ;;  %293 = vst.msk [vmem:[#allocation2 + $0x129] sm:$0xff] %vm52_vm0, %v228_v10  ;;  %v416_v25 = vld [vmem:[#allocation2 + $0xd9] sm:$0xff]  ;;  %v8009_v29 = vpack.i.bf16 %v413_v19, %v412_v18  ;;  %v190_v12 = vld [vmem:[#allocation7 + $0x190] sm:$0xff] }
  0x32   :  { %v417_v26 = vld [vmem:[#allocation2 + $0xe1] sm:$0xff]  ;;  %296 = vst.msk [vmem:[#allocation2 + $0x151] sm:$0xff] %vm52_vm0, %v231_v14  ;;  %v187_v9 = vld [vmem:[#allocation7 + $0x178] sm:$0xff] }
  0x33   :  { %297 = vst.msk [vmem:[#allocation2 + $0x159] sm:$0xff] %vm52_vm0, %v232_v16  ;;  %v8019_v34 = vpack.i.bf16 %v417_v26, %v416_v25  ;;  %v420_v37 = vld [vmem:[#allocation2 + $0x109] sm:$0xff]  ;;  %v191_v16 = vld [vmem:[#allocation7 + $0x198] sm:$0xff]  ;;  %v252_v18 = vadd.f32 %v10478_v2, %v187_v9  ;;  %v188_v19 = vld [vmem:[#allocation7 + $0x180] sm:$0xff] }
  0x34   :  { %294 = vst.msk [vmem:[#allocation2 + $0x139] sm:$0xff] %vm52_vm0, %v229_v20  ;;  %v421_v38 = vld [vmem:[#allocation2 + $0x111] sm:$0xff]  ;;  %v255_v20 = vadd.f32 %v10478_v2, %v190_v12 }
  0x35   :  { %8015 = vrot.lane.b32.xlu2 %v8014_v22, %s10424_s1  ;;  %295 = vst.msk [vmem:[#allocation2 + $0x141] sm:$0xff] %vm52_vm0, %v230_v23  ;;  %v418_v43 = vld [vmem:[#allocation2 + $0xf1] sm:$0xff]  ;;  %v8029_v47 = vpack.i.bf16 %v421_v38, %v420_v37  ;;  %v256_v23 = vadd.f32 %v10478_v2, %v191_v16 }
  0x36   :  { %298 = vst.msk [vmem:[#allocation2 + $0x169] sm:$0xff] %vm52_vm0, %v233_v27  ;;  %v419_v44 = vld [vmem:[#allocation2 + $0xf9] sm:$0xff]  ;;  %v253_v27 = vadd.f32 %v10478_v2, %v188_v19  ;;  %v194_v37 = vld [vmem:[#allocation7 + $0x1b0] sm:$0xff] }
  0x37   :  { %8010 = vrot.lane.b32.xlu1 %v8009_v29, %s10424_s1  ;;  %299 = vst.msk [vmem:[#allocation2 + $0x171] sm:$0xff] %vm52_vm0, %v234_v30  ;;  %v422_v50 = vld [vmem:[#allocation2 + $0x121] sm:$0xff]  ;;  %v8024_v54 = vpack.i.bf16 %v419_v44, %v418_v43  ;;  %v254_v29 = vadd.f32 %v10478_v2, %v189_v21  ;;  %v198_v44 = vld [vmem:[#allocation7 + $0x1d0] sm:$0xff] }
  0x38   :  { %302 = vst.msk [vmem:[#allocation2 + $0x1c9] sm:$0xff] %vm52_vm0, %v237_v32  ;;  %v423_v51 = vld [vmem:[#allocation2 + $0x129] sm:$0xff]  ;;  %v196_v30 = vld [vmem:[#allocation7 + $0x1c0] sm:$0xff] }
  0x39   :  { %8020 = vrot.lane.b32.xlu0 %v8019_v34, %s10424_s1  ;;  %303 = vst.msk [vmem:[#allocation2 + $0x1d1] sm:$0xff] %vm52_vm0, %v238_v35  ;;  %v8034_v59 = vpack.i.bf16 %v423_v51, %v422_v50  ;;  %v426_v62 = vld [vmem:[#allocation2 + $0x151] sm:$0xff]  ;;  %v431_v32 = vld [vmem:[#allocation2 + $0x1b9] sm:$0xff]  ;;  %v197_v34 = vld [vmem:[#allocation7 + $0x1c8] sm:$0xff]  ;;  %v261_v40 = vadd.f32 %v10478_v2, %v196_v30  ;;  %v263_v51 = vadd.f32 %v10478_v2, %v198_v44 }
  0x3a   :  { %304 = vst.msk [vmem:[#allocation2 + $0x1e1] sm:$0xff] %vm52_vm0, %v239_v39  ;;  %v427_v63 = vld [vmem:[#allocation2 + $0x159] sm:$0xff]  ;;  %v8054_v42 = vpack.i.bf16 %v431_v32, %v430_v31  ;;  %v262_v43 = vadd.f32 %v10478_v2, %v197_v34  ;;  %v468_v31 = vld [vmem:[#allocation2 + $0x4a] sm:$0xff]  ;;  %v470_v34 = vld [vmem:[#allocation2 + $0x62] sm:$0xff] }
  0x3b   :  { %305 = vst.msk [vmem:[#allocation2 + $0x1e9] sm:$0xff] %vm52_vm0, %v240_v41  ;;  %v424_v6 = vld [vmem:[#allocation2 + $0x139] sm:$0xff]  ;;  %v8044_v10 = vpack.i.bf16 %v427_v63, %v426_v62 }
  0x3c   :  { %308 = vst.msk [vmem:[#allocation2 + $0x211] sm:$0xff] %vm52_vm0, %v243_v45  ;;  %v425_v7 = vld [vmem:[#allocation2 + $0x141] sm:$0xff]  ;;  %v195_v41 = vld [vmem:[#allocation7 + $0x1b8] sm:$0xff]  ;;  %v259_v45 = vadd.f32 %v10478_v2, %v194_v37 }
  0x3d   :  { %8030 = vrot.lane.b32.xlu2 %v8029_v47, %s10424_s1  ;;  %309 = vst.msk [vmem:[#allocation2 + $0x219] sm:$0xff] %vm52_vm0, %v244_v48  ;;  %v428_v13 = vld [vmem:[#allocation2 + $0x169] sm:$0xff]  ;;  %v8039_v17 = vpack.i.bf16 %v425_v7, %v424_v6  ;;  %v260_v48 = vadd.f32 %v10478_v2, %v195_v41 }
  0x3e   :  { %306 = vst.msk [vmem:[#allocation2 + $0x1f9] sm:$0xff] %vm52_vm0, %v241_v52  ;;  %v429_v14 = vld [vmem:[#allocation2 + $0x171] sm:$0xff]  ;;  %v264_v52 = vadd.f32 %v10478_v2, %v199_v46 }
  0x3f   :  { %8025 = vrot.lane.b32.xlu1 %v8024_v54, %s10424_s1  ;;  %307 = vst.msk [vmem:[#allocation2 + $0x201] sm:$0xff] %vm52_vm0, %v242_v55  ;;  %v8049_v22 = vpack.i.bf16 %v429_v14, %v428_v13  ;;  %v432_v25 = vld [vmem:[#allocation2 + $0x1c9] sm:$0xff] }
  0x40   :  { %310 = vst.msk [vmem:[#allocation2 + $0x229] sm:$0xff] %vm52_vm0, %v245_v57  ;;  %v433_v26 = vld [vmem:[#allocation2 + $0x1d1] sm:$0xff] }
  0x41   :  { %8035 = vrot.lane.b32.xlu0 %v8034_v59, %s10424_s1  ;;  %311 = vst.msk [vmem:[#allocation2 + $0x231] sm:$0xff] %vm52_vm0, %v246_v60  ;;  %v8059_v35 = vpack.i.bf16 %v433_v26, %v432_v25  ;;  %v434_v38 = vld [vmem:[#allocation2 + $0x1e1] sm:$0xff]  ;;  %v476_v41 = vld [vmem:[#allocation2 + $0xaa] sm:$0xff] }
  0x42   :  { %314 = vst.msk [vmem:[#allocation2 + $0x259] sm:$0xff] %vm52_vm0, %v249_v1  ;;  %v435_v39 = vld [vmem:[#allocation2 + $0x1e9] sm:$0xff] }
  0x43   :  { %315 = vst.msk [vmem:[#allocation2 + $0x261] sm:$0xff] %vm52_vm0, %v250_v4  ;;  %v8064_v47 = vpack.i.bf16 %v435_v39, %v434_v38  ;;  %v438_v49 = vld [vmem:[#allocation2 + $0x211] sm:$0xff]  ;;  %v462_v25 = vld [vmem:[#allocation2 + $0x2] sm:$0xff] }
  0x44   :  { %312 = vst.msk [vmem:[#allocation2 + $0x241] sm:$0xff] %vm52_vm0, %v247_v8  ;;  %v439_v50 = vld [vmem:[#allocation2 + $0x219] sm:$0xff] }
  0x45   :  { %8045 = vrot.lane.b32.xlu2 %v8044_v10, %s10424_s1  ;;  %313 = vst.msk [vmem:[#allocation2 + $0x249] sm:$0xff] %vm52_vm0, %v248_v11  ;;  %v436_v53 = vld [vmem:[#allocation2 + $0x1f9] sm:$0xff]  ;;  %v8074_v55 = vpack.i.bf16 %v439_v50, %v438_v49 }
  0x46   :  { %316 = vst.msk [vmem:[#allocation2 + $0x271] sm:$0xff] %vm52_vm0, %v251_v15  ;;  %v437_v54 = vld [vmem:[#allocation2 + $0x201] sm:$0xff]  ;;  %v474_v38 = vld [vmem:[#allocation2 + $0x92] sm:$0xff] }
  0x47   :  { %8040 = vrot.lane.b32.xlu1 %v8039_v17, %s10424_s1  ;;  %317 = vst.msk [vmem:[#allocation2 + $0x279] sm:$0xff] %vm52_vm0, %v252_v18  ;;  %v440_v56 = vld [vmem:[#allocation2 + $0x229] sm:$0xff]  ;;  %v8069_v58 = vpack.i.bf16 %v437_v54, %v436_v53 }
  0x48   :  { %320 = vst.msk [vmem:[#allocation2 + $0x2a1] sm:$0xff] %vm52_vm0, %v255_v20  ;;  %v441_v57 = vld [vmem:[#allocation2 + $0x231] sm:$0xff] }
  0x49   :  { %8050 = vrot.lane.b32.xlu0 %v8049_v22, %s10424_s1  ;;  %321 = vst.msk [vmem:[#allocation2 + $0x2a9] sm:$0xff] %vm52_vm0, %v256_v23  ;;  %v8079_v59 = vpack.i.bf16 %v441_v57, %v440_v56  ;;  %v444_v60 = vld [vmem:[#allocation2 + $0x259] sm:$0xff]  ;;  %v486_v57 = vld [vmem:[#allocation2 + $0x122] sm:$0xff] }
  0x4a   :  { %318 = vst.msk [vmem:[#allocation2 + $0x289] sm:$0xff] %vm52_vm0, %v253_v27  ;;  %v445_v61 = vld [vmem:[#allocation2 + $0x261] sm:$0xff] }
  0x4b   :  { %319 = vst.msk [vmem:[#allocation2 + $0x291] sm:$0xff] %vm52_vm0, %v254_v29  ;;  %v442_v62 = vld [vmem:[#allocation2 + $0x241] sm:$0xff]  ;;  %v8089_v1 = vpack.i.bf16 %v445_v61, %v444_v60 }
  0x4c   :  { %322 = vst.msk [vmem:[#allocation2 + $0x2b9] sm:$0xff] %vm52_vm0, %v257_v33  ;;  %v443_v63 = vld [vmem:[#allocation2 + $0x249] sm:$0xff]  ;;  %v488_v61 = vld [vmem:[#allocation2 + $0x13a] sm:$0xff] }
  0x4d   :  { %8060 = vrot.lane.b32.xlu2 %v8059_v35, %s10424_s1  ;;  %323 = vst.msk [vmem:[#allocation2 + $0x2c1] sm:$0xff] %vm52_vm0, %v258_v36  ;;  %v446_v3 = vld [vmem:[#allocation2 + $0x271] sm:$0xff]  ;;  %v8084_v5 = vpack.i.bf16 %v443_v63, %v442_v62 }
  0x4e   :  { %326 = vst.msk [vmem:[#allocation2 + $0x2e9] sm:$0xff] %vm52_vm0, %v261_v40  ;;  %v447_v4 = vld [vmem:[#allocation2 + $0x279] sm:$0xff] }
  0x4f   :  { %8055 = vrot.lane.b32.xlu1 %v8054_v42, %s10424_s1  ;;  %327 = vst.msk [vmem:[#allocation2 + $0x2f1] sm:$0xff] %vm52_vm0, %v262_v43  ;;  %v8094_v6 = vpack.i.bf16 %v447_v4, %v446_v3  ;;  %v450_v7 = vld [vmem:[#allocation2 + $0x2a1] sm:$0xff]  ;;  %v466_v4 = vld [vmem:[#allocation2 + $0x32] sm:$0xff] }
  0x50   :  { %324 = vst.msk [vmem:[#allocation2 + $0x2d1] sm:$0xff] %vm52_vm0, %v259_v45  ;;  %v451_v8 = vld [vmem:[#allocation2 + $0x2a9] sm:$0xff]  ;;  %v200_v43 = vld [vmem:[#allocation7 + $0x1e0] sm:$0xff] }
  0x51   :  { %8065 = vrot.lane.b32.xlu0 %v8064_v47, %s10424_s1  ;;  %325 = vst.msk [vmem:[#allocation2 + $0x2d9] sm:$0xff] %vm52_vm0, %v260_v48  ;;  %v448_v9 = vld [vmem:[#allocation2 + $0x289] sm:$0xff]  ;;  %v8104_v11 = vpack.i.bf16 %v451_v8, %v450_v7  ;;  %v480_v47 = vld [vmem:[#allocation2 + $0xda] sm:$0xff]  ;;  %v265_v48 = vadd.f32 %v10478_v2, %v200_v43  ;;  %v510_v43 = vld [vmem:[#allocation2 + $0x272] sm:$0xff] }
  0x52   :  { %328 = vst.msk [vmem:[#allocation2 + $0x301] sm:$0xff] %vm52_vm0, %v263_v51  ;;  %v449_v10 = vld [vmem:[#allocation2 + $0x291] sm:$0xff]  ;;  %v201_v45 = vld [vmem:[#allocation7 + $0x1e8] sm:$0xff] }
  0x53   :  { %329 = vst.msk [vmem:[#allocation2 + $0x309] sm:$0xff] %vm52_vm0, %v264_v52  ;;  %v452_v12 = vld [vmem:[#allocation2 + $0x2b9] sm:$0xff]  ;;  %v8099_v14 = vpack.i.bf16 %v449_v10, %v448_v9  ;;  %v266_v50 = vadd.f32 %v10478_v2, %v201_v45  ;;  %v492_v7 = vld [vmem:[#allocation2 + $0x16a] sm:$0xff] }
  0x54   :  { %104 = vst.msk [vmem:[#allocation2 + $0x11] sm:$0x1] %vm67_vm2, %v10423_v0  ;;  %v453_v13 = vld [vmem:[#allocation2 + $0x2c1] sm:$0xff]  ;;  %v482_v52 = vld [vmem:[#allocation2 + $0xf2] sm:$0xff] }
  0x55   :  { %8075 = vrot.lane.b32.xlu2 %v8074_v55, %s10424_s1  ;;  %68 = vst.msk [vmem:[#allocation2] sm:$0x1] %vm67_vm2, %v10423_v0  ;;  %v8109_v15 = vpack.i.bf16 %v453_v13, %v452_v12  ;;  %v456_v16 = vld [vmem:[#allocation2 + $0x2e9] sm:$0xff] }
  0x56   :  { %69 = vst.msk [vmem:[#allocation2 + $0x18] sm:$0x1] %vm67_vm2, %v10423_v0  ;;  %v457_v17 = vld [vmem:[#allocation2 + $0x2f1] sm:$0xff] }
  0x57   :  { %8070 = vrot.lane.b32.xlu1 %v8069_v58, %s10424_s1  ;;  %70 = vst.msk [vmem:[#allocation2 + $0x30] sm:$0x1] %vm67_vm2, %v10423_v0  ;;  %v454_v18 = vld [vmem:[#allocation2 + $0x2d1] sm:$0xff]  ;;  %v8119_v20 = vpack.i.bf16 %v457_v17, %v456_v16 }
  0x58   :  { %71 = vst.msk [vmem:[#allocation2 + $0x48] sm:$0x1] %vm67_vm2, %v10423_v0  ;;  %v455_v19 = vld [vmem:[#allocation2 + $0x2d9] sm:$0xff] }
  0x59   :  { %8080 = vrot.lane.b32.xlu0 %v8079_v59, %s10424_s1  ;;  %72 = vst.msk [vmem:[#allocation2 + $0x60] sm:$0x1] %vm67_vm2, %v10423_v0  ;;  %v458_v21 = vld [vmem:[#allocation2 + $0x301] sm:$0xff]  ;;  %v8114_v23 = vpack.i.bf16 %v455_v19, %v454_v18 }
  0x5a   :  { %73 = vst.msk [vmem:[#allocation2 + $0x78] sm:$0x1] %vm67_vm2, %v10423_v0  ;;  %v459_v22 = vld [vmem:[#allocation2 + $0x309] sm:$0xff] }
  0x5b   :  { %74 = vst.msk [vmem:[#allocation2 + $0x90] sm:$0x1] %vm67_vm2, %v10423_v0  ;;  %v8124_v24 = vpack.i.bf16 %v459_v22, %v458_v21  ;;  %v463_v26 = vld [vmem:[#allocation2 + $0xa] sm:$0xff]  ;;  %v498_v18 = vld [vmem:[#allocation2 + $0x1e2] sm:$0xff]  ;;  %v500_v22 = vld [vmem:[#allocation2 + $0x1fa] sm:$0xff] }
  0x5c   :  { %75 = vst.msk [vmem:[#allocation2 + $0xa8] sm:$0x1] %vm67_vm2, %v10423_v0  ;;  %v8134_v27 = vpack.i.bf16 %v463_v26, %v462_v25 }
  0x5d   :  { %8090 = vrot.lane.b32.xlu2 %v8089_v1, %s10424_s1  ;;  %76 = vst.msk [vmem:[#allocation2 + $0xc0] sm:$0x1] %vm67_vm2, %v10423_v0 }
  0x5e   :  { %77 = vst.msk [vmem:[#allocation2 + $0xd8] sm:$0x1] %vm67_vm2, %v10423_v0 }
  0x5f   :  { %8085 = vrot.lane.b32.xlu1 %v8084_v5, %s10424_s1  ;;  %78 = vst.msk [vmem:[#allocation2 + $0xf0] sm:$0x1] %vm67_vm2, %v10423_v0 }
  0x60   :  { %79 = vst.msk [vmem:[#allocation2 + $0x108] sm:$0x1] %vm67_vm2, %v10423_v0 }
  0x61   :  { %8095 = vrot.lane.b32.xlu0 %v8094_v6, %s10424_s1  ;;  %80 = vst.msk [vmem:[#allocation2 + $0x120] sm:$0x1] %vm67_vm2, %v10423_v0 }
  0x62   :  { %81 = vst.msk [vmem:[#allocation2 + $0x138] sm:$0x1] %vm67_vm2, %v10423_v0 }
  0x63   :  { %82 = vst.msk [vmem:[#allocation2 + $0x150] sm:$0x1] %vm67_vm2, %v10423_v0 }
  0x64   :  { %83 = vst.msk [vmem:[#allocation2 + $0x168] sm:$0x1] %vm67_vm2, %v10423_v0 }
  0x65   :  { %8105 = vrot.lane.b32.xlu2 %v8104_v11, %s10424_s1  ;;  %84 = vst.msk [vmem:[#allocation2 + $0x180] sm:$0x1] %vm67_vm2, %v10423_v0  ;;  %v494_v11 = vld [vmem:[#allocation2 + $0x1b2] sm:$0xff] }
  0x66   :  { %85 = vst.msk [vmem:[#allocation2 + $0x198] sm:$0x1] %vm67_vm2, %v10423_v0 }
  0x67   :  { %8100 = vrot.lane.b32.xlu1 %v8099_v14, %s10424_s1  ;;  %86 = vst.msk [vmem:[#allocation2 + $0x1b0] sm:$0x1] %vm67_vm2, %v10423_v0 }
  0x68   :  { %87 = vst.msk [vmem:[#allocation2 + $0x1c8] sm:$0x1] %vm67_vm2, %v10423_v0 }
  0x69   :  { %8110 = vrot.lane.b32.xlu0 %v8109_v15, %s10424_s1  ;;  %88 = vst.msk [vmem:[#allocation2 + $0x1e0] sm:$0x1] %vm67_vm2, %v10423_v0  ;;  %v472_v15 = vld [vmem:[#allocation2 + $0x7a] sm:$0xff] }
  0x6a   :  { %89 = vst.msk [vmem:[#allocation2 + $0x1f8] sm:$0x1] %vm67_vm2, %v10423_v0 }
  0x6b   :  { %90 = vst.msk [vmem:[#allocation2 + $0x210] sm:$0x1] %vm67_vm2, %v10423_v0 }
  0x6c   :  { %91 = vst.msk [vmem:[#allocation2 + $0x228] sm:$0x1] %vm67_vm2, %v10423_v0 }
  0x6d   :  { %8120 = vrot.lane.b32.xlu2 %v8119_v20, %s10424_s1  ;;  %92 = vst.msk [vmem:[#allocation2 + $0x240] sm:$0x1] %vm67_vm2, %v10423_v0 }
  0x6e   :  { %93 = vst.msk [vmem:[#allocation2 + $0x258] sm:$0x1] %vm67_vm2, %v10423_v0 }
  0x6f   :  { %8115 = vrot.lane.b32.xlu1 %v8114_v23, %s10424_s1  ;;  %94 = vst.msk [vmem:[#allocation2 + $0x270] sm:$0x1] %vm67_vm2, %v10423_v0 }
  0x70   :  { %95 = vst.msk [vmem:[#allocation2 + $0x288] sm:$0x1] %vm67_vm2, %v10423_v0 }
  0x71   :  { %8125 = vrot.lane.b32.xlu0 %v8124_v24, %s10424_s1  ;;  %96 = vst.msk [vmem:[#allocation2 + $0x2a0] sm:$0x1] %vm67_vm2, %v10423_v0 }
  0x72   :  { %97 = vst.msk [vmem:[#allocation2 + $0x2b8] sm:$0x1] %vm67_vm2, %v10423_v0 }
  0x73   :  { %98 = vst.msk [vmem:[#allocation2 + $0x2d0] sm:$0x1] %vm67_vm2, %v10423_v0 }
  0x74   :  { %99 = vst.msk [vmem:[#allocation2 + $0x2e8] sm:$0x1] %vm67_vm2, %v10423_v0 }
  0x75   :  { %8135 = vrot.lane.b32.xlu2 %v8134_v27, %s10425_s26  ;;  %100 = vst.msk [vmem:[#allocation2 + $0x300] sm:$0x1] %vm67_vm2, %v10423_v0  ;;  %v478_v27 = vld [vmem:[#allocation2 + $0xc2] sm:$0xff] }
  0x76   :  { %101 = vst.msk [vmem:[#allocation2 + $0x318] sm:$0x1] %vm67_vm2, %v10423_v0 }
  0x77   :  { %102 = vst.msk [vmem:[#allocation2 + $0x330] sm:$0x1] %vm67_vm2, %v10423_v0 }
  0x78   :  { %103 = vst.msk [vmem:[#allocation2 + $0x348] sm:$0x1] %vm67_vm2, %v10423_v0 }
  0x79   :  { %105 = vst.msk [vmem:[#allocation2 + $0x29] sm:$0x1] %vm67_vm2, %v10423_v0 }
  0x7a   :  { %106 = vst.msk [vmem:[#allocation2 + $0x41] sm:$0x1] %vm67_vm2, %v10423_v0 }
  0x7b   :  { %107 = vst.msk [vmem:[#allocation2 + $0x59] sm:$0x1] %vm67_vm2, %v10423_v0 }
  0x7c   :  { %108 = vst.msk [vmem:[#allocation2 + $0x71] sm:$0x1] %vm67_vm2, %v10423_v0 }
  0x7d   :  { %109 = vst.msk [vmem:[#allocation2 + $0x89] sm:$0x1] %vm67_vm2, %v10423_v0 }
  0x7e   :  { %110 = vst.msk [vmem:[#allocation2 + $0xa1] sm:$0x1] %vm67_vm2, %v10423_v0 }
  0x7f   :  { %111 = vst.msk [vmem:[#allocation2 + $0xb9] sm:$0x1] %vm67_vm2, %v10423_v0  ;;  %v10763_v37 = vpop.permute.xlu2 %7995 }
  0x80   :  { %112 = vst.msk [vmem:[#allocation2 + $0xd1] sm:$0x1] %vm67_vm2, %v10423_v0  ;;  %v465_v29 = vld [vmem:[#allocation2 + $0x22] sm:$0xff] }
  0x81   :  { %113 = vst.msk [vmem:[#allocation2 + $0xe9] sm:$0x1] %vm67_vm2, %v10423_v0  ;;  %v8139_v30 = vpack.i.bf16 %v465_v29, %v464_v28  ;;  %v467_v5 = vld [vmem:[#allocation2 + $0x3a] sm:$0xff] }
  0x82   :  { %114 = vst.msk [vmem:[#allocation2 + $0x101] sm:$0x1] %vm67_vm2, %v10423_v0  ;;  %v469_v32 = vld [vmem:[#allocation2 + $0x52] sm:$0xff]  ;;  %v8144_v9 = vpack.i.bf16 %v467_v5, %v466_v4  ;;  %v496_v4 = vld [vmem:[#allocation2 + $0x1ca] sm:$0xff] }
  0x83   :  { %115 = vst.msk [vmem:[#allocation2 + $0x119] sm:$0x1] %vm67_vm2, %v10423_v0  ;;  %8140 = vrot.lane.b32.xlu0 %v8139_v30, %s10425_s26  ;;  %v8149_v33 = vpack.i.bf16 %v469_v32, %v468_v31  ;;  %v471_v35 = vld [vmem:[#allocation2 + $0x6a] sm:$0xff] }
  0x84   :  { %116 = vst.msk [vmem:[#allocation2 + $0x131] sm:$0x1] %vm67_vm2, %v10423_v0  ;;  %v8154_v36 = vpack.i.bf16 %v471_v35, %v470_v34  ;;  %v473_v16 = vld [vmem:[#allocation2 + $0x82] sm:$0xff]  ;;  %v504_v30 = vld [vmem:[#allocation2 + $0x22a] sm:$0xff] }
  0x85   :  { %117 = vst.msk [vmem:[#allocation2 + $0x149] sm:$0x1] %vm67_vm2, %v10423_v0  ;;  %8150 = vrot.lane.b32.xlu2 %v8149_v33, %s10425_s26  ;;  %v475_v39 = vld [vmem:[#allocation2 + $0x9a] sm:$0xff]  ;;  %v8159_v20 = vpack.i.bf16 %v473_v16, %v472_v15  ;;  %v506_v34 = vld [vmem:[#allocation2 + $0x242] sm:$0xff] }
  0x86   :  { %118 = vst.msk [vmem:[#allocation2 + $0x161] sm:$0x1] %vm67_vm2, %v10423_v0  ;;  %v8164_v40 = vpack.i.bf16 %v475_v39, %v474_v38  ;;  %v477_v42 = vld [vmem:[#allocation2 + $0xb2] sm:$0xff] }
  0x87   :  { %119 = vst.msk [vmem:[#allocation2 + $0x179] sm:$0x1] %vm67_vm2, %v10423_v0  ;;  %v8169_v44 = vpack.i.bf16 %v477_v42, %v476_v41  ;;  %v10783_v46 = vpop.permute.xlu2 %8000  ;;  %v479_v28 = vld [vmem:[#allocation2 + $0xca] sm:$0xff] }
  0x88   :  { %120 = vst.msk [vmem:[#allocation2 + $0x191] sm:$0x1] %vm67_vm2, %v10423_v0  ;;  %v481_v49 = vld [vmem:[#allocation2 + $0xe2] sm:$0xff]  ;;  %v8174_v32 = vpack.i.bf16 %v479_v28, %v478_v27 }
  0x89   :  { %121 = vst.msk [vmem:[#allocation2 + $0x1a9] sm:$0x1] %vm67_vm2, %v10423_v0  ;;  %v8179_v51 = vpack.i.bf16 %v481_v49, %v480_v47  ;;  %v483_v53 = vld [vmem:[#allocation2 + $0xfa] sm:$0xff]  ;;  %v340_v28 = vld [vmem:[#allocation2 + $0x48] sm:$0xff] }
  0x8a   :  { %122 = vst.msk [vmem:[#allocation2 + $0x1c1] sm:$0x1] %vm67_vm2, %v10423_v0  ;;  %v8184_v54 = vpack.i.bf16 %v483_v53, %v482_v52  ;;  %v485_v41 = vld [vmem:[#allocation2 + $0x112] sm:$0xff] }
  0x8b   :  { %123 = vst.msk [vmem:[#allocation2 + $0x1d9] sm:$0x1] %vm67_vm2, %v10423_v0  ;;  %8155 = vrot.lane.b32.xlu0 %v8154_v36, %s10425_s26  ;;  %v487_v58 = vld [vmem:[#allocation2 + $0x12a] sm:$0xff]  ;;  %v490_v52 = vld [vmem:[#allocation2 + $0x152] sm:$0xff] }
  0x8c   :  { %124 = vst.msk [vmem:[#allocation2 + $0x1f1] sm:$0x1] %vm67_vm2, %v10423_v0  ;;  %v10799_v55 = vpop.permute.xlu0 %7975  ;;  %v8194_v59 = vpack.i.bf16 %v487_v58, %v486_v57  ;;  %v489_v62 = vld [vmem:[#allocation2 + $0x142] sm:$0xff]  ;;  %v516_v58 = vld [vmem:[#allocation2 + $0x2ba] sm:$0xff] }
  0x8d   :  { %125 = vst.msk [vmem:[#allocation2 + $0x209] sm:$0x1] %vm67_vm2, %v10423_v0  ;;  %8165 = vrot.lane.b32.xlu2 %v8164_v40, %s10425_s26  ;;  %v8199_v1 = vpack.i.bf16 %v489_v62, %v488_v61  ;;  %v484_v40 = vld [vmem:[#allocation2 + $0x10a] sm:$0xff]  ;;  %v491_v53 = vld [vmem:[#allocation2 + $0x15a] sm:$0xff]  ;;  %v518_v61 = vld [vmem:[#allocation2 + $0x2d2] sm:$0xff] }
  0x8e   :  { %126 = vst.msk [vmem:[#allocation2 + $0x221] sm:$0x1] %vm67_vm2, %v10423_v0  ;;  %v493_v8 = vld [vmem:[#allocation2 + $0x172] sm:$0xff]  ;;  %v8189_v45 = vpack.i.bf16 %v485_v41, %v484_v40 }
  0x8f   :  { %127 = vst.msk [vmem:[#allocation2 + $0x239] sm:$0x1] %vm67_vm2, %v10423_v0  ;;  %v10801_v56 = vpop.permute.xlu2 %8015  ;;  %v8209_v10 = vpack.i.bf16 %v493_v8, %v492_v7  ;;  %v522_v8 = vld [vmem:[#allocation2 + $0x302] sm:$0xff] }
  0x90   :  { %128 = vst.msk [vmem:[#allocation2 + $0x251] sm:$0x1] %vm67_vm2, %v10423_v0 }
  0x91   :  { %129 = vst.msk [vmem:[#allocation2 + $0x269] sm:$0x1] %vm67_vm2, %v10423_v0  ;;  %v495_v12 = vld [vmem:[#allocation2 + $0x1ba] sm:$0xff] }
  0x92   :  { %130 = vst.msk [vmem:[#allocation2 + $0x281] sm:$0x1] %vm67_vm2, %v10423_v0  ;;  %v8214_v13 = vpack.i.bf16 %v495_v12, %v494_v11  ;;  %v497_v5 = vld [vmem:[#allocation2 + $0x1d2] sm:$0xff] }
  0x93   :  { %131 = vst.msk [vmem:[#allocation2 + $0x299] sm:$0x1] %vm67_vm2, %v10423_v0  ;;  %8170 = vrot.lane.b32.xlu0 %v8169_v44, %s10425_s26  ;;  %v499_v19 = vld [vmem:[#allocation2 + $0x1ea] sm:$0xff] }
  0x94   :  { %132 = vst.msk [vmem:[#allocation2 + $0x2b1] sm:$0x1] %vm67_vm2, %v10423_v0  ;;  %v8224_v21 = vpack.i.bf16 %v499_v19, %v498_v18  ;;  %v501_v23 = vld [vmem:[#allocation2 + $0x202] sm:$0xff]  ;;  %v338_v18 = vld [vmem:[#allocation2 + $0x30] sm:$0xff] }
  0x95   :  { %133 = vst.msk [vmem:[#allocation2 + $0x2c9] sm:$0x1] %vm67_vm2, %v10423_v0  ;;  %8180 = vrot.lane.b32.xlu2 %v8179_v51, %s10425_s26  ;;  %v8229_v25 = vpack.i.bf16 %v501_v23, %v500_v22  ;;  %v503_v22 = vld [vmem:[#allocation2 + $0x21a] sm:$0xff] }
  0x96   :  { %134 = vst.msk [vmem:[#allocation2 + $0x2e1] sm:$0x1] %vm67_vm2, %v10423_v0  ;;  %v505_v31 = vld [vmem:[#allocation2 + $0x232] sm:$0xff] }
  0x97   :  { %135 = vst.msk [vmem:[#allocation2 + $0x2f9] sm:$0x1] %vm67_vm2, %v10423_v0  ;;  %v10806_v3 = vpop.permute.xlu2 %8030  ;;  %v8239_v33 = vpack.i.bf16 %v505_v31, %v504_v30  ;;  %v507_v35 = vld [vmem:[#allocation2 + $0x24a] sm:$0xff] }
  0x98   :  { %136 = vst.msk [vmem:[#allocation2 + $0x311] sm:$0x1] %vm67_vm2, %v10423_v0  ;;  %v8244_v36 = vpack.i.bf16 %v507_v35, %v506_v34  ;;  %v341_v30 = vld [vmem:[#allocation2 + $0x50] sm:$0xff]  ;;  %v345_v35 = vld [vmem:[#allocation2 + $0x80] sm:$0xff] }
  0x99   :  { %137 = vst.msk [vmem:[#allocation2 + $0x329] sm:$0x1] %vm67_vm2, %v10423_v0  ;;  %v10817_v24 = vpop.permute.xlu1 %7985  ;;  %v511_v44 = vld [vmem:[#allocation2 + $0x27a] sm:$0xff]  ;;  %v509_v40 = vld [vmem:[#allocation2 + $0x262] sm:$0xff] }
  0x9a   :  { %138 = vst.msk [vmem:[#allocation2 + $0x341] sm:$0x1] %vm67_vm2, %v10423_v0  ;;  %v8254_v47 = vpack.i.bf16 %v511_v44, %v510_v43  ;;  %v513_v49 = vld [vmem:[#allocation2 + $0x292] sm:$0xff] }
  0x9b   :  { %139 = vst.msk [vmem:[#allocation2 + $0x359] sm:$0x1] %vm67_vm2, %v10423_v0  ;;  %8185 = vrot.lane.b32.xlu0 %v8184_v54, %s10425_s26  ;;  %v10808_v6 = vpop.permute.xlu0 %7980 }
  0x9c   :  { %330 = vst.msk [vmem:[#allocation2 + $0x319] sm:$0xff] %vm52_vm0, %v265_v48  ;;  %v512_v48 = vld [vmem:[#allocation2 + $0x28a] sm:$0xff] }
  0x9d   :  { %331 = vst.msk [vmem:[#allocation2 + $0x321] sm:$0xff] %vm52_vm0, %v266_v50  ;;  %8195 = vrot.lane.b32.xlu2 %v8194_v59, %s10425_s26  ;;  %v8259_v50 = vpack.i.bf16 %v513_v49, %v512_v48  ;;  %v517_v59 = vld [vmem:[#allocation2 + $0x2c2] sm:$0xff]  ;;  %v519_v62 = vld [vmem:[#allocation2 + $0x2da] sm:$0xff] }
  0x9e   :  { %14667 = vst [vmem:[#allocation12_spill] sm:$0xff] %v10801_v56  ;;  %v350_v49 = vld [vmem:[#allocation2 + $0xc0] sm:$0xff] }
  0x9f   :  { %14668 = vst [vmem:[#allocation13_spill] sm:$0xff] %v10806_v3  ;;  %v10813_v14 = vpop.permute.xlu2 %8045 }
  0xa0   :  { %14669 = vst [vmem:[#allocation14_spill] sm:$0xff] %v10813_v14 }
  0xa1   :  { %v10828_v38 = vpop.permute.xlu1 %7990 }
  0xa3   :  { %v460_v60 = vld [vmem:[#allocation2 + $0x319] sm:$0xff]  ;;  %8200 = vrot.lane.b32.xlu0 %v8199_v1, %s10425_s26  ;;  %v10815_v17 = vpop.permute.xlu0 %8005 }
  0xa4   :  { %v461_v0 = vld [vmem:[#allocation2 + $0x321] sm:$0xff] }
  0xa5   :  { %v8129_v63 = vpack.i.bf16 %v461_v0, %v460_v60  ;;  %8210 = vrot.lane.b32.xlu2 %v8209_v10, %s10425_s26  ;;  %v8204_v60 = vpack.i.bf16 %v491_v53, %v490_v52  ;;  %v8269_v0 = vpack.i.bf16 %v517_v59, %v516_v58  ;;  %v8219_v10 = vpack.i.bf16 %v497_v5, %v496_v4  ;;  %v525_v15 = vld [vmem:[#allocation2 + $0x322] sm:$0xff]  ;;  %v515_v59 = vld [vmem:[#allocation2 + $0x2aa] sm:$0xff] }
  0xa6   :  { %v351_v53 = vld [vmem:[#allocation2 + $0xc8] sm:$0xff] }
  0xa7   :  { %8130 = vrot.lane.b32.xlu1 %v8129_v63, %s10424_s1  ;;  %v10822_v26 = vpop.permute.xlu2 %8060  ;;  %v8274_v63 = vpack.i.bf16 %v519_v62, %v518_v61  ;;  %v514_v58 = vld [vmem:[#allocation2 + $0x2a2] sm:$0xff]  ;;  %v352_v62 = vld [vmem:[#allocation2 + $0xd8] sm:$0xff] }
  0xa8   :  { %14670 = vst [vmem:[#allocation15_spill] sm:$0xff] %v10822_v26  ;;  %v8264_v61 = vpack.i.bf16 %v515_v59, %v514_v58  ;;  %v356_v5 = vld [vmem:[#allocation2 + $0x108] sm:$0xff] }
  0xa9   :  { %v10842_v57 = vpop.permute.xlu1 %8010  ;;  %v641_v26 = vld [vmem:[#allocation2 + $0x2a9] sm:$0xff] }
  0xab   :  { %8215 = vrot.lane.b32.xlu0 %v8214_v13, %s10425_s26  ;;  %v10824_v29 = vpop.permute.xlu0 %8020  ;;  %v524_v13 = vld [vmem:[#allocation2 + $0x31a] sm:$0xff] }
  0xac   :  { %14671 = vst [vmem:[#allocation16_spill] sm:$0xff] %v10824_v29  ;;  %v8289_v16 = vpack.i.bf16 %v525_v15, %v524_v13  ;;  %v810_v29 = vld [vmem:[#allocation2 + $0x171] sm:$0xff] }
  0xad   :  { %8225 = vrot.lane.b32.xlu2 %v8224_v21, %s10425_s26  ;;  %v502_v21 = vld [vmem:[#allocation2 + $0x212] sm:$0xff] }
  0xae   :  { %v8234_v27 = vpack.i.bf16 %v503_v22, %v502_v21  ;;  %v359_v21 = vld [vmem:[#allocation2 + $0x128] sm:$0xff] }
  0xaf   :  { %8145 = vrot.lane.b32.xlu1 %v8144_v9, %s10425_s26  ;;  %v10831_v39 = vpop.permute.xlu2 %8075  ;;  %v523_v9 = vld [vmem:[#allocation2 + $0x30a] sm:$0xff] }
  0xb0   :  { %14672 = vst [vmem:[#allocation17_spill] sm:$0xff] %v10831_v39  ;;  %v8284_v12 = vpack.i.bf16 %v523_v9, %v522_v8  ;;  %v357_v9 = vld [vmem:[#allocation2 + $0x110] sm:$0xff] }
  0xb1   :  { %v10851_v11 = vpop.permute.xlu1 %8025  ;;  %v638_v39 = vld [vmem:[#allocation2 + $0x289] sm:$0xff] }
  0xb2   :  { %14678 = vst [vmem:[#allocation23_spill] sm:$0xff] %v10851_v11 }
  0xb3   :  { %8230 = vrot.lane.b32.xlu0 %v8229_v25, %s10425_s26  ;;  %v10833_v42 = vpop.permute.xlu0 %8035 }
  0xb4   :  { %14673 = vst [vmem:[#allocation18_spill] sm:$0xff] %v10833_v42 }
  0xb5   :  { %8240 = vrot.lane.b32.xlu2 %v8239_v33, %s10425_s26  ;;  %v344_v33 = vld [vmem:[#allocation2 + $0x78] sm:$0xff] }
  0xb6   :  { %v8314_v43 = vpack.i.bf16 %v345_v35, %v344_v33  ;;  %v171_v33 = vld [vmem:[#allocation7 + $0xf8] sm:$0xff]  ;;  %v362_v35 = vld [vmem:[#allocation2 + $0x150] sm:$0xff] }
  0xb7   :  { %8160 = vrot.lane.b32.xlu1 %v8159_v20, %s10425_s26  ;;  %v10838_v51 = vpop.permute.xlu2 %8090  ;;  %v339_v20 = vld [vmem:[#allocation2 + $0x38] sm:$0xff] }
  0xb8   :  { %14674 = vst [vmem:[#allocation19_spill] sm:$0xff] %v10838_v51  ;;  %v8299_v25 = vpack.i.bf16 %v339_v20, %v338_v18  ;;  %v358_v20 = vld [vmem:[#allocation2 + $0x120] sm:$0xff] }
  0xb9   :  { %v10860_v31 = vpop.permute.xlu1 %8040  ;;  %v8349_v22 = vpack.i.bf16 %v359_v21, %v358_v20  ;;  %v348_v21 = vld [vmem:[#allocation2 + $0xa8] sm:$0xff] }
  0xba   :  { %14681 = vst [vmem:[#allocation26_spill] sm:$0xff] %v10860_v31  ;;  %v599_v51 = vld [vmem:[#allocation2 + $0x81] sm:$0xff] }
  0xbb   :  { %8245 = vrot.lane.b32.xlu0 %v8244_v36, %s10425_s26  ;;  %v10840_v54 = vpop.permute.xlu0 %8050  ;;  %v508_v36 = vld [vmem:[#allocation2 + $0x25a] sm:$0xff]  ;;  %v715_v31 = vld [vmem:[#allocation2 + $0x322] sm:$0xff] }
  0xbc   :  { %14675 = vst [vmem:[#allocation20_spill] sm:$0xff] %v10840_v54  ;;  %v8249_v44 = vpack.i.bf16 %v509_v40, %v508_v36  ;;  %v363_v36 = vld [vmem:[#allocation2 + $0x158] sm:$0xff] }
  0xbd   :  { %8255 = vrot.lane.b32.xlu2 %v8254_v47, %s10425_s26  ;;  %v347_v47 = vld [vmem:[#allocation2 + $0x98] sm:$0xff] }
  0xbe   :  { %v665_v54 = vld [vmem:[#allocation2 + $0x9a] sm:$0xff] }
  0xbf   :  { %8175 = vrot.lane.b32.xlu1 %v8174_v32, %s10425_s26  ;;  %v10847_v1 = vpop.permute.xlu2 %8105  ;;  %v8304_v32 = vpack.i.bf16 %v341_v30, %v340_v28  ;;  %v337_v30 = vld [vmem:[#allocation2 + $0x20] sm:$0xff] }
  0xc0   :  { %14676 = vst [vmem:[#allocation21_spill] sm:$0xff] %v10847_v1  ;;  %v608_v1 = vld [vmem:[#allocation2 + $0xf1] sm:$0xff] }
  0xc3   :  { %8260 = vrot.lane.b32.xlu0 %v8259_v50, %s10425_s26  ;;  %v10849_v7 = vpop.permute.xlu0 %8065  ;;  %v10871_v50 = vpop.permute.xlu1 %8055 }
  0xc4   :  { %14677 = vst [vmem:[#allocation22_spill] sm:$0xff] %v10849_v7  ;;  %v629_v7 = vld [vmem:[#allocation2 + $0x219] sm:$0xff] }
  0xc5   :  { %8270 = vrot.lane.b32.xlu2 %v8269_v0, %s10425_s26  ;;  %14683 = vst [vmem:[#allocation28_spill] sm:$0xff] %v10871_v50  ;;  %v8329_v0 = vpack.i.bf16 %v351_v53, %v350_v49  ;;  %v8359_v49 = vpack.i.bf16 %v363_v36, %v362_v35  ;;  %v377_v35 = vld [vmem:[#allocation2 + $0x230] sm:$0xff] }
  0xc7   :  { %8190 = vrot.lane.b32.xlu1 %v8189_v45, %s10425_s26  ;;  %v10856_v19 = vpop.permute.xlu2 %8120  ;;  %v346_v45 = vld [vmem:[#allocation2 + $0x90] sm:$0xff] }
  0xc8   :  { %14679 = vst [vmem:[#allocation24_spill] sm:$0xff] %v10856_v19  ;;  %v8319_v48 = vpack.i.bf16 %v347_v47, %v346_v45  ;;  %v236_v45 = vadd.f32 %v10478_v2, %v171_v33  ;;  %v364_v47 = vld [vmem:[#allocation2 + $0x168] sm:$0xff]  ;;  %v600_v19 = vld [vmem:[#allocation2 + $0x91] sm:$0xff] }
  0xc9   :  { %v376_v33 = vld [vmem:[#allocation2 + $0x228] sm:$0xff] }
  0xca   :  { %301 = vst.msk [vmem:[#allocation2 + $0x189] sm:$0xff] %vm52_vm0, %v236_v45 }
  0xcb   :  { %8275 = vrot.lane.b32.xlu0 %v8274_v63, %s10425_s26  ;;  %v10858_v23 = vpop.permute.xlu0 %8080  ;;  %v353_v63 = vld [vmem:[#allocation2 + $0xe0] sm:$0xff]  ;;  %v10885_v15 = vpop.permute.xlu1 %8070 }
  0xcc   :  { %14680 = vst [vmem:[#allocation25_spill] sm:$0xff] %v10858_v23  ;;  %v8334_v4 = vpack.i.bf16 %v353_v63, %v352_v62  ;;  %v368_v62 = vld [vmem:[#allocation2 + $0x1c8] sm:$0xff]  ;;  %v369_v63 = vld [vmem:[#allocation2 + $0x1d0] sm:$0xff] }
  0xcd   :  { %8285 = vrot.lane.b32.xlu2 %v8284_v12, %s10425_s26  ;;  %v521_v12 = vld [vmem:[#allocation2 + $0x2f2] sm:$0xff]  ;;  %14686 = vst [vmem:[#allocation31_spill] sm:$0xff] %v10885_v15  ;;  %v632_v23 = vld [vmem:[#allocation2 + $0x241] sm:$0xff] }
  0xce   :  { %v623_v15 = vld [vmem:[#allocation2 + $0x1d1] sm:$0xff] }
  0xcf   :  { %8205 = vrot.lane.b32.xlu1 %v8204_v60, %s10425_s26  ;;  %v10865_v34 = vpop.permute.xlu2 %8135 }
  0xd3   :  { %8290 = vrot.lane.b32.xlu0 %v8289_v16, %s10425_s26  ;;  %v10867_v41 = vpop.permute.xlu0 %8095  ;;  %v8344_v16 = vpack.i.bf16 %v357_v9, %v356_v5  ;;  %v370_v5 = vld [vmem:[#allocation2 + $0x1e0] sm:$0xff]  ;;  %v371_v9 = vld [vmem:[#allocation2 + $0x1e8] sm:$0xff] }
  0xd4   :  { %14682 = vst [vmem:[#allocation27_spill] sm:$0xff] %v10867_v41 }
  0xd5   :  { %8300 = vrot.lane.b32.xlu2 %v8299_v25, %s10426_s27 }
  0xd7   :  { %8220 = vrot.lane.b32.xlu1 %v8219_v10, %s10425_s26  ;;  %v520_v10 = vld [vmem:[#allocation2 + $0x2ea] sm:$0xff] }
  0xd8   :  { %v8279_v18 = vpack.i.bf16 %v521_v12, %v520_v10  ;;  %v8374_v10 = vpack.i.bf16 %v369_v63, %v368_v62  ;;  %v382_v62 = vld [vmem:[#allocation2 + $0x270] sm:$0xff]  ;;  %v383_v63 = vld [vmem:[#allocation2 + $0x278] sm:$0xff] }
  0xdb   :  { %8305 = vrot.lane.b32.xlu0 %v8304_v32, %s10426_s27  ;;  %v10876_v60 = vpop.permute.xlu0 %8110  ;;  %v170_v32 = vld [vmem:[#allocation7 + $0xf0] sm:$0xff] }
  0xdc   :  { %14684 = vst [vmem:[#allocation29_spill] sm:$0xff] %v10876_v60  ;;  %v606_v60 = vld [vmem:[#allocation2 + $0xd9] sm:$0xff] }
  0xdd   :  { %8315 = vrot.lane.b32.xlu2 %v8314_v43, %s10426_s27  ;;  %v10894_v43 = vpop.permute.xlu1 %8085 }
  0xde   :  { %14688 = vst [vmem:[#allocation33_spill] sm:$0xff] %v10894_v43  ;;  %v626_v43 = vld [vmem:[#allocation2 + $0x1f9] sm:$0xff] }
  0xdf   :  { %8235 = vrot.lane.b32.xlu1 %v8234_v27, %s10425_s26  ;;  %v10874_v52 = vpop.permute.xlu2 %8150  ;;  %v336_v27 = vld [vmem:[#allocation2 + $0x18] sm:$0xff] }
  0xe0   :  { %v8294_v40 = vpack.i.bf16 %v337_v30, %v336_v27  ;;  %v374_v27 = vld [vmem:[#allocation2 + $0x210] sm:$0xff]  ;;  %v375_v30 = vld [vmem:[#allocation2 + $0x218] sm:$0xff] }
  0xe1   :  { %v8389_v36 = vpack.i.bf16 %v375_v30, %v374_v27  ;;  %v386_v27 = vld [vmem:[#allocation2 + $0x2a0] sm:$0xff]  ;;  %v387_v30 = vld [vmem:[#allocation2 + $0x2a8] sm:$0xff] }
  0xe3   :  { %8320 = vrot.lane.b32.xlu0 %v8319_v48, %s10426_s27  ;;  %v10883_v13 = vpop.permute.xlu0 %8125  ;;  %v365_v48 = vld [vmem:[#allocation2 + $0x170] sm:$0xff] }
  0xe4   :  { %14685 = vst [vmem:[#allocation30_spill] sm:$0xff] %v10883_v13  ;;  %v8364_v53 = vpack.i.bf16 %v365_v48, %v364_v47  ;;  %v354_v48 = vld [vmem:[#allocation2 + $0xf0] sm:$0xff] }
  0xe5   :  { %8330 = vrot.lane.b32.xlu2 %v8329_v0, %s10426_s27  ;;  %v342_v0 = vld [vmem:[#allocation2 + $0x60] sm:$0xff]  ;;  %v10907_v12 = vpop.permute.xlu1 %8100  ;;  %v595_v13 = vld [vmem:[#allocation2 + $0x51] sm:$0xff] }
  0xe6   :  { %14690 = vst [vmem:[#allocation35_spill] sm:$0xff] %v10907_v12  ;;  %v614_v12 = vld [vmem:[#allocation2 + $0x139] sm:$0xff] }
  0xe7   :  { %8250 = vrot.lane.b32.xlu1 %v8249_v44, %s10425_s26  ;;  %v10881_v8 = vpop.permute.xlu2 %8165  ;;  %v235_v44 = vadd.f32 %v10478_v2, %v170_v32 }
  0xe9   :  { %300 = vst.msk [vmem:[#allocation2 + $0x181] sm:$0xff] %vm52_vm0, %v235_v44 }
  0xeb   :  { %8335 = vrot.lane.b32.xlu0 %v8334_v4, %s10426_s27 }
  0xed   :  { %8345 = vrot.lane.b32.xlu2 %v8344_v16, %s10426_s27  ;;  %v8379_v16 = vpack.i.bf16 %v371_v9, %v370_v5  ;;  %v10918_v44 = vpop.permute.xlu1 %8115  ;;  %v8409_v5 = vpack.i.bf16 %v383_v63, %v382_v62  ;;  %v202_v62 = vld [vmem:[#allocation7 + $0x1f0] sm:$0xff]  ;;  %v203_v63 = vld [vmem:[#allocation7 + $0x1f8] sm:$0xff] }
  0xee   :  { %14692 = vst [vmem:[#allocation37_spill] sm:$0xff] %v10918_v44  ;;  %v602_v44 = vld [vmem:[#allocation2 + $0xa9] sm:$0xff] }
  0xef   :  { %8265 = vrot.lane.b32.xlu1 %v8264_v61, %s10425_s26  ;;  %v10890_v25 = vpop.permute.xlu2 %8180  ;;  %v343_v61 = vld [vmem:[#allocation2 + $0x68] sm:$0xff] }
  0xf0   :  { %14687 = vst [vmem:[#allocation32_spill] sm:$0xff] %v10890_v25  ;;  %v8309_v4 = vpack.i.bf16 %v343_v61, %v342_v0  ;;  %v381_v0 = vld [vmem:[#allocation2 + $0x260] sm:$0xff] }
  0xf1   :  { %v620_v41 = vld [vmem:[#allocation2 + $0x181] sm:$0xff] }
  0xf2   :  { %v826_v25 = vld [vmem:[#allocation2 + $0x261] sm:$0xff] }
  0xf3   :  { %8350 = vrot.lane.b32.xlu0 %v8349_v22, %s10426_s27  ;;  %v349_v22 = vld [vmem:[#allocation2 + $0xb0] sm:$0xff] }
  0xf4   :  { %v8324_v32 = vpack.i.bf16 %v349_v22, %v348_v21  ;;  %v360_v21 = vld [vmem:[#allocation2 + $0x138] sm:$0xff]  ;;  %v361_v22 = vld [vmem:[#allocation2 + $0x140] sm:$0xff] }
  0xf5   :  { %v10892_v28 = vpop.permute.xlu0 %8140  ;;  %8360 = vrot.lane.b32.xlu2 %v8359_v49, %s10426_s27  ;;  %v355_v49 = vld [vmem:[#allocation2 + $0xf8] sm:$0xff] }
  0xf6   :  { %v8339_v61 = vpack.i.bf16 %v355_v49, %v354_v48  ;;  %v556_v49 = vld [vmem:[#allocation2 + $0x180] sm:$0xff] }
  0xf7   :  { %8280 = vrot.lane.b32.xlu1 %v8279_v18, %s10425_s26  ;;  %v10903_v58 = vpop.permute.xlu2 %8195 }
  0xf8   :  { %14689 = vst [vmem:[#allocation34_spill] sm:$0xff] %v10903_v58  ;;  %v707_v58 = vld [vmem:[#allocation2 + $0x2c2] sm:$0xff] }
  0xfb   :  { %8365 = vrot.lane.b32.xlu0 %v8364_v53, %s10426_s27  ;;  %v380_v53 = vld [vmem:[#allocation2 + $0x258] sm:$0xff] }
  0xfd   :  { %v10905_v59 = vpop.permute.xlu0 %8155  ;;  %8375 = vrot.lane.b32.xlu2 %v8374_v10, %s10426_s27 }
  0xff   :  { %8295 = vrot.lane.b32.xlu1 %v8294_v40, %s10426_s27  ;;  %v10912_v18 = vpop.permute.xlu2 %8210  ;;  %v8394_v40 = vpack.i.bf16 %v377_v35, %v376_v33  ;;  %v388_v33 = vld [vmem:[#allocation2 + $0x2b8] sm:$0xff]  ;;  %v389_v35 = vld [vmem:[#allocation2 + $0x2c0] sm:$0xff] }
 0x100   :  { %14691 = vst [vmem:[#allocation36_spill] sm:$0xff] %v10912_v18  ;;  %v686_v18 = vld [vmem:[#allocation2 + $0x1ca] sm:$0xff] }
 0x103   :  { %8380 = vrot.lane.b32.xlu0 %v8379_v16, %s10426_s27 }
 0x105   :  { %v10914_v20 = vpop.permute.xlu0 %8170  ;;  %8390 = vrot.lane.b32.xlu2 %v8389_v36, %s10426_s27  ;;  %v8419_v36 = vpack.i.bf16 %v387_v30, %v386_v27  ;;  %v268_v27 = vadd.f32 %v10478_v2, %v203_v63  ;;  %v394_v30 = vld [vmem:[#allocation2 + $0x300] sm:$0xff] }
 0x107   :  { %8310 = vrot.lane.b32.xlu1 %v8309_v4, %s10426_s27  ;;  %v10921_v45 = vpop.permute.xlu2 %8225  ;;  %v8404_v4 = vpack.i.bf16 %v381_v0, %v380_v53  ;;  %v557_v53 = vld [vmem:[#allocation2 + $0x188] sm:$0xff]  ;;  %333 = vst.msk [vmem:[#allocation2 + $0x339] sm:$0xff] %vm52_vm0, %v268_v27 }
 0x108   :  { %14693 = vst [vmem:[#allocation38_spill] sm:$0xff] %v10921_v45  ;;  %v650_v45 = vld [vmem:[#allocation2 + $0x319] sm:$0xff] }
 0x10b   :  { %8395 = vrot.lane.b32.xlu0 %v8394_v40, %s10426_s27  ;;  %v8424_v40 = vpack.i.bf16 %v389_v35, %v388_v33 }
 0x10d   :  { %v10923_v47 = vpop.permute.xlu0 %8185  ;;  %8405 = vrot.lane.b32.xlu2 %v8404_v4, %s10426_s27  ;;  %v392_v4 = vld [vmem:[#allocation2 + $0x2e8] sm:$0xff] }
 0x10e   :  { %14694 = vst [vmem:[#allocation39_spill] sm:$0xff] %v10923_v47  ;;  %v756_v47 = vld [vmem:[#allocation2 + $0x218] sm:$0xff] }
 0x10f   :  { %8325 = vrot.lane.b32.xlu1 %v8324_v32, %s10426_s27  ;;  %v10928_v9 = vpop.permute.xlu2 %8240  ;;  %v8354_v32 = vpack.i.bf16 %v361_v22, %v360_v21  ;;  %v8369_v21 = vpack.i.bf16 %v557_v53, %v556_v49  ;;  %v267_v22 = vadd.f32 %v10478_v2, %v202_v62  ;;  %v372_v2 = vld [vmem:[#allocation2 + $0x1f8] sm:$0xff]  ;;  %v373_v53 = vld [vmem:[#allocation2 + $0x200] sm:$0xff] }
 0x110   :  { %14695 = vst [vmem:[#allocation40_spill] sm:$0xff] %v10928_v9  ;;  %v8384_v62 = vpack.i.bf16 %v373_v53, %v372_v2  ;;  %v379_v2 = vld [vmem:[#allocation2 + $0x248] sm:$0xff] }
 0x111   :  { %332 = vst.msk [vmem:[#allocation2 + $0x331] sm:$0xff] %vm52_vm0, %v267_v22  ;;  %v605_v9 = vld [vmem:[#allocation2 + $0xc9] sm:$0xff] }
 0x113   :  { %8410 = vrot.lane.b32.xlu0 %v8409_v5, %s10426_s27  ;;  %v393_v5 = vld [vmem:[#allocation2 + $0x2f0] sm:$0xff] }
 0x114   :  { %v8434_v33 = vpack.i.bf16 %v393_v5, %v392_v4  ;;  %v590_v4 = vld [vmem:[#allocation2 + $0x19] sm:$0xff]  ;;  %v591_v5 = vld [vmem:[#allocation2 + $0x21] sm:$0xff] }
 0x115   :  { %v10932_v16 = vpop.permute.xlu0 %8200  ;;  %8420 = vrot.lane.b32.xlu2 %v8419_v36, %s10426_s27 }
 0x116   :  { %14697 = vst [vmem:[#allocation42_spill] sm:$0xff] %v10932_v16  ;;  %v705_v16 = vld [vmem:[#allocation2 + $0x2aa] sm:$0xff] }
 0x117   :  { %8340 = vrot.lane.b32.xlu1 %v8339_v61, %s10426_s27  ;;  %v10937_v48 = vpop.permute.xlu2 %8255 }
 0x118   :  { %14698 = vst [vmem:[#allocation43_spill] sm:$0xff] %v10937_v48  ;;  %v588_v63 = vld [vmem:[#allocation2 + $0x330] sm:$0xff]  ;;  %v589_v22 = vld [vmem:[#allocation2 + $0x338] sm:$0xff] }
 0x119   :  { %v10930_v10 = vpop.permute.xlu1 %8130  ;;  %v593_v48 = vld [vmem:[#allocation2 + $0x39] sm:$0xff] }
 0x11a   :  { %14696 = vst [vmem:[#allocation41_spill] sm:$0xff] %v10930_v10  ;;  %v594_v10 = vld [vmem:[#allocation2 + $0x49] sm:$0xff] }
 0x11b   :  { %8425 = vrot.lane.b32.xlu0 %v8424_v40, %s10426_s27 }
 0x11d   :  { %v10941_v61 = vpop.permute.xlu0 %8215  ;;  %8435 = vrot.lane.b32.xlu2 %v8434_v33, %s10426_s27 }
 0x11e   :  { %14699 = vst [vmem:[#allocation44_spill] sm:$0xff] %v10941_v61 }
 0x11f   :  { %8355 = vrot.lane.b32.xlu1 %v8354_v32, %s10426_s27  ;;  %v395_v32 = vld [vmem:[#allocation2 + $0x308] sm:$0xff]  ;;  %v10950_v36 = vpop.permute.xlu2 %8270 }
 0x120   :  { %v8439_v35 = vpack.i.bf16 %v395_v32, %v394_v30  ;;  %14700 = vst [vmem:[#allocation45_spill] sm:$0xff] %v10950_v36  ;;  %v8454_v30 = vpack.i.bf16 %v591_v5, %v590_v4  ;;  %v8449_v32 = vpack.i.bf16 %v589_v22, %v588_v63  ;;  %v8464_v4 = vpack.i.bf16 %v595_v13, %v594_v10  ;;  %v596_v63 = vld [vmem:[#allocation2 + $0x61] sm:$0xff]  ;;  %v597_v5 = vld [vmem:[#allocation2 + $0x69] sm:$0xff]  ;;  %v601_v13 = vld [vmem:[#allocation2 + $0x99] sm:$0xff] }
 0x121   :  { %v10939_v0 = vpop.permute.xlu1 %8145  ;;  %v8479_v10 = vpack.i.bf16 %v601_v13, %v600_v19  ;;  %v390_v36 = vld [vmem:[#allocation2 + $0x2d0] sm:$0xff]  ;;  %v607_v19 = vld [vmem:[#allocation2 + $0xe1] sm:$0xff] }
 0x122   :  { %v8494_v13 = vpack.i.bf16 %v607_v19, %v606_v60  ;;  %v613_v60 = vld [vmem:[#allocation2 + $0x129] sm:$0xff] }
 0x123   :  { %8440 = vrot.lane.b32.xlu0 %v8439_v35, %s10426_s27  ;;  %v378_v35 = vld [vmem:[#allocation2 + $0x240] sm:$0xff] }
 0x124   :  { %v8399_v53 = vpack.i.bf16 %v379_v2, %v378_v35  ;;  %v385_v35 = vld [vmem:[#allocation2 + $0x290] sm:$0xff] }
 0x125   :  { %v10954_v49 = vpop.permute.xlu0 %8230  ;;  %8450 = vrot.lane.b32.xlu2 %v8449_v32, %s10426_s27 }
 0x126   :  { %14701 = vst [vmem:[#allocation46_spill] sm:$0xff] %v10954_v49  ;;  %v617_v49 = vld [vmem:[#allocation2 + $0x159] sm:$0xff] }
 0x127   :  { %8370 = vrot.lane.b32.xlu1 %v8369_v21, %s10426_s27  ;;  %v10958_v21 = vpop.permute.xlu2 %8285 }
 0x128   :  { %14702 = vst [vmem:[#allocation47_spill] sm:$0xff] %v10958_v21  ;;  %v384_v21 = vld [vmem:[#allocation2 + $0x288] sm:$0xff] }
 0x129   :  { %v10952_v40 = vpop.permute.xlu1 %8160  ;;  %v8414_v2 = vpack.i.bf16 %v385_v35, %v384_v21  ;;  %v391_v21 = vld [vmem:[#allocation2 + $0x2d8] sm:$0xff] }
 0x12a   :  { %v8429_v35 = vpack.i.bf16 %v391_v21, %v390_v36  ;;  %v397_v36 = vld [vmem:[#allocation2 + $0x320] sm:$0xff] }
 0x12b   :  { %8455 = vrot.lane.b32.xlu0 %v8454_v30, %s10427_s28 }
 0x12d   :  { %v10963_v33 = vpop.permute.xlu0 %8245  ;;  %8465 = vrot.lane.b32.xlu2 %v8464_v4, %s10427_s28 }
 0x12e   :  { %14704 = vst [vmem:[#allocation49_spill] sm:$0xff] %v10963_v33 }
 0x12f   :  { %8385 = vrot.lane.b32.xlu1 %v8384_v62, %s10426_s27  ;;  %v8469_v62 = vpack.i.bf16 %v597_v5, %v596_v63  ;;  %v10966_v22 = vpop.permute.xlu2 %8300  ;;  %v603_v63 = vld [vmem:[#allocation2 + $0xb1] sm:$0xff] }
 0x130   :  { %v8484_v5 = vpack.i.bf16 %v603_v63, %v602_v44  ;;  %v609_v44 = vld [vmem:[#allocation2 + $0xf9] sm:$0xff] }
 0x131   :  { %v10961_v27 = vpop.permute.xlu1 %8175  ;;  %v8499_v63 = vpack.i.bf16 %v609_v44, %v608_v1  ;;  %v615_v1 = vld [vmem:[#allocation2 + $0x141] sm:$0xff] }
 0x132   :  { %14703 = vst [vmem:[#allocation48_spill] sm:$0xff] %v10961_v27  ;;  %v8514_v44 = vpack.i.bf16 %v615_v1, %v614_v12  ;;  %v621_v12 = vld [vmem:[#allocation2 + $0x189] sm:$0xff] }
 0x133   :  { %8470 = vrot.lane.b32.xlu0 %v8469_v62, %s10427_s28  ;;  %v8529_v1 = vpack.i.bf16 %v621_v12, %v620_v41  ;;  %v627_v41 = vld [vmem:[#allocation2 + $0x201] sm:$0xff] }
 0x134   :  { %v8544_v12 = vpack.i.bf16 %v627_v41, %v626_v43  ;;  %v633_v43 = vld [vmem:[#allocation2 + $0x249] sm:$0xff] }
 0x135   :  { %v10972_v32 = vpop.permute.xlu0 %8260  ;;  %8480 = vrot.lane.b32.xlu2 %v8479_v10, %s10427_s28  ;;  %v8559_v41 = vpack.i.bf16 %v633_v43, %v632_v23  ;;  %v639_v23 = vld [vmem:[#allocation2 + $0x291] sm:$0xff] }
 0x136   :  { %14706 = vst [vmem:[#allocation51_spill] sm:$0xff] %v10972_v32  ;;  %v612_v32 = vld [vmem:[#allocation2 + $0x121] sm:$0xff]  ;;  %v8574_v43 = vpack.i.bf16 %v639_v23, %v638_v39  ;;  %v645_v39 = vld [vmem:[#allocation2 + $0x2d9] sm:$0xff] }
 0x137   :  { %8400 = vrot.lane.b32.xlu1 %v8399_v53, %s10426_s27  ;;  %v10975_v53 = vpop.permute.xlu2 %8315  ;;  %v8509_v19 = vpack.i.bf16 %v613_v60, %v612_v32  ;;  %v619_v32 = vld [vmem:[#allocation2 + $0x171] sm:$0xff] }
 0x139   :  { %v10970_v30 = vpop.permute.xlu1 %8190 }
 0x13a   :  { %14705 = vst [vmem:[#allocation50_spill] sm:$0xff] %v10970_v30 }
 0x13b   :  { %8485 = vrot.lane.b32.xlu0 %v8484_v5, %s10427_s28 }
 0x13d   :  { %v10981_v62 = vpop.permute.xlu0 %8275  ;;  %8495 = vrot.lane.b32.xlu2 %v8494_v13, %s10427_s28  ;;  %v592_v13 = vld [vmem:[#allocation2 + $0x31] sm:$0xff] }
 0x13e   :  { %14708 = vst [vmem:[#allocation53_spill] sm:$0xff] %v10981_v62  ;;  %v396_v62 = vld [vmem:[#allocation2 + $0x318] sm:$0xff] }
 0x13f   :  { %8415 = vrot.lane.b32.xlu1 %v8414_v2, %s10426_s27  ;;  %v10984_v2 = vpop.permute.xlu2 %8330  ;;  %v8444_v21 = vpack.i.bf16 %v397_v36, %v396_v62  ;;  %v8459_v62 = vpack.i.bf16 %v593_v48, %v592_v13  ;;  %v618_v36 = vld [vmem:[#allocation2 + $0x169] sm:$0xff]  ;;  %v624_v13 = vld [vmem:[#allocation2 + $0x1e1] sm:$0xff] }
 0x140   :  { %v8524_v60 = vpack.i.bf16 %v619_v32, %v618_v36  ;;  %v625_v36 = vld [vmem:[#allocation2 + $0x1e9] sm:$0xff] }
 0x141   :  { %v10979_v4 = vpop.permute.xlu1 %8205  ;;  %v8539_v32 = vpack.i.bf16 %v625_v36, %v624_v13  ;;  %v631_v13 = vld [vmem:[#allocation2 + $0x231] sm:$0xff] }
 0x142   :  { %14707 = vst [vmem:[#allocation52_spill] sm:$0xff] %v10979_v4 }
 0x143   :  { %8500 = vrot.lane.b32.xlu0 %v8499_v63, %s10427_s28 }
 0x145   :  { %v10990_v5 = vpop.permute.xlu0 %8290  ;;  %8510 = vrot.lane.b32.xlu2 %v8509_v19, %s10427_s28 }
 0x146   :  { %14710 = vst [vmem:[#allocation55_spill] sm:$0xff] %v10990_v5 }
 0x147   :  { %8430 = vrot.lane.b32.xlu1 %v8429_v35, %s10426_s27  ;;  %v10993_v35 = vpop.permute.xlu2 %8345 }
 0x148   :  { %14711 = vst [vmem:[#allocation56_spill] sm:$0xff] %v10993_v35 }
 0x149   :  { %v10988_v10 = vpop.permute.xlu1 %8220 }
 0x14a   :  { %14709 = vst [vmem:[#allocation54_spill] sm:$0xff] %v10988_v10  ;;  %v635_v10 = vld [vmem:[#allocation2 + $0x261] sm:$0xff] }
 0x14b   :  { %8515 = vrot.lane.b32.xlu0 %v8514_v44, %s10427_s28 }
 0x14d   :  { %v10999_v5 = vpop.permute.xlu0 %8305  ;;  %8525 = vrot.lane.b32.xlu2 %v8524_v60, %s10427_s28 }
 0x14f   :  { %8445 = vrot.lane.b32.xlu1 %v8444_v21, %s10426_s27  ;;  %v598_v21 = vld [vmem:[#allocation2 + $0x79] sm:$0xff]  ;;  %v11004_v19 = vpop.permute.xlu2 %8360 }
 0x150   :  { %14713 = vst [vmem:[#allocation58_spill] sm:$0xff] %v11004_v19  ;;  %v8474_v48 = vpack.i.bf16 %v599_v51, %v598_v21  ;;  %v630_v21 = vld [vmem:[#allocation2 + $0x229] sm:$0xff] }
 0x151   :  { %v10997_v63 = vpop.permute.xlu1 %8235  ;;  %v8554_v36 = vpack.i.bf16 %v631_v13, %v630_v21  ;;  %v637_v21 = vld [vmem:[#allocation2 + $0x279] sm:$0xff] }
 0x152   :  { %14712 = vst [vmem:[#allocation57_spill] sm:$0xff] %v10997_v63  ;;  %v611_v63 = vld [vmem:[#allocation2 + $0x111] sm:$0xff] }
 0x153   :  { %8530 = vrot.lane.b32.xlu0 %v8529_v1, %s10427_s28 }
 0x155   :  { %v11008_v33 = vpop.permute.xlu0 %8320  ;;  %8540 = vrot.lane.b32.xlu2 %v8539_v32, %s10427_s28 }
 0x157   :  { %8460 = vrot.lane.b32.xlu1 %v8459_v62, %s10427_s28  ;;  %v604_v62 = vld [vmem:[#allocation2 + $0xc1] sm:$0xff]  ;;  %v11013_v60 = vpop.permute.xlu2 %8375 }
 0x158   :  { %14715 = vst [vmem:[#allocation60_spill] sm:$0xff] %v11013_v60  ;;  %v8489_v51 = vpack.i.bf16 %v605_v9, %v604_v62  ;;  %v636_v62 = vld [vmem:[#allocation2 + $0x271] sm:$0xff] }
 0x159   :  { %v11006_v44 = vpop.permute.xlu1 %8250  ;;  %v8569_v13 = vpack.i.bf16 %v637_v21, %v636_v62  ;;  %v643_v62 = vld [vmem:[#allocation2 + $0x2c1] sm:$0xff]  ;;  %v647_v60 = vld [vmem:[#allocation2 + $0x2f1] sm:$0xff] }
 0x15a   :  { %14714 = vst [vmem:[#allocation59_spill] sm:$0xff] %v11006_v44 }
 0x15b   :  { %8545 = vrot.lane.b32.xlu0 %v8544_v12, %s10427_s28 }
 0x15d   :  { %v11017_v44 = vpop.permute.xlu0 %8335  ;;  %8555 = vrot.lane.b32.xlu2 %v8554_v36, %s10427_s28 }
 0x15e   :  { %14717 = vst [vmem:[#allocation62_spill] sm:$0xff] %v11017_v44  ;;  %v846_v44 = vld [vmem:[#allocation2 + $0x351] sm:$0xff] }
 0x15f   :  { %8475 = vrot.lane.b32.xlu1 %v8474_v48, %s10427_s28  ;;  %v610_v48 = vld [vmem:[#allocation2 + $0x109] sm:$0xff]  ;;  %v11022_v32 = vpop.permute.xlu2 %8390 }
 0x160   :  { %14718 = vst [vmem:[#allocation63_spill] sm:$0xff] %v11022_v32  ;;  %v8504_v9 = vpack.i.bf16 %v611_v63, %v610_v48  ;;  %v642_v48 = vld [vmem:[#allocation2 + $0x2b9] sm:$0xff]  ;;  %v644_v32 = vld [vmem:[#allocation2 + $0x2d1] sm:$0xff] }
 0x161   :  { %v11015_v1 = vpop.permute.xlu1 %8265  ;;  %v8584_v21 = vpack.i.bf16 %v643_v62, %v642_v48  ;;  %v8589_v23 = vpack.i.bf16 %v645_v39, %v644_v32  ;;  %v649_v48 = vld [vmem:[#allocation2 + $0x309] sm:$0xff]  ;;  %v651_v32 = vld [vmem:[#allocation2 + $0x321] sm:$0xff] }
 0x162   :  { %14716 = vst [vmem:[#allocation61_spill] sm:$0xff] %v11015_v1  ;;  %v8604_v39 = vpack.i.bf16 %v651_v32, %v650_v45  ;;  %v657_v45 = vld [vmem:[#allocation2 + $0x3a] sm:$0xff] }
 0x163   :  { %8560 = vrot.lane.b32.xlu0 %v8559_v41, %s10427_s28 }
 0x165   :  { %v11026_v1 = vpop.permute.xlu0 %8350  ;;  %8570 = vrot.lane.b32.xlu2 %v8569_v13, %s10427_s28 }
 0x166   :  { %14720 = vst [vmem:[#allocation65_spill] sm:$0xff] %v11026_v1  ;;  %v732_v1 = vld [vmem:[#allocation2 + $0xc8] sm:$0xff] }
 0x167   :  { %8490 = vrot.lane.b32.xlu1 %v8489_v51, %s10427_s28  ;;  %v616_v51 = vld [vmem:[#allocation2 + $0x151] sm:$0xff]  ;;  %v11031_v36 = vpop.permute.xlu2 %8405 }
 0x168   :  { %14721 = vst [vmem:[#allocation66_spill] sm:$0xff] %v11031_v36  ;;  %v8519_v63 = vpack.i.bf16 %v617_v49, %v616_v51  ;;  %v648_v51 = vld [vmem:[#allocation2 + $0x301] sm:$0xff] }
 0x169   :  { %v11024_v12 = vpop.permute.xlu1 %8280  ;;  %v8599_v62 = vpack.i.bf16 %v649_v48, %v648_v51  ;;  %v655_v51 = vld [vmem:[#allocation2 + $0x22] sm:$0xff] }
 0x16a   :  { %14719 = vst [vmem:[#allocation64_spill] sm:$0xff] %v11024_v12 }
 0x16b   :  { %8575 = vrot.lane.b32.xlu0 %v8574_v43, %s10427_s28 }
 0x16d   :  { %v11035_v12 = vpop.permute.xlu0 %8365  ;;  %8585 = vrot.lane.b32.xlu2 %v8584_v21, %s10427_s28 }
 0x16e   :  { %14722 = vst [vmem:[#allocation67_spill] sm:$0xff] %v11035_v12  ;;  %v691_v12 = vld [vmem:[#allocation2 + $0x202] sm:$0xff] }
 0x16f   :  { %8505 = vrot.lane.b32.xlu1 %v8504_v9, %s10427_s28  ;;  %v622_v9 = vld [vmem:[#allocation2 + $0x1c9] sm:$0xff]  ;;  %v11040_v13 = vpop.permute.xlu2 %8420 }
 0x170   :  { %14723 = vst [vmem:[#allocation68_spill] sm:$0xff] %v11040_v13  ;;  %v8534_v49 = vpack.i.bf16 %v623_v15, %v622_v9  ;;  %v654_v9 = vld [vmem:[#allocation2 + $0x1a] sm:$0xff] }
 0x171   :  { %v11033_v41 = vpop.permute.xlu1 %8295  ;;  %v8614_v48 = vpack.i.bf16 %v655_v51, %v654_v9  ;;  %v660_v9 = vld [vmem:[#allocation2 + $0x62] sm:$0xff]  ;;  %v661_v51 = vld [vmem:[#allocation2 + $0x6a] sm:$0xff] }
 0x173   :  { %8590 = vrot.lane.b32.xlu0 %v8589_v23, %s10427_s28 }
 0x175   :  { %v11044_v36 = vpop.permute.xlu0 %8380  ;;  %8600 = vrot.lane.b32.xlu2 %v8599_v62, %s10427_s28 }
 0x176   :  { %14724 = vst [vmem:[#allocation69_spill] sm:$0xff] %v11044_v36  ;;  %v656_v36 = vld [vmem:[#allocation2 + $0x32] sm:$0xff] }
 0x177   :  { %8520 = vrot.lane.b32.xlu1 %v8519_v63, %s10427_s28  ;;  %v628_v63 = vld [vmem:[#allocation2 + $0x211] sm:$0xff]  ;;  %v11049_v21 = vpop.permute.xlu2 %8435  ;;  %v8619_v32 = vpack.i.bf16 %v657_v45, %v656_v36  ;;  %v662_v36 = vld [vmem:[#allocation2 + $0x7a] sm:$0xff]  ;;  %v663_v45 = vld [vmem:[#allocation2 + $0x82] sm:$0xff] }
 0x178   :  { %14725 = vst [vmem:[#allocation70_spill] sm:$0xff] %v11049_v21  ;;  %v8549_v15 = vpack.i.bf16 %v629_v7, %v628_v63  ;;  %v8629_v21 = vpack.i.bf16 %v661_v51, %v660_v9  ;;  %v668_v51 = vld [vmem:[#allocation2 + $0xc2] sm:$0xff] }
 0x179   :  { %v11042_v43 = vpop.permute.xlu1 %8310 }
 0x17b   :  { %8605 = vrot.lane.b32.xlu0 %v8604_v39, %s10427_s28 }
 0x17d   :  { %v11053_v13 = vpop.permute.xlu0 %8395  ;;  %8615 = vrot.lane.b32.xlu2 %v8614_v48, %s10428_s29 }
 0x17e   :  { %14726 = vst [vmem:[#allocation71_spill] sm:$0xff] %v11053_v13  ;;  %v640_v13 = vld [vmem:[#allocation2 + $0x2a1] sm:$0xff] }
 0x17f   :  { %8535 = vrot.lane.b32.xlu1 %v8534_v49, %s10427_s28  ;;  %v634_v49 = vld [vmem:[#allocation2 + $0x259] sm:$0xff]  ;;  %v11062_v63 = vpop.permute.xlu2 %8450 }
 0x180   :  { %v8564_v7 = vpack.i.bf16 %v635_v10, %v634_v49  ;;  %14729 = vst [vmem:[#allocation74_spill] sm:$0xff] %v11062_v63  ;;  %v8579_v10 = vpack.i.bf16 %v641_v26, %v640_v13  ;;  %v666_v49 = vld [vmem:[#allocation2 + $0xaa] sm:$0xff]  ;;  %v667_v63 = vld [vmem:[#allocation2 + $0xb2] sm:$0xff] }
 0x181   :  { %v11051_v23 = vpop.permute.xlu1 %8325  ;;  %v8644_v9 = vpack.i.bf16 %v667_v63, %v666_v49  ;;  %v672_v13 = vld [vmem:[#allocation2 + $0xf2] sm:$0xff]  ;;  %v674_v63 = vld [vmem:[#allocation2 + $0x10a] sm:$0xff] }
 0x182   :  { %v675_v49 = vld [vmem:[#allocation2 + $0x112] sm:$0xff] }
 0x183   :  { %8620 = vrot.lane.b32.xlu0 %v8619_v32, %s10428_s29  ;;  %v8664_v50 = vpack.i.bf16 %v675_v49, %v674_v63  ;;  %v681_v63 = vld [vmem:[#allocation2 + $0x15a] sm:$0xff] }
 0x185   :  { %v11060_v39 = vpop.permute.xlu0 %8410  ;;  %8630 = vrot.lane.b32.xlu2 %v8629_v21, %s10428_s29 }
 0x186   :  { %14728 = vst [vmem:[#allocation73_spill] sm:$0xff] %v11060_v39 }
 0x187   :  { %8550 = vrot.lane.b32.xlu1 %v8549_v15, %s10427_s28  ;;  %v8634_v15 = vpack.i.bf16 %v663_v45, %v662_v36  ;;  %v11071_v39 = vpop.permute.xlu2 %8465  ;;  %v669_v36 = vld [vmem:[#allocation2 + $0xca] sm:$0xff] }
 0x188   :  { %v8649_v45 = vpack.i.bf16 %v669_v36, %v668_v51  ;;  %v652_v51 = vld [vmem:[#allocation2 + $0x331] sm:$0xff]  ;;  %v653_v36 = vld [vmem:[#allocation2 + $0x339] sm:$0xff] }
 0x189   :  { %v11058_v62 = vpop.permute.xlu1 %8340 }
 0x18a   :  { %14727 = vst [vmem:[#allocation72_spill] sm:$0xff] %v11058_v62  ;;  %v818_v62 = vld [vmem:[#allocation2 + $0x201] sm:$0xff] }
 0x18b   :  { %8635 = vrot.lane.b32.xlu0 %v8634_v15, %s10428_s29 }
 0x18d   :  { %v11069_v32 = vpop.permute.xlu0 %8425  ;;  %8645 = vrot.lane.b32.xlu2 %v8644_v9, %s10428_s29 }
 0x18e   :  { %14731 = vst [vmem:[#allocation76_spill] sm:$0xff] %v11069_v32  ;;  %v673_v32 = vld [vmem:[#allocation2 + $0xfa] sm:$0xff] }
 0x18f   :  { %8565 = vrot.lane.b32.xlu1 %v8564_v7, %s10427_s28  ;;  %v646_v7 = vld [vmem:[#allocation2 + $0x2e9] sm:$0xff]  ;;  %v8659_v61 = vpack.i.bf16 %v673_v32, %v672_v13 }
 0x190   :  { %v8594_v26 = vpack.i.bf16 %v647_v60, %v646_v7  ;;  %v8609_v60 = vpack.i.bf16 %v653_v36, %v652_v51  ;;  %v678_v7 = vld [vmem:[#allocation2 + $0x13a] sm:$0xff]  ;;  %v679_v32 = vld [vmem:[#allocation2 + $0x142] sm:$0xff]  ;;  %v685_v36 = vld [vmem:[#allocation2 + $0x18a] sm:$0xff] }
 0x191   :  { %v11067_v48 = vpop.permute.xlu1 %8355  ;;  %v8674_v13 = vpack.i.bf16 %v679_v32, %v678_v7  ;;  %v684_v51 = vld [vmem:[#allocation2 + $0x182] sm:$0xff] }
 0x192   :  { %14730 = vst [vmem:[#allocation75_spill] sm:$0xff] %v11067_v48  ;;  %v8689_v32 = vpack.i.bf16 %v685_v36, %v684_v51  ;;  %v692_v51 = vld [vmem:[#allocation2 + $0x212] sm:$0xff]  ;;  %v723_v48 = vld [vmem:[#allocation2 + $0x60] sm:$0xff] }
 0x193   :  { %8650 = vrot.lane.b32.xlu0 %v8649_v45, %s10428_s29 }
 0x195   :  { %v11078_v15 = vpop.permute.xlu0 %8440  ;;  %8660 = vrot.lane.b32.xlu2 %v8659_v61, %s10428_s29 }
 0x196   :  { %14733 = vst [vmem:[#allocation78_spill] sm:$0xff] %v11078_v15  ;;  %v680_v15 = vld [vmem:[#allocation2 + $0x152] sm:$0xff] }
 0x197   :  { %8580 = vrot.lane.b32.xlu1 %v8579_v10, %s10427_s28  ;;  %v11081_v10 = vpop.permute.xlu2 %8480  ;;  %v8679_v49 = vpack.i.bf16 %v681_v63, %v680_v15  ;;  %v687_v15 = vld [vmem:[#allocation2 + $0x1d2] sm:$0xff] }
 0x198   :  { %v8694_v63 = vpack.i.bf16 %v687_v15, %v686_v18  ;;  %v693_v18 = vld [vmem:[#allocation2 + $0x21a] sm:$0xff]  ;;  %v671_v15 = vld [vmem:[#allocation2 + $0xe2] sm:$0xff] }
 0x199   :  { %v11076_v21 = vpop.permute.xlu1 %8370  ;;  %v8709_v36 = vpack.i.bf16 %v693_v18, %v692_v51  ;;  %v677_v18 = vld [vmem:[#allocation2 + $0x12a] sm:$0xff] }
 0x19a   :  { %14732 = vst [vmem:[#allocation77_spill] sm:$0xff] %v11076_v21  ;;  %v659_v21 = vld [vmem:[#allocation2 + $0x52] sm:$0xff] }
 0x19b   :  { %8665 = vrot.lane.b32.xlu0 %v8664_v50, %s10428_s29 }
 0x19d   :  { %v11087_v45 = vpop.permute.xlu0 %8455  ;;  %8675 = vrot.lane.b32.xlu2 %v8674_v13, %s10428_s29 }
 0x19f   :  { %8595 = vrot.lane.b32.xlu1 %v8594_v26, %s10427_s28  ;;  %v658_v26 = vld [vmem:[#allocation2 + $0x4a] sm:$0xff]  ;;  %v11094_v61 = vpop.permute.xlu2 %8495 }
 0x1a0   :  { %14736 = vst [vmem:[#allocation81_spill] sm:$0xff] %v11094_v61  ;;  %v8624_v7 = vpack.i.bf16 %v659_v21, %v658_v26 }
 0x1a1   :  { %v11085_v9 = vpop.permute.xlu1 %8385 }
 0x1a2   :  { %14734 = vst [vmem:[#allocation79_spill] sm:$0xff] %v11085_v9 }
 0x1a3   :  { %8680 = vrot.lane.b32.xlu0 %v8679_v49, %s10428_s29 }
 0x1a5   :  { %v11096_v9 = vpop.permute.xlu0 %8470  ;;  %8690 = vrot.lane.b32.xlu2 %v8689_v32, %s10428_s29 }
 0x1a7   :  { %8610 = vrot.lane.b32.xlu1 %v8609_v60, %s10427_s28  ;;  %v664_v60 = vld [vmem:[#allocation2 + $0x92] sm:$0xff]  ;;  %v11105_v21 = vpop.permute.xlu2 %8510 }
 0x1a8   :  { %v8639_v4 = vpack.i.bf16 %v665_v54, %v664_v60  ;;  %14738 = vst [vmem:[#allocation83_spill] sm:$0xff] %v11105_v21  ;;  %v697_v54 = vld [vmem:[#allocation2 + $0x24a] sm:$0xff] }
 0x1a9   :  { %v11092_v50 = vpop.permute.xlu1 %8400 }
 0x1aa   :  { %14735 = vst [vmem:[#allocation80_spill] sm:$0xff] %v11092_v50  ;;  %v690_v50 = vld [vmem:[#allocation2 + $0x1fa] sm:$0xff] }
 0x1ab   :  { %8695 = vrot.lane.b32.xlu0 %v8694_v63, %s10428_s29  ;;  %v8704_v26 = vpack.i.bf16 %v691_v12, %v690_v50  ;;  %v698_v12 = vld [vmem:[#allocation2 + $0x25a] sm:$0xff]  ;;  %v699_v50 = vld [vmem:[#allocation2 + $0x262] sm:$0xff] }
 0x1ac   :  { %v8724_v51 = vpack.i.bf16 %v699_v50, %v698_v12  ;;  %v682_v12 = vld [vmem:[#allocation2 + $0x16a] sm:$0xff]  ;;  %v683_v50 = vld [vmem:[#allocation2 + $0x172] sm:$0xff] }
 0x1ad   :  { %v11103_v49 = vpop.permute.xlu0 %8485  ;;  %8705 = vrot.lane.b32.xlu2 %v8704_v26, %s10428_s29 }
 0x1af   :  { %8625 = vrot.lane.b32.xlu1 %v8624_v7, %s10428_s29  ;;  %v670_v7 = vld [vmem:[#allocation2 + $0xda] sm:$0xff]  ;;  %v11114_v19 = vpop.permute.xlu2 %8525 }
 0x1b0   :  { %v8654_v60 = vpack.i.bf16 %v671_v15, %v670_v7  ;;  %14741 = vst [vmem:[#allocation86_spill] sm:$0xff] %v11114_v19  ;;  %v703_v7 = vld [vmem:[#allocation2 + $0x292] sm:$0xff] }
 0x1b1   :  { %v11101_v13 = vpop.permute.xlu1 %8415 }
 0x1b2   :  { %14737 = vst [vmem:[#allocation82_spill] sm:$0xff] %v11101_v13  ;;  %v696_v13 = vld [vmem:[#allocation2 + $0x242] sm:$0xff] }
 0x1b3   :  { %8710 = vrot.lane.b32.xlu0 %v8709_v36, %s10428_s29  ;;  %v8719_v14 = vpack.i.bf16 %v697_v54, %v696_v13  ;;  %v704_v54 = vld [vmem:[#allocation2 + $0x2a2] sm:$0xff] }
 0x1b4   :  { %v8739_v19 = vpack.i.bf16 %v705_v16, %v704_v54 }
 0x1b5   :  { %v11112_v63 = vpop.permute.xlu0 %8500  ;;  %8720 = vrot.lane.b32.xlu2 %v8719_v14, %s10428_s29 }
 0x1b6   :  { %14740 = vst [vmem:[#allocation85_spill] sm:$0xff] %v11112_v63  ;;  %v796_v63 = vld [vmem:[#allocation2 + $0xc9] sm:$0xff] }
 0x1b7   :  { %8640 = vrot.lane.b32.xlu1 %v8639_v4, %s10428_s29  ;;  %v676_v4 = vld [vmem:[#allocation2 + $0x122] sm:$0xff] }
 0x1b8   :  { %v8669_v13 = vpack.i.bf16 %v677_v18, %v676_v4  ;;  %v708_v4 = vld [vmem:[#allocation2 + $0x2d2] sm:$0xff]  ;;  %v710_v18 = vld [vmem:[#allocation2 + $0x2ea] sm:$0xff] }
 0x1b9   :  { %v11110_v32 = vpop.permute.xlu1 %8430 }
 0x1ba   :  { %14739 = vst [vmem:[#allocation84_spill] sm:$0xff] %v11110_v32  ;;  %v702_v32 = vld [vmem:[#allocation2 + $0x28a] sm:$0xff] }
 0x1bb   :  { %8725 = vrot.lane.b32.xlu0 %v8724_v51, %s10428_s29  ;;  %v8734_v15 = vpack.i.bf16 %v703_v7, %v702_v32  ;;  %v709_v32 = vld [vmem:[#allocation2 + $0x2da] sm:$0xff]  ;;  %v711_v7 = vld [vmem:[#allocation2 + $0x2f2] sm:$0xff] }
 0x1bc   :  { %v8749_v16 = vpack.i.bf16 %v709_v32, %v708_v4  ;;  %v8754_v54 = vpack.i.bf16 %v711_v7, %v710_v18  ;;  %v717_v4 = vld [vmem:[#allocation2 + $0x33a] sm:$0xff]  ;;  %v695_v7 = vld [vmem:[#allocation2 + $0x232] sm:$0xff] }
 0x1bd   :  { %v11121_v36 = vpop.permute.xlu0 %8515  ;;  %8735 = vrot.lane.b32.xlu2 %v8734_v15, %s10428_s29 }
 0x1be   :  { %14743 = vst [vmem:[#allocation88_spill] sm:$0xff] %v11121_v36  ;;  %v716_v36 = vld [vmem:[#allocation2 + $0x332] sm:$0xff] }
 0x1bf   :  { %8655 = vrot.lane.b32.xlu1 %v8654_v60, %s10428_s29  ;;  %v11124_v60 = vpop.permute.xlu2 %8540  ;;  %v8769_v18 = vpack.i.bf16 %v717_v4, %v716_v36  ;;  %v701_v4 = vld [vmem:[#allocation2 + $0x27a] sm:$0xff] }
 0x1c0   :  { %14744 = vst [vmem:[#allocation89_spill] sm:$0xff] %v11124_v60  ;;  %v689_v60 = vld [vmem:[#allocation2 + $0x1ea] sm:$0xff] }
 0x1c1   :  { %v11119_v26 = vpop.permute.xlu1 %8445 }
 0x1c2   :  { %14742 = vst [vmem:[#allocation87_spill] sm:$0xff] %v11119_v26  ;;  %v8684_v26 = vpack.i.bf16 %v683_v50, %v682_v12  ;;  %v714_v50 = vld [vmem:[#allocation2 + $0x31a] sm:$0xff] }
 0x1c3   :  { %8740 = vrot.lane.b32.xlu0 %v8739_v19, %s10428_s29  ;;  %v8764_v32 = vpack.i.bf16 %v715_v31, %v714_v50  ;;  %v724_v31 = vld [vmem:[#allocation2 + $0x68] sm:$0xff] }
 0x1c4   :  { %v8784_v50 = vpack.i.bf16 %v724_v31, %v723_v48  ;;  %v729_v48 = vld [vmem:[#allocation2 + $0xa8] sm:$0xff]  ;;  %v706_v31 = vld [vmem:[#allocation2 + $0x2ba] sm:$0xff] }
 0x1c5   :  { %v11130_v51 = vpop.permute.xlu0 %8530  ;;  %8750 = vrot.lane.b32.xlu2 %v8749_v16, %s10428_s29 }
 0x1c6   :  { %14745 = vst [vmem:[#allocation90_spill] sm:$0xff] %v11130_v51 }
 0x1c7   :  { %8670 = vrot.lane.b32.xlu1 %v8669_v13, %s10428_s29  ;;  %v688_v13 = vld [vmem:[#allocation2 + $0x1e2] sm:$0xff]  ;;  %v11137_v15 = vpop.permute.xlu2 %8555 }
 0x1c8   :  { %14746 = vst [vmem:[#allocation91_spill] sm:$0xff] %v11137_v15  ;;  %v8699_v12 = vpack.i.bf16 %v689_v60, %v688_v13  ;;  %v721_v13 = vld [vmem:[#allocation2 + $0x48] sm:$0xff] }
 0x1c9   :  { %v11128_v14 = vpop.permute.xlu1 %8460 }
 0x1cb   :  { %8755 = vrot.lane.b32.xlu0 %v8754_v54, %s10428_s29 }
 0x1cd   :  { %v11139_v51 = vpop.permute.xlu0 %8545  ;;  %8765 = vrot.lane.b32.xlu2 %v8764_v32, %s10428_s29 }
 0x1ce   :  { %14747 = vst [vmem:[#allocation92_spill] sm:$0xff] %v11139_v51  ;;  %v722_v51 = vld [vmem:[#allocation2 + $0x50] sm:$0xff] }
 0x1cf   :  { %8685 = vrot.lane.b32.xlu1 %v8684_v26, %s10428_s29  ;;  %v694_v26 = vld [vmem:[#allocation2 + $0x22a] sm:$0xff]  ;;  %v11148_v60 = vpop.permute.xlu2 %8570  ;;  %v8779_v36 = vpack.i.bf16 %v722_v51, %v721_v13 }
 0x1d0   :  { %v8714_v15 = vpack.i.bf16 %v695_v7, %v694_v26  ;;  %14750 = vst [vmem:[#allocation95_spill] sm:$0xff] %v11148_v60  ;;  %v727_v7 = vld [vmem:[#allocation2 + $0x90] sm:$0xff]  ;;  %v728_v60 = vld [vmem:[#allocation2 + $0x98] sm:$0xff] }
 0x1d1   :  { %v11135_v19 = vpop.permute.xlu1 %8475  ;;  %v8794_v51 = vpack.i.bf16 %v728_v60, %v727_v7  ;;  %v730_v13 = vld [vmem:[#allocation2 + $0xb0] sm:$0xff]  ;;  %v736_v7 = vld [vmem:[#allocation2 + $0xf8] sm:$0xff] }
 0x1d2   :  { %v735_v60 = vld [vmem:[#allocation2 + $0xf0] sm:$0xff] }
 0x1d3   :  { %8770 = vrot.lane.b32.xlu0 %v8769_v18, %s10428_s29  ;;  %v8814_v42 = vpack.i.bf16 %v736_v7, %v735_v60  ;;  %v742_v60 = vld [vmem:[#allocation2 + $0x140] sm:$0xff] }
 0x1d5   :  { %v11146_v54 = vpop.permute.xlu0 %8560  ;;  %8780 = vrot.lane.b32.xlu2 %v8779_v36, %s10429_s30 }
 0x1d6   :  { %14749 = vst [vmem:[#allocation94_spill] sm:$0xff] %v11146_v54 }
 0x1d7   :  { %8700 = vrot.lane.b32.xlu1 %v8699_v12, %s10428_s29  ;;  %v700_v12 = vld [vmem:[#allocation2 + $0x272] sm:$0xff]  ;;  %v11157_v54 = vpop.permute.xlu2 %8585 }
 0x1d8   :  { %v8729_v26 = vpack.i.bf16 %v701_v4, %v700_v12  ;;  %14753 = vst [vmem:[#allocation98_spill] sm:$0xff] %v11157_v54  ;;  %v8744_v12 = vpack.i.bf16 %v707_v58, %v706_v31  ;;  %v733_v4 = vld [vmem:[#allocation2 + $0xd8] sm:$0xff]  ;;  %v739_v31 = vld [vmem:[#allocation2 + $0x120] sm:$0xff] }
 0x1d9   :  { %v11144_v16 = vpop.permute.xlu1 %8490 }
 0x1da   :  { %14748 = vst [vmem:[#allocation93_spill] sm:$0xff] %v11144_v16  ;;  %v8298_v16 = vunpack.i.h.bf16 %v11033_v41 }
 0x1db   :  { %8785 = vrot.lane.b32.xlu0 %v8784_v50, %s10429_s30 }
 0x1dd   :  { %v11155_v18 = vpop.permute.xlu0 %8575  ;;  %8795 = vrot.lane.b32.xlu2 %v8794_v51, %s10429_s30 }
 0x1de   :  { %14752 = vst [vmem:[#allocation97_spill] sm:$0xff] %v11155_v18  ;;  %v734_v18 = vld [vmem:[#allocation2 + $0xe0] sm:$0xff] }
 0x1df   :  { %8715 = vrot.lane.b32.xlu1 %v8714_v15, %s10428_s29  ;;  %v8799_v15 = vpack.i.bf16 %v730_v13, %v729_v48  ;;  %v8809_v54 = vpack.i.bf16 %v734_v18, %v733_v4  ;;  %v712_v48 = vld [vmem:[#allocation2 + $0x302] sm:$0xff]  ;;  %v713_v13 = vld [vmem:[#allocation2 + $0x30a] sm:$0xff] }
 0x1e0   :  { %v8759_v58 = vpack.i.bf16 %v713_v13, %v712_v48  ;;  %v740_v18 = vld [vmem:[#allocation2 + $0x128] sm:$0xff] }
 0x1e1   :  { %v11153_v32 = vpop.permute.xlu1 %8505  ;;  %v8824_v4 = vpack.i.bf16 %v740_v18, %v739_v31  ;;  %v745_v13 = vld [vmem:[#allocation2 + $0x168] sm:$0xff]  ;;  %v746_v31 = vld [vmem:[#allocation2 + $0x170] sm:$0xff] }
 0x1e2   :  { %14751 = vst [vmem:[#allocation96_spill] sm:$0xff] %v11153_v32  ;;  %v8839_v18 = vpack.i.bf16 %v746_v31, %v745_v13  ;;  %v753_v31 = vld [vmem:[#allocation2 + $0x1f8] sm:$0xff]  ;;  %v766_v32 = vld [vmem:[#allocation2 + $0x290] sm:$0xff] }
 0x1e3   :  { %8800 = vrot.lane.b32.xlu0 %v8799_v15, %s10429_s30 }
 0x1e5   :  { %v11164_v50 = vpop.permute.xlu0 %8590  ;;  %8810 = vrot.lane.b32.xlu2 %v8809_v54, %s10429_s30 }
 0x1e6   :  { %14755 = vst [vmem:[#allocation100_spill] sm:$0xff] %v11164_v50  ;;  %v741_v50 = vld [vmem:[#allocation2 + $0x138] sm:$0xff] }
 0x1e7   :  { %8730 = vrot.lane.b32.xlu1 %v8729_v26, %s10428_s29  ;;  %v11167_v26 = vpop.permute.xlu2 %8600  ;;  %v8829_v7 = vpack.i.bf16 %v742_v60, %v741_v50  ;;  %v748_v50 = vld [vmem:[#allocation2 + $0x188] sm:$0xff] }
 0x1e8   :  { %14756 = vst [vmem:[#allocation101_spill] sm:$0xff] %v11167_v26  ;;  %v720_v26 = vld [vmem:[#allocation2 + $0x38] sm:$0xff] }
 0x1e9   :  { %v11162_v36 = vpop.permute.xlu1 %8520 }
 0x1ea   :  { %14754 = vst [vmem:[#allocation99_spill] sm:$0xff] %v11162_v36  ;;  %v726_v36 = vld [vmem:[#allocation2 + $0x80] sm:$0xff] }
 0x1eb   :  { %8815 = vrot.lane.b32.xlu0 %v8814_v42, %s10429_s30 }
 0x1ed   :  { %v11173_v15 = vpop.permute.xlu0 %8605  ;;  %8825 = vrot.lane.b32.xlu2 %v8824_v4, %s10429_s30 }
 0x1ee   :  { %14758 = vst [vmem:[#allocation103_spill] sm:$0xff] %v11173_v15 }
 0x1ef   :  { %8745 = vrot.lane.b32.xlu1 %v8744_v12, %s10428_s29  ;;  %v719_v12 = vld [vmem:[#allocation2 + $0x30] sm:$0xff]  ;;  %v11180_v54 = vpop.permute.xlu2 %8615 }
 0x1f0   :  { %v8774_v48 = vpack.i.bf16 %v720_v26, %v719_v12  ;;  %v752_v26 = vld [vmem:[#allocation2 + $0x1e8] sm:$0xff] }
 0x1f1   :  { %v11171_v51 = vpop.permute.xlu1 %8535 }
 0x1f2   :  { %14757 = vst [vmem:[#allocation102_spill] sm:$0xff] %v11171_v51  ;;  %v747_v51 = vld [vmem:[#allocation2 + $0x180] sm:$0xff] }
 0x1f3   :  { %8830 = vrot.lane.b32.xlu0 %v8829_v7, %s10429_s30  ;;  %v8844_v60 = vpack.i.bf16 %v748_v50, %v747_v51  ;;  %v754_v51 = vld [vmem:[#allocation2 + $0x200] sm:$0xff] }
 0x1f4   :  { %v8859_v50 = vpack.i.bf16 %v754_v51, %v753_v31  ;;  %v738_v51 = vld [vmem:[#allocation2 + $0x110] sm:$0xff] }
 0x1f5   :  { %v11182_v15 = vpop.permute.xlu0 %8620  ;;  %8840 = vrot.lane.b32.xlu2 %v8839_v18, %s10429_s30 }
 0x1f7   :  { %8760 = vrot.lane.b32.xlu1 %v8759_v58, %s10428_s29  ;;  %v725_v58 = vld [vmem:[#allocation2 + $0x78] sm:$0xff]  ;;  %v11191_v21 = vpop.permute.xlu2 %8630 }
 0x1f8   :  { %v8789_v12 = vpack.i.bf16 %v726_v36, %v725_v58  ;;  %v758_v36 = vld [vmem:[#allocation2 + $0x230] sm:$0xff] }
 0x1f9   :  { %v11178_v42 = vpop.permute.xlu1 %8550 }
 0x1fa   :  { %14759 = vst [vmem:[#allocation104_spill] sm:$0xff] %v11178_v42  ;;  %v751_v42 = vld [vmem:[#allocation2 + $0x1e0] sm:$0xff] }
 0x1fb   :  { %8845 = vrot.lane.b32.xlu0 %v8844_v60, %s10429_s30  ;;  %v8854_v13 = vpack.i.bf16 %v752_v26, %v751_v42  ;;  %v759_v42 = vld [vmem:[#allocation2 + $0x240] sm:$0xff]  ;;  %v760_v26 = vld [vmem:[#allocation2 + $0x248] sm:$0xff] }
 0x1fc   :  { %v8874_v31 = vpack.i.bf16 %v760_v26, %v759_v42  ;;  %v743_v42 = vld [vmem:[#allocation2 + $0x150] sm:$0xff]  ;;  %v744_v26 = vld [vmem:[#allocation2 + $0x158] sm:$0xff] }
 0x1fd   :  { %v11189_v7 = vpop.permute.xlu0 %8635  ;;  %8855 = vrot.lane.b32.xlu2 %v8854_v13, %s10429_s30 }
 0x1ff   :  { %8775 = vrot.lane.b32.xlu1 %v8774_v48, %s10429_s30  ;;  %v731_v48 = vld [vmem:[#allocation2 + $0xc0] sm:$0xff]  ;;  %v11200_v3 = vpop.permute.xlu2 %8645 }
 0x200   :  { %v8804_v58 = vpack.i.bf16 %v732_v1, %v731_v48  ;;  %v764_v1 = vld [vmem:[#allocation2 + $0x278] sm:$0xff] }
 0x201   :  { %v11187_v4 = vpop.permute.xlu1 %8565 }
 0x202   :  { %14760 = vst [vmem:[#allocation105_spill] sm:$0xff] %v11187_v4  ;;  %v757_v4 = vld [vmem:[#allocation2 + $0x228] sm:$0xff] }
 0x203   :  { %8860 = vrot.lane.b32.xlu0 %v8859_v50, %s10429_s30  ;;  %v8869_v30 = vpack.i.bf16 %v758_v36, %v757_v4  ;;  %v765_v36 = vld [vmem:[#allocation2 + $0x288] sm:$0xff] }
 0x204   :  { %v8889_v35 = vpack.i.bf16 %v766_v32, %v765_v36  ;;  %v772_v32 = vld [vmem:[#allocation2 + $0x2d8] sm:$0xff] }
 0x205   :  { %v11198_v60 = vpop.permute.xlu0 %8650  ;;  %8870 = vrot.lane.b32.xlu2 %v8869_v30, %s10429_s30 }
 0x206   :  { %14762 = vst [vmem:[#allocation107_spill] sm:$0xff] %v11198_v60 }
 0x207   :  { %8790 = vrot.lane.b32.xlu1 %v8789_v12, %s10429_s30  ;;  %v737_v12 = vld [vmem:[#allocation2 + $0x108] sm:$0xff] }
 0x208   :  { %v8819_v4 = vpack.i.bf16 %v738_v51, %v737_v12  ;;  %v770_v12 = vld [vmem:[#allocation2 + $0x2c0] sm:$0xff] }
 0x209   :  { %v11196_v18 = vpop.permute.xlu1 %8580 }
 0x20a   :  { %14761 = vst [vmem:[#allocation106_spill] sm:$0xff] %v11196_v18  ;;  %v763_v18 = vld [vmem:[#allocation2 + $0x270] sm:$0xff] }
 0x20b   :  { %8875 = vrot.lane.b32.xlu0 %v8874_v31, %s10429_s30  ;;  %v8884_v48 = vpack.i.bf16 %v764_v1, %v763_v18  ;;  %v8834_v18 = vpack.i.bf16 %v744_v26, %v743_v42  ;;  %v771_v1 = vld [vmem:[#allocation2 + $0x2d0] sm:$0xff]  ;;  %v776_v42 = vld [vmem:[#allocation2 + $0x308] sm:$0xff] }
 0x20c   :  { %v8904_v36 = vpack.i.bf16 %v772_v32, %v771_v1  ;;  %v778_v1 = vld [vmem:[#allocation2 + $0x320] sm:$0xff] }
 0x20d   :  { %v11207_v50 = vpop.permute.xlu0 %8665  ;;  %8885 = vrot.lane.b32.xlu2 %v8884_v48, %s10429_s30 }
 0x20e   :  { %14764 = vst [vmem:[#allocation109_spill] sm:$0xff] %v11207_v50  ;;  %v750_v50 = vld [vmem:[#allocation2 + $0x1a0] sm:$0xff] }
 0x20f   :  { %8805 = vrot.lane.b32.xlu1 %v8804_v58, %s10429_s30  ;;  %v11210_v58 = vpop.permute.xlu2 %8660 }
 0x210   :  { %14765 = vst [vmem:[#allocation110_spill] sm:$0xff] %v11210_v58  ;;  %v793_v58 = vld [vmem:[#allocation2 + $0xa9] sm:$0xff] }
 0x211   :  { %v11205_v13 = vpop.permute.xlu1 %8595 }
 0x212   :  { %14763 = vst [vmem:[#allocation108_spill] sm:$0xff] %v11205_v13  ;;  %v769_v13 = vld [vmem:[#allocation2 + $0x2b8] sm:$0xff] }
 0x213   :  { %8890 = vrot.lane.b32.xlu0 %v8889_v35, %s10429_s30  ;;  %v8899_v51 = vpack.i.bf16 %v770_v12, %v769_v13  ;;  %v777_v12 = vld [vmem:[#allocation2 + $0x318] sm:$0xff] }
 0x214   :  { %v8919_v32 = vpack.i.bf16 %v778_v1, %v777_v12  ;;  %v762_v1 = vld [vmem:[#allocation2 + $0x260] sm:$0xff] }
 0x215   :  { %v11216_v31 = vpop.permute.xlu0 %8680  ;;  %8900 = vrot.lane.b32.xlu2 %v8899_v51, %s10429_s30 }
 0x216   :  { %14767 = vst [vmem:[#allocation112_spill] sm:$0xff] %v11216_v31  ;;  %v775_v31 = vld [vmem:[#allocation2 + $0x300] sm:$0xff] }
 0x217   :  { %8820 = vrot.lane.b32.xlu1 %v8819_v4, %s10429_s30  ;;  %v749_v4 = vld [vmem:[#allocation2 + $0x198] sm:$0xff]  ;;  %v11221_v35 = vpop.permute.xlu2 %8675  ;;  %v8914_v26 = vpack.i.bf16 %v776_v42, %v775_v31 }
 0x218   :  { %14768 = vst [vmem:[#allocation113_spill] sm:$0xff] %v11221_v35  ;;  %v8849_v13 = vpack.i.bf16 %v750_v50, %v749_v4  ;;  %v782_v35 = vld [vmem:[#allocation2 + $0x350] sm:$0xff]  ;;  %v784_v42 = vld [vmem:[#allocation2 + $0x39] sm:$0xff] }
 0x219   :  { %v11214_v30 = vpop.permute.xlu1 %8610  ;;  %v783_v4 = vld [vmem:[#allocation2 + $0x31] sm:$0xff] }
 0x21a   :  { %14766 = vst [vmem:[#allocation111_spill] sm:$0xff] %v11214_v30  ;;  %v8934_v12 = vpack.i.bf16 %v784_v42, %v783_v4  ;;  %v767_v42 = vld [vmem:[#allocation2 + $0x2a0] sm:$0xff] }
 0x21b   :  { %8905 = vrot.lane.b32.xlu0 %v8904_v36, %s10429_s30 }
 0x21d   :  { %v11225_v30 = vpop.permute.xlu0 %8695  ;;  %8915 = vrot.lane.b32.xlu2 %v8914_v26, %s10429_s30 }
 0x21e   :  { %14769 = vst [vmem:[#allocation114_spill] sm:$0xff] %v11225_v30  ;;  %v781_v30 = vld [vmem:[#allocation2 + $0x348] sm:$0xff] }
 0x21f   :  { %8835 = vrot.lane.b32.xlu1 %v8834_v18, %s10429_s30  ;;  %v755_v18 = vld [vmem:[#allocation2 + $0x210] sm:$0xff]  ;;  %v11234_v11 = vpop.permute.xlu2 %8690  ;;  %v8929_v31 = vpack.i.bf16 %v782_v35, %v781_v30  ;;  %v789_v35 = vld [vmem:[#allocation2 + $0x79] sm:$0xff] }
 0x220   :  { %14771 = vst [vmem:[#allocation116_spill] sm:$0xff] %v11234_v11  ;;  %v8864_v50 = vpack.i.bf16 %v756_v47, %v755_v18  ;;  %v788_v11 = vld [vmem:[#allocation2 + $0x69] sm:$0xff]  ;;  %v790_v18 = vld [vmem:[#allocation2 + $0x81] sm:$0xff] }
 0x221   :  { %v11223_v48 = vpop.permute.xlu1 %8625 }
 0x223   :  { %8920 = vrot.lane.b32.xlu0 %v8919_v32, %s10429_s30 }
 0x225   :  { %v11232_v36 = vpop.permute.xlu0 %8710  ;;  %8930 = vrot.lane.b32.xlu2 %v8929_v31, %s10429_s30  ;;  %v768_v31 = vld [vmem:[#allocation2 + $0x2a8] sm:$0xff] }
 0x226   :  { %14770 = vst [vmem:[#allocation115_spill] sm:$0xff] %v11232_v36  ;;  %v787_v36 = vld [vmem:[#allocation2 + $0x61] sm:$0xff] }
 0x227   :  { %8850 = vrot.lane.b32.xlu1 %v8849_v13, %s10429_s30  ;;  %v761_v13 = vld [vmem:[#allocation2 + $0x258] sm:$0xff]  ;;  %v8944_v30 = vpack.i.bf16 %v788_v11, %v787_v36  ;;  %v11243_v4 = vpop.permute.xlu2 %8705  ;;  %v8894_v11 = vpack.i.bf16 %v768_v31, %v767_v42 }
 0x228   :  { %v8879_v47 = vpack.i.bf16 %v762_v1, %v761_v13  ;;  %14774 = vst [vmem:[#allocation119_spill] sm:$0xff] %v11243_v4  ;;  %v794_v13 = vld [vmem:[#allocation2 + $0xb1] sm:$0xff]  ;;  %v795_v1 = vld [vmem:[#allocation2 + $0xc1] sm:$0xff]  ;;  %v800_v42 = vld [vmem:[#allocation2 + $0xf9] sm:$0xff] }
 0x229   :  { %v11230_v51 = vpop.permute.xlu1 %8640  ;;  %v8959_v36 = vpack.i.bf16 %v794_v13, %v793_v58  ;;  %v8964_v4 = vpack.i.bf16 %v796_v63, %v795_v1  ;;  %v801_v13 = vld [vmem:[#allocation2 + $0x109] sm:$0xff]  ;;  %v802_v63 = vld [vmem:[#allocation2 + $0x111] sm:$0xff] }
 0x22a   :  { %v8979_v1 = vpack.i.bf16 %v802_v63, %v801_v13  ;;  %v808_v13 = vld [vmem:[#allocation2 + $0x159] sm:$0xff] }
 0x22b   :  { %8935 = vrot.lane.b32.xlu0 %v8934_v12, %s10430_s5 }
 0x22d   :  { %v11241_v32 = vpop.permute.xlu0 %8725  ;;  %8945 = vrot.lane.b32.xlu2 %v8944_v30, %s10430_s5 }
 0x22e   :  { %14773 = vst [vmem:[#allocation118_spill] sm:$0xff] %v11241_v32 }
 0x22f   :  { %8865 = vrot.lane.b32.xlu1 %v8864_v50, %s10429_s30  ;;  %v8949_v50 = vpack.i.bf16 %v790_v18, %v789_v35  ;;  %v11252_v35 = vpop.permute.xlu2 %8720  ;;  %v774_v18 = vld [vmem:[#allocation2 + $0x2f0] sm:$0xff] }
 0x230   :  { %14777 = vst [vmem:[#allocation122_spill] sm:$0xff] %v11252_v35  ;;  %v780_v35 = vld [vmem:[#allocation2 + $0x338] sm:$0xff] }
 0x231   :  { %v11239_v26 = vpop.permute.xlu1 %8655 }
 0x232   :  { %14772 = vst [vmem:[#allocation117_spill] sm:$0xff] %v11239_v26  ;;  %v842_v26 = vld [vmem:[#allocation2 + $0x321] sm:$0xff] }
 0x233   :  { %8950 = vrot.lane.b32.xlu0 %v8949_v50, %s10430_s5 }
 0x235   :  { %v11250_v32 = vpop.permute.xlu0 %8740  ;;  %8960 = vrot.lane.b32.xlu2 %v8959_v36, %s10430_s5 }
 0x236   :  { %14776 = vst [vmem:[#allocation121_spill] sm:$0xff] %v11250_v32  ;;  %v799_v32 = vld [vmem:[#allocation2 + $0xf1] sm:$0xff] }
 0x237   :  { %8880 = vrot.lane.b32.xlu1 %v8879_v47, %s10429_s30  ;;  %v773_v47 = vld [vmem:[#allocation2 + $0x2e8] sm:$0xff]  ;;  %v8974_v31 = vpack.i.bf16 %v800_v42, %v799_v32  ;;  %v807_v42 = vld [vmem:[#allocation2 + $0x151] sm:$0xff] }
 0x238   :  { %v8909_v58 = vpack.i.bf16 %v774_v18, %v773_v47  ;;  %v806_v47 = vld [vmem:[#allocation2 + $0x141] sm:$0xff]  ;;  %v8994_v63 = vpack.i.bf16 %v808_v13, %v807_v42  ;;  %v792_v13 = vld [vmem:[#allocation2 + $0x99] sm:$0xff] }
 0x239   :  { %v11248_v12 = vpop.permute.xlu1 %8670 }
 0x23a   :  { %14775 = vst [vmem:[#allocation120_spill] sm:$0xff] %v11248_v12  ;;  %v786_v12 = vld [vmem:[#allocation2 + $0x51] sm:$0xff] }
 0x23b   :  { %8965 = vrot.lane.b32.xlu0 %v8964_v4, %s10430_s5  ;;  %v11264_v4 = vpop.permute.xlu2 %8735 }
 0x23c   :  { %14780 = vst [vmem:[#allocation125_spill] sm:$0xff] %v11264_v4  ;;  %v812_v4 = vld [vmem:[#allocation2 + $0x189] sm:$0xff] }
 0x23d   :  { %v11259_v50 = vpop.permute.xlu0 %8755  ;;  %8975 = vrot.lane.b32.xlu2 %v8974_v31, %s10430_s5 }
 0x23e   :  { %14779 = vst [vmem:[#allocation124_spill] sm:$0xff] %v11259_v50 }
 0x23f   :  { %8895 = vrot.lane.b32.xlu1 %v8894_v11, %s10429_s30  ;;  %v779_v11 = vld [vmem:[#allocation2 + $0x330] sm:$0xff] }
 0x240   :  { %v8924_v32 = vpack.i.bf16 %v780_v35, %v779_v11  ;;  %v813_v11 = vld [vmem:[#allocation2 + $0x199] sm:$0xff] }
 0x241   :  { %v11257_v30 = vpop.permute.xlu1 %8685 }
 0x242   :  { %14778 = vst [vmem:[#allocation123_spill] sm:$0xff] %v11257_v30  ;;  %v805_v30 = vld [vmem:[#allocation2 + $0x139] sm:$0xff] }
 0x243   :  { %8980 = vrot.lane.b32.xlu0 %v8979_v1, %s10430_s5  ;;  %v8989_v18 = vpack.i.bf16 %v806_v47, %v805_v30  ;;  %v814_v47 = vld [vmem:[#allocation2 + $0x1a1] sm:$0xff] }
 0x244   :  { %v9009_v42 = vpack.i.bf16 %v814_v47, %v813_v11  ;;  %v798_v47 = vld [vmem:[#allocation2 + $0xe1] sm:$0xff] }
 0x245   :  { %v11268_v50 = vpop.permute.xlu0 %8770  ;;  %8990 = vrot.lane.b32.xlu2 %v8989_v18, %s10430_s5 }
 0x246   :  { %14782 = vst [vmem:[#allocation127_spill] sm:$0xff] %v11268_v50  ;;  %v811_v50 = vld [vmem:[#allocation2 + $0x181] sm:$0xff] }
 0x247   :  { %8910 = vrot.lane.b32.xlu1 %v8909_v58, %s10429_s30  ;;  %v785_v58 = vld [vmem:[#allocation2 + $0x49] sm:$0xff]  ;;  %v9004_v30 = vpack.i.bf16 %v812_v4, %v811_v50  ;;  %v819_v50 = vld [vmem:[#allocation2 + $0x211] sm:$0xff]  ;;  %v820_v4 = vld [vmem:[#allocation2 + $0x219] sm:$0xff] }
 0x248   :  { %v8939_v35 = vpack.i.bf16 %v786_v12, %v785_v58  ;;  %v9024_v11 = vpack.i.bf16 %v820_v4, %v819_v50  ;;  %v804_v4 = vld [vmem:[#allocation2 + $0x129] sm:$0xff] }
 0x249   :  { %v11266_v36 = vpop.permute.xlu1 %8700 }
 0x24a   :  { %14781 = vst [vmem:[#allocation126_spill] sm:$0xff] %v11266_v36  ;;  %v11277_v36 = vpop.permute.xlu2 %8750 }
 0x24b   :  { %8995 = vrot.lane.b32.xlu0 %v8994_v63, %s10430_s5  ;;  %14784 = vst [vmem:[#allocation129_spill] sm:$0xff] %v11277_v36 }
 0x24d   :  { %v11275_v1 = vpop.permute.xlu0 %8785  ;;  %9005 = vrot.lane.b32.xlu2 %v9004_v30, %s10430_s5 }
 0x24f   :  { %8925 = vrot.lane.b32.xlu1 %v8924_v32, %s10429_s30  ;;  %v791_v32 = vld [vmem:[#allocation2 + $0x91] sm:$0xff] }
 0x250   :  { %v8954_v36 = vpack.i.bf16 %v792_v13, %v791_v32  ;;  %v824_v32 = vld [vmem:[#allocation2 + $0x249] sm:$0xff]  ;;  %v825_v13 = vld [vmem:[#allocation2 + $0x259] sm:$0xff] }
 0x251   :  { %v11273_v31 = vpop.permute.xlu1 %8715 }
 0x252   :  { %14783 = vst [vmem:[#allocation128_spill] sm:$0xff] %v11273_v31  ;;  %v817_v31 = vld [vmem:[#allocation2 + $0x1f9] sm:$0xff]  ;;  %v11286_v58 = vpop.permute.xlu2 %8765 }
 0x253   :  { %9010 = vrot.lane.b32.xlu0 %v9009_v42, %s10430_s5  ;;  %v9019_v12 = vpack.i.bf16 %v818_v62, %v817_v31  ;;  %14786 = vst [vmem:[#allocation131_spill] sm:$0xff] %v11286_v58  ;;  %v9039_v58 = vpack.i.bf16 %v826_v25, %v825_v13  ;;  %v832_v25 = vld [vmem:[#allocation2 + $0x2a9] sm:$0xff] }
 0x255   :  { %v11284_v63 = vpop.permute.xlu0 %8800  ;;  %9020 = vrot.lane.b32.xlu2 %v9019_v12, %s10430_s5 }
 0x257   :  { %8940 = vrot.lane.b32.xlu1 %v8939_v35, %s10430_s5  ;;  %v797_v35 = vld [vmem:[#allocation2 + $0xd9] sm:$0xff] }
 0x258   :  { %v8969_v62 = vpack.i.bf16 %v798_v47, %v797_v35  ;;  %v830_v35 = vld [vmem:[#allocation2 + $0x291] sm:$0xff] }
 0x259   :  { %v11282_v18 = vpop.permute.xlu1 %8730 }
 0x25a   :  { %14785 = vst [vmem:[#allocation130_spill] sm:$0xff] %v11282_v18  ;;  %v823_v18 = vld [vmem:[#allocation2 + $0x241] sm:$0xff]  ;;  %v11295_v50 = vpop.permute.xlu2 %8780 }
 0x25b   :  { %9025 = vrot.lane.b32.xlu0 %v9024_v11, %s10430_s5  ;;  %v9034_v31 = vpack.i.bf16 %v824_v32, %v823_v18  ;;  %v831_v32 = vld [vmem:[#allocation2 + $0x2a1] sm:$0xff] }
 0x25c   :  { %v9054_v13 = vpack.i.bf16 %v832_v25, %v831_v32  ;;  %v838_v32 = vld [vmem:[#allocation2 + $0x2f1] sm:$0xff] }
 0x25d   :  { %v11293_v42 = vpop.permute.xlu0 %8815  ;;  %9035 = vrot.lane.b32.xlu2 %v9034_v31, %s10430_s5 }
 0x25e   :  { %14788 = vst [vmem:[#allocation133_spill] sm:$0xff] %v11293_v42  ;;  %v816_v42 = vld [vmem:[#allocation2 + $0x1e9] sm:$0xff] }
 0x25f   :  { %8955 = vrot.lane.b32.xlu1 %v8954_v36, %s10430_s5  ;;  %v803_v36 = vld [vmem:[#allocation2 + $0x121] sm:$0xff] }
 0x260   :  { %v8984_v18 = vpack.i.bf16 %v804_v4, %v803_v36  ;;  %v836_v36 = vld [vmem:[#allocation2 + $0x2d9] sm:$0xff] }
 0x261   :  { %v11291_v30 = vpop.permute.xlu1 %8745 }
 0x262   :  { %14787 = vst [vmem:[#allocation132_spill] sm:$0xff] %v11291_v30  ;;  %v829_v30 = vld [vmem:[#allocation2 + $0x289] sm:$0xff] }
 0x263   :  { %9040 = vrot.lane.b32.xlu0 %v9039_v58, %s10430_s5  ;;  %v9049_v47 = vpack.i.bf16 %v830_v35, %v829_v30  ;;  %v11307_v58 = vpop.permute.xlu2 %8795  ;;  %v837_v35 = vld [vmem:[#allocation2 + $0x2e9] sm:$0xff] }
 0x264   :  { %v9069_v25 = vpack.i.bf16 %v838_v32, %v837_v35  ;;  %v822_v32 = vld [vmem:[#allocation2 + $0x231] sm:$0xff] }
 0x265   :  { %v11302_v11 = vpop.permute.xlu0 %8830  ;;  %9050 = vrot.lane.b32.xlu2 %v9049_v47, %s10430_s5 }
 0x266   :  { %14790 = vst [vmem:[#allocation135_spill] sm:$0xff] %v11302_v11  ;;  %v835_v11 = vld [vmem:[#allocation2 + $0x2d1] sm:$0xff] }
 0x267   :  { %8970 = vrot.lane.b32.xlu1 %v8969_v62, %s10430_s5  ;;  %v809_v62 = vld [vmem:[#allocation2 + $0x169] sm:$0xff]  ;;  %v9064_v4 = vpack.i.bf16 %v836_v36, %v835_v11  ;;  %v844_v36 = vld [vmem:[#allocation2 + $0x339] sm:$0xff] }
 0x268   :  { %v8999_v30 = vpack.i.bf16 %v810_v29, %v809_v62  ;;  %v843_v62 = vld [vmem:[#allocation2 + $0x331] sm:$0xff] }
 0x269   :  { %v11300_v12 = vpop.permute.xlu1 %8760  ;;  %v9084_v35 = vpack.i.bf16 %v844_v36, %v843_v62  ;;  %v3170_v36 = vld [vmem:[%s14455_s2 + $0x68] sm:$0xff] }
 0x26a   :  { %14789 = vst [vmem:[#allocation134_spill] sm:$0xff] %v11300_v12 }
 0x26b   :  { %9055 = vrot.lane.b32.xlu0 %v9054_v13, %s10430_s5  ;;  %v11320_v61 = vpop.permute.xlu2 %8810 }
 0x26c   :  { %14793 = vst [vmem:[#allocation138_spill] sm:$0xff] %v11320_v61 }
 0x26d   :  { %v11311_v12 = vpop.permute.xlu0 %8845  ;;  %9065 = vrot.lane.b32.xlu2 %v9064_v4, %s10430_s5 }
 0x26e   :  { %14791 = vst [vmem:[#allocation136_spill] sm:$0xff] %v11311_v12  ;;  %v841_v12 = vld [vmem:[#allocation2 + $0x319] sm:$0xff] }
 0x26f   :  { %8985 = vrot.lane.b32.xlu1 %v8984_v18, %s10430_s5  ;;  %v815_v18 = vld [vmem:[#allocation2 + $0x1e1] sm:$0xff]  ;;  %v9079_v11 = vpack.i.bf16 %v842_v26, %v841_v12 }
 0x270   :  { %v9014_v29 = vpack.i.bf16 %v816_v42, %v815_v18  ;;  %v3172_v42 = vld [vmem:[%s14455_s2 + $0x78] sm:$0xff]  ;;  %v3171_v18 = vld [vmem:[%s14455_s2 + $0x70] sm:$0xff] }
 0x271   :  { %v11309_v31 = vpop.permute.xlu1 %8775  ;;  %3367 = vmatpush.msra.mxu0 %v3172_v42  ;;  %v3168_v42 = vld [vmem:[%s14455_s2 + $0x58] sm:$0xff] }
 0x273   :  { %9070 = vrot.lane.b32.xlu0 %v9069_v25, %s10430_s5  ;;  %v11332_v12 = vpop.permute.xlu2 %8825  ;;  %3368 = vmatpush.msra.mxu0 %v3171_v18 }
 0x274   :  { %14795 = vst [vmem:[#allocation140_spill] sm:$0xff] %v11332_v12 }
 0x275   :  { %v11318_v13 = vpop.permute.xlu0 %8860  ;;  %9080 = vrot.lane.b32.xlu2 %v9079_v11, %s10430_s5  ;;  %v828_v11 = vld [vmem:[#allocation2 + $0x279] sm:$0xff]  ;;  %3369 = vmatpush.msra.mxu0 %v3170_v36 }
 0x276   :  { %14792 = vst [vmem:[#allocation137_spill] sm:$0xff] %v11318_v13  ;;  %v833_v36 = vld [vmem:[#allocation2 + $0x2b9] sm:$0xff]  ;;  %v839_v13 = vld [vmem:[#allocation2 + $0x301] sm:$0xff] }
 0x277   :  { %9000 = vrot.lane.b32.xlu1 %v8999_v30, %s10430_s5  ;;  %v821_v30 = vld [vmem:[#allocation2 + $0x229] sm:$0xff] }
 0x278   :  { %v9029_v26 = vpack.i.bf16 %v822_v32, %v821_v30  ;;  %v3169_v30 = vld [vmem:[%s14455_s2 + $0x60] sm:$0xff] }
 0x279   :  { %v11316_v47 = vpop.permute.xlu1 %8790  ;;  %3370 = vmatpush.msra.mxu0 %v3169_v30  ;;  %v3165_v30 = vld [vmem:[%s14455_s2 + $0x40] sm:$0xff] }
 0x27b   :  { %9085 = vrot.lane.b32.xlu0 %v9084_v35, %s10430_s5  ;;  %3371 = vmatpush.msra.mxu0 %v3168_v42  ;;  %v11354_v18 = vpop.permute.xlu2 %8840 }
 0x27c   :  { %14798 = vst [vmem:[#allocation143_spill] sm:$0xff] %v11354_v18 }
 0x27d   :  { %v11327_v25 = vpop.permute.xlu0 %8875 }
 0x27e   :  { %14794 = vst [vmem:[#allocation139_spill] sm:$0xff] %v11327_v25 }
 0x27f   :  { %9015 = vrot.lane.b32.xlu1 %v9014_v29, %s10430_s5  ;;  %v827_v29 = vld [vmem:[#allocation2 + $0x271] sm:$0xff] }
 0x280   :  { %v9044_v32 = vpack.i.bf16 %v828_v11, %v827_v29  ;;  %v3166_v29 = vld [vmem:[%s14455_s2 + $0x48] sm:$0xff] }
 0x281   :  { %v11325_v4 = vpop.permute.xlu1 %8805 }
 0x285   :  { %v11343_v35 = vpop.permute.xlu0 %8890 }
 0x286   :  { %14797 = vst [vmem:[#allocation142_spill] sm:$0xff] %v11343_v35  ;;  %v834_v35 = vld [vmem:[#allocation2 + $0x2c1] sm:$0xff] }
 0x287   :  { %9030 = vrot.lane.b32.xlu1 %v9029_v26, %s10430_s5  ;;  %v3167_v26 = vld [vmem:[%s14455_s2 + $0x50] sm:$0xff]  ;;  %v9059_v42 = vpack.i.bf16 %v834_v35, %v833_v36  ;;  %v3162_v35 = vld [vmem:[%s14455_s2 + $0x28] sm:$0xff] }
 0x288   :  { %3372 = vmatpush.msra.mxu0 %v3167_v26  ;;  %v3163_v26 = vld [vmem:[%s14455_s2 + $0x30] sm:$0xff] }
 0x289   :  { %v11338_v62 = vpop.permute.xlu1 %8820 }
 0x28a   :  { %14796 = vst [vmem:[#allocation141_spill] sm:$0xff] %v11338_v62  ;;  %3373 = vmatpush.msra.mxu0 %v3166_v29  ;;  %v11374_v29 = vpop.permute.xlu2 %8855  ;;  %v845_v62 = vld [vmem:[#allocation2 + $0x349] sm:$0xff] }
 0x28b   :  { %14801 = vst [vmem:[#allocation146_spill] sm:$0xff] %v11374_v29  ;;  %v334_v29 = vld [vmem:[#allocation2] sm:$0xff] }
 0x28c   :  { %3374 = vmatpush.msra.mxu0 %v3165_v30  ;;  %v3161_v30 = vld [vmem:[%s14455_s2 + $0x20] sm:$0xff] }
 0x28d   :  { %v11362_v11 = vpop.permute.xlu0 %8905 }
 0x28e   :  { %14800 = vst [vmem:[#allocation145_spill] sm:$0xff] %v11362_v11  ;;  %v840_v11 = vld [vmem:[#allocation2 + $0x309] sm:$0xff] }
 0x28f   :  { %9045 = vrot.lane.b32.xlu1 %v9044_v32, %s10430_s5  ;;  %v3164_v32 = vld [vmem:[%s14455_s2 + $0x38] sm:$0xff] }
 0x290   :  { %3375 = vmatpush.msra.mxu0 %v3164_v32  ;;  %v9074_v32 = vpack.i.bf16 %v840_v11, %v839_v13  ;;  %v8617_v11 = vunpack.i.l.bf16 %v11180_v54 }
 0x291   :  { %v11357_v25 = vpop.permute.xlu1 %8835 }
 0x292   :  { %14799 = vst [vmem:[#allocation144_spill] sm:$0xff] %v11357_v25  ;;  %3376 = vmatpush.msra.mxu0 %v3163_v26  ;;  %v3160_v26 = vld [vmem:[%s14455_s2 + $0x18] sm:$0xff]  ;;  %v8297_v25 = vunpack.i.l.bf16 %v11033_v41 }
 0x294   :  { %3377 = vmatpush.msra.mxu0 %v3162_v35  ;;  %v3159_v35 = vld [vmem:[%s14455_s2 + $0x10] sm:$0xff] }
 0x295   :  { %v11381_v36 = vpop.permute.xlu0 %8920 }
 0x296   :  { %14803 = vst [vmem:[#allocation148_spill] sm:$0xff] %v11381_v36  ;;  %3378 = vmatpush.msra.mxu0 %v3161_v30  ;;  %v8457_v36 = vunpack.i.l.bf16 %v11087_v45  ;;  %v8777_v30 = vunpack.i.l.bf16 %v11309_v31 }
 0x297   :  { %9060 = vrot.lane.b32.xlu1 %v9059_v42, %s10430_s5  ;;  %v7977_v42 = vunpack.i.l.bf16 %v10799_v55 }
 0x298   :  { %3379 = vmatpush.msra.mxu0 %v3160_v26 }
 0x299   :  { %v11376_v18 = vpop.permute.xlu1 %8850  ;;  %v2703_v13 = vsel %vm52_vm0, %v334_v29, %v7977_v42  ;;  %v3158_v29 = vld [vmem:[%s14455_s2 + $0x8] sm:$0xff]  ;;  %v7978_v42 = vunpack.i.h.bf16 %v10799_v55 }
 0x29a   :  { %14802 = vst [vmem:[#allocation147_spill] sm:$0xff] %v11376_v18  ;;  %v8137_v18 = vunpack.i.l.bf16 %v10865_v34  ;;  %3380 = vmatpush.msra.mxu0 %v3159_v35  ;;  %v847_v35 = vld [vmem:[#allocation2 + $0x32] sm:$0xff] }
 0x29c   :  { %v2768_v12 = vsel %vm2767_vm3, %v2703_v13, %v8137_v18  ;;  %v3174_v18 = vld [vmem:[%s14455_s2 + $0x88] sm:$0xff]  ;;  %3381 = vmatpush.msra.mxu0 %v3158_v29  ;;  %v11418_v13 = vpop.permute.xlu2 %8870 }
 0x29d   :  { %v2833_v27 = vsel %vm2832_vm4, %v2768_v12, %v8297_v25  ;;  %3590 = vmatpush.msra.mxu1 %v3174_v18  ;;  %v3157_v25 = vld [vmem:[%s14455_s2] sm:$0xff]  ;;  %v335_v29 = vld [vmem:[#allocation2 + $0x8] sm:$0xff]  ;;  %v8138_v18 = vunpack.i.h.bf16 %v10865_v34 }
 0x29e   :  { %v3173_v12 = vld [vmem:[%s14455_s2 + $0x80] sm:$0xff]  ;;  %v2898_v26 = vsel %vm2897_vm6, %v2833_v27, %v8457_v36  ;;  %3382 = vmatpush.msra.mxu0 %v3157_v25  ;;  %v8618_v36 = vunpack.i.h.bf16 %v11180_v54  ;;  %s7829_s2 = sld [smem:[#allocation3 + $0x1]] }
 0x29f   :  { %9075 = vrot.lane.b32.xlu1 %v9074_v32, %s10430_s5  ;;  %v8936_v32 = vpop.permute.xlu0 %8935  ;;  %v2963_v55 = vsel %vm2962_vm5, %v2898_v26, %v8617_v11  ;;  %3591 = vmatpush.msra.mxu1 %v3173_v12  ;;  %v8778_v11 = vunpack.i.h.bf16 %v11309_v31  ;;  %v848_v25 = vld [vmem:[#allocation2 + $0x3a] sm:$0xff]  ;;  %v850_v26 = vld [vmem:[#allocation2 + $0x52] sm:$0xff] }
 0x2a0   :  { %v8937_v61 = vunpack.i.l.bf16 %v8936_v32  ;;  %v3028_v60 = vsel %vm3027_vm7, %v2963_v55, %v8777_v30  ;;  %7833 = vmatmul.msk.f32.vlgmr.msra.gmra.mxu1 %vm52_vm0, %v847_v35 }
 0x2a1   :  { %v11402_v56 = vpop.permute.xlu1 %8865 }
 0x2a2   :  { %14804 = vst [vmem:[#allocation149_spill] sm:$0xff] %v11402_v56  ;;  %v9089_v56 = vpack.i.bf16 %v846_v44, %v845_v62  ;;  %v3093_v27 = vsel %vm3092_vm8, %v3028_v60, %v8937_v61  ;;  %v8458_v44 = vunpack.i.h.bf16 %v11087_v45  ;;  %v2704_v62 = vsel %vm52_vm0, %v335_v29, %v7978_v42 }
 0x2a3   :  { %3383 = vmatmul.f32.vlgmr.msra.gmra.mxu0 %v3093_v27  ;;  %v2769_v34 = vsel %vm2767_vm3, %v2704_v62, %v8138_v18  ;;  %v8938_v61 = vunpack.i.h.bf16 %v8936_v32  ;;  %v7982_v29 = vunpack.i.l.bf16 %v10808_v6  ;;  %v851_v18 = vld [vmem:[#allocation2 + $0x62] sm:$0xff]  ;;  %v8142_v27 = vunpack.i.l.bf16 %v10892_v28 }
 0x2a4   :  { %v2834_v30 = vsel %vm2832_vm4, %v2769_v34, %v8298_v16  ;;  %v11438_v12 = vpop.permute.xlu2 %8885  ;;  %v849_v16 = vld [vmem:[#allocation2 + $0x4a] sm:$0xff]  ;;  %v8462_v62 = vunpack.i.l.bf16 %v11128_v14 }
 0x2a5   :  { %v2899_v60 = vsel %vm2897_vm6, %v2834_v30, %v8458_v44  ;;  %v8302_v44 = vunpack.i.l.bf16 %v10966_v22 }
 0x2a6   :  { %v2964_v45 = vsel %vm2962_vm5, %v2899_v60, %v8618_v36  ;;  %v10199_v36 = vld [vmem:[#allocation2 + $0x18] sm:$0xff] }
 0x2a7   :  { %9090 = vrot.lane.b32.xlu1 %v9089_v56, %s10430_s5  ;;  %v3029_v42 = vsel %vm3027_vm7, %v2964_v45, %v8778_v11  ;;  %v2705_v34 = vsel %vm52_vm0, %v10199_v36, %v7982_v29  ;;  %v8622_v11 = vunpack.i.l.bf16 %v11182_v15 }
 0x2a8   :  { %v3094_v56 = vsel %vm3092_vm8, %v3029_v42, %v8938_v61  ;;  %7834 = vmatmul.msk.f32.gmra.mxu1 %vm52_vm0, %v848_v25  ;;  %v2770_v30 = vsel %vm2767_vm3, %v2705_v34, %v8142_v27  ;;  %v8782_v61 = vunpack.i.l.bf16 %v11295_v50  ;;  %v7983_v42 = vunpack.i.h.bf16 %v10808_v6  ;;  %v10200_v6 = vld [vmem:[#allocation2 + $0x20] sm:$0xff] }
 0x2a9   :  { %v11433_v41 = vpop.permute.xlu1 %8880  ;;  %v2835_v60 = vsel %vm2832_vm4, %v2770_v30, %v8302_v44  ;;  %v8303_v27 = vunpack.i.h.bf16 %v10966_v22  ;;  %v8463_v44 = vunpack.i.h.bf16 %v11128_v14  ;;  %v8783_v30 = vunpack.i.h.bf16 %v11295_v50 }
 0x2aa   :  { %v2900_v45 = vsel %vm2897_vm6, %v2835_v60, %v8462_v62  ;;  %v2706_v62 = vsel %vm52_vm0, %v10200_v6, %v7983_v42  ;;  %v8467_v50 = vunpack.i.l.bf16 %v11071_v39 }
 0x2ab   :  { %3386 = vmatmul.f32.gmra.mxu0 %v3094_v56 }
 0x2ac   :  { %v11445_v31 = vpop.permute.xlu2 %8900 }
 0x2b0   :  { %7835 = vmatmul.msk.f32.gmra.mxu1 %vm52_vm0, %v849_v16  ;;  %v2965_v16 = vsel %vm2962_vm5, %v2900_v45, %v8622_v11  ;;  %v8623_v11 = vunpack.i.h.bf16 %v11182_v15  ;;  %v7987_v45 = vunpack.i.l.bf16 %v10817_v24  ;;  %v8307_v15 = vunpack.i.l.bf16 %v10999_v5 }
 0x2b1   :  { %v11442_v54 = vpop.permute.xlu1 %8895  ;;  %v3030_v36 = vsel %vm3027_vm7, %v2965_v16, %v8782_v61  ;;  %v8147_v16 = vunpack.i.l.bf16 %v10939_v0 }
 0x2b4   :  { %v11450_v35 = vpop.permute.xlu2 %8915 }
 0x2b8   :  { %7836 = vmatmul.msk.f32.gmra.mxu1 %vm52_vm0, %v850_v26  ;;  %v852_v26 = vld [vmem:[#allocation2 + $0x6a] sm:$0xff] }
 0x2b9   :  { %v11447_v32 = vpop.permute.xlu1 %8910 }
 0x2bc   :  { %v11468_v29 = vpop.permute.xlu2 %8930 }
 0x2c0   :  { %7837 = vmatmul.msk.f32.gmra.mxu1 %vm52_vm0, %v851_v18  ;;  %v8143_v18 = vunpack.i.h.bf16 %v10892_v28 }
 0x2c1   :  { %v11452_v55 = vpop.permute.xlu1 %8925 }
 0x2c2   :  { %v2771_v28 = vsel %vm2767_vm3, %v2706_v62, %v8143_v18 }
 0x2c3   :  { %v2836_v61 = vsel %vm2832_vm4, %v2771_v28, %v8303_v27  ;;  %v8627_v27 = vunpack.i.l.bf16 %v11223_v48  ;;  %v7988_v28 = vunpack.i.h.bf16 %v10817_v24  ;;  %v8628_v24 = vunpack.i.h.bf16 %v11223_v48 }
 0x2c4   :  { %v2901_v22 = vsel %vm2897_vm6, %v2836_v61, %v8463_v44  ;;  %v8946_v18 = vpop.permute.xlu2 %8945  ;;  %v8787_v44 = vunpack.i.l.bf16 %v11275_v1  ;;  %v854_v61 = vld [vmem:[#allocation2 + $0x82] sm:$0xff]  ;;  %v8312_v48 = vunpack.i.l.bf16 %v11042_v43 }
 0x2c5   :  { %v2966_v14 = vsel %vm2962_vm5, %v2901_v22, %v8623_v11  ;;  %v8947_v62 = vunpack.i.l.bf16 %v8946_v18 }
 0x2c6   :  { %v3031_v42 = vsel %vm3027_vm7, %v2966_v14, %v8783_v30 }
 0x2c8   :  { %7838 = vmatmul.msk.f32.gmra.mxu1 %vm52_vm0, %v852_v26 }
 0x2c9   :  { %v8941_v25 = vpop.permute.xlu1 %8940 }
 0x2ca   :  { %v8942_v56 = vunpack.i.l.bf16 %v8941_v25  ;;  %v8943_v60 = vunpack.i.h.bf16 %v8941_v25  ;;  %v10201_v25 = vld [vmem:[#allocation2 + $0x30] sm:$0xff] }
 0x2cc   :  { %v3095_v34 = vsel %vm3092_vm8, %v3030_v36, %v8942_v56  ;;  %v853_v56 = vld [vmem:[#allocation2 + $0x7a] sm:$0xff]  ;;  %v3096_v26 = vsel %vm3092_vm8, %v3031_v42, %v8943_v60  ;;  %v2707_v36 = vsel %vm52_vm0, %v10201_v25, %v7987_v45  ;;  %v8148_v60 = vunpack.i.h.bf16 %v10939_v0 }
 0x2cd   :  { %3389 = vmatmul.f32.gmra.mxu0 %v3095_v34  ;;  %v2772_v34 = vsel %vm2767_vm3, %v2707_v36, %v8147_v16  ;;  %v8308_v45 = vunpack.i.h.bf16 %v10999_v5  ;;  %v10202_v16 = vld [vmem:[#allocation2 + $0x38] sm:$0xff]  ;;  %v8788_v0 = vunpack.i.h.bf16 %v11275_v1  ;;  %v7992_v25 = vunpack.i.l.bf16 %v10828_v38 }
 0x2ce   :  { %v2837_v6 = vsel %vm2832_vm4, %v2772_v34, %v8307_v15  ;;  %v2708_v42 = vsel %vm52_vm0, %v10202_v16, %v7988_v28  ;;  %v855_v36 = vld [vmem:[#allocation2 + $0x92] sm:$0xff]  ;;  %v8472_v1 = vunpack.i.l.bf16 %v11096_v9  ;;  %v8153_v16 = vunpack.i.h.bf16 %v10874_v52 }
 0x2cf   :  { %v2902_v11 = vsel %vm2897_vm6, %v2837_v6, %v8467_v50  ;;  %v2773_v15 = vsel %vm2767_vm3, %v2708_v42, %v8148_v60  ;;  %v8948_v50 = vunpack.i.h.bf16 %v8946_v18  ;;  %v8951_v6 = vpop.permute.xlu0 %8950  ;;  %v10203_v18 = vld [vmem:[#allocation2 + $0x48] sm:$0xff] }
 0x2d0   :  { %7839 = vmatmul.msk.f32.gmra.mxu1 %vm52_vm0, %v853_v56  ;;  %v2967_v30 = vsel %vm2962_vm5, %v2902_v11, %v8627_v27  ;;  %v8468_v56 = vunpack.i.h.bf16 %v11071_v39  ;;  %v8152_v27 = vunpack.i.l.bf16 %v10874_v52  ;;  %v8632_v11 = vunpack.i.l.bf16 %v11191_v21 }
 0x2d1   :  { %v3032_v22 = vsel %vm3027_vm7, %v2967_v30, %v8787_v44  ;;  %v8792_v30 = vunpack.i.l.bf16 %v11316_v47  ;;  %v8952_v60 = vunpack.i.l.bf16 %v8951_v6  ;;  %v8793_v52 = vunpack.i.h.bf16 %v11316_v47 }
 0x2d2   :  { %v3097_v14 = vsel %vm3092_vm8, %v3032_v22, %v8947_v62  ;;  %v2709_v62 = vsel %vm52_vm0, %v10203_v18, %v7992_v25  ;;  %v8477_v47 = vunpack.i.l.bf16 %v11135_v19 }
 0x2d3   :  { %v2774_v28 = vsel %vm2767_vm3, %v2709_v62, %v8152_v27  ;;  %v857_v27 = vld [vmem:[#allocation2 + $0xaa] sm:$0xff]  ;;  %v8637_v62 = vunpack.i.l.bf16 %v11189_v7 }
 0x2d5   :  { %3392 = vmatmul.f32.gmra.mxu0 %v3096_v26  ;;  %v2838_v26 = vsel %vm2832_vm4, %v2773_v15, %v8308_v45  ;;  %v7993_v45 = vunpack.i.h.bf16 %v10828_v38  ;;  %v8633_v38 = vunpack.i.h.bf16 %v11191_v21  ;;  %v8317_v21 = vunpack.i.l.bf16 %v10975_v53 }
 0x2d6   :  { %v2903_v5 = vsel %vm2897_vm6, %v2838_v26, %v8468_v56  ;;  %v856_v56 = vld [vmem:[#allocation2 + $0x9a] sm:$0xff]  ;;  %v10204_v26 = vld [vmem:[#allocation2 + $0x50] sm:$0xff] }
 0x2d7   :  { %v2968_v39 = vsel %vm2962_vm5, %v2903_v5, %v8628_v24  ;;  %v8313_v24 = vunpack.i.h.bf16 %v11042_v43 }
 0x2d8   :  { %7840 = vmatmul.msk.f32.gmra.mxu1 %vm52_vm0, %v854_v61  ;;  %v3033_v34 = vsel %vm3027_vm7, %v2968_v39, %v8788_v0  ;;  %v2839_v61 = vsel %vm2832_vm4, %v2774_v28, %v8312_v48  ;;  %v8473_v0 = vunpack.i.h.bf16 %v11096_v9  ;;  %v8953_v39 = vunpack.i.h.bf16 %v8951_v6  ;;  %v10205_v6 = vld [vmem:[#allocation2 + $0x60] sm:$0xff] }
 0x2d9   :  { %v3098_v44 = vsel %vm3092_vm8, %v3033_v34, %v8948_v50  ;;  %v2904_v22 = vsel %vm2897_vm6, %v2839_v61, %v8472_v1  ;;  %v2710_v50 = vsel %vm52_vm0, %v10204_v26, %v7993_v45  ;;  %v8157_v34 = vunpack.i.l.bf16 %v10905_v59  ;;  %v8956_v1 = vpop.permute.xlu1 %8955 }
 0x2da   :  { %v2775_v5 = vsel %vm2767_vm3, %v2710_v50, %v8153_v16  ;;  %v8797_v28 = vunpack.i.l.bf16 %v11307_v58  ;;  %v8957_v61 = vunpack.i.l.bf16 %v8956_v1 }
 0x2db   :  { %v2840_v25 = vsel %vm2832_vm4, %v2775_v5, %v8313_v24  ;;  %v8958_v5 = vunpack.i.h.bf16 %v8956_v1 }
 0x2dc   :  { %v2905_v43 = vsel %vm2897_vm6, %v2840_v25, %v8473_v0  ;;  %v10206_v0 = vld [vmem:[#allocation2 + $0x68] sm:$0xff] }
 0x2dd   :  { %3395 = vmatmul.f32.gmra.mxu0 %v3097_v14  ;;  %v2969_v14 = vsel %vm2962_vm5, %v2904_v22, %v8632_v11  ;;  %v2970_v9 = vsel %vm2962_vm5, %v2905_v43, %v8633_v38  ;;  %v7998_v22 = vunpack.i.h.bf16 %v10763_v37  ;;  %v859_v25 = vld [vmem:[#allocation2 + $0xc2] sm:$0xff] }
 0x2de   :  { %v3034_v42 = vsel %vm3027_vm7, %v2969_v14, %v8792_v30  ;;  %v3035_v48 = vsel %vm3027_vm7, %v2970_v9, %v8793_v52  ;;  %v858_v14 = vld [vmem:[#allocation2 + $0xb2] sm:$0xff]  ;;  %v8002_v52 = vunpack.i.l.bf16 %v10783_v46  ;;  %v8961_v9 = vpop.permute.xlu2 %8960 }
 0x2df   :  { %v3099_v15 = vsel %vm3092_vm8, %v3034_v42, %v8952_v60  ;;  %v8318_v42 = vunpack.i.h.bf16 %v10975_v53  ;;  %v2712_v26 = vsel %vm52_vm0, %v10206_v0, %v7998_v22  ;;  %v8962_v1 = vunpack.i.l.bf16 %v8961_v9 }
 0x2e0   :  { %7841 = vmatmul.msk.f32.gmra.mxu1 %vm52_vm0, %v855_v36  ;;  %v7997_v36 = vunpack.i.l.bf16 %v10763_v37  ;;  %v8638_v37 = vunpack.i.h.bf16 %v11189_v7  ;;  %v8322_v7 = vunpack.i.l.bf16 %v11008_v33  ;;  %v8483_v22 = vunpack.i.h.bf16 %v11081_v10 }
 0x2e1   :  { %v8167_v0 = vunpack.i.l.bf16 %v10881_v8 }
 0x2e2   :  { %v2711_v18 = vsel %vm52_vm0, %v10205_v6, %v7997_v36 }
 0x2e3   :  { %v2776_v11 = vsel %vm2767_vm3, %v2711_v18, %v8157_v34  ;;  %v8003_v18 = vunpack.i.h.bf16 %v10783_v46  ;;  %v8643_v46 = vunpack.i.h.bf16 %v11230_v51 }
 0x2e4   :  { %v2841_v30 = vsel %vm2832_vm4, %v2776_v11, %v8317_v21  ;;  %v860_v11 = vld [vmem:[#allocation2 + $0xca] sm:$0xff] }
 0x2e5   :  { %3398 = vmatmul.f32.gmra.mxu0 %v3098_v44  ;;  %v3100_v44 = vsel %vm3092_vm8, %v3035_v48, %v8953_v39  ;;  %v2906_v60 = vsel %vm2897_vm6, %v2841_v30, %v8477_v47  ;;  %v8162_v39 = vunpack.i.l.bf16 %v10952_v40  ;;  %v8642_v48 = vunpack.i.l.bf16 %v11230_v51 }
 0x2e6   :  { %v2971_v45 = vsel %vm2962_vm5, %v2906_v60, %v8637_v62  ;;  %v8327_v51 = vunpack.i.l.bf16 %v11051_v23 }
 0x2e7   :  { %v3036_v16 = vsel %vm3027_vm7, %v2971_v45, %v8797_v28  ;;  %v8163_v28 = vunpack.i.h.bf16 %v10952_v40  ;;  %v10208_v45 = vld [vmem:[#allocation2 + $0x80] sm:$0xff]  ;;  %v8803_v40 = vunpack.i.h.bf16 %v11284_v63 }
 0x2e8   :  { %7842 = vmatmul.msk.f32.gmra.mxu1 %vm52_vm0, %v856_v56  ;;  %v8158_v56 = vunpack.i.h.bf16 %v10905_v59  ;;  %v3101_v24 = vsel %vm3092_vm8, %v3036_v16, %v8957_v61  ;;  %v8798_v59 = vunpack.i.h.bf16 %v11307_v58  ;;  %v8482_v58 = vunpack.i.l.bf16 %v11081_v10 }
 0x2e9   :  { %v8323_v61 = vunpack.i.h.bf16 %v11008_v33 }
 0x2ea   :  { %v2777_v50 = vsel %vm2767_vm3, %v2712_v26, %v8158_v56 }
 0x2eb   :  { %v2842_v38 = vsel %vm2832_vm4, %v2777_v50, %v8318_v42  ;;  %v8963_v42 = vunpack.i.h.bf16 %v8961_v9  ;;  %v8966_v50 = vpop.permute.xlu0 %8965 }
 0x2ed   :  { %3401 = vmatmul.f32.gmra.mxu0 %v3099_v15  ;;  %v8478_v15 = vunpack.i.h.bf16 %v11135_v19 }
 0x2ef   :  { %v2907_v53 = vsel %vm2897_vm6, %v2842_v38, %v8478_v15  ;;  %v861_v15 = vld [vmem:[#allocation2 + $0xda] sm:$0xff] }
 0x2f0   :  { %7843 = vmatmul.msk.f32.gmra.mxu1 %vm52_vm0, %v857_v27  ;;  %v2972_v19 = vsel %vm2962_vm5, %v2907_v53, %v8638_v37  ;;  %v10207_v27 = vld [vmem:[#allocation2 + $0x78] sm:$0xff] }
 0x2f1   :  { %v3037_v43 = vsel %vm3027_vm7, %v2972_v19, %v8798_v59  ;;  %v2713_v34 = vsel %vm52_vm0, %v10207_v27, %v8002_v52  ;;  %v10209_v59 = vld [vmem:[#allocation2 + $0x90] sm:$0xff]  ;;  %v8807_v52 = vunpack.i.l.bf16 %v11325_v4  ;;  %v8328_v27 = vunpack.i.h.bf16 %v11051_v23 }
 0x2f2   :  { %v3102_v36 = vsel %vm3092_vm8, %v3037_v43, %v8958_v5  ;;  %v2778_v21 = vsel %vm2767_vm3, %v2713_v34, %v8162_v39  ;;  %v8647_v5 = vunpack.i.l.bf16 %v11200_v3  ;;  %v8008_v43 = vunpack.i.h.bf16 %v10815_v17 }
 0x2f3   :  { %v2843_v47 = vsel %vm2832_vm4, %v2778_v21, %v8322_v7  ;;  %v10210_v21 = vld [vmem:[#allocation2 + $0x98] sm:$0xff]  ;;  %v8968_v23 = vunpack.i.h.bf16 %v8966_v50 }
 0x2f4   :  { %v2908_v6 = vsel %vm2897_vm6, %v2843_v47, %v8482_v58  ;;  %v8168_v58 = vunpack.i.h.bf16 %v10881_v8  ;;  %v8808_v8 = vunpack.i.h.bf16 %v11325_v4  ;;  %v8332_v4 = vunpack.i.l.bf16 %v10984_v2 }
 0x2f5   :  { %3404 = vmatmul.f32.gmra.mxu0 %v3100_v44  ;;  %v8802_v44 = vunpack.i.l.bf16 %v11284_v63  ;;  %v2973_v62 = vsel %vm2962_vm5, %v2908_v6, %v8642_v48  ;;  %v8487_v63 = vunpack.i.l.bf16 %v11103_v49  ;;  %v8488_v48 = vunpack.i.h.bf16 %v11103_v49 }
 0x2f6   :  { %v8012_v49 = vunpack.i.l.bf16 %v10842_v57 }
 0x2f7   :  { %v3038_v30 = vsel %vm3027_vm7, %v2973_v62, %v8802_v44  ;;  %v8648_v44 = vunpack.i.h.bf16 %v11200_v3 }
 0x2f8   :  { %7844 = vmatmul.msk.f32.gmra.mxu1 %vm52_vm0, %v858_v14  ;;  %v3103_v60 = vsel %vm3092_vm8, %v3038_v30, %v8962_v1  ;;  %v2714_v14 = vsel %vm52_vm0, %v10208_v45, %v8003_v18  ;;  %v14805_v45 = vld [vmem:[#allocation93_spill] sm:$0xff] }
 0x2f9   :  { %v2779_v56 = vsel %vm2767_vm3, %v2714_v14, %v8163_v28  ;;  %v8172_v28 = vunpack.i.l.bf16 %v10914_v20  ;;  %v8492_v14 = vunpack.i.l.bf16 %v14805_v45 }
 0x2fa   :  { %v2844_v16 = vsel %vm2832_vm4, %v2779_v56, %v8323_v61  ;;  %v11625_v61 = vstv %s7829_s2  ;;  %v10211_v56 = vld [vmem:[#allocation2 + $0xa8] sm:$0xff] }
 0x2fb   :  { %v2909_v33 = vsel %vm2897_vm6, %v2844_v16, %v8483_v22  ;;  %v14806_v16 = vld [vmem:[#allocation107_spill] sm:$0xff] }
 0x2fc   :  { %v2974_v10 = vsel %vm2962_vm5, %v2909_v33, %v8643_v46  ;;  %v8971_v46 = vpop.permute.xlu1 %8970 }
 0x2fd   :  { %3407 = vmatmul.f32.gmra.mxu0 %v3101_v24  ;;  %v8007_v24 = vunpack.i.l.bf16 %v10815_v17  ;;  %v3039_v26 = vsel %vm3027_vm7, %v2974_v10, %v8803_v40  ;;  %v2716_v17 = vsel %vm52_vm0, %v10210_v21, %v8008_v43  ;;  %v2717_v40 = vsel %vm52_vm0, %v10211_v56, %v8012_v49  ;;  %v14807_v10 = vld [vmem:[#allocation138_spill] sm:$0xff] }
 0x2fe   :  { %v3104_v37 = vsel %vm3092_vm8, %v3039_v26, %v8963_v42  ;;  %v2781_v47 = vsel %vm2767_vm3, %v2716_v17, %v8168_v58  ;;  %v8652_v42 = vunpack.i.l.bf16 %v14806_v16 }
 0x2ff   :  { %v2715_v38 = vsel %vm52_vm0, %v10209_v59, %v8007_v24  ;;  %v2846_v1 = vsel %vm2832_vm4, %v2781_v47, %v8328_v27  ;;  %v2782_v24 = vsel %vm2767_vm3, %v2717_v40, %v8172_v28  ;;  %v14813_v40 = vld [vmem:[#allocation133_spill] sm:$0xff] }
 0x300   :  { %7845 = vmatmul.msk.f32.gmra.mxu1 %vm52_vm0, %v859_v25  ;;  %v2780_v53 = vsel %vm2767_vm3, %v2715_v38, %v8167_v0  ;;  %v8967_v25 = vunpack.i.l.bf16 %v8966_v50  ;;  %v2911_v6 = vsel %vm2897_vm6, %v2846_v1, %v8488_v48  ;;  %v11636_v0 = vstv %s7830_s23 }
 0x301   :  { %v2845_v19 = vsel %vm2832_vm4, %v2780_v53, %v8327_v51  ;;  %v2976_v18 = vsel %vm2962_vm5, %v2911_v6, %v8648_v44  ;;  %v2847_v26 = vsel %vm2832_vm4, %v2782_v24, %v8332_v4  ;;  %v8972_v51 = vunpack.i.l.bf16 %v8971_v46  ;;  %v864_v53 = vld [vmem:[#allocation2 + $0xfa] sm:$0xff] }
 0x302   :  { %v2910_v39 = vsel %vm2897_vm6, %v2845_v19, %v8487_v63  ;;  %v3041_v3 = vsel %vm3027_vm7, %v2976_v18, %v8808_v8  ;;  %v2912_v63 = vsel %vm2897_vm6, %v2847_v26, %v8492_v14  ;;  %v8013_v50 = vunpack.i.h.bf16 %v10842_v57  ;;  %v14808_v44 = vld [vmem:[#allocation12_spill] sm:$0xff]  ;;  %v14812_v14 = vld [vmem:[#allocation117_spill] sm:$0xff] }
 0x303   :  { %v2975_v7 = vsel %vm2962_vm5, %v2910_v39, %v8647_v5  ;;  %v2977_v59 = vsel %vm2962_vm5, %v2912_v63, %v8652_v42  ;;  %v8333_v39 = vunpack.i.h.bf16 %v10984_v2  ;;  %v8493_v57 = vunpack.i.h.bf16 %v14805_v45  ;;  %v14809_v6 = vld [vmem:[#allocation48_spill] sm:$0xff]  ;;  %v866_v63 = vld [vmem:[#allocation2 + $0x112] sm:$0xff] }
 0x304   :  { %v3040_v9 = vsel %vm3027_vm7, %v2975_v7, %v8807_v52  ;;  %v8173_v52 = vunpack.i.h.bf16 %v10914_v20  ;;  %v8653_v20 = vunpack.i.h.bf16 %v14806_v16  ;;  %v8813_v2 = vunpack.i.h.bf16 %v14807_v10 }
 0x305   :  { %3410 = vmatmul.f32.gmra.mxu0 %v3102_v36  ;;  %v862_v36 = vld [vmem:[#allocation2 + $0xe2] sm:$0xff]  ;;  %v3105_v34 = vsel %vm3092_vm8, %v3040_v9, %v8967_v25  ;;  %v8973_v48 = vunpack.i.h.bf16 %v8971_v46  ;;  %v8017_v47 = vunpack.i.l.bf16 %v14808_v44  ;;  %v8177_v49 = vunpack.i.l.bf16 %v14809_v6 }
 0x306   :  { %v8657_v46 = vunpack.i.l.bf16 %v14812_v14  ;;  %v8817_v16 = vunpack.i.l.bf16 %v14813_v40 }
 0x308   :  { %7846 = vmatmul.msk.f32.gmra.mxu1 %vm52_vm0, %v860_v11  ;;  %v863_v11 = vld [vmem:[#allocation2 + $0xf2] sm:$0xff] }
 0x30d   :  { %3413 = vmatmul.f32.gmra.mxu0 %v3103_v60  ;;  %v3106_v60 = vsel %vm3092_vm8, %v3041_v3, %v8968_v23 }
 0x310   :  { %7847 = vmatmul.msk.f32.gmra.mxu1 %vm52_vm0, %v861_v15  ;;  %v8812_v15 = vunpack.i.l.bf16 %v14807_v10  ;;  %v8018_v10 = vunpack.i.h.bf16 %v14808_v44  ;;  %v6876_v44 = vld [vmem:[%s14456_s3 + $0x88] sm:$0xff] }
 0x311   :  { %7292 = vmatpush.msra.mxu3 %v6876_v44  ;;  %v869_v44 = vld [vmem:[#allocation2 + $0x13a] sm:$0xff] }
 0x312   :  { %v3042_v19 = vsel %vm3027_vm7, %v2977_v59, %v8812_v15 }
 0x313   :  { %v3107_v43 = vsel %vm3092_vm8, %v3042_v19, %v8972_v51  ;;  %v8178_v51 = vunpack.i.h.bf16 %v14809_v6  ;;  %v10214_v19 = vld [vmem:[#allocation2 + $0xc8] sm:$0xff] }
 0x314   :  { %v14817_v6 = vld [vmem:[#allocation85_spill] sm:$0xff] }
 0x315   :  { %3416 = vmatmul.f32.gmra.mxu0 %v3104_v37 }
 0x318   :  { %7848 = vmatmul.msk.f32.gmra.mxu1 %vm52_vm0, %v862_v36  ;;  %v10212_v36 = vld [vmem:[#allocation2 + $0xb0] sm:$0xff] }
 0x319   :  { %v2718_v58 = vsel %vm52_vm0, %v10212_v36, %v8013_v50 }
 0x31a   :  { %v2783_v27 = vsel %vm2767_vm3, %v2718_v58, %v8173_v52 }
 0x31d   :  { %3419 = vmatmul.f32.gmra.mxu0 %v3105_v34  ;;  %v3593_v62 = vpop.f32.mrf.mxu1  ;;  %v2848_v34 = vsel %vm2832_vm4, %v2783_v27, %v8333_v39  ;;  %v8658_v39 = vunpack.i.h.bf16 %v14812_v14 }
 0x31e   :  { %v2913_v17 = vsel %vm2897_vm6, %v2848_v34, %v8493_v57  ;;  %v14815_v34 = vld [vmem:[#allocation32_spill] sm:$0xff] }
 0x31f   :  { %v2978_v8 = vsel %vm2962_vm5, %v2913_v17, %v8653_v20  ;;  %v14814_v20 = vld [vmem:[#allocation16_spill] sm:$0xff] }
 0x320   :  { %v3384_v30 = vpop.f32.mrf.mxu0  ;;  %7849 = vmatmul.msk.f32.gmra.mxu1 %vm52_vm0, %v863_v11  ;;  %v3043_v18 = vsel %vm3027_vm7, %v2978_v8, %v8813_v2  ;;  %v14810_v11 = vld [vmem:[#allocation62_spill] sm:$0xff]  ;;  %v867_v17 = vld [vmem:[#allocation2 + $0x122] sm:$0xff] }
 0x321   :  { %v3594_v22 = vadd.f32 %v3593_v62, %v3384_v30  ;;  %v865_v62 = vld [vmem:[#allocation2 + $0x10a] sm:$0xff]  ;;  %v8337_v28 = vunpack.i.l.bf16 %v14810_v11  ;;  %v3108_v3 = vsel %vm3092_vm8, %v3043_v18, %v8973_v48  ;;  %v8182_v48 = vunpack.i.l.bf16 %v14815_v34  ;;  %v8981_v18 = vpop.permute.xlu0 %8980 }
 0x322   :  { %v14811_v30 = vld [vmem:[#allocation81_spill] sm:$0xff] }
 0x323   :  { %v3786_v33 = vadd.f32 %v11625_v61, %v3594_v22  ;;  %v8497_v4 = vunpack.i.l.bf16 %v14811_v30  ;;  %v10213_v22 = vld [vmem:[#allocation2 + $0xc0] sm:$0xff]  ;;  %v8498_v52 = vunpack.i.h.bf16 %v14811_v30 }
 0x324   :  { %v2719_v45 = vsel %vm52_vm0, %v10213_v22, %v8017_v47  ;;  %v14816_v47 = vld [vmem:[#allocation72_spill] sm:$0xff] }
 0x325   :  { %3422 = vmatmul.f32.gmra.mxu0 %v3106_v60  ;;  %v3850_v37 = vmax.f32 %v3786_v33, 0.0  ;;  %v3596_v5 = vpop.f32.mrf.mxu1  ;;  %v8976_v60 = vpop.permute.xlu2 %8975  ;;  %v2784_v56 = vsel %vm2767_vm3, %v2719_v45, %v8177_v49  ;;  %v8342_v8 = vunpack.i.l.bf16 %v14816_v47  ;;  %v8502_v49 = vunpack.i.l.bf16 %v14817_v6 }
 0x326   :  { %v2849_v42 = vsel %vm2832_vm4, %v2784_v56, %v8337_v28  ;;  %v8977_v33 = vunpack.i.l.bf16 %v8976_v60  ;;  %v8978_v36 = vunpack.i.h.bf16 %v8976_v60  ;;  %v14818_v28 = vld [vmem:[#allocation110_spill] sm:$0xff]  ;;  %v8982_v45 = vunpack.i.l.bf16 %v8981_v18 }
 0x327   :  { %v3915_v38 = vadd.f32 %v11636_v0, %v3850_v37  ;;  %v2914_v24 = vsel %vm2897_vm6, %v2849_v42, %v8497_v4  ;;  %v14819_v4 = vld [vmem:[#allocation141_spill] sm:$0xff]  ;;  %v8023_v56 = vunpack.i.h.bf16 %v14814_v20 }
 0x328   :  { %v3387_v25 = vpop.f32.mrf.mxu0  ;;  %7850 = vmatmul.msk.f32.gmra.mxu1 %vm52_vm0, %v864_v53  ;;  %v2979_v15 = vsel %vm2962_vm5, %v2914_v24, %v8657_v46  ;;  %v8822_v60 = vunpack.i.l.bf16 %v14819_v4  ;;  %v6875_v46 = vld [vmem:[%s14456_s3 + $0x80] sm:$0xff] }
 0x329   :  { %3979 = vst.msk [vmem:[#allocation2 + $0x19] sm:$0xff] %vm52_vm0, %v3915_v38  ;;  %v3597_v7 = vadd.f32 %v3596_v5, %v3387_v25  ;;  %v3044_v37 = vsel %vm3027_vm7, %v2979_v15, %v8817_v16  ;;  %v8338_v38 = vunpack.i.h.bf16 %v14810_v11  ;;  %v2720_v25 = vsel %vm52_vm0, %v10214_v19, %v8018_v10  ;;  %7293 = vmatpush.msra.mxu3 %v6875_v46  ;;  %v868_v15 = vld [vmem:[#allocation2 + $0x12a] sm:$0xff] }
 0x32a   :  { %v3109_v5 = vsel %vm3092_vm8, %v3044_v37, %v8977_v33  ;;  %v8183_v33 = vunpack.i.h.bf16 %v14815_v34  ;;  %v14821_v34 = vld [vmem:[#allocation39_spill] sm:$0xff] }
 0x32b   :  { %v3787_v9 = vadd.f32 %v11625_v61, %v3597_v7  ;;  %v8818_v7 = vunpack.i.h.bf16 %v14813_v40 }
 0x32d   :  { %3425 = vmatmul.f32.gmra.mxu0 %v3107_v43  ;;  %v3851_v21 = vmax.f32 %v3787_v9, 0.0  ;;  %v11660_v23 = vpop.f32.mrf.mxu1  ;;  %v2785_v43 = vsel %vm2767_vm3, %v2720_v25, %v8178_v51  ;;  %v8022_v9 = vunpack.i.l.bf16 %v14814_v20  ;;  %v8343_v51 = vunpack.i.h.bf16 %v14816_v47 }
 0x32e   :  { %v2850_v57 = vsel %vm2832_vm4, %v2785_v43, %v8338_v38  ;;  %v8983_v25 = vunpack.i.h.bf16 %v8981_v18 }
 0x32f   :  { %v3916_v1 = vadd.f32 %v11636_v0, %v3851_v21  ;;  %v2915_v58 = vsel %vm2897_vm6, %v2850_v57, %v8498_v52 }
 0x330   :  { %7851 = vmatmul.msk.f32.gmra.mxu1 %vm52_vm0, %v865_v62  ;;  %v4109_v50 = vld [vmem:[#allocation2 + $0x19] sm:$0xff]  ;;  %v2980_v27 = vsel %vm2962_vm5, %v2915_v58, %v8658_v39 }
 0x331   :  { %3980 = vst.msk [vmem:[#allocation2 + $0x21] sm:$0xff] %vm52_vm0, %v3916_v1  ;;  %v3045_v21 = vsel %vm3027_vm7, %v2980_v27, %v8818_v7  ;;  %v10215_v62 = vld [vmem:[#allocation2 + $0xd8] sm:$0xff]  ;;  %v4108_v27 = vld [vmem:[#allocation2 + $0x9] sm:$0xff] }
 0x332   :  { %v3110_v1 = vsel %vm3092_vm8, %v3045_v21, %v8978_v36  ;;  %v2721_v11 = vsel %vm52_vm0, %v10215_v62, %v8022_v9  ;;  %v14820_v7 = vld [vmem:[#allocation23_spill] sm:$0xff]  ;;  %v4107_v9 = vld [vmem:[#allocation2 + $0x1] sm:$0xff]  ;;  %v8986_v62 = vpop.permute.xlu1 %8985 }
 0x333   :  { %v2786_v30 = vsel %vm2767_vm3, %v2721_v11, %v8182_v48  ;;  %v8027_v57 = vunpack.i.l.bf16 %v14820_v7  ;;  %v8187_v48 = vunpack.i.l.bf16 %v14821_v34  ;;  %v9094_v47 = vpack.i.bf16 %v4108_v27, %v4107_v9 }
 0x334   :  { %v2851_v22 = vsel %vm2832_vm4, %v2786_v30, %v8342_v8  ;;  %v14822_v8 = vld [vmem:[#allocation56_spill] sm:$0xff]  ;;  %v8987_v46 = vunpack.i.l.bf16 %v8986_v62 }
 0x335   :  { %3428 = vmatmul.f32.gmra.mxu0 %v3108_v3  ;;  %v11677_v26 = vpop.f32.mrf.mxu1  ;;  %v8662_v3 = vunpack.i.l.bf16 %v14818_v28  ;;  %v2916_v14 = vsel %vm2897_vm6, %v2851_v22, %v8502_v49  ;;  %v14823_v49 = vld [vmem:[#allocation96_spill] sm:$0xff]  ;;  %9095 = vrot.lane.b32.xlu2 %v9094_v47, %s10424_s1 }
 0x336   :  { %v8507_v18 = vunpack.i.l.bf16 %v14823_v49 }
 0x337   :  { %v2981_v16 = vsel %vm2962_vm5, %v2916_v14, %v8662_v3 }
 0x338   :  { %v4110_v59 = vld [vmem:[#allocation2 + $0x21] sm:$0xff]  ;;  %7852 = vmatmul.msk.f32.gmra.mxu1 %vm52_vm0, %v866_v63  ;;  %v3046_v10 = vsel %vm3027_vm7, %v2981_v16, %v8822_v60  ;;  %v8503_v63 = vunpack.i.h.bf16 %v14817_v6  ;;  %v8028_v16 = vunpack.i.h.bf16 %v14820_v7 }
 0x339   :  { %v9099_v53 = vpack.i.bf16 %v4110_v59, %v4109_v50  ;;  %v3111_v37 = vsel %vm3092_vm8, %v3046_v10, %v8982_v45  ;;  %v10216_v59 = vld [vmem:[#allocation2 + $0xe0] sm:$0xff] }
 0x33a   :  { %v2722_v38 = vsel %vm52_vm0, %v10216_v59, %v8023_v56  ;;  %v14825_v60 = vld [vmem:[#allocation140_spill] sm:$0xff] }
 0x33b   :  { %9100 = vrot.lane.b32.xlu0 %v9099_v53, %s10424_s1  ;;  %v8823_v53 = vunpack.i.h.bf16 %v14819_v4  ;;  %v8827_v22 = vunpack.i.l.bf16 %v14825_v60 }
 0x33d   :  { %3431 = vmatmul.f32.gmra.mxu0 %v3109_v5  ;;  %v11694_v2 = vpop.f32.mrf.mxu1  ;;  %v8663_v5 = vunpack.i.h.bf16 %v14818_v28  ;;  %v10217_v28 = vld [vmem:[#allocation2 + $0xf0] sm:$0xff] }
 0x33e   :  { %v2723_v3 = vsel %vm52_vm0, %v10217_v28, %v8027_v57  ;;  %v14829_v28 = vld [vmem:[#allocation83_spill] sm:$0xff] }
 0x33f   :  { %v2788_v4 = vsel %vm2767_vm3, %v2723_v3, %v8187_v48  ;;  %v8512_v3 = vunpack.i.l.bf16 %v14829_v28 }
 0x340   :  { %7853 = vmatmul.msk.f32.gmra.mxu1 %vm52_vm0, %v867_v17 }
 0x345   :  { %3434 = vmatmul.f32.gmra.mxu0 %v3110_v1  ;;  %v11716_v42 = vpop.f32.mrf.mxu1  ;;  %v8347_v1 = vunpack.i.l.bf16 %v14822_v8 }
 0x347   :  { %v2853_v14 = vsel %vm2832_vm4, %v2788_v4, %v8347_v1  ;;  %v10219_v4 = vld [vmem:[#allocation2 + $0x108] sm:$0xff] }
 0x348   :  { %7854 = vmatmul.msk.f32.gmra.mxu1 %vm52_vm0, %v868_v15  ;;  %v8188_v15 = vunpack.i.h.bf16 %v14821_v34 }
 0x34a   :  { %v3390_v40 = vpop.f32.mrf.mxu0 }
 0x34b   :  { %v3600_v24 = vadd.f32 %v11660_v23, %v3390_v40  ;;  %v2787_v23 = vsel %vm2767_vm3, %v2722_v38, %v8183_v33  ;;  %v2918_v40 = vsel %vm2897_vm6, %v2853_v14, %v8507_v18  ;;  %v8508_v38 = vunpack.i.h.bf16 %v14823_v49  ;;  %v871_v49 = vld [vmem:[#allocation2 + $0x152] sm:$0xff]  ;;  %v14828_v18 = vld [vmem:[#allocation65_spill] sm:$0xff] }
 0x34c   :  { %v2852_v19 = vsel %vm2832_vm4, %v2787_v23, %v8343_v51  ;;  %v10218_v23 = vld [vmem:[#allocation2 + $0xf8] sm:$0xff] }
 0x34d   :  { %v3788_v50 = vadd.f32 %v11625_v61, %v3600_v24  ;;  %3437 = vmatmul.f32.gmra.mxu0 %v3111_v37  ;;  %v2917_v43 = vsel %vm2897_vm6, %v2852_v19, %v8503_v63  ;;  %v11735_v20 = vpop.f32.mrf.mxu1  ;;  %v870_v63 = vld [vmem:[#allocation2 + $0x142] sm:$0xff]  ;;  %v8828_v19 = vunpack.i.h.bf16 %v14825_v60  ;;  %v14831_v14 = vld [vmem:[#allocation135_spill] sm:$0xff] }
 0x34e   :  { %v2982_v58 = vsel %vm2962_vm5, %v2917_v43, %v8663_v5  ;;  %v8988_v43 = vunpack.i.h.bf16 %v8986_v62  ;;  %v8352_v62 = vunpack.i.l.bf16 %v14828_v18  ;;  %v14830_v60 = vld [vmem:[#allocation120_spill] sm:$0xff] }
 0x34f   :  { %v3852_v52 = vmax.f32 %v3788_v50, 0.0  ;;  %v3047_v17 = vsel %vm3027_vm7, %v2982_v58, %v8823_v53  ;;  %v8348_v50 = vunpack.i.h.bf16 %v14822_v8  ;;  %v2724_v53 = vsel %vm52_vm0, %v10218_v23, %v8028_v16  ;;  %v872_v23 = vld [vmem:[#allocation2 + $0x15a] sm:$0xff] }
 0x350   :  { %v3112_v6 = vsel %vm3092_vm8, %v3047_v17, %v8983_v25  ;;  %7855 = vmatmul.msk.f32.gmra.mxu1 %vm52_vm0, %v869_v44  ;;  %v14827_v44 = vld [vmem:[#allocation50_spill] sm:$0xff] }
 0x351   :  { %v3917_v39 = vadd.f32 %v11636_v0, %v3852_v52  ;;  %v8192_v47 = vunpack.i.l.bf16 %v14827_v44 }
 0x352   :  { %v3393_v36 = vpop.f32.mrf.mxu0 }
 0x353   :  { %3981 = vst.msk [vmem:[#allocation2 + $0x31] sm:$0xff] %vm52_vm0, %v3917_v39  ;;  %v3603_v21 = vadd.f32 %v11677_v26, %v3393_v36  ;;  %v14824_v26 = vld [vmem:[#allocation109_spill] sm:$0xff] }
 0x354   :  { %v8667_v30 = vunpack.i.l.bf16 %v14824_v26  ;;  %v8668_v52 = vunpack.i.h.bf16 %v14824_v26  ;;  %v14826_v36 = vld [vmem:[#allocation13_spill] sm:$0xff]  ;;  %v8991_v26 = vpop.permute.xlu2 %8990 }
 0x355   :  { %v3789_v11 = vadd.f32 %v11625_v61, %v3603_v21  ;;  %3440 = vmatmul.f32.gmra.mxu0 %v3112_v6  ;;  %v11756_v10 = vpop.f32.mrf.mxu1  ;;  %v8032_v58 = vunpack.i.l.bf16 %v14826_v36  ;;  %v8992_v16 = vunpack.i.l.bf16 %v8991_v26 }
 0x356   :  { %v2983_v24 = vsel %vm2962_vm5, %v2918_v40, %v8667_v30 }
 0x357   :  { %v3853_v45 = vmax.f32 %v3789_v11, 0.0  ;;  %v3048_v37 = vsel %vm3027_vm7, %v2983_v24, %v8827_v22  ;;  %v8672_v22 = vunpack.i.l.bf16 %v14830_v60 }
 0x358   :  { %v3113_v59 = vsel %vm3092_vm8, %v3048_v37, %v8987_v46  ;;  %7856 = vmatmul.msk.f32.gmra.mxu1 %vm52_vm0, %v870_v63  ;;  %v8832_v46 = vunpack.i.l.bf16 %v14831_v14 }
 0x359   :  { %v3918_v56 = vadd.f32 %v11636_v0, %v3853_v45 }
 0x35a   :  { %v3396_v33 = vpop.f32.mrf.mxu0  ;;  %v4111_v48 = vld [vmem:[#allocation2 + $0x31] sm:$0xff] }
 0x35b   :  { %3982 = vst.msk [vmem:[#allocation2 + $0x39] sm:$0xff] %vm52_vm0, %v3918_v56  ;;  %v3606_v51 = vadd.f32 %v11694_v2, %v3396_v33  ;;  %v2789_v2 = vsel %vm2767_vm3, %v2724_v53, %v8188_v15  ;;  %v8033_v15 = vunpack.i.h.bf16 %v14826_v36  ;;  %v8353_v53 = vunpack.i.h.bf16 %v14828_v18 }
 0x35c   :  { %v2854_v39 = vsel %vm2832_vm4, %v2789_v2, %v8348_v50  ;;  %v8513_v2 = vunpack.i.h.bf16 %v14829_v28 }
 0x35d   :  { %v3790_v5 = vadd.f32 %v11625_v61, %v3606_v51  ;;  %3443 = vmatmul.f32.gmra.mxu0 %v3113_v59  ;;  %v2919_v57 = vsel %vm2897_vm6, %v2854_v39, %v8508_v38  ;;  %v11776_v17 = vpop.f32.mrf.mxu1  ;;  %v8193_v59 = vunpack.i.h.bf16 %v14827_v44 }
 0x35e   :  { %v2984_v34 = vsel %vm2962_vm5, %v2919_v57, %v8668_v52 }
 0x35f   :  { %v3854_v25 = vmax.f32 %v3790_v5, 0.0  ;;  %v3049_v1 = vsel %vm3027_vm7, %v2984_v34, %v8828_v19  ;;  %v14832_v34 = vld [vmem:[#allocation18_spill] sm:$0xff] }
 0x360   :  { %v3114_v11 = vsel %vm3092_vm8, %v3049_v1, %v8988_v43  ;;  %7857 = vmatmul.msk.f32.gmra.mxu1 %vm52_vm0, %v871_v49  ;;  %v8673_v43 = vunpack.i.h.bf16 %v14830_v60  ;;  %v14833_v49 = vld [vmem:[#allocation34_spill] sm:$0xff] }
 0x361   :  { %v3919_v7 = vadd.f32 %v11636_v0, %v3854_v25  ;;  %v10220_v25 = vld [vmem:[#allocation2 + $0x110] sm:$0xff]  ;;  %v8197_v18 = vunpack.i.l.bf16 %v14833_v49 }
 0x362   :  { %v3399_v9 = vpop.f32.mrf.mxu0  ;;  %v4555_v27 = vld [vmem:[#allocation2 + $0x32] sm:$0xff]  ;;  %v4556_v37 = vld [vmem:[#allocation2 + $0x3a] sm:$0xff]  ;;  %v2726_v39 = vsel %vm52_vm0, %v10220_v25, %v8033_v15 }
 0x363   :  { %v4112_v21 = vld [vmem:[#allocation2 + $0x39] sm:$0xff]  ;;  %3983 = vst.msk [vmem:[#allocation2 + $0x49] sm:$0xff] %vm52_vm0, %v3919_v7  ;;  %v3609_v8 = vadd.f32 %v11716_v42, %v3399_v9  ;;  %7897 = vmatmul.msk.f32.vlgmr.msra.gmra.mxu3 %vm52_vm0, %v4555_v27  ;;  %v2725_v42 = vsel %vm52_vm0, %v10219_v4, %v8032_v58  ;;  %v8833_v7 = vunpack.i.h.bf16 %v14831_v14  ;;  %v8993_v58 = vunpack.i.h.bf16 %v8991_v26 }
 0x364   :  { %v9104_v6 = vpack.i.bf16 %v4112_v21, %v4111_v48  ;;  %v2790_v45 = vsel %vm2767_vm3, %v2725_v42, %v8192_v47  ;;  %v8037_v48 = vunpack.i.l.bf16 %v14832_v34  ;;  %v14834_v26 = vld [vmem:[#allocation75_spill] sm:$0xff]  ;;  %v14835_v42 = vld [vmem:[#allocation88_spill] sm:$0xff] }
 0x365   :  { %v3791_v30 = vadd.f32 %v11625_v61, %v3609_v8  ;;  %3446 = vmatmul.f32.gmra.mxu0 %v3114_v11  ;;  %v2855_v40 = vsel %vm2832_vm4, %v2790_v45, %v8352_v62  ;;  %v11798_v50 = vpop.f32.mrf.mxu1  ;;  %v8517_v60 = vunpack.i.l.bf16 %v14835_v42  ;;  %v10221_v14 = vld [vmem:[#allocation2 + $0x120] sm:$0xff]  ;;  %v874_v25 = vld [vmem:[#allocation2 + $0x172] sm:$0xff] }
 0x366   :  { %9105 = vrot.lane.b32.xlu1 %v9104_v6, %s10424_s1  ;;  %v2920_v24 = vsel %vm2897_vm6, %v2855_v40, %v8512_v3  ;;  %v873_v3 = vld [vmem:[#allocation2 + $0x16a] sm:$0xff] }
 0x367   :  { %v3855_v56 = vmax.f32 %v3791_v30, 0.0  ;;  %v2985_v63 = vsel %vm2962_vm5, %v2920_v24, %v8672_v22  ;;  %v8357_v30 = vunpack.i.l.bf16 %v14834_v26  ;;  %v8996_v22 = vpop.permute.xlu0 %8995 }
 0x368   :  { %v3050_v5 = vsel %vm3027_vm7, %v2985_v63, %v8832_v46  ;;  %7858 = vmatmul.msk.f32.gmra.mxu1 %vm52_vm0, %v872_v23  ;;  %v14836_v46 = vld [vmem:[#allocation113_spill] sm:$0xff] }
 0x369   :  { %v3920_v33 = vadd.f32 %v11636_v0, %v3855_v56  ;;  %v3115_v52 = vsel %vm3092_vm8, %v3050_v5, %v8992_v16  ;;  %v8677_v56 = vunpack.i.l.bf16 %v14836_v46  ;;  %v14837_v16 = vld [vmem:[#allocation144_spill] sm:$0xff] }
 0x36a   :  { %v3402_v51 = vpop.f32.mrf.mxu0  ;;  %v4113_v8 = vld [vmem:[#allocation2 + $0x49] sm:$0xff] }
 0x36b   :  { %3984 = vst.msk [vmem:[#allocation2 + $0x51] sm:$0xff] %vm52_vm0, %v3920_v33  ;;  %v3612_v38 = vadd.f32 %v11735_v20, %v3402_v51  ;;  %7898 = vmatmul.msk.f32.gmra.mxu3 %vm52_vm0, %v4556_v37  ;;  %v2791_v20 = vsel %vm2767_vm3, %v2726_v39, %v8193_v59  ;;  %v8837_v33 = vunpack.i.l.bf16 %v14837_v16  ;;  %v8997_v51 = vunpack.i.l.bf16 %v8996_v22 }
 0x36c   :  { %v2856_v36 = vsel %vm2832_vm4, %v2791_v20, %v8353_v53  ;;  %v8038_v59 = vunpack.i.h.bf16 %v14832_v34  ;;  %v8358_v39 = vunpack.i.h.bf16 %v14834_v26  ;;  %v8518_v20 = vunpack.i.h.bf16 %v14835_v42 }
 0x36d   :  { %v3792_v19 = vadd.f32 %v11625_v61, %v3612_v38  ;;  %3449 = vmatmul.f32.gmra.mxu0 %v3115_v52  ;;  %v2921_v27 = vsel %vm2897_vm6, %v2856_v36, %v8513_v2  ;;  %v11819_v6 = vpop.f32.mrf.mxu1  ;;  %v8198_v52 = vunpack.i.h.bf16 %v14833_v49 }
 0x36e   :  { %v2986_v47 = vsel %vm2962_vm5, %v2921_v27, %v8673_v43 }
 0x36f   :  { %v3856_v57 = vmax.f32 %v3792_v19, 0.0  ;;  %v3051_v11 = vsel %vm3027_vm7, %v2986_v47, %v8833_v7  ;;  %v14838_v47 = vld [vmem:[#allocation26_spill] sm:$0xff] }
 0x370   :  { %v3116_v4 = vsel %vm3092_vm8, %v3051_v11, %v8993_v58  ;;  %7859 = vmatmul.msk.f32.gmra.mxu1 %vm52_vm0, %v873_v3  ;;  %v8678_v58 = vunpack.i.h.bf16 %v14836_v46  ;;  %v14839_v3 = vld [vmem:[#allocation42_spill] sm:$0xff] }
 0x371   :  { %v3921_v9 = vadd.f32 %v11636_v0, %v3856_v57  ;;  %v10222_v57 = vld [vmem:[#allocation2 + $0x128] sm:$0xff]  ;;  %v8202_v26 = vunpack.i.l.bf16 %v14839_v3 }
 0x372   :  { %v3405_v21 = vpop.f32.mrf.mxu0  ;;  %v4557_v44 = vld [vmem:[#allocation2 + $0x4a] sm:$0xff]  ;;  %v4558_v5 = vld [vmem:[#allocation2 + $0x52] sm:$0xff]  ;;  %v2728_v36 = vsel %vm52_vm0, %v10222_v57, %v8038_v59 }
 0x373   :  { %v4114_v1 = vld [vmem:[#allocation2 + $0x51] sm:$0xff]  ;;  %3985 = vst.msk [vmem:[#allocation2 + $0x61] sm:$0xff] %vm52_vm0, %v3921_v9  ;;  %v3615_v62 = vadd.f32 %v11756_v10, %v3405_v21  ;;  %7899 = vmatmul.msk.f32.gmra.mxu3 %vm52_vm0, %v4557_v44  ;;  %v2727_v10 = vsel %vm52_vm0, %v10221_v14, %v8037_v48  ;;  %v8838_v9 = vunpack.i.h.bf16 %v14837_v16  ;;  %v8998_v48 = vunpack.i.h.bf16 %v8996_v22 }
 0x374   :  { %v9109_v28 = vpack.i.bf16 %v4114_v1, %v4113_v8  ;;  %v2792_v40 = vsel %vm2767_vm3, %v2727_v10, %v8197_v18  ;;  %v8042_v8 = vunpack.i.l.bf16 %v14838_v47  ;;  %v14840_v22 = vld [vmem:[#allocation58_spill] sm:$0xff]  ;;  %v14841_v10 = vld [vmem:[#allocation99_spill] sm:$0xff] }
 0x375   :  { %v3793_v45 = vadd.f32 %v11625_v61, %v3615_v62  ;;  %3452 = vmatmul.f32.gmra.mxu0 %v3116_v4  ;;  %v2857_v15 = vsel %vm2832_vm4, %v2792_v40, %v8357_v30  ;;  %v11841_v53 = vpop.f32.mrf.mxu1  ;;  %v8522_v46 = vunpack.i.l.bf16 %v14841_v10  ;;  %v10223_v16 = vld [vmem:[#allocation2 + $0x138] sm:$0xff]  ;;  %v876_v57 = vld [vmem:[#allocation2 + $0x18a] sm:$0xff] }
 0x376   :  { %9110 = vrot.lane.b32.xlu2 %v9109_v28, %s10424_s1  ;;  %v2922_v37 = vsel %vm2897_vm6, %v2857_v15, %v8517_v60  ;;  %v875_v60 = vld [vmem:[#allocation2 + $0x182] sm:$0xff] }
 0x377   :  { %v3857_v24 = vmax.f32 %v3793_v45, 0.0  ;;  %v2987_v23 = vsel %vm2962_vm5, %v2922_v37, %v8677_v56  ;;  %v8362_v45 = vunpack.i.l.bf16 %v14840_v22  ;;  %v9001_v56 = vpop.permute.xlu1 %9000 }
 0x378   :  { %v3052_v19 = vsel %vm3027_vm7, %v2987_v23, %v8837_v33  ;;  %7860 = vmatmul.msk.f32.gmra.mxu1 %vm52_vm0, %v874_v25  ;;  %v14842_v33 = vld [vmem:[#allocation112_spill] sm:$0xff] }
 0x379   :  { %v3922_v63 = vadd.f32 %v11636_v0, %v3857_v24  ;;  %v3117_v43 = vsel %vm3092_vm8, %v3052_v19, %v8997_v51  ;;  %v8682_v24 = vunpack.i.l.bf16 %v14842_v33  ;;  %v14843_v51 = vld [vmem:[#allocation143_spill] sm:$0xff] }
 0x37a   :  { %v3408_v38 = vpop.f32.mrf.mxu0  ;;  %v4115_v62 = vld [vmem:[#allocation2 + $0x61] sm:$0xff]  ;;  %v8842_v37 = vunpack.i.l.bf16 %v14843_v51 }
 0x37b   :  { %3986 = vst.msk [vmem:[#allocation2 + $0x69] sm:$0xff] %vm52_vm0, %v3922_v63  ;;  %v3618_v2 = vadd.f32 %v11776_v17, %v3408_v38  ;;  %7900 = vmatmul.msk.f32.gmra.mxu3 %vm52_vm0, %v4558_v5  ;;  %v2793_v17 = vsel %vm2767_vm3, %v2728_v36, %v8198_v52  ;;  %v9002_v38 = vunpack.i.l.bf16 %v9001_v56  ;;  %v8043_v52 = vunpack.i.h.bf16 %v14838_v47 }
 0x37c   :  { %v2858_v34 = vsel %vm2832_vm4, %v2793_v17, %v8358_v39  ;;  %v8363_v36 = vunpack.i.h.bf16 %v14840_v22  ;;  %v8523_v17 = vunpack.i.h.bf16 %v14841_v10 }
 0x37d   :  { %v3794_v7 = vadd.f32 %v11625_v61, %v3618_v2  ;;  %3455 = vmatmul.f32.gmra.mxu0 %v3117_v43  ;;  %v2923_v21 = vsel %vm2897_vm6, %v2858_v34, %v8518_v20  ;;  %v11862_v28 = vpop.f32.mrf.mxu1  ;;  %v8203_v43 = vunpack.i.h.bf16 %v14839_v3 }
 0x37e   :  { %v2988_v18 = vsel %vm2962_vm5, %v2923_v21, %v8678_v58  ;;  %v8843_v21 = vunpack.i.h.bf16 %v14843_v51  ;;  %v10225_v51 = vld [vmem:[#allocation2 + $0x150] sm:$0xff] }
 0x37f   :  { %v3858_v27 = vmax.f32 %v3794_v7, 0.0  ;;  %v3053_v4 = vsel %vm3027_vm7, %v2988_v18, %v8838_v9  ;;  %v14844_v18 = vld [vmem:[#allocation14_spill] sm:$0xff] }
 0x380   :  { %v3118_v14 = vsel %vm3092_vm8, %v3053_v4, %v8998_v48  ;;  %7861 = vmatmul.msk.f32.gmra.mxu1 %vm52_vm0, %v875_v60  ;;  %v8683_v48 = vunpack.i.h.bf16 %v14842_v33  ;;  %v14845_v60 = vld [vmem:[#allocation52_spill] sm:$0xff] }
 0x381   :  { %v3923_v44 = vadd.f32 %v11636_v0, %v3858_v27  ;;  %v10224_v27 = vld [vmem:[#allocation2 + $0x140] sm:$0xff]  ;;  %v8207_v22 = vunpack.i.l.bf16 %v14845_v60 }
 0x382   :  { %v3411_v1 = vpop.f32.mrf.mxu0  ;;  %v4559_v49 = vld [vmem:[#allocation2 + $0x62] sm:$0xff]  ;;  %v4560_v19 = vld [vmem:[#allocation2 + $0x6a] sm:$0xff]  ;;  %v2730_v34 = vsel %vm52_vm0, %v10224_v27, %v8043_v52 }
 0x383   :  { %v4116_v11 = vld [vmem:[#allocation2 + $0x69] sm:$0xff]  ;;  %3987 = vst.msk [vmem:[#allocation2 + $0x79] sm:$0xff] %vm52_vm0, %v3923_v44  ;;  %v3621_v30 = vadd.f32 %v11798_v50, %v3411_v1  ;;  %7901 = vmatmul.msk.f32.gmra.mxu3 %vm52_vm0, %v4559_v49  ;;  %v2729_v50 = vsel %vm52_vm0, %v10223_v16, %v8042_v8  ;;  %v9003_v8 = vunpack.i.h.bf16 %v9001_v56  ;;  %v14846_v56 = vld [vmem:[#allocation67_spill] sm:$0xff] }
 0x384   :  { %v9114_v42 = vpack.i.bf16 %v4116_v11, %v4115_v62  ;;  %v2794_v15 = vsel %vm2767_vm3, %v2729_v50, %v8202_v26  ;;  %v8047_v62 = vunpack.i.l.bf16 %v14844_v18  ;;  %v14847_v50 = vld [vmem:[#allocation86_spill] sm:$0xff]  ;;  %v878_v27 = vld [vmem:[#allocation2 + $0x1a2] sm:$0xff] }
 0x385   :  { %v3795_v40 = vadd.f32 %v11625_v61, %v3621_v30  ;;  %3458 = vmatmul.f32.gmra.mxu0 %v3118_v14  ;;  %v2859_v59 = vsel %vm2832_vm4, %v2794_v15, %v8362_v45  ;;  %v11884_v39 = vpop.f32.mrf.mxu1  ;;  %v8527_v33 = vunpack.i.l.bf16 %v14847_v50 }
 0x386   :  { %9115 = vrot.lane.b32.xlu0 %v9114_v42, %s10424_s1  ;;  %v2924_v5 = vsel %vm2897_vm6, %v2859_v59, %v8522_v46  ;;  %v877_v46 = vld [vmem:[#allocation2 + $0x19a] sm:$0xff] }
 0x387   :  { %v3859_v63 = vmax.f32 %v3795_v40, 0.0  ;;  %v2989_v25 = vsel %vm2962_vm5, %v2924_v5, %v8682_v24  ;;  %v8367_v40 = vunpack.i.l.bf16 %v14846_v56  ;;  %v9006_v24 = vpop.permute.xlu2 %9005 }
 0x388   :  { %v3054_v7 = vsel %vm3027_vm7, %v2989_v25, %v8842_v37  ;;  %7862 = vmatmul.msk.f32.gmra.mxu1 %vm52_vm0, %v876_v57  ;;  %v14848_v37 = vld [vmem:[#allocation123_spill] sm:$0xff] }
 0x389   :  { %v3924_v23 = vadd.f32 %v11636_v0, %v3859_v63  ;;  %v3119_v58 = vsel %vm3092_vm8, %v3054_v7, %v9002_v38  ;;  %v8687_v63 = vunpack.i.l.bf16 %v14848_v37  ;;  %v14849_v38 = vld [vmem:[#allocation136_spill] sm:$0xff] }
 0x38a   :  { %v3414_v2 = vpop.f32.mrf.mxu0  ;;  %v4117_v30 = vld [vmem:[#allocation2 + $0x79] sm:$0xff]  ;;  %v8847_v5 = vunpack.i.l.bf16 %v14849_v38 }
 0x38b   :  { %3988 = vst.msk [vmem:[#allocation2 + $0x81] sm:$0xff] %vm52_vm0, %v3924_v23  ;;  %v3624_v20 = vadd.f32 %v11819_v6, %v3414_v2  ;;  %7902 = vmatmul.msk.f32.gmra.mxu3 %vm52_vm0, %v4560_v19  ;;  %v2795_v6 = vsel %vm2767_vm3, %v2730_v34, %v8203_v43  ;;  %v9007_v2 = vunpack.i.l.bf16 %v9006_v24  ;;  %v8048_v43 = vunpack.i.h.bf16 %v14844_v18 }
 0x38c   :  { %v2860_v47 = vsel %vm2832_vm4, %v2795_v6, %v8363_v36  ;;  %v8368_v34 = vunpack.i.h.bf16 %v14846_v56  ;;  %v8528_v6 = vunpack.i.h.bf16 %v14847_v50 }
 0x38d   :  { %v3796_v9 = vadd.f32 %v11625_v61, %v3624_v20  ;;  %3461 = vmatmul.f32.gmra.mxu0 %v3119_v58  ;;  %v2925_v1 = vsel %vm2897_vm6, %v2860_v47, %v8523_v17  ;;  %v11905_v42 = vpop.f32.mrf.mxu1  ;;  %v8208_v58 = vunpack.i.h.bf16 %v14845_v60 }
 0x38e   :  { %v2990_v26 = vsel %vm2962_vm5, %v2925_v1, %v8683_v48  ;;  %v8848_v1 = vunpack.i.h.bf16 %v14849_v38  ;;  %v10227_v38 = vld [vmem:[#allocation2 + $0x168] sm:$0xff] }
 0x38f   :  { %v3860_v44 = vmax.f32 %v3796_v9, 0.0  ;;  %v3055_v14 = vsel %vm3027_vm7, %v2990_v26, %v8843_v21  ;;  %v14850_v26 = vld [vmem:[#allocation20_spill] sm:$0xff] }
 0x390   :  { %v3120_v16 = vsel %vm3092_vm8, %v3055_v14, %v9003_v8  ;;  %7863 = vmatmul.msk.f32.gmra.mxu1 %vm52_vm0, %v877_v46  ;;  %v8688_v8 = vunpack.i.h.bf16 %v14848_v37  ;;  %v14851_v46 = vld [vmem:[#allocation36_spill] sm:$0xff] }
 0x391   :  { %v3925_v49 = vadd.f32 %v11636_v0, %v3860_v44  ;;  %v10226_v44 = vld [vmem:[#allocation2 + $0x158] sm:$0xff]  ;;  %v8212_v56 = vunpack.i.l.bf16 %v14851_v46 }
 0x392   :  { %v3417_v11 = vpop.f32.mrf.mxu0  ;;  %v4561_v3 = vld [vmem:[#allocation2 + $0x7a] sm:$0xff]  ;;  %v4562_v7 = vld [vmem:[#allocation2 + $0x82] sm:$0xff]  ;;  %v2732_v47 = vsel %vm52_vm0, %v10226_v44, %v8048_v43  ;;  %v880_v44 = vld [vmem:[#allocation2 + $0x1ea] sm:$0xff] }
 0x393   :  { %v4118_v4 = vld [vmem:[#allocation2 + $0x81] sm:$0xff]  ;;  %3989 = vst.msk [vmem:[#allocation2 + $0x91] sm:$0xff] %vm52_vm0, %v3925_v49  ;;  %v3627_v45 = vadd.f32 %v11841_v53, %v3417_v11  ;;  %7903 = vmatmul.msk.f32.gmra.mxu3 %vm52_vm0, %v4561_v3  ;;  %v2731_v53 = vsel %vm52_vm0, %v10225_v51, %v8047_v62  ;;  %v9008_v62 = vunpack.i.h.bf16 %v9006_v24 }
 0x394   :  { %v9119_v10 = vpack.i.bf16 %v4118_v4, %v4117_v30  ;;  %v2796_v59 = vsel %vm2767_vm3, %v2731_v53, %v8207_v22  ;;  %v8052_v30 = vunpack.i.l.bf16 %v14850_v26  ;;  %v14852_v24 = vld [vmem:[#allocation77_spill] sm:$0xff]  ;;  %v14853_v53 = vld [vmem:[#allocation90_spill] sm:$0xff] }
 0x395   :  { %v3797_v15 = vadd.f32 %v11625_v61, %v3627_v45  ;;  %3464 = vmatmul.f32.gmra.mxu0 %v3120_v16  ;;  %v2861_v52 = vsel %vm2832_vm4, %v2796_v59, %v8367_v40  ;;  %v11927_v36 = vpop.f32.mrf.mxu1  ;;  %v8532_v37 = vunpack.i.l.bf16 %v14853_v53 }
 0x396   :  { %9120 = vrot.lane.b32.xlu1 %v9119_v10, %s10424_s1  ;;  %v2926_v19 = vsel %vm2897_vm6, %v2861_v52, %v8527_v33  ;;  %v879_v33 = vld [vmem:[#allocation2 + $0x1e2] sm:$0xff] }
 0x397   :  { %v3861_v23 = vmax.f32 %v3797_v15, 0.0  ;;  %v2991_v57 = vsel %vm2962_vm5, %v2926_v19, %v8687_v63  ;;  %v8372_v15 = vunpack.i.l.bf16 %v14852_v24  ;;  %v9011_v63 = vpop.permute.xlu0 %9010 }
 0x398   :  { %v3056_v9 = vsel %vm3027_vm7, %v2991_v57, %v8847_v5  ;;  %7864 = vmatmul.msk.f32.gmra.mxu1 %vm52_vm0, %v878_v27  ;;  %v14854_v5 = vld [vmem:[#allocation116_spill] sm:$0xff] }
 0x399   :  { %v3926_v25 = vadd.f32 %v11636_v0, %v3861_v23  ;;  %v3121_v48 = vsel %vm3092_vm8, %v3056_v9, %v9007_v2  ;;  %v8692_v23 = vunpack.i.l.bf16 %v14854_v5  ;;  %v14855_v2 = vld [vmem:[#allocation147_spill] sm:$0xff] }
 0x39a   :  { %v3420_v20 = vpop.f32.mrf.mxu0  ;;  %v4119_v45 = vld [vmem:[#allocation2 + $0x91] sm:$0xff]  ;;  %v8852_v19 = vunpack.i.l.bf16 %v14855_v2 }
 0x39b   :  { %3990 = vst.msk [vmem:[#allocation2 + $0x99] sm:$0xff] %vm52_vm0, %v3926_v25  ;;  %v3630_v17 = vadd.f32 %v11862_v28, %v3420_v20  ;;  %7904 = vmatmul.msk.f32.gmra.mxu3 %vm52_vm0, %v4562_v7  ;;  %v2797_v28 = vsel %vm2767_vm3, %v2732_v47, %v8208_v58  ;;  %v9012_v20 = vunpack.i.l.bf16 %v9011_v63  ;;  %v8053_v58 = vunpack.i.h.bf16 %v14850_v26 }
 0x39c   :  { %v2862_v18 = vsel %vm2832_vm4, %v2797_v28, %v8368_v34  ;;  %v8373_v47 = vunpack.i.h.bf16 %v14852_v24  ;;  %v8533_v28 = vunpack.i.h.bf16 %v14853_v53  ;;  %v14857_v24 = vld [vmem:[#allocation44_spill] sm:$0xff] }
 0x39d   :  { %v3798_v21 = vadd.f32 %v11625_v61, %v3630_v17  ;;  %3467 = vmatmul.f32.gmra.mxu0 %v3121_v48  ;;  %v2927_v11 = vsel %vm2897_vm6, %v2862_v18, %v8528_v6  ;;  %v11948_v10 = vpop.f32.mrf.mxu1  ;;  %v8213_v48 = vunpack.i.h.bf16 %v14851_v46 }
 0x39e   :  { %v2992_v22 = vsel %vm2962_vm5, %v2927_v11, %v8688_v8  ;;  %v8853_v11 = vunpack.i.h.bf16 %v14855_v2 }
 0x39f   :  { %v3862_v49 = vmax.f32 %v3798_v21, 0.0  ;;  %v3057_v16 = vsel %vm3027_vm7, %v2992_v22, %v8848_v1  ;;  %v14856_v22 = vld [vmem:[#allocation28_spill] sm:$0xff] }
 0x3a0   :  { %v3122_v51 = vsel %vm3092_vm8, %v3057_v16, %v9008_v62  ;;  %7865 = vmatmul.msk.f32.gmra.mxu1 %vm52_vm0, %v879_v33  ;;  %v8693_v62 = vunpack.i.h.bf16 %v14854_v5  ;;  %v366_v33 = vld [vmem:[#allocation2 + $0x1b0] sm:$0xff] }
 0x3a1   :  { %v3927_v3 = vadd.f32 %v11636_v0, %v3862_v49  ;;  %v10228_v49 = vld [vmem:[#allocation2 + $0x170] sm:$0xff] }
 0x3a2   :  { %v3423_v4 = vpop.f32.mrf.mxu0  ;;  %v4563_v60 = vld [vmem:[#allocation2 + $0x92] sm:$0xff]  ;;  %v4564_v9 = vld [vmem:[#allocation2 + $0x9a] sm:$0xff]  ;;  %v2734_v18 = vsel %vm52_vm0, %v10228_v49, %v8053_v58 }
 0x3a3   :  { %v4120_v14 = vld [vmem:[#allocation2 + $0x99] sm:$0xff]  ;;  %3991 = vst.msk [vmem:[#allocation2 + $0xa9] sm:$0xff] %vm52_vm0, %v3927_v3  ;;  %v3633_v40 = vadd.f32 %v11884_v39, %v3423_v4  ;;  %7905 = vmatmul.msk.f32.gmra.mxu3 %vm52_vm0, %v4563_v60  ;;  %v2733_v39 = vsel %vm52_vm0, %v10227_v38, %v8052_v30  ;;  %v9013_v30 = vunpack.i.h.bf16 %v9011_v63  ;;  %v14859_v5 = vld [vmem:[#allocation102_spill] sm:$0xff] }
 0x3a4   :  { %v9124_v50 = vpack.i.bf16 %v4120_v14, %v4119_v45  ;;  %v2798_v52 = vsel %vm2767_vm3, %v2733_v39, %v8212_v56  ;;  %v8057_v45 = vunpack.i.l.bf16 %v14856_v22  ;;  %v881_v63 = vld [vmem:[#allocation2 + $0x1fa] sm:$0xff] }
 0x3a5   :  { %v3799_v59 = vadd.f32 %v11625_v61, %v3633_v40  ;;  %3470 = vmatmul.f32.gmra.mxu0 %v3122_v51  ;;  %v2863_v43 = vsel %vm2832_vm4, %v2798_v52, %v8372_v15  ;;  %v11970_v34 = vpop.f32.mrf.mxu1  ;;  %v8217_v15 = vunpack.i.l.bf16 %v14857_v24  ;;  %v9016_v52 = vpop.permute.xlu1 %9015 }
 0x3a6   :  { %9125 = vrot.lane.b32.xlu2 %v9124_v50, %s10424_s1  ;;  %v2928_v7 = vsel %vm2897_vm6, %v2863_v43, %v8532_v37 }
 0x3a7   :  { %v3863_v25 = vmax.f32 %v3799_v59, 0.0  ;;  %v2993_v27 = vsel %vm2962_vm5, %v2928_v7, %v8692_v23  ;;  %v14858_v59 = vld [vmem:[#allocation60_spill] sm:$0xff]  ;;  %v8537_v23 = vunpack.i.l.bf16 %v14859_v5 }
 0x3a8   :  { %v3058_v21 = vsel %vm3027_vm7, %v2993_v27, %v8852_v19  ;;  %7866 = vmatmul.msk.f32.gmra.mxu1 %vm52_vm0, %v880_v44  ;;  %v8377_v38 = vunpack.i.l.bf16 %v14858_v59  ;;  %v14860_v19 = vld [vmem:[#allocation114_spill] sm:$0xff] }
 0x3a9   :  { %v3928_v57 = vadd.f32 %v11636_v0, %v3863_v25  ;;  %v3123_v8 = vsel %vm3092_vm8, %v3058_v21, %v9012_v20  ;;  %v8697_v25 = vunpack.i.l.bf16 %v14860_v19  ;;  %v14861_v20 = vld [vmem:[#allocation146_spill] sm:$0xff] }
 0x3aa   :  { %v3426_v17 = vpop.f32.mrf.mxu0  ;;  %v4121_v40 = vld [vmem:[#allocation2 + $0xa9] sm:$0xff]  ;;  %v8857_v7 = vunpack.i.l.bf16 %v14861_v20 }
 0x3ab   :  { %3992 = vst.msk [vmem:[#allocation2 + $0xb1] sm:$0xff] %vm52_vm0, %v3928_v57  ;;  %v3636_v6 = vadd.f32 %v11905_v42, %v3426_v17  ;;  %7906 = vmatmul.msk.f32.gmra.mxu3 %vm52_vm0, %v4564_v9  ;;  %v2799_v42 = vsel %vm2767_vm3, %v2734_v18, %v8213_v48  ;;  %v9017_v17 = vunpack.i.l.bf16 %v9016_v52  ;;  %v8058_v48 = vunpack.i.h.bf16 %v14856_v22  ;;  %v882_v18 = vld [vmem:[#allocation2 + $0x202] sm:$0xff] }
 0x3ac   :  { %v2864_v26 = vsel %vm2832_vm4, %v2799_v42, %v8373_v47 }
 0x3ad   :  { %v3800_v1 = vadd.f32 %v11625_v61, %v3636_v6  ;;  %3473 = vmatmul.f32.gmra.mxu0 %v3123_v8  ;;  %v2929_v4 = vsel %vm2897_vm6, %v2864_v26, %v8533_v28  ;;  %v11991_v50 = vpop.f32.mrf.mxu1  ;;  %v367_v8 = vld [vmem:[#allocation2 + $0x1b8] sm:$0xff]  ;;  %v8218_v28 = vunpack.i.h.bf16 %v14857_v24 }
 0x3ae   :  { %v2994_v56 = vsel %vm2962_vm5, %v2929_v4, %v8693_v62  ;;  %v8378_v62 = vunpack.i.h.bf16 %v14858_v59  ;;  %v2736_v26 = vsel %vm52_vm0, %v367_v8, %v8058_v48  ;;  %v8858_v4 = vunpack.i.h.bf16 %v14861_v20  ;;  %v10229_v20 = vld [vmem:[#allocation2 + $0x1c8] sm:$0xff] }
 0x3af   :  { %v3864_v3 = vmax.f32 %v3800_v1, 0.0  ;;  %v3059_v53 = vsel %vm3027_vm7, %v2994_v56, %v8853_v11  ;;  %v8538_v11 = vunpack.i.h.bf16 %v14859_v5  ;;  %v14862_v56 = vld [vmem:[#allocation15_spill] sm:$0xff] }
 0x3b0   :  { %v3124_v39 = vsel %vm3092_vm8, %v3059_v53, %v9013_v30  ;;  %7867 = vmatmul.msk.f32.gmra.mxu1 %vm52_vm0, %v881_v63  ;;  %v8698_v30 = vunpack.i.h.bf16 %v14860_v19  ;;  %v883_v5 = vld [vmem:[#allocation2 + $0x212] sm:$0xff]  ;;  %v8063_v8 = vunpack.i.h.bf16 %v14862_v56 }
 0x3b1   :  { %v3929_v60 = vadd.f32 %v11636_v0, %v3864_v3 }
 0x3b2   :  { %v3429_v14 = vpop.f32.mrf.mxu0  ;;  %v4565_v46 = vld [vmem:[#allocation2 + $0xaa] sm:$0xff]  ;;  %v4566_v21 = vld [vmem:[#allocation2 + $0xb2] sm:$0xff] }
 0x3b3   :  { %v4122_v16 = vld [vmem:[#allocation2 + $0xb1] sm:$0xff]  ;;  %3993 = vst.msk [vmem:[#allocation2 + $0xc1] sm:$0xff] %vm52_vm0, %v3929_v60  ;;  %v3639_v51 = vadd.f32 %v11927_v36, %v3429_v14  ;;  %7907 = vmatmul.msk.f32.gmra.mxu3 %vm52_vm0, %v4565_v46  ;;  %v2735_v36 = vsel %vm52_vm0, %v366_v33, %v8057_v45  ;;  %v9018_v45 = vunpack.i.h.bf16 %v9016_v52 }
 0x3b4   :  { %v9129_v37 = vpack.i.bf16 %v4122_v16, %v4121_v40  ;;  %v2800_v43 = vsel %vm2767_vm3, %v2735_v36, %v8217_v15  ;;  %v8062_v40 = vunpack.i.l.bf16 %v14862_v56  ;;  %v14865_v36 = vld [vmem:[#allocation89_spill] sm:$0xff] }
 0x3b5   :  { %v3801_v2 = vadd.f32 %v11625_v61, %v3639_v51  ;;  %3476 = vmatmul.f32.gmra.mxu0 %v3124_v39  ;;  %v2865_v58 = vsel %vm2832_vm4, %v2800_v43, %v8377_v38  ;;  %v12013_v47 = vpop.f32.mrf.mxu1  ;;  %v8542_v19 = vunpack.i.l.bf16 %v14865_v36 }
 0x3b6   :  { %9130 = vrot.lane.b32.xlu0 %v9129_v37, %s10424_s1  ;;  %v2930_v9 = vsel %vm2897_vm6, %v2865_v58, %v8537_v23  ;;  %v14863_v37 = vld [vmem:[#allocation54_spill] sm:$0xff]  ;;  %v14864_v23 = vld [vmem:[#allocation69_spill] sm:$0xff] }
 0x3b7   :  { %v3865_v57 = vmax.f32 %v3801_v2, 0.0  ;;  %v2995_v44 = vsel %vm2962_vm5, %v2930_v9, %v8697_v25  ;;  %v8222_v63 = vunpack.i.l.bf16 %v14863_v37  ;;  %v8382_v52 = vunpack.i.l.bf16 %v14864_v23  ;;  %v9021_v25 = vpop.permute.xlu2 %9020 }
 0x3b8   :  { %v3060_v49 = vsel %vm3027_vm7, %v2995_v44, %v8857_v7  ;;  %7868 = vmatmul.msk.f32.gmra.mxu1 %vm52_vm0, %v882_v18  ;;  %v14866_v7 = vld [vmem:[#allocation126_spill] sm:$0xff] }
 0x3b9   :  { %v3930_v27 = vadd.f32 %v11636_v0, %v3865_v57  ;;  %v3125_v42 = vsel %vm3092_vm8, %v3060_v49, %v9017_v17  ;;  %v8702_v57 = vunpack.i.l.bf16 %v14866_v7  ;;  %v14867_v17 = vld [vmem:[#allocation137_spill] sm:$0xff] }
 0x3ba   :  { %v3432_v6 = vpop.f32.mrf.mxu0  ;;  %v4123_v15 = vld [vmem:[#allocation2 + $0xc1] sm:$0xff]  ;;  %v8862_v9 = vunpack.i.l.bf16 %v14867_v17 }
 0x3bb   :  { %3994 = vst.msk [vmem:[#allocation2 + $0xc9] sm:$0xff] %vm52_vm0, %v3930_v27  ;;  %v3642_v1 = vadd.f32 %v11948_v10, %v3432_v6  ;;  %7908 = vmatmul.msk.f32.gmra.mxu3 %vm52_vm0, %v4566_v21  ;;  %v2801_v10 = vsel %vm2767_vm3, %v2736_v26, %v8218_v28  ;;  %v9022_v6 = vunpack.i.l.bf16 %v9021_v25  ;;  %v8383_v26 = vunpack.i.h.bf16 %v14864_v23 }
 0x3bc   :  { %v2866_v22 = vsel %vm2832_vm4, %v2801_v10, %v8378_v62  ;;  %v8223_v62 = vunpack.i.h.bf16 %v14863_v37  ;;  %v8543_v10 = vunpack.i.h.bf16 %v14865_v36 }
 0x3bd   :  { %v3802_v3 = vadd.f32 %v11625_v61, %v3642_v1  ;;  %3479 = vmatmul.f32.gmra.mxu0 %v3125_v42  ;;  %v2931_v14 = vsel %vm2897_vm6, %v2866_v22, %v8538_v11  ;;  %v12034_v53 = vpop.f32.mrf.mxu1 }
 0x3be   :  { %v2996_v24 = vsel %vm2962_vm5, %v2931_v14, %v8698_v30  ;;  %v8863_v14 = vunpack.i.h.bf16 %v14867_v17  ;;  %v10231_v17 = vld [vmem:[#allocation2 + $0x1e0] sm:$0xff] }
 0x3bf   :  { %v3866_v60 = vmax.f32 %v3802_v3, 0.0  ;;  %v3061_v38 = vsel %vm3027_vm7, %v2996_v24, %v8858_v4  ;;  %v884_v3 = vld [vmem:[#allocation2 + $0x21a] sm:$0xff]  ;;  %v14868_v24 = vld [vmem:[#allocation22_spill] sm:$0xff] }
 0x3c0   :  { %v3126_v2 = vsel %vm3092_vm8, %v3061_v38, %v9018_v45  ;;  %7869 = vmatmul.msk.f32.gmra.mxu1 %vm52_vm0, %v883_v5  ;;  %v8703_v45 = vunpack.i.h.bf16 %v14866_v7  ;;  %v14869_v5 = vld [vmem:[#allocation38_spill] sm:$0xff] }
 0x3c1   :  { %v3931_v46 = vadd.f32 %v11636_v0, %v3866_v60  ;;  %v10230_v60 = vld [vmem:[#allocation2 + $0x1d0] sm:$0xff]  ;;  %v8227_v23 = vunpack.i.l.bf16 %v14869_v5 }
 0x3c2   :  { %v3435_v16 = vpop.f32.mrf.mxu0  ;;  %v4567_v33 = vld [vmem:[#allocation2 + $0xc2] sm:$0xff]  ;;  %v4568_v1 = vld [vmem:[#allocation2 + $0xca] sm:$0xff]  ;;  %v2738_v22 = vsel %vm52_vm0, %v10230_v60, %v8063_v8  ;;  %v886_v60 = vld [vmem:[#allocation2 + $0x232] sm:$0xff] }
 0x3c3   :  { %v4124_v51 = vld [vmem:[#allocation2 + $0xc9] sm:$0xff]  ;;  %3995 = vst.msk [vmem:[#allocation2 + $0xd9] sm:$0xff] %vm52_vm0, %v3931_v46  ;;  %v3645_v59 = vadd.f32 %v11970_v34, %v3435_v16  ;;  %7909 = vmatmul.msk.f32.gmra.mxu3 %vm52_vm0, %v4567_v33  ;;  %v2737_v34 = vsel %vm52_vm0, %v10229_v20, %v8062_v40  ;;  %v9023_v40 = vunpack.i.h.bf16 %v9021_v25  ;;  %v14870_v25 = vld [vmem:[#allocation79_spill] sm:$0xff] }
 0x3c4   :  { %v9134_v39 = vpack.i.bf16 %v4124_v51, %v4123_v15  ;;  %v2802_v58 = vsel %vm2767_vm3, %v2737_v34, %v8222_v63  ;;  %v8067_v15 = vunpack.i.l.bf16 %v14868_v24  ;;  %v14871_v34 = vld [vmem:[#allocation92_spill] sm:$0xff] }
 0x3c5   :  { %v3803_v43 = vadd.f32 %v11625_v61, %v3645_v59  ;;  %3482 = vmatmul.f32.gmra.mxu0 %v3126_v2  ;;  %v2867_v48 = vsel %vm2832_vm4, %v2802_v58, %v8382_v52  ;;  %v12056_v18 = vpop.f32.mrf.mxu1  ;;  %v8547_v7 = vunpack.i.l.bf16 %v14871_v34 }
 0x3c6   :  { %9135 = vrot.lane.b32.xlu1 %v9134_v39, %s10424_s1  ;;  %v2932_v21 = vsel %vm2897_vm6, %v2867_v48, %v8542_v19  ;;  %v885_v19 = vld [vmem:[#allocation2 + $0x22a] sm:$0xff] }
 0x3c7   :  { %v3867_v27 = vmax.f32 %v3803_v43, 0.0  ;;  %v2997_v49 = vsel %vm2962_vm5, %v2932_v21, %v8702_v57  ;;  %v8387_v43 = vunpack.i.l.bf16 %v14870_v25  ;;  %v9026_v57 = vpop.permute.xlu0 %9025 }
 0x3c8   :  { %v3062_v11 = vsel %vm3027_vm7, %v2997_v49, %v8862_v9  ;;  %7870 = vmatmul.msk.f32.gmra.mxu1 %vm52_vm0, %v884_v3  ;;  %v14872_v9 = vld [vmem:[#allocation119_spill] sm:$0xff] }
 0x3c9   :  { %v3932_v44 = vadd.f32 %v11636_v0, %v3867_v27  ;;  %v3127_v30 = vsel %vm3092_vm8, %v3062_v11, %v9022_v6  ;;  %v8707_v27 = vunpack.i.l.bf16 %v14872_v9  ;;  %v14873_v6 = vld [vmem:[#allocation149_spill] sm:$0xff] }
 0x3ca   :  { %v3438_v28 = vpop.f32.mrf.mxu0  ;;  %v4125_v59 = vld [vmem:[#allocation2 + $0xd9] sm:$0xff]  ;;  %v8867_v21 = vunpack.i.l.bf16 %v14873_v6 }
 0x3cb   :  { %3996 = vst.msk [vmem:[#allocation2 + $0xe1] sm:$0xff] %vm52_vm0, %v3932_v44  ;;  %v3648_v42 = vadd.f32 %v11991_v50, %v3438_v28  ;;  %7910 = vmatmul.msk.f32.gmra.mxu3 %vm52_vm0, %v4568_v1  ;;  %v2803_v50 = vsel %vm2767_vm3, %v2738_v22, %v8223_v62  ;;  %v9027_v28 = vunpack.i.l.bf16 %v9026_v57  ;;  %v8068_v62 = vunpack.i.h.bf16 %v14868_v24 }
 0x3cc   :  { %v2868_v56 = vsel %vm2832_vm4, %v2803_v50, %v8383_v26  ;;  %v8388_v22 = vunpack.i.h.bf16 %v14870_v25  ;;  %v8548_v50 = vunpack.i.h.bf16 %v14871_v34 }
 0x3cd   :  { %v3804_v4 = vadd.f32 %v11625_v61, %v3648_v42  ;;  %3485 = vmatmul.f32.gmra.mxu0 %v3127_v30  ;;  %v2933_v16 = vsel %vm2897_vm6, %v2868_v56, %v8543_v10  ;;  %v12077_v39 = vpop.f32.mrf.mxu1  ;;  %v8228_v30 = vunpack.i.h.bf16 %v14869_v5 }
 0x3ce   :  { %v2998_v63 = vsel %vm2962_vm5, %v2933_v16, %v8703_v45  ;;  %v8868_v16 = vunpack.i.h.bf16 %v14873_v6 }
 0x3cf   :  { %v3868_v46 = vmax.f32 %v3804_v4, 0.0  ;;  %v3063_v2 = vsel %vm3027_vm7, %v2998_v63, %v8863_v14  ;;  %v14874_v63 = vld [vmem:[#allocation31_spill] sm:$0xff] }
 0x3d0   :  { %v3128_v20 = vsel %vm3092_vm8, %v3063_v2, %v9023_v40  ;;  %7871 = vmatmul.msk.f32.gmra.mxu1 %vm52_vm0, %v885_v19  ;;  %v8708_v40 = vunpack.i.h.bf16 %v14872_v9 }
 0x3d1   :  { %v3933_v33 = vadd.f32 %v11636_v0, %v3868_v46  ;;  %v10232_v46 = vld [vmem:[#allocation2 + $0x1e8] sm:$0xff] }
 0x3d2   :  { %v3441_v51 = vpop.f32.mrf.mxu0  ;;  %v4569_v37 = vld [vmem:[#allocation2 + $0xda] sm:$0xff]  ;;  %v4570_v11 = vld [vmem:[#allocation2 + $0xe2] sm:$0xff]  ;;  %v2740_v56 = vsel %vm52_vm0, %v10232_v46, %v8068_v62  ;;  %v888_v46 = vld [vmem:[#allocation2 + $0x24a] sm:$0xff] }
 0x3d3   :  { %v4126_v38 = vld [vmem:[#allocation2 + $0xe1] sm:$0xff]  ;;  %3997 = vst.msk [vmem:[#allocation2 + $0xf1] sm:$0xff] %vm52_vm0, %v3933_v33  ;;  %v3651_v52 = vadd.f32 %v12013_v47, %v3441_v51  ;;  %7911 = vmatmul.msk.f32.gmra.mxu3 %vm52_vm0, %v4569_v37  ;;  %v2739_v47 = vsel %vm52_vm0, %v10231_v17, %v8067_v15  ;;  %v9028_v15 = vunpack.i.h.bf16 %v9026_v57  ;;  %v14876_v57 = vld [vmem:[#allocation63_spill] sm:$0xff] }
 0x3d4   :  { %v9139_v36 = vpack.i.bf16 %v4126_v38, %v4125_v59  ;;  %v2804_v48 = vsel %vm2767_vm3, %v2739_v47, %v8227_v23  ;;  %v8072_v59 = vunpack.i.l.bf16 %v14874_v63  ;;  %v14877_v47 = vld [vmem:[#allocation104_spill] sm:$0xff] }
 0x3d5   :  { %v3805_v58 = vadd.f32 %v11625_v61, %v3651_v52  ;;  %3488 = vmatmul.f32.gmra.mxu0 %v3128_v20  ;;  %v2869_v8 = vsel %vm2832_vm4, %v2804_v48, %v8387_v43  ;;  %v12099_v26 = vpop.f32.mrf.mxu1  ;;  %v8552_v9 = vunpack.i.l.bf16 %v14877_v47 }
 0x3d6   :  { %9140 = vrot.lane.b32.xlu2 %v9139_v36, %s10424_s1  ;;  %v2934_v1 = vsel %vm2897_vm6, %v2869_v8, %v8547_v7  ;;  %v14875_v36 = vld [vmem:[#allocation46_spill] sm:$0xff]  ;;  %v887_v7 = vld [vmem:[#allocation2 + $0x242] sm:$0xff] }
 0x3d7   :  { %v3869_v44 = vmax.f32 %v3805_v58, 0.0  ;;  %v2999_v3 = vsel %vm2962_vm5, %v2934_v1, %v8707_v27  ;;  %v8232_v19 = vunpack.i.l.bf16 %v14875_v36  ;;  %v8392_v58 = vunpack.i.l.bf16 %v14876_v57  ;;  %v9031_v27 = vpop.permute.xlu1 %9030 }
 0x3d8   :  { %v3064_v4 = vsel %vm3027_vm7, %v2999_v3, %v8867_v21  ;;  %7872 = vmatmul.msk.f32.gmra.mxu1 %vm52_vm0, %v886_v60  ;;  %v14878_v21 = vld [vmem:[#allocation115_spill] sm:$0xff]  ;;  %v8872_v1 = vunpack.i.l.bf16 %v11418_v13 }
 0x3d9   :  { %v3934_v49 = vadd.f32 %v11636_v0, %v3869_v44  ;;  %v3129_v45 = vsel %vm3092_vm8, %v3064_v4, %v9027_v28  ;;  %v8712_v44 = vunpack.i.l.bf16 %v14878_v21 }
 0x3da   :  { %v3444_v42 = vpop.f32.mrf.mxu0  ;;  %v4127_v52 = vld [vmem:[#allocation2 + $0xf1] sm:$0xff] }
 0x3db   :  { %3998 = vst.msk [vmem:[#allocation2 + $0xf9] sm:$0xff] %vm52_vm0, %v3934_v49  ;;  %v3654_v10 = vadd.f32 %v12034_v53, %v3444_v42  ;;  %7912 = vmatmul.msk.f32.gmra.mxu3 %vm52_vm0, %v4570_v11  ;;  %v2805_v53 = vsel %vm2767_vm3, %v2740_v56, %v8228_v30  ;;  %v9032_v42 = vunpack.i.l.bf16 %v9031_v27  ;;  %v8073_v30 = vunpack.i.h.bf16 %v14874_v63 }
 0x3dc   :  { %v2870_v24 = vsel %vm2832_vm4, %v2805_v53, %v8388_v22  ;;  %v8233_v22 = vunpack.i.h.bf16 %v14875_v36  ;;  %v8393_v56 = vunpack.i.h.bf16 %v14876_v57  ;;  %v8553_v53 = vunpack.i.h.bf16 %v14877_v47 }
 0x3dd   :  { %v3806_v14 = vadd.f32 %v11625_v61, %v3654_v10  ;;  %3491 = vmatmul.f32.gmra.mxu0 %v3129_v45  ;;  %v2935_v51 = vsel %vm2897_vm6, %v2870_v24, %v8548_v50  ;;  %v12125_v34 = vpop.f32.mrf.mxu1 }
 0x3de   :  { %v3000_v23 = vsel %vm2962_vm5, %v2935_v51, %v8708_v40 }
 0x3df   :  { %v3870_v33 = vmax.f32 %v3806_v14, 0.0  ;;  %v3065_v43 = vsel %vm3027_vm7, %v3000_v23, %v8868_v16 }
 0x3e0   :  { %v3130_v17 = vsel %vm3092_vm8, %v3065_v43, %v9028_v15  ;;  %7873 = vmatmul.msk.f32.gmra.mxu1 %vm52_vm0, %v887_v7  ;;  %v14881_v7 = vld [vmem:[#allocation57_spill] sm:$0xff] }
 0x3e1   :  { %v3935_v37 = vadd.f32 %v11636_v0, %v3870_v33  ;;  %v10234_v33 = vld [vmem:[#allocation2 + $0x200] sm:$0xff]  ;;  %v8237_v57 = vunpack.i.l.bf16 %v14881_v7 }
 0x3e2   :  { %v3447_v38 = vpop.f32.mrf.mxu0  ;;  %v4571_v5 = vld [vmem:[#allocation2 + $0xf2] sm:$0xff]  ;;  %v4572_v4 = vld [vmem:[#allocation2 + $0xfa] sm:$0xff]  ;;  %v2742_v24 = vsel %vm52_vm0, %v10234_v33, %v8073_v30 }
 0x3e3   :  { %v4128_v2 = vld [vmem:[#allocation2 + $0xf9] sm:$0xff]  ;;  %3999 = vst.msk [vmem:[#allocation2 + $0x109] sm:$0xff] %vm52_vm0, %v3935_v37  ;;  %v3657_v25 = vadd.f32 %v12056_v18, %v3447_v38  ;;  %7913 = vmatmul.msk.f32.gmra.mxu3 %vm52_vm0, %v4571_v5  ;;  %v2807_v51 = vsel %vm2767_vm3, %v2742_v24, %v8233_v22  ;;  %v8873_v37 = vunpack.i.h.bf16 %v11418_v13  ;;  %v9033_v38 = vunpack.i.h.bf16 %v9031_v27 }
 0x3e4   :  { %v9144_v20 = vpack.i.bf16 %v4128_v2, %v4127_v52  ;;  %v10233_v18 = vld [vmem:[#allocation2 + $0x1f8] sm:$0xff]  ;;  %v14880_v52 = vld [vmem:[#allocation17_spill] sm:$0xff] }
 0x3e5   :  { %v3807_v48 = vadd.f32 %v11625_v61, %v3657_v25  ;;  %3494 = vmatmul.f32.gmra.mxu0 %v3130_v17  ;;  %v2741_v6 = vsel %vm52_vm0, %v10233_v18, %v8072_v59  ;;  %v12149_v14 = vpop.f32.mrf.mxu1  ;;  %v2872_v59 = vsel %vm2832_vm4, %v2807_v51, %v8393_v56  ;;  %v8077_v2 = vunpack.i.l.bf16 %v14880_v52  ;;  %v14882_v27 = vld [vmem:[#allocation71_spill] sm:$0xff] }
 0x3e6   :  { %9145 = vrot.lane.b32.xlu0 %v9144_v20, %s10424_s1  ;;  %v12134_v8 = vpop.f32.mrf.mxu3  ;;  %v2806_v28 = vsel %vm2767_vm3, %v2741_v6, %v8232_v19  ;;  %v2937_v5 = vsel %vm2897_vm6, %v2872_v59, %v8553_v53  ;;  %v14883_v6 = vld [vmem:[#allocation91_spill] sm:$0xff]  ;;  %v8238_v53 = vunpack.i.h.bf16 %v14881_v7  ;;  %v8398_v51 = vunpack.i.h.bf16 %v14882_v27  ;;  %v14888_v7 = vld [vmem:[#allocation25_spill] sm:$0xff] }
 0x3e7   :  { %v3871_v49 = vmax.f32 %v3807_v48, 0.0  ;;  %v2871_v62 = vsel %vm2832_vm4, %v2806_v28, %v8392_v58  ;;  %v8397_v48 = vunpack.i.l.bf16 %v14882_v27 }
 0x3e8   :  { %v2936_v11 = vsel %vm2897_vm6, %v2871_v62, %v8552_v9  ;;  %7874 = vmatmul.msk.f32.gmra.mxu1 %vm52_vm0, %v888_v46  ;;  %v889_v9 = vld [vmem:[#allocation2 + $0x25a] sm:$0xff] }
 0x3e9   :  { %v3936_v3 = vadd.f32 %v11636_v0, %v3871_v49  ;;  %v3001_v60 = vsel %vm2962_vm5, %v2936_v11, %v8712_v44  ;;  %v9036_v44 = vpop.permute.xlu2 %9035  ;;  %v14884_v49 = vld [vmem:[#allocation128_spill] sm:$0xff] }
 0x3ea   :  { %v3450_v10 = vpop.f32.mrf.mxu0  ;;  %v3066_v50 = vsel %vm3027_vm7, %v3001_v60, %v8872_v1  ;;  %v4129_v43 = vld [vmem:[#allocation2 + $0x109] sm:$0xff]  ;;  %v8717_v62 = vunpack.i.l.bf16 %v14884_v49  ;;  %v9037_v60 = vunpack.i.l.bf16 %v9036_v44 }
 0x3eb   :  { %4000 = vst.msk [vmem:[#allocation2 + $0x111] sm:$0xff] %vm52_vm0, %v3936_v3  ;;  %v3660_v45 = vadd.f32 %v12077_v39, %v3450_v10  ;;  %7914 = vmatmul.msk.f32.gmra.mxu3 %vm52_vm0, %v4572_v4  ;;  %v3131_v40 = vsel %vm3092_vm8, %v3066_v50, %v9032_v42  ;;  %v8713_v39 = vunpack.i.h.bf16 %v14878_v21  ;;  %v8557_v21 = vunpack.i.l.bf16 %v14883_v6  ;;  %v14886_v3 = vld [vmem:[#allocation139_spill] sm:$0xff] }
 0x3ec   :  { %v8877_v30 = vunpack.i.l.bf16 %v14886_v3  ;;  %v8078_v50 = vunpack.i.h.bf16 %v14880_v52 }
 0x3ed   :  { %v3808_v16 = vadd.f32 %v11625_v61, %v3660_v45  ;;  %3497 = vmatmul.f32.gmra.mxu0 %v3131_v40  ;;  %v3002_v25 = vsel %vm2962_vm5, %v2937_v5, %v8713_v39  ;;  %v12172_v47 = vpop.f32.mrf.mxu1  ;;  %v890_v39 = vld [vmem:[#allocation2 + $0x262] sm:$0xff] }
 0x3ee   :  { %v12157_v15 = vpop.f32.mrf.mxu3  ;;  %v3067_v58 = vsel %vm3027_vm7, %v3002_v25, %v8873_v37  ;;  %v9038_v25 = vunpack.i.h.bf16 %v9036_v44 }
 0x3ef   :  { %14879 = vst [vmem:[#allocation93_spill] sm:$0xff] %v12157_v15  ;;  %v3872_v63 = vmax.f32 %v3808_v16, 0.0  ;;  %v3132_v18 = vsel %vm3092_vm8, %v3067_v58, %v9033_v38  ;;  %v10236_v38 = vld [vmem:[#allocation2 + $0x218] sm:$0xff] }
 0x3f0   :  { %7875 = vmatmul.msk.f32.gmra.mxu1 %vm52_vm0, %v889_v9  ;;  %v2744_v5 = vsel %vm52_vm0, %v10236_v38, %v8078_v50 }
 0x3f1   :  { %v3937_v23 = vadd.f32 %v11636_v0, %v3872_v63  ;;  %v8558_v63 = vunpack.i.h.bf16 %v14883_v6  ;;  %v2809_v52 = vsel %vm2767_vm3, %v2744_v5, %v8238_v53 }
 0x3f2   :  { %v3453_v36 = vpop.f32.mrf.mxu0  ;;  %v4573_v19 = vld [vmem:[#allocation2 + $0x10a] sm:$0xff]  ;;  %v4574_v56 = vld [vmem:[#allocation2 + $0x112] sm:$0xff] }
 0x3f3   :  { %v4130_v20 = vld [vmem:[#allocation2 + $0x111] sm:$0xff]  ;;  %4001 = vst.msk [vmem:[#allocation2 + $0x121] sm:$0xff] %vm52_vm0, %v3937_v23  ;;  %v3663_v13 = vadd.f32 %v12099_v26, %v3453_v36  ;;  %7915 = vmatmul.msk.f32.gmra.mxu3 %vm52_vm0, %v4573_v19  ;;  %v2874_v19 = vsel %vm2832_vm4, %v2809_v52, %v8398_v51  ;;  %v892_v52 = vld [vmem:[#allocation2 + $0x27a] sm:$0xff] }
 0x3f4   :  { %v9149_v17 = vpack.i.bf16 %v4130_v20, %v4129_v43  ;;  %v10235_v26 = vld [vmem:[#allocation2 + $0x210] sm:$0xff]  ;;  %v2939_v43 = vsel %vm2897_vm6, %v2874_v19, %v8558_v63 }
 0x3f5   :  { %v3809_v28 = vadd.f32 %v11625_v61, %v3663_v13  ;;  %3500 = vmatmul.f32.gmra.mxu0 %v3132_v18  ;;  %v2743_v1 = vsel %vm52_vm0, %v10235_v26, %v8077_v2  ;;  %v12196_v24 = vpop.f32.mrf.mxu1  ;;  %v8878_v2 = vunpack.i.h.bf16 %v14886_v3  ;;  %v891_v26 = vld [vmem:[#allocation2 + $0x272] sm:$0xff] }
 0x3f6   :  { %9150 = vrot.lane.b32.xlu1 %v9149_v17, %s10424_s1  ;;  %v12181_v42 = vpop.f32.mrf.mxu3  ;;  %v2808_v11 = vsel %vm2767_vm3, %v2743_v1, %v8237_v57  ;;  %v8082_v57 = vunpack.i.l.bf16 %v14888_v7  ;;  %v14890_v1 = vld [vmem:[#allocation80_spill] sm:$0xff] }
 0x3f7   :  { %14885 = vst [vmem:[#allocation107_spill] sm:$0xff] %v12181_v42  ;;  %v3873_v10 = vmax.f32 %v3809_v28, 0.0  ;;  %v2873_v4 = vsel %vm2832_vm4, %v2808_v11, %v8397_v48  ;;  %v14889_v48 = vld [vmem:[#allocation40_spill] sm:$0xff]  ;;  %v14891_v11 = vld [vmem:[#allocation94_spill] sm:$0xff] }
 0x3f8   :  { %v2938_v22 = vsel %vm2897_vm6, %v2873_v4, %v8557_v21  ;;  %7876 = vmatmul.msk.f32.gmra.mxu1 %vm52_vm0, %v890_v39  ;;  %v8242_v18 = vunpack.i.l.bf16 %v14889_v48  ;;  %v8562_v3 = vunpack.i.l.bf16 %v14891_v11  ;;  %v8083_v39 = vunpack.i.h.bf16 %v14888_v7  ;;  %v4522_v42 = vld [vmem:[#allocation2 + $0x1a1] sm:$0xff] }
 0x3f9   :  { %v3938_v45 = vadd.f32 %v11636_v0, %v3873_v10  ;;  %v3003_v40 = vsel %vm2962_vm5, %v2938_v22, %v8717_v62  ;;  %v8563_v19 = vunpack.i.h.bf16 %v14891_v11 }
 0x3fa   :  { %v3456_v46 = vpop.f32.mrf.mxu0  ;;  %v3068_v33 = vsel %vm3027_vm7, %v3003_v40, %v8877_v30  ;;  %v4131_v9 = vld [vmem:[#allocation2 + $0x121] sm:$0xff]  ;;  %v9041_v30 = vpop.permute.xlu0 %9040 }
 0x3fb   :  { %4002 = vst.msk [vmem:[#allocation2 + $0x129] sm:$0xff] %vm52_vm0, %v3938_v45  ;;  %v3666_v16 = vadd.f32 %v12125_v34, %v3456_v46  ;;  %7916 = vmatmul.msk.f32.gmra.mxu3 %vm52_vm0, %v4574_v56  ;;  %v3133_v37 = vsel %vm3092_vm8, %v3068_v33, %v9037_v60  ;;  %v8718_v34 = vunpack.i.h.bf16 %v14884_v49  ;;  %v8402_v49 = vunpack.i.l.bf16 %v14890_v1  ;;  %v14892_v60 = vld [vmem:[#allocation122_spill] sm:$0xff] }
 0x3fc   :  { %v8722_v22 = vunpack.i.l.bf16 %v14892_v60  ;;  %v8882_v46 = vunpack.i.l.bf16 %v11433_v41  ;;  %v9042_v53 = vunpack.i.l.bf16 %v9041_v30 }
 0x3fd   :  { %v3810_v59 = vadd.f32 %v11625_v61, %v3666_v16  ;;  %3503 = vmatmul.f32.gmra.mxu0 %v3133_v37  ;;  %v3004_v17 = vsel %vm2962_vm5, %v2939_v43, %v8718_v34  ;;  %v12219_v28 = vpop.f32.mrf.mxu1  ;;  %v10238_v43 = vld [vmem:[#allocation2 + $0x230] sm:$0xff] }
 0x3fe   :  { %v12204_v23 = vpop.f32.mrf.mxu3  ;;  %v3069_v21 = vsel %vm3027_vm7, %v3004_v17, %v8878_v2  ;;  %v8403_v2 = vunpack.i.h.bf16 %v14890_v1 }
 0x3ff   :  { %14887 = vst [vmem:[#allocation138_spill] sm:$0xff] %v12204_v23  ;;  %v3874_v36 = vmax.f32 %v3810_v59, 0.0  ;;  %v3134_v62 = vsel %vm3092_vm8, %v3069_v21, %v9038_v25  ;;  %v8243_v59 = vunpack.i.h.bf16 %v14889_v48 }
 0x400   :  { %7877 = vmatmul.msk.f32.gmra.mxu1 %vm52_vm0, %v891_v26 }
 0x401   :  { %v3939_v20 = vadd.f32 %v11636_v0, %v3874_v36 }
 0x402   :  { %v3459_v13 = vpop.f32.mrf.mxu0  ;;  %v4575_v58 = vld [vmem:[#allocation2 + $0x122] sm:$0xff]  ;;  %v4576_v37 = vld [vmem:[#allocation2 + $0x12a] sm:$0xff] }
 0x403   :  { %v4132_v27 = vld [vmem:[#allocation2 + $0x129] sm:$0xff]  ;;  %4003 = vst.msk [vmem:[#allocation2 + $0x139] sm:$0xff] %vm52_vm0, %v3939_v20  ;;  %v3669_v6 = vadd.f32 %v12149_v14, %v3459_v13  ;;  %7917 = vmatmul.msk.f32.gmra.mxu3 %vm52_vm0, %v4575_v58  ;;  %v2746_v20 = vsel %vm52_vm0, %v10238_v43, %v8083_v39  ;;  %v8883_v13 = vunpack.i.h.bf16 %v11433_v41 }
 0x404   :  { %v9154_v44 = vpack.i.bf16 %v4132_v27, %v4131_v9  ;;  %v10237_v14 = vld [vmem:[#allocation2 + $0x228] sm:$0xff]  ;;  %v9043_v9 = vunpack.i.h.bf16 %v9041_v30 }
 0x405   :  { %v3811_v10 = vadd.f32 %v11625_v61, %v3669_v6  ;;  %3506 = vmatmul.f32.gmra.mxu0 %v3134_v62  ;;  %v2745_v4 = vsel %vm52_vm0, %v10237_v14, %v8082_v57  ;;  %v12243_v34 = vpop.f32.mrf.mxu1  ;;  %v2811_v57 = vsel %vm2767_vm3, %v2746_v20, %v8243_v59  ;;  %v14896_v62 = vld [vmem:[#allocation49_spill] sm:$0xff] }
 0x406   :  { %9155 = vrot.lane.b32.xlu2 %v9154_v44, %s10424_s1  ;;  %v12228_v45 = vpop.f32.mrf.mxu3  ;;  %v2810_v50 = vsel %vm2767_vm3, %v2745_v4, %v8242_v18  ;;  %v2876_v17 = vsel %vm2832_vm4, %v2811_v57, %v8403_v2  ;;  %v14895_v18 = vld [vmem:[#allocation33_spill] sm:$0xff]  ;;  %v8247_v11 = vunpack.i.l.bf16 %v14896_v62  ;;  %v14897_v4 = vld [vmem:[#allocation66_spill] sm:$0xff]  ;;  %v8248_v43 = vunpack.i.h.bf16 %v14896_v62 }
 0x407   :  { %14893 = vst [vmem:[#allocation12_spill] sm:$0xff] %v12228_v45  ;;  %v3875_v56 = vmax.f32 %v3811_v10, 0.0  ;;  %v2875_v40 = vsel %vm2832_vm4, %v2810_v50, %v8402_v49  ;;  %v2941_v27 = vsel %vm2897_vm6, %v2876_v17, %v8563_v19  ;;  %v8087_v6 = vunpack.i.l.bf16 %v14895_v18  ;;  %v893_v14 = vld [vmem:[#allocation2 + $0x28a] sm:$0xff] }
 0x408   :  { %v2940_v16 = vsel %vm2897_vm6, %v2875_v40, %v8562_v3  ;;  %7878 = vmatmul.msk.f32.gmra.mxu1 %vm52_vm0, %v892_v52  ;;  %v14898_v50 = vld [vmem:[#allocation105_spill] sm:$0xff]  ;;  %v8088_v2 = vunpack.i.h.bf16 %v14895_v18 }
 0x409   :  { %v3940_v33 = vadd.f32 %v11636_v0, %v3875_v56  ;;  %v3005_v63 = vsel %vm2962_vm5, %v2940_v16, %v8722_v22  ;;  %v9046_v56 = vpop.permute.xlu1 %9045  ;;  %v14899_v16 = vld [vmem:[#allocation118_spill] sm:$0xff] }
 0x40a   :  { %v3462_v51 = vpop.f32.mrf.mxu0  ;;  %v3070_v5 = vsel %vm3027_vm7, %v3005_v63, %v8882_v46  ;;  %v4133_v1 = vld [vmem:[#allocation2 + $0x139] sm:$0xff]  ;;  %v8567_v46 = vunpack.i.l.bf16 %v14898_v50 }
 0x40b   :  { %4004 = vst.msk [vmem:[#allocation2 + $0x141] sm:$0xff] %vm52_vm0, %v3940_v33  ;;  %v3672_v38 = vadd.f32 %v12172_v47, %v3462_v51  ;;  %7918 = vmatmul.msk.f32.gmra.mxu3 %vm52_vm0, %v4576_v37  ;;  %v3135_v36 = vsel %vm3092_vm8, %v3070_v5, %v9042_v53  ;;  %v8723_v47 = vunpack.i.h.bf16 %v14892_v60  ;;  %v8407_v60 = vunpack.i.l.bf16 %v14897_v4 }
 0x40c   :  { %v8727_v33 = vunpack.i.l.bf16 %v14899_v16  ;;  %v8887_v37 = vunpack.i.l.bf16 %v11438_v12 }
 0x40d   :  { %v3812_v25 = vadd.f32 %v11625_v61, %v3672_v38  ;;  %3509 = vmatmul.f32.gmra.mxu0 %v3135_v36  ;;  %v3006_v26 = vsel %vm2962_vm5, %v2941_v27, %v8723_v47  ;;  %v12266_v10 = vpop.f32.mrf.mxu1  ;;  %v9047_v38 = vunpack.i.l.bf16 %v9046_v56 }
 0x40e   :  { %v12251_v7 = vpop.f32.mrf.mxu3  ;;  %v3071_v3 = vsel %vm3027_vm7, %v3006_v26, %v8883_v13  ;;  %v894_v13 = vld [vmem:[#allocation2 + $0x292] sm:$0xff] }
 0x40f   :  { %14894 = vst [vmem:[#allocation48_spill] sm:$0xff] %v12251_v7  ;;  %v3876_v58 = vmax.f32 %v3812_v25, 0.0  ;;  %v3136_v22 = vsel %vm3092_vm8, %v3071_v3, %v9043_v9  ;;  %v8568_v9 = vunpack.i.h.bf16 %v14898_v50  ;;  %v14903_v50 = vld [vmem:[#allocation59_spill] sm:$0xff] }
 0x410   :  { %7879 = vmatmul.msk.f32.gmra.mxu1 %vm52_vm0, %v893_v14 }
 0x411   :  { %v3941_v48 = vadd.f32 %v11636_v0, %v3876_v58  ;;  %v8408_v58 = vunpack.i.h.bf16 %v14897_v4 }
 0x412   :  { %v3465_v21 = vpop.f32.mrf.mxu0  ;;  %v4577_v44 = vld [vmem:[#allocation2 + $0x13a] sm:$0xff]  ;;  %v4578_v19 = vld [vmem:[#allocation2 + $0x142] sm:$0xff] }
 0x413   :  { %v4134_v49 = vld [vmem:[#allocation2 + $0x141] sm:$0xff]  ;;  %4005 = vst.msk [vmem:[#allocation2 + $0x151] sm:$0xff] %vm52_vm0, %v3941_v48  ;;  %v3675_v41 = vadd.f32 %v12196_v24, %v3465_v21  ;;  %7919 = vmatmul.msk.f32.gmra.mxu3 %vm52_vm0, %v4577_v44  ;;  %v8888_v21 = vunpack.i.h.bf16 %v11438_v12  ;;  %v8252_v12 = vunpack.i.l.bf16 %v14903_v50 }
 0x414   :  { %v9159_v30 = vpack.i.bf16 %v4134_v49, %v4133_v1  ;;  %v10239_v24 = vld [vmem:[#allocation2 + $0x240] sm:$0xff]  ;;  %v10240_v48 = vld [vmem:[#allocation2 + $0x248] sm:$0xff]  ;;  %v9048_v49 = vunpack.i.h.bf16 %v9046_v56 }
 0x415   :  { %v3813_v40 = vadd.f32 %v11625_v61, %v3675_v41  ;;  %3512 = vmatmul.f32.gmra.mxu0 %v3136_v22  ;;  %v2747_v53 = vsel %vm52_vm0, %v10239_v24, %v8087_v6  ;;  %v12290_v57 = vpop.f32.mrf.mxu1  ;;  %v2748_v18 = vsel %vm52_vm0, %v10240_v48, %v8088_v2  ;;  %v14902_v41 = vld [vmem:[#allocation19_spill] sm:$0xff] }
 0x416   :  { %9160 = vrot.lane.b32.xlu0 %v9159_v30, %s10424_s1  ;;  %v12275_v39 = vpop.f32.mrf.mxu3  ;;  %v2812_v51 = vsel %vm2767_vm3, %v2747_v53, %v8247_v11  ;;  %v2813_v6 = vsel %vm2767_vm3, %v2748_v18, %v8248_v43  ;;  %v8092_v3 = vunpack.i.l.bf16 %v14902_v41  ;;  %v895_v53 = vld [vmem:[#allocation2 + $0x2a2] sm:$0xff] }
 0x417   :  { %14900 = vst [vmem:[#allocation62_spill] sm:$0xff] %v12275_v39  ;;  %v3877_v63 = vmax.f32 %v3813_v40, 0.0  ;;  %v2877_v59 = vsel %vm2832_vm4, %v2812_v51, %v8407_v60  ;;  %v2878_v1 = vsel %vm2832_vm4, %v2813_v6, %v8408_v58 }
 0x418   :  { %v2942_v5 = vsel %vm2897_vm6, %v2877_v59, %v8567_v46  ;;  %7880 = vmatmul.msk.f32.gmra.mxu1 %vm52_vm0, %v894_v13  ;;  %v2943_v62 = vsel %vm2897_vm6, %v2878_v1, %v8568_v9  ;;  %v9051_v59 = vpop.permute.xlu2 %9050  ;;  %v8093_v9 = vunpack.i.h.bf16 %v14902_v41  ;;  %v896_v1 = vld [vmem:[#allocation2 + $0x2aa] sm:$0xff] }
 0x419   :  { %v3942_v52 = vadd.f32 %v11636_v0, %v3877_v63  ;;  %v3007_v25 = vsel %vm2962_vm5, %v2942_v5, %v8727_v33 }
 0x41a   :  { %v3468_v36 = vpop.f32.mrf.mxu0  ;;  %v3072_v47 = vsel %vm3027_vm7, %v3007_v25, %v8887_v37  ;;  %v4135_v60 = vld [vmem:[#allocation2 + $0x151] sm:$0xff] }
 0x41b   :  { %4006 = vst.msk [vmem:[#allocation2 + $0x159] sm:$0xff] %vm52_vm0, %v3942_v52  ;;  %v3678_v20 = vadd.f32 %v12219_v28, %v3468_v36  ;;  %7920 = vmatmul.msk.f32.gmra.mxu3 %vm52_vm0, %v4578_v19  ;;  %v3137_v17 = vsel %vm3092_vm8, %v3072_v47, %v9047_v38  ;;  %v8728_v28 = vunpack.i.h.bf16 %v14899_v16  ;;  %v14904_v16 = vld [vmem:[#allocation73_spill] sm:$0xff]  ;;  %v14905_v37 = vld [vmem:[#allocation95_spill] sm:$0xff]  ;;  %v14906_v52 = vld [vmem:[#allocation130_spill] sm:$0xff]  ;;  %v9052_v47 = vunpack.i.l.bf16 %v9051_v59 }
 0x41c   :  { %v8412_v33 = vunpack.i.l.bf16 %v14904_v16  ;;  %v8572_v63 = vunpack.i.l.bf16 %v14905_v37  ;;  %v8732_v2 = vunpack.i.l.bf16 %v14906_v52  ;;  %v14907_v19 = vld [vmem:[#allocation142_spill] sm:$0xff] }
 0x41d   :  { %v3814_v27 = vadd.f32 %v11625_v61, %v3678_v20  ;;  %3515 = vmatmul.f32.gmra.mxu0 %v3137_v17  ;;  %v3008_v4 = vsel %vm2962_vm5, %v2943_v62, %v8728_v28  ;;  %v12313_v24 = vpop.f32.mrf.mxu1  ;;  %v8892_v25 = vunpack.i.l.bf16 %v14907_v19  ;;  %v8253_v28 = vunpack.i.h.bf16 %v14903_v50 }
 0x41e   :  { %v12301_v26 = vpop.f32.mrf.mxu3  ;;  %v3073_v56 = vsel %vm3027_vm7, %v3008_v4, %v8888_v21  ;;  %v8893_v4 = vunpack.i.h.bf16 %v14907_v19  ;;  %v9053_v50 = vunpack.i.h.bf16 %v9051_v59  ;;  %v14912_v19 = vld [vmem:[#allocation82_spill] sm:$0xff] }
 0x41f   :  { %v3878_v44 = vmax.f32 %v3814_v27, 0.0  ;;  %14901 = vst [vmem:[#allocation81_spill] sm:$0xff] %v12301_v26  ;;  %v3138_v51 = vsel %vm3092_vm8, %v3073_v56, %v9048_v49  ;;  %v8413_v49 = vunpack.i.h.bf16 %v14904_v16  ;;  %v14909_v56 = vld [vmem:[#allocation27_spill] sm:$0xff] }
 0x420   :  { %7881 = vmatmul.msk.f32.gmra.mxu1 %vm52_vm0, %v895_v53 }
 0x421   :  { %v3943_v11 = vadd.f32 %v11636_v0, %v3878_v44 }
 0x422   :  { %v3471_v30 = vpop.f32.mrf.mxu0  ;;  %v4579_v14 = vld [vmem:[#allocation2 + $0x152] sm:$0xff]  ;;  %v4580_v48 = vld [vmem:[#allocation2 + $0x15a] sm:$0xff] }
 0x423   :  { %v4136_v22 = vld [vmem:[#allocation2 + $0x159] sm:$0xff]  ;;  %4007 = vst.msk [vmem:[#allocation2 + $0x169] sm:$0xff] %vm52_vm0, %v3943_v11  ;;  %v3681_v46 = vadd.f32 %v12243_v34, %v3471_v30  ;;  %7921 = vmatmul.msk.f32.gmra.mxu3 %vm52_vm0, %v4579_v14  ;;  %v8573_v11 = vunpack.i.h.bf16 %v14905_v37 }
 0x424   :  { %v9164_v40 = vpack.i.bf16 %v4136_v22, %v4135_v60  ;;  %v10241_v34 = vld [vmem:[#allocation2 + $0x258] sm:$0xff] }
 0x425   :  { %v3815_v38 = vadd.f32 %v11625_v61, %v3681_v46  ;;  %3518 = vmatmul.f32.gmra.mxu0 %v3138_v51  ;;  %v2749_v5 = vsel %vm52_vm0, %v10241_v34, %v8092_v3  ;;  %v12337_v44 = vpop.f32.mrf.mxu1  ;;  %v10242_v3 = vld [vmem:[#allocation2 + $0x260] sm:$0xff] }
 0x426   :  { %9165 = vrot.lane.b32.xlu1 %v9164_v40, %s10424_s1  ;;  %v2814_v36 = vsel %vm2767_vm3, %v2749_v5, %v8252_v12  ;;  %v12328_v17 = vpop.f32.mrf.mxu3  ;;  %v2750_v30 = vsel %vm52_vm0, %v10242_v3, %v8093_v9  ;;  %v8097_v40 = vunpack.i.l.bf16 %v14909_v56 }
 0x427   :  { %v3879_v43 = vmax.f32 %v3815_v38, 0.0  ;;  %v2879_v20 = vsel %vm2832_vm4, %v2814_v36, %v8412_v33  ;;  %14908 = vst [vmem:[#allocation117_spill] sm:$0xff] %v12328_v17  ;;  %v2815_v14 = vsel %vm2767_vm3, %v2750_v30, %v8253_v28  ;;  %v897_v36 = vld [vmem:[#allocation2 + $0x2ba] sm:$0xff]  ;;  %v8897_v28 = vunpack.i.l.bf16 %v11442_v54 }
 0x428   :  { %v2944_v13 = vsel %vm2897_vm6, %v2879_v20, %v8572_v63  ;;  %7882 = vmatmul.msk.f32.gmra.mxu1 %vm52_vm0, %v896_v1  ;;  %v2880_v22 = vsel %vm2832_vm4, %v2815_v14, %v8413_v49  ;;  %v14910_v63 = vld [vmem:[#allocation43_spill] sm:$0xff]  ;;  %v14913_v20 = vld [vmem:[#allocation97_spill] sm:$0xff] }
 0x429   :  { %v3944_v58 = vadd.f32 %v11636_v0, %v3879_v43  ;;  %v3009_v18 = vsel %vm2962_vm5, %v2944_v13, %v8732_v2  ;;  %v2945_v12 = vsel %vm2897_vm6, %v2880_v22, %v8573_v11  ;;  %v8257_v38 = vunpack.i.l.bf16 %v14910_v63  ;;  %v9056_v13 = vpop.permute.xlu0 %9055  ;;  %v898_v22 = vld [vmem:[#allocation2 + $0x2c2] sm:$0xff] }
 0x42a   :  { %v3474_v27 = vpop.f32.mrf.mxu0  ;;  %v3074_v21 = vsel %vm3027_vm7, %v3009_v18, %v8892_v25  ;;  %v4137_v51 = vld [vmem:[#allocation2 + $0x169] sm:$0xff]  ;;  %v8417_v25 = vunpack.i.l.bf16 %v14912_v19  ;;  %v9057_v1 = vunpack.i.l.bf16 %v9056_v13  ;;  %v8098_v11 = vunpack.i.h.bf16 %v14909_v56  ;;  %v4321_v17 = vld [vmem:[#allocation2 + $0x121] sm:$0xff] }
 0x42b   :  { %4008 = vst.msk [vmem:[#allocation2 + $0x171] sm:$0xff] %vm52_vm0, %v3944_v58  ;;  %v3684_v6 = vadd.f32 %v12266_v10, %v3474_v27  ;;  %7922 = vmatmul.msk.f32.gmra.mxu3 %vm52_vm0, %v4580_v48  ;;  %v3139_v62 = vsel %vm3092_vm8, %v3074_v21, %v9052_v47  ;;  %v8733_v10 = vunpack.i.h.bf16 %v14906_v52  ;;  %v8577_v47 = vunpack.i.l.bf16 %v14913_v20  ;;  %v14914_v27 = vld [vmem:[#allocation125_spill] sm:$0xff] }
 0x42c   :  { %v8737_v48 = vunpack.i.l.bf16 %v14914_v27 }
 0x42d   :  { %v3816_v41 = vadd.f32 %v11625_v61, %v3684_v6  ;;  %3521 = vmatmul.f32.gmra.mxu0 %v3139_v62  ;;  %v3010_v33 = vsel %vm2962_vm5, %v2945_v12, %v8733_v10  ;;  %v12360_v2 = vpop.f32.mrf.mxu1  ;;  %v8258_v10 = vunpack.i.h.bf16 %v14910_v63 }
 0x42e   :  { %v12355_v34 = vpop.f32.mrf.mxu3  ;;  %v3075_v5 = vsel %vm3027_vm7, %v3010_v33, %v8893_v4 }
 0x42f   :  { %v3880_v60 = vmax.f32 %v3816_v41, 0.0  ;;  %14911 = vst [vmem:[#allocation133_spill] sm:$0xff] %v12355_v34  ;;  %v3140_v43 = vsel %vm3092_vm8, %v3075_v5, %v9053_v50  ;;  %v8418_v50 = vunpack.i.h.bf16 %v14912_v19 }
 0x430   :  { %7883 = vmatmul.msk.f32.gmra.mxu1 %vm52_vm0, %v897_v36 }
 0x431   :  { %v3945_v46 = vadd.f32 %v11636_v0, %v3880_v60 }
 0x432   :  { %v3477_v53 = vpop.f32.mrf.mxu0  ;;  %v4581_v16 = vld [vmem:[#allocation2 + $0x16a] sm:$0xff]  ;;  %v4582_v3 = vld [vmem:[#allocation2 + $0x172] sm:$0xff] }
 0x433   :  { %v4138_v37 = vld [vmem:[#allocation2 + $0x171] sm:$0xff]  ;;  %4009 = vst.msk [vmem:[#allocation2 + $0x181] sm:$0xff] %vm52_vm0, %v3945_v46  ;;  %v3687_v59 = vadd.f32 %v12290_v57, %v3477_v53  ;;  %7923 = vmatmul.msk.f32.gmra.mxu3 %vm52_vm0, %v4581_v16  ;;  %v8578_v46 = vunpack.i.h.bf16 %v14913_v20  ;;  %v8738_v16 = vunpack.i.h.bf16 %v14914_v27 }
 0x434   :  { %v9169_v52 = vpack.i.bf16 %v4138_v37, %v4137_v51  ;;  %v10243_v57 = vld [vmem:[#allocation2 + $0x270] sm:$0xff]  ;;  %v10244_v53 = vld [vmem:[#allocation2 + $0x278] sm:$0xff]  ;;  %v8898_v51 = vunpack.i.h.bf16 %v11442_v54 }
 0x435   :  { %v3817_v58 = vadd.f32 %v11625_v61, %v3687_v59  ;;  %3524 = vmatmul.f32.gmra.mxu0 %v3140_v43  ;;  %v2751_v9 = vsel %vm52_vm0, %v10243_v57, %v8097_v40  ;;  %v12382_v60 = vpop.f32.mrf.mxu1  ;;  %v14917_v20 = vld [vmem:[#allocation51_spill] sm:$0xff] }
 0x436   :  { %9170 = vrot.lane.b32.xlu2 %v9169_v52, %s10424_s1  ;;  %v2816_v18 = vsel %vm2767_vm3, %v2751_v9, %v8257_v38  ;;  %v12387_v56 = vpop.f32.mrf.mxu3  ;;  %v9058_v38 = vunpack.i.h.bf16 %v9056_v13  ;;  %v14916_v52 = vld [vmem:[#allocation35_spill] sm:$0xff]  ;;  %v14918_v9 = vld [vmem:[#allocation68_spill] sm:$0xff] }
 0x437   :  { %v3881_v6 = vmax.f32 %v3817_v58, 0.0  ;;  %v2881_v21 = vsel %vm2832_vm4, %v2816_v18, %v8417_v25  ;;  %14915 = vst [vmem:[#allocation16_spill] sm:$0xff] %v12387_v56  ;;  %v8102_v36 = vunpack.i.l.bf16 %v14916_v52  ;;  %v899_v57 = vld [vmem:[#allocation2 + $0x2d2] sm:$0xff]  ;;  %v8422_v27 = vunpack.i.l.bf16 %v14918_v9 }
 0x438   :  { %v2946_v49 = vsel %vm2897_vm6, %v2881_v21, %v8577_v47  ;;  %7884 = vmatmul.msk.f32.gmra.mxu1 %vm52_vm0, %v898_v22  ;;  %v8262_v47 = vunpack.i.l.bf16 %v14917_v20  ;;  %v14919_v18 = vld [vmem:[#allocation106_spill] sm:$0xff]  ;;  %v4315_v56 = vld [vmem:[#allocation2 + $0xd9] sm:$0xff] }
 0x439   :  { %v3946_v62 = vadd.f32 %v11636_v0, %v3881_v6  ;;  %v3011_v30 = vsel %vm2962_vm5, %v2946_v49, %v8737_v48  ;;  %v9061_v6 = vpop.permute.xlu1 %9060  ;;  %v14920_v49 = vld [vmem:[#allocation121_spill] sm:$0xff] }
 0x43a   :  { %v3480_v41 = vpop.f32.mrf.mxu0  ;;  %v3076_v4 = vsel %vm3027_vm7, %v3011_v30, %v8897_v28  ;;  %v8582_v28 = vunpack.i.l.bf16 %v14919_v18 }
 0x43b   :  { %4010 = vst.msk [vmem:[#allocation2 + $0x189] sm:$0xff] %vm52_vm0, %v3946_v62  ;;  %v3690_v14 = vadd.f32 %v12313_v24, %v3480_v41  ;;  %7924 = vmatmul.msk.f32.gmra.mxu3 %vm52_vm0, %v4582_v3  ;;  %v3141_v12 = vsel %vm3092_vm8, %v3076_v4, %v9057_v1  ;;  %v2752_v24 = vsel %vm52_vm0, %v10244_v53, %v8098_v11  ;;  %v10245_v1 = vld [vmem:[#allocation2 + $0x288] sm:$0xff]  ;;  %v8742_v62 = vunpack.i.l.bf16 %v14920_v49 }
 0x43c   :  { %v2817_v33 = vsel %vm2767_vm3, %v2752_v24, %v8258_v10  ;;  %v8902_v41 = vunpack.i.l.bf16 %v11445_v31  ;;  %v8263_v53 = vunpack.i.h.bf16 %v14917_v20  ;;  %v9063_v20 = vunpack.i.h.bf16 %v9061_v6 }
 0x43d   :  { %v3818_v40 = vadd.f32 %v11625_v61, %v3690_v14  ;;  %3527 = vmatmul.f32.gmra.mxu0 %v3141_v12  ;;  %v2882_v63 = vsel %vm2832_vm4, %v2817_v33, %v8418_v50  ;;  %v12405_v58 = vpop.f32.mrf.mxu1  ;;  %v9062_v14 = vunpack.i.l.bf16 %v9061_v6  ;;  %v8103_v50 = vunpack.i.h.bf16 %v14916_v52  ;;  %v10247_v6 = vld [vmem:[#allocation2 + $0x19a] sm:$0xff] }
 0x43e   :  { %v2947_v59 = vsel %vm2897_vm6, %v2882_v63, %v8578_v46  ;;  %v12416_v3 = vpop.f32.mrf.mxu3 }
 0x43f   :  { %v3882_v37 = vmax.f32 %v3818_v40, 0.0  ;;  %v3012_v43 = vsel %vm2962_vm5, %v2947_v59, %v8738_v16  ;;  %14921 = vst [vmem:[#allocation32_spill] sm:$0xff] %v12416_v3 }
 0x440   :  { %v3077_v13 = vsel %vm3027_vm7, %v3012_v43, %v8898_v51  ;;  %7885 = vmatmul.msk.f32.gmra.mxu1 %vm52_vm0, %v899_v57  ;;  %v900_v51 = vld [vmem:[#allocation2 + $0x2da] sm:$0xff]  ;;  %v14923_v57 = vld [vmem:[#allocation21_spill] sm:$0xff] }
 0x441   :  { %v3947_v5 = vadd.f32 %v11636_v0, %v3882_v37  ;;  %v3142_v48 = vsel %vm3092_vm8, %v3077_v13, %v9058_v38  ;;  %v8423_v37 = vunpack.i.h.bf16 %v14918_v9  ;;  %v8583_v38 = vunpack.i.h.bf16 %v14919_v18 }
 0x442   :  { %v3483_v19 = vpop.f32.mrf.mxu0  ;;  %v4583_v25 = vld [vmem:[#allocation2 + $0x182] sm:$0xff]  ;;  %v4584_v46 = vld [vmem:[#allocation2 + $0x18a] sm:$0xff]  ;;  %v8107_v9 = vunpack.i.l.bf16 %v14923_v57 }
 0x443   :  { %4011 = vst.msk [vmem:[#allocation2 + $0x1c9] sm:$0xff] %vm52_vm0, %v3947_v5  ;;  %v3693_v54 = vadd.f32 %v12337_v44, %v3483_v19  ;;  %7925 = vmatmul.msk.f32.gmra.mxu3 %vm52_vm0, %v4583_v25  ;;  %v2753_v44 = vsel %vm52_vm0, %v10245_v1, %v8102_v36  ;;  %v10246_v5 = vld [vmem:[#allocation2 + $0x290] sm:$0xff]  ;;  %v8903_v19 = vunpack.i.h.bf16 %v11445_v31 }
 0x444   :  { %v2818_v11 = vsel %vm2767_vm3, %v2753_v44, %v8262_v47  ;;  %v2754_v52 = vsel %vm52_vm0, %v10246_v5, %v8103_v50  ;;  %v14926_v50 = vld [vmem:[#allocation98_spill] sm:$0xff] }
 0x445   :  { %v3819_v21 = vadd.f32 %v11625_v61, %v3693_v54  ;;  %3530 = vmatmul.f32.gmra.mxu0 %v3142_v48  ;;  %v2883_v10 = vsel %vm2832_vm4, %v2818_v11, %v8422_v27  ;;  %v12428_v33 = vpop.f32.mrf.mxu1  ;;  %v2819_v36 = vsel %vm2767_vm3, %v2754_v52, %v8263_v53  ;;  %v901_v11 = vld [vmem:[#allocation2 + $0x2ea] sm:$0xff]  ;;  %v8108_v52 = vunpack.i.h.bf16 %v14923_v57 }
 0x446   :  { %v2948_v4 = vsel %vm2897_vm6, %v2883_v10, %v8582_v28  ;;  %v2884_v43 = vsel %vm2832_vm4, %v2819_v36, %v8423_v37  ;;  %v12441_v54 = vpop.f32.mrf.mxu3  ;;  %v14925_v10 = vld [vmem:[#allocation76_spill] sm:$0xff]  ;;  %v14928_v37 = vld [vmem:[#allocation145_spill] sm:$0xff] }
 0x447   :  { %v3883_v30 = vmax.f32 %v3819_v21, 0.0  ;;  %v3013_v40 = vsel %vm2962_vm5, %v2948_v4, %v8742_v62  ;;  %v2949_v47 = vsel %vm2897_vm6, %v2884_v43, %v8583_v38  ;;  %14922 = vst [vmem:[#allocation72_spill] sm:$0xff] %v12441_v54  ;;  %v14924_v21 = vld [vmem:[#allocation61_spill] sm:$0xff] }
 0x448   :  { %v3078_v16 = vsel %vm3027_vm7, %v3013_v40, %v8902_v41  ;;  %7886 = vmatmul.msk.f32.gmra.mxu1 %vm52_vm0, %v900_v51  ;;  %v8267_v1 = vunpack.i.l.bf16 %v14924_v21  ;;  %v4139_v41 = vld [vmem:[#allocation2 + $0x1b1] sm:$0xff]  ;;  %v10248_v40 = vld [vmem:[#allocation2 + $0x2a0] sm:$0xff] }
 0x449   :  { %v3948_v22 = vadd.f32 %v11636_v0, %v3883_v30  ;;  %v3143_v63 = vsel %vm3092_vm8, %v3078_v16, %v9062_v14  ;;  %v4140_v30 = vld [vmem:[#allocation2 + $0x1b9] sm:$0xff]  ;;  %v8427_v14 = vunpack.i.l.bf16 %v14925_v10  ;;  %v2755_v53 = vsel %vm52_vm0, %v10248_v40, %v8107_v9  ;;  %v10249_v9 = vld [vmem:[#allocation2 + $0x1a2] sm:$0xff] }
 0x44a   :  { %v3486_v12 = vpop.f32.mrf.mxu0  ;;  %v4141_v18 = vld [vmem:[#allocation2 + $0x1c9] sm:$0xff]  ;;  %v2820_v51 = vsel %vm2767_vm3, %v2755_v53, %v8267_v1 }
 0x44b   :  { %4012 = vst.msk [vmem:[#allocation2 + $0x1d1] sm:$0xff] %vm52_vm0, %v3948_v22  ;;  %v3696_v24 = vadd.f32 %v12360_v2, %v3486_v12  ;;  %7926 = vmatmul.msk.f32.gmra.mxu3 %vm52_vm0, %v4584_v46  ;;  %v8743_v2 = vunpack.i.h.bf16 %v14920_v49  ;;  %v9174_v22 = vpack.i.bf16 %v4140_v30, %v4139_v41  ;;  %v8587_v12 = vunpack.i.l.bf16 %v14926_v50  ;;  %v12456_v46 = vpop.permute.xlu2 %9065 }
 0x44c   :  { %v9067_v5 = vunpack.i.l.bf16 %v12456_v46  ;;  %v9068_v30 = vunpack.i.h.bf16 %v12456_v46 }
 0x44d   :  { %v3820_v59 = vadd.f32 %v11625_v61, %v3696_v24  ;;  %3533 = vmatmul.f32.gmra.mxu0 %v3143_v63  ;;  %v3014_v48 = vsel %vm2962_vm5, %v2949_v47, %v8743_v2  ;;  %v12451_v62 = vpop.f32.mrf.mxu1  ;;  %v14927_v24 = vld [vmem:[#allocation132_spill] sm:$0xff]  ;;  %9175 = vrot.lane.b32.xlu0 %v9174_v22, %s10424_s1  ;;  %v8907_v63 = vunpack.i.l.bf16 %v14928_v37  ;;  %v14930_v22 = vld [vmem:[#allocation29_spill] sm:$0xff] }
 0x44e   :  { %v3079_v44 = vsel %vm3027_vm7, %v3014_v48, %v8903_v19  ;;  %v8747_v16 = vunpack.i.l.bf16 %v14927_v24  ;;  %v8268_v19 = vunpack.i.h.bf16 %v14924_v21  ;;  %v12474_v47 = vpop.f32.mrf.mxu3  ;;  %v902_v48 = vld [vmem:[#allocation2 + $0x2f2] sm:$0xff]  ;;  %v10250_v21 = vld [vmem:[#allocation2 + $0x2a8] sm:$0xff] }
 0x44f   :  { %v3884_v25 = vmax.f32 %v3820_v59, 0.0  ;;  %v3144_v4 = vsel %vm3092_vm8, %v3079_v44, %v9063_v20  ;;  %v2885_v59 = vsel %vm2832_vm4, %v2820_v51, %v8427_v14  ;;  %v8428_v20 = vunpack.i.h.bf16 %v14925_v10  ;;  %14929 = vst [vmem:[#allocation85_spill] sm:$0xff] %v12474_v47 }
 0x450   :  { %7887 = vmatmul.msk.f32.gmra.mxu1 %vm52_vm0, %v901_v11  ;;  %v2950_v2 = vsel %vm2897_vm6, %v2885_v59, %v8587_v12  ;;  %v2756_v1 = vsel %vm52_vm0, %v10250_v21, %v8108_v52  ;;  %v8908_v44 = vunpack.i.h.bf16 %v14928_v37 }
 0x451   :  { %v3949_v13 = vadd.f32 %v11636_v0, %v3884_v25  ;;  %v3015_v43 = vsel %vm2962_vm5, %v2950_v2, %v8747_v16  ;;  %v14931_v16 = vld [vmem:[#allocation45_spill] sm:$0xff] }
 0x452   :  { %v3489_v27 = vpop.f32.mrf.mxu0  ;;  %v4142_v28 = vld [vmem:[#allocation2 + $0x1d1] sm:$0xff]  ;;  %v3080_v57 = vsel %vm3027_vm7, %v3015_v43, %v8907_v63  ;;  %v8272_v51 = vunpack.i.l.bf16 %v14931_v16 }
 0x453   :  { %4013 = vst.msk [vmem:[#allocation2 + $0x1e1] sm:$0xff] %vm52_vm0, %v3949_v13  ;;  %v3699_v31 = vadd.f32 %v12382_v60, %v3489_v27  ;;  %7927 = vmatmul.msk.f32.gmra.mxu3 %vm52_vm0, %v10247_v6  ;;  %v9179_v49 = vpack.i.bf16 %v4142_v28, %v4141_v18  ;;  %v8588_v18 = vunpack.i.h.bf16 %v14926_v50  ;;  %v3145_v28 = vsel %vm3092_vm8, %v3080_v57, %v9067_v5  ;;  %v14932_v5 = vld [vmem:[#allocation84_spill] sm:$0xff] }
 0x454   :  { %v8112_v50 = vunpack.i.l.bf16 %v14930_v22  ;;  %v8432_v52 = vunpack.i.l.bf16 %v14932_v5 }
 0x455   :  { %v3821_v60 = vadd.f32 %v11625_v61, %v3699_v31  ;;  %3536 = vmatmul.f32.gmra.mxu0 %v3144_v4  ;;  %9180 = vrot.lane.b32.xlu1 %v9179_v49, %s10424_s1  ;;  %v12480_v27 = vpop.f32.mrf.mxu1  ;;  %v8748_v31 = vunpack.i.h.bf16 %v14927_v24 }
 0x456   :  { %v12513_v43 = vpop.f32.mrf.mxu3 }
 0x457   :  { %v3885_v38 = vmax.f32 %v3821_v60, 0.0  ;;  %14934 = vst [vmem:[#allocation110_spill] sm:$0xff] %v12513_v43 }
 0x458   :  { %7888 = vmatmul.msk.f32.gmra.mxu1 %vm52_vm0, %v902_v48 }
 0x459   :  { %v3950_v36 = vadd.f32 %v11636_v0, %v3885_v38  ;;  %v903_v38 = vld [vmem:[#allocation2 + $0x302] sm:$0xff] }
 0x45a   :  { %v3492_v25 = vpop.f32.mrf.mxu0  ;;  %v4143_v4 = vld [vmem:[#allocation2 + $0x1e1] sm:$0xff] }
 0x45b   :  { %4014 = vst.msk [vmem:[#allocation2 + $0x1e9] sm:$0xff] %vm52_vm0, %v3950_v36  ;;  %v3702_v13 = vadd.f32 %v12405_v58, %v3492_v25  ;;  %7928 = vmatmul.msk.f32.gmra.mxu3 %vm52_vm0, %v10249_v9  ;;  %v2821_v58 = vsel %vm2767_vm3, %v2756_v1, %v8268_v19  ;;  %v14933_v36 = vld [vmem:[#allocation100_spill] sm:$0xff]  ;;  %v9071_v25 = vpop.permute.xlu0 %9070  ;;  %v14935_v9 = vld [vmem:[#allocation129_spill] sm:$0xff] }
 0x45c   :  { %v2886_v49 = vsel %vm2832_vm4, %v2821_v58, %v8428_v20  ;;  %v8592_v19 = vunpack.i.l.bf16 %v14933_v36  ;;  %v10251_v20 = vld [vmem:[#allocation2 + $0x2b8] sm:$0xff]  ;;  %v8752_v57 = vunpack.i.l.bf16 %v14935_v9  ;;  %v9072_v1 = vunpack.i.l.bf16 %v9071_v25 }
 0x45d   :  { %v3822_v6 = vadd.f32 %v11625_v61, %v3702_v13  ;;  %3539 = vmatmul.f32.gmra.mxu0 %v3145_v28  ;;  %v2951_v41 = vsel %vm2897_vm6, %v2886_v49, %v8588_v18  ;;  %v12506_v63 = vpop.f32.mrf.mxu1  ;;  %v2757_v13 = vsel %vm52_vm0, %v10251_v20, %v8112_v50  ;;  %v8912_v18 = vunpack.i.l.bf16 %v11447_v32 }
 0x45e   :  { %v3016_v14 = vsel %vm2962_vm5, %v2951_v41, %v8748_v31  ;;  %v2822_v48 = vsel %vm2767_vm3, %v2757_v13, %v8272_v51  ;;  %v8113_v31 = vunpack.i.h.bf16 %v14930_v22  ;;  %v8433_v41 = vunpack.i.h.bf16 %v14932_v5 }
 0x45f   :  { %v3886_v11 = vmax.f32 %v3822_v6, 0.0  ;;  %v3081_v40 = vsel %vm3027_vm7, %v3016_v14, %v8908_v44  ;;  %v2887_v21 = vsel %vm2832_vm4, %v2822_v48, %v8432_v52  ;;  %v8273_v44 = vunpack.i.h.bf16 %v14931_v16 }
 0x460   :  { %v3146_v2 = vsel %vm3092_vm8, %v3081_v40, %v9068_v30  ;;  %7889 = vmatmul.msk.f32.gmra.mxu1 %vm52_vm0, %v903_v38  ;;  %v2952_v6 = vsel %vm2897_vm6, %v2887_v21, %v8592_v19  ;;  %v8593_v22 = vunpack.i.h.bf16 %v14933_v36  ;;  %v8913_v51 = vunpack.i.h.bf16 %v11447_v32 }
 0x461   :  { %v3951_v10 = vadd.f32 %v11636_v0, %v3886_v11  ;;  %v3017_v11 = vsel %vm2962_vm5, %v2952_v6, %v8752_v57  ;;  %v9073_v52 = vunpack.i.h.bf16 %v9071_v25 }
 0x462   :  { %v3495_v12 = vpop.f32.mrf.mxu0  ;;  %v12496_v60 = vld [vmem:[#allocation2 + $0x1e2] sm:$0xff]  ;;  %v12499_v24 = vld [vmem:[#allocation2 + $0x1ea] sm:$0xff] }
 0x463   :  { %v4144_v53 = vld [vmem:[#allocation2 + $0x1e9] sm:$0xff]  ;;  %4015 = vst.msk [vmem:[#allocation2 + $0x1f9] sm:$0xff] %vm52_vm0, %v3951_v10  ;;  %v3705_v46 = vadd.f32 %v12428_v33, %v3495_v12  ;;  %7929 = vmatmul.msk.f32.gmra.mxu3 %vm52_vm0, %v12496_v60  ;;  %v3082_v10 = vsel %vm3027_vm7, %v3017_v11, %v8912_v18  ;;  %v10252_v12 = vld [vmem:[#allocation2 + $0x2c0] sm:$0xff] }
 0x464   :  { %v9184_v37 = vpack.i.bf16 %v4144_v53, %v4143_v4  ;;  %v904_v4 = vld [vmem:[#allocation2 + $0x30a] sm:$0xff]  ;;  %v3147_v50 = vsel %vm3092_vm8, %v3082_v10, %v9072_v1  ;;  %v2758_v40 = vsel %vm52_vm0, %v10252_v12, %v8113_v31  ;;  %v8753_v53 = vunpack.i.h.bf16 %v14935_v9  ;;  %v905_v31 = vld [vmem:[#allocation2 + $0x31a] sm:$0xff] }
 0x465   :  { %v3823_v33 = vadd.f32 %v11625_v61, %v3705_v46  ;;  %3542 = vmatmul.f32.gmra.mxu0 %v3146_v2  ;;  %v12534_v14 = vpop.f32.mrf.mxu1  ;;  %v14938_v18 = vld [vmem:[#allocation53_spill] sm:$0xff]  ;;  %v14940_v11 = vld [vmem:[#allocation108_spill] sm:$0xff] }
 0x466   :  { %9185 = vrot.lane.b32.xlu2 %v9184_v37, %s10424_s1  ;;  %v12545_v37 = vpop.f32.mrf.mxu3 }
 0x467   :  { %v3887_v28 = vmax.f32 %v3823_v33, 0.0  ;;  %14936 = vst [vmem:[#allocation141_spill] sm:$0xff] %v12545_v37  ;;  %v14937_v33 = vld [vmem:[#allocation37_spill] sm:$0xff]  ;;  %v4265_v37 = vld [vmem:[#allocation2 + $0x180] sm:$0xff] }
 0x468   :  { %7890 = vmatmul.msk.f32.gmra.mxu1 %vm52_vm0, %v904_v4  ;;  %v8117_v20 = vunpack.i.l.bf16 %v14937_v33 }
 0x469   :  { %v3952_v58 = vadd.f32 %v11636_v0, %v3887_v28  ;;  %v8277_v28 = vunpack.i.l.bf16 %v14938_v18 }
 0x46a   :  { %v3498_v49 = vpop.f32.mrf.mxu0  ;;  %v4145_v19 = vld [vmem:[#allocation2 + $0x1f9] sm:$0xff] }
 0x46b   :  { %4016 = vst.msk [vmem:[#allocation2 + $0x201] sm:$0xff] %vm52_vm0, %v3952_v58  ;;  %v3708_v30 = vadd.f32 %v12451_v62, %v3498_v49  ;;  %7930 = vmatmul.msk.f32.gmra.mxu3 %vm52_vm0, %v12499_v24  ;;  %v2823_v62 = vsel %vm2767_vm3, %v2758_v40, %v8273_v44  ;;  %v14939_v58 = vld [vmem:[#allocation70_spill] sm:$0xff]  ;;  %v8917_v40 = vunpack.i.l.bf16 %v11450_v35 }
 0x46c   :  { %v2888_v46 = vsel %vm2832_vm4, %v2823_v62, %v8433_v41  ;;  %v8437_v44 = vunpack.i.l.bf16 %v14939_v58  ;;  %v8597_v41 = vunpack.i.l.bf16 %v14940_v11 }
 0x46d   :  { %v3824_v16 = vadd.f32 %v11625_v61, %v3708_v30  ;;  %3545 = vmatmul.f32.gmra.mxu0 %v3147_v50  ;;  %v2953_v5 = vsel %vm2897_vm6, %v2888_v46, %v8593_v22  ;;  %v12561_v1 = vpop.f32.mrf.mxu1  ;;  %v9076_v30 = vpop.permute.xlu1 %9075  ;;  %v14941_v22 = vld [vmem:[#allocation124_spill] sm:$0xff] }
 0x46e   :  { %v3018_v36 = vsel %vm2962_vm5, %v2953_v5, %v8753_v53  ;;  %v8757_v50 = vunpack.i.l.bf16 %v14941_v22  ;;  %v9077_v62 = vunpack.i.l.bf16 %v9076_v30 }
 0x46f   :  { %v3888_v38 = vmax.f32 %v3824_v16, 0.0  ;;  %v3083_v32 = vsel %vm3027_vm7, %v3018_v36, %v8913_v51  ;;  %v8118_v51 = vunpack.i.h.bf16 %v14937_v33 }
 0x470   :  { %v3148_v49 = vsel %vm3092_vm8, %v3083_v32, %v9073_v52  ;;  %7891 = vmatmul.msk.f32.gmra.mxu1 %vm52_vm0, %v905_v31  ;;  %v8278_v52 = vunpack.i.h.bf16 %v14938_v18  ;;  %v906_v32 = vld [vmem:[#allocation2 + $0x322] sm:$0xff] }
 0x471   :  { %v3953_v2 = vadd.f32 %v11636_v0, %v3888_v38  ;;  %v12578_v38 = vpop.f32.mrf.mxu3 }
 0x472   :  { %v3501_v13 = vpop.f32.mrf.mxu0  ;;  %v12551_v9 = vld [vmem:[#allocation2 + $0x1fa] sm:$0xff]  ;;  %v12554_v48 = vld [vmem:[#allocation2 + $0x202] sm:$0xff]  ;;  %14942 = vst [vmem:[#allocation23_spill] sm:$0xff] %v12578_v38 }
 0x473   :  { %v4146_v57 = vld [vmem:[#allocation2 + $0x201] sm:$0xff]  ;;  %4017 = vst.msk [vmem:[#allocation2 + $0x211] sm:$0xff] %vm52_vm0, %v3953_v2  ;;  %v3711_v25 = vadd.f32 %v12480_v27, %v3501_v13  ;;  %7931 = vmatmul.msk.f32.gmra.mxu3 %vm52_vm0, %v12551_v9  ;;  %v10253_v27 = vld [vmem:[#allocation2 + $0x2d0] sm:$0xff]  ;;  %v4259_v38 = vld [vmem:[#allocation2 + $0x138] sm:$0xff] }
 0x474   :  { %v9189_v21 = vpack.i.bf16 %v4146_v57, %v4145_v19  ;;  %v2759_v4 = vsel %vm52_vm0, %v10253_v27, %v8117_v20  ;;  %v8438_v19 = vunpack.i.h.bf16 %v14939_v58  ;;  %v8598_v57 = vunpack.i.h.bf16 %v14940_v11 }
 0x475   :  { %v3825_v10 = vadd.f32 %v11625_v61, %v3711_v25  ;;  %3548 = vmatmul.f32.gmra.mxu0 %v3148_v49  ;;  %v2824_v12 = vsel %vm2767_vm3, %v2759_v4, %v8277_v28  ;;  %v12589_v13 = vpop.f32.mrf.mxu1  ;;  %v10254_v28 = vld [vmem:[#allocation2 + $0x2d8] sm:$0xff]  ;;  %v8918_v58 = vunpack.i.h.bf16 %v11450_v35 }
 0x476   :  { %9190 = vrot.lane.b32.xlu0 %v9189_v21, %s10424_s1  ;;  %v2889_v16 = vsel %vm2832_vm4, %v2824_v12, %v8437_v44  ;;  %v2760_v25 = vsel %vm52_vm0, %v10254_v28, %v8118_v51  ;;  %v8758_v21 = vunpack.i.h.bf16 %v14941_v22  ;;  %v14943_v22 = vld [vmem:[#allocation24_spill] sm:$0xff] }
 0x477   :  { %v3889_v53 = vmax.f32 %v3825_v10, 0.0  ;;  %v2954_v46 = vsel %vm2897_vm6, %v2889_v16, %v8597_v41  ;;  %v9078_v41 = vunpack.i.h.bf16 %v9076_v30 }
 0x478   :  { %v3019_v36 = vsel %vm2962_vm5, %v2954_v46, %v8757_v50  ;;  %7892 = vmatmul.msk.f32.gmra.mxu1 %vm52_vm0, %v906_v32  ;;  %v8122_v50 = vunpack.i.l.bf16 %v14943_v22  ;;  %v14947_v32 = vld [vmem:[#allocation101_spill] sm:$0xff] }
 0x479   :  { %v3954_v5 = vadd.f32 %v11636_v0, %v3889_v53  ;;  %v3084_v33 = vsel %vm3027_vm7, %v3019_v36, %v8917_v40  ;;  %v12610_v46 = vpop.f32.mrf.mxu3 }
 0x47a   :  { %v3504_v2 = vpop.f32.mrf.mxu0  ;;  %v3149_v18 = vsel %vm3092_vm8, %v3084_v33, %v9077_v62  ;;  %v4147_v4 = vld [vmem:[#allocation2 + $0x211] sm:$0xff]  ;;  %v14944_v62 = vld [vmem:[#allocation64_spill] sm:$0xff]  ;;  %14945 = vst [vmem:[#allocation39_spill] sm:$0xff] %v12610_v46  ;;  %v4263_v46 = vld [vmem:[#allocation2 + $0x168] sm:$0xff] }
 0x47b   :  { %4018 = vst.msk [vmem:[#allocation2 + $0x219] sm:$0xff] %vm52_vm0, %v3954_v5  ;;  %v3714_v20 = vadd.f32 %v12506_v63, %v3504_v2  ;;  %7932 = vmatmul.msk.f32.gmra.mxu3 %vm52_vm0, %v12554_v48  ;;  %v2825_v63 = vsel %vm2767_vm3, %v2760_v25, %v8278_v52  ;;  %v8282_v51 = vunpack.i.l.bf16 %v14944_v62  ;;  %v907_v2 = vld [vmem:[#allocation2 + $0x332] sm:$0xff] }
 0x47c   :  { %v2890_v44 = vsel %vm2832_vm4, %v2825_v63, %v8438_v19  ;;  %v14946_v19 = vld [vmem:[#allocation78_spill] sm:$0xff] }
 0x47d   :  { %v3826_v31 = vadd.f32 %v11625_v61, %v3714_v20  ;;  %3551 = vmatmul.f32.gmra.mxu0 %v3149_v18  ;;  %v2955_v11 = vsel %vm2897_vm6, %v2890_v44, %v8598_v57  ;;  %v12616_v52 = vpop.f32.mrf.mxu1  ;;  %v8442_v20 = vunpack.i.l.bf16 %v14946_v19  ;;  %v8602_v57 = vunpack.i.l.bf16 %v14947_v32  ;;  %v9081_v18 = vpop.permute.xlu2 %9080 }
 0x47e   :  { %v3020_v27 = vsel %vm2962_vm5, %v2955_v11, %v8758_v21  ;;  %v14948_v21 = vld [vmem:[#allocation134_spill] sm:$0xff] }
 0x47f   :  { %v3890_v49 = vmax.f32 %v3826_v31, 0.0  ;;  %v3085_v35 = vsel %vm3027_vm7, %v3020_v27, %v8918_v58  ;;  %v8762_v31 = vunpack.i.l.bf16 %v14948_v21  ;;  %v14949_v58 = vld [vmem:[#allocation148_spill] sm:$0xff] }
 0x480   :  { %v3150_v33 = vsel %vm3092_vm8, %v3085_v35, %v9078_v41  ;;  %7893 = vmatmul.msk.f32.gmra.mxu1 %vm52_vm0, %v907_v2  ;;  %v8922_v44 = vunpack.i.l.bf16 %v14949_v58  ;;  %v9082_v41 = vunpack.i.l.bf16 %v9081_v18  ;;  %v8603_v2 = vunpack.i.h.bf16 %v14947_v32 }
 0x481   :  { %v3955_v10 = vadd.f32 %v11636_v0, %v3890_v49 }
 0x482   :  { %v3507_v12 = vpop.f32.mrf.mxu0  ;;  %v12604_v40 = vld [vmem:[#allocation2 + $0x212] sm:$0xff]  ;;  %v12607_v16 = vld [vmem:[#allocation2 + $0x21a] sm:$0xff] }
 0x483   :  { %v4148_v53 = vld [vmem:[#allocation2 + $0x219] sm:$0xff]  ;;  %4019 = vst.msk [vmem:[#allocation2 + $0x229] sm:$0xff] %vm52_vm0, %v3955_v10  ;;  %v3717_v30 = vadd.f32 %v12534_v14, %v3507_v12  ;;  %7933 = vmatmul.msk.f32.gmra.mxu3 %vm52_vm0, %v12604_v40  ;;  %v10255_v14 = vld [vmem:[#allocation2 + $0x2e8] sm:$0xff]  ;;  %v8123_v10 = vunpack.i.h.bf16 %v14943_v22 }
 0x484   :  { %v9194_v5 = vpack.i.bf16 %v4148_v53, %v4147_v4  ;;  %v2761_v25 = vsel %vm52_vm0, %v10255_v14, %v8122_v50  ;;  %v8283_v50 = vunpack.i.h.bf16 %v14944_v62  ;;  %v8443_v53 = vunpack.i.h.bf16 %v14946_v19  ;;  %v4084_v43 = vld [vmem:[#allocation2 + $0x218] sm:$0xff] }
 0x485   :  { %v3827_v28 = vadd.f32 %v11625_v61, %v3717_v30  ;;  %3554 = vmatmul.f32.gmra.mxu0 %v3150_v33  ;;  %v2826_v63 = vsel %vm2767_vm3, %v2761_v25, %v8282_v51  ;;  %v12642_v30 = vpop.f32.mrf.mxu1  ;;  %v8763_v19 = vunpack.i.h.bf16 %v14948_v21  ;;  %v8923_v14 = vunpack.i.h.bf16 %v14949_v58 }
 0x486   :  { %9195 = vrot.lane.b32.xlu1 %v9194_v5, %s10424_s1  ;;  %v2891_v11 = vsel %vm2832_vm4, %v2826_v63, %v8442_v20  ;;  %v908_v5 = vld [vmem:[#allocation2 + $0x33a] sm:$0xff]  ;;  %v10256_v20 = vld [vmem:[#allocation2 + $0x2f0] sm:$0xff]  ;;  %v9083_v63 = vunpack.i.h.bf16 %v9081_v18 }
 0x487   :  { %v3891_v49 = vmax.f32 %v3827_v28, 0.0  ;;  %v2956_v27 = vsel %vm2897_vm6, %v2891_v11, %v8602_v57  ;;  %v2762_v33 = vsel %vm52_vm0, %v10256_v20, %v8123_v10  ;;  %v12648_v57 = vpop.f32.mrf.mxu3  ;;  %v14951_v11 = vld [vmem:[#allocation30_spill] sm:$0xff] }
 0x488   :  { %v3021_v35 = vsel %vm2962_vm5, %v2956_v27, %v8762_v31  ;;  %14950 = vst [vmem:[#allocation56_spill] sm:$0xff] %v12648_v57  ;;  %v2827_v28 = vsel %vm2767_vm3, %v2762_v33, %v8283_v50  ;;  %7894 = vmatmul.msk.f32.gmra.mxu1 %vm52_vm0, %v908_v5  ;;  %v14954_v33 = vld [vmem:[#allocation103_spill] sm:$0xff] }
 0x489   :  { %v3956_v4 = vadd.f32 %v11636_v0, %v3891_v49  ;;  %v3086_v22 = vsel %vm3027_vm7, %v3021_v35, %v8922_v44  ;;  %v2892_v32 = vsel %vm2832_vm4, %v2827_v28, %v8443_v53 }
 0x48a   :  { %v3510_v12 = vpop.f32.mrf.mxu0  ;;  %v3151_v62 = vsel %vm3092_vm8, %v3086_v22, %v9082_v41  ;;  %v2957_v31 = vsel %vm2897_vm6, %v2892_v32, %v8603_v2  ;;  %v4149_v49 = vld [vmem:[#allocation2 + $0x229] sm:$0xff]  ;;  %v8127_v41 = vunpack.i.l.bf16 %v14951_v11  ;;  %v14953_v2 = vld [vmem:[#allocation87_spill] sm:$0xff] }
 0x48b   :  { %4020 = vst.msk [vmem:[#allocation2 + $0x231] sm:$0xff] %vm52_vm0, %v3956_v4  ;;  %v3720_v51 = vadd.f32 %v12561_v1, %v3510_v12  ;;  %7934 = vmatmul.msk.f32.gmra.mxu3 %vm52_vm0, %v12607_v16  ;;  %v3022_v21 = vsel %vm2962_vm5, %v2957_v31, %v8763_v19  ;;  %v14952_v12 = vld [vmem:[#allocation47_spill] sm:$0xff]  ;;  %v909_v22 = vld [vmem:[#allocation2 + $0x34a] sm:$0xff]  ;;  %v8607_v19 = vunpack.i.l.bf16 %v14954_v33 }
 0x48c   :  { %v3087_v58 = vsel %vm3027_vm7, %v3022_v21, %v8923_v14  ;;  %v8287_v35 = vunpack.i.l.bf16 %v14952_v12  ;;  %v14955_v32 = vld [vmem:[#allocation131_spill] sm:$0xff] }
 0x48d   :  { %v3828_v1 = vadd.f32 %v11625_v61, %v3720_v51  ;;  %3557 = vmatmul.f32.gmra.mxu0 %v3151_v62  ;;  %v12669_v51 = vpop.f32.mrf.mxu1  ;;  %v8447_v62 = vunpack.i.l.bf16 %v14953_v2  ;;  %v3152_v20 = vsel %vm3092_vm8, %v3087_v58, %v9083_v63  ;;  %v8128_v58 = vunpack.i.h.bf16 %v14951_v11 }
 0x48f   :  { %v3892_v25 = vmax.f32 %v3828_v1, 0.0  ;;  %v9086_v1 = vpop.permute.xlu0 %9085  ;;  %v12683_v63 = vpop.f32.mrf.mxu3 }
 0x490   :  { %7895 = vmatmul.msk.f32.gmra.mxu1 %vm52_vm0, %v909_v22  ;;  %14956 = vst [vmem:[#allocation96_spill] sm:$0xff] %v12683_v63 }
 0x491   :  { %v3957_v44 = vadd.f32 %v11636_v0, %v3892_v25  ;;  %v8767_v25 = vunpack.i.l.bf16 %v14955_v32 }
 0x492   :  { %v3513_v10 = vpop.f32.mrf.mxu0  ;;  %v12659_v27 = vld [vmem:[#allocation2 + $0x22a] sm:$0xff]  ;;  %v12662_v50 = vld [vmem:[#allocation2 + $0x232] sm:$0xff] }
 0x493   :  { %v4150_v4 = vld [vmem:[#allocation2 + $0x231] sm:$0xff]  ;;  %4021 = vst.msk [vmem:[#allocation2 + $0x241] sm:$0xff] %vm52_vm0, %v3957_v44  ;;  %v3723_v18 = vadd.f32 %v12589_v13, %v3513_v10  ;;  %7935 = vmatmul.msk.f32.gmra.mxu3 %vm52_vm0, %v12659_v27  ;;  %v10257_v13 = vld [vmem:[#allocation2 + $0x300] sm:$0xff]  ;;  %v8927_v44 = vunpack.i.l.bf16 %v11452_v55  ;;  %v9087_v10 = vunpack.i.l.bf16 %v9086_v1 }
 0x494   :  { %v9199_v53 = vpack.i.bf16 %v4150_v4, %v4149_v49  ;;  %v2763_v14 = vsel %vm52_vm0, %v10257_v13, %v8127_v41  ;;  %v10258_v13 = vld [vmem:[#allocation2 + $0x308] sm:$0xff] }
 0x495   :  { %v3829_v28 = vadd.f32 %v11625_v61, %v3723_v18  ;;  %3560 = vmatmul.f32.gmra.mxu0 %v3152_v20  ;;  %v2828_v31 = vsel %vm2767_vm3, %v2763_v14, %v8287_v35  ;;  %v8288_v18 = vunpack.i.h.bf16 %v14952_v12  ;;  %v8448_v35 = vunpack.i.h.bf16 %v14953_v2 }
 0x496   :  { %9200 = vrot.lane.b32.xlu2 %v9199_v53, %s10424_s1  ;;  %v2893_v49 = vsel %vm2832_vm4, %v2828_v31, %v8447_v62  ;;  %v12697_v62 = vpop.f32.mrf.mxu1  ;;  %v2764_v14 = vsel %vm52_vm0, %v10258_v13, %v8128_v58  ;;  %v8768_v2 = vunpack.i.h.bf16 %v14955_v32  ;;  %v8928_v31 = vunpack.i.h.bf16 %v11452_v55  ;;  %v4182_v13 = vld [vmem:[#allocation2 + $0x82] sm:$0xff] }
 0x497   :  { %v3893_v21 = vmax.f32 %v3829_v28, 0.0  ;;  %v2958_v4 = vsel %vm2897_vm6, %v2893_v49, %v8607_v19  ;;  %v910_v19 = vld [vmem:[#allocation2 + $0x352] sm:$0xff]  ;;  %v8608_v28 = vunpack.i.h.bf16 %v14954_v33  ;;  %v9088_v49 = vunpack.i.h.bf16 %v9086_v1 }
 0x498   :  { %v3023_v22 = vsel %vm2962_vm5, %v2958_v4, %v8767_v25  ;;  %7896 = vmatmul.msk.f32.gmra.mxu1 %vm52_vm0, %v910_v19 }
 0x499   :  { %v3958_v41 = vadd.f32 %v11636_v0, %v3893_v21  ;;  %v3088_v11 = vsel %vm3027_vm7, %v3023_v22, %v8927_v44 }
 0x49a   :  { %v3516_v53 = vpop.f32.mrf.mxu0  ;;  %v3153_v12 = vsel %vm3092_vm8, %v3088_v11, %v9087_v10  ;;  %v12709_v10 = vpop.f32.mrf.mxu3  ;;  %v4151_v4 = vld [vmem:[#allocation2 + $0x241] sm:$0xff]  ;;  %v14959_v11 = vld [vmem:[#allocation55_spill] sm:$0xff] }
 0x49b   :  { %4022 = vst.msk [vmem:[#allocation2 + $0x249] sm:$0xff] %vm52_vm0, %v3958_v41  ;;  %v3726_v20 = vadd.f32 %v12616_v52, %v3516_v53  ;;  %7936 = vmatmul.msk.f32.gmra.mxu3 %vm52_vm0, %v12662_v50  ;;  %v2829_v52 = vsel %vm2767_vm3, %v2764_v14, %v8288_v18  ;;  %v14958_v41 = vld [vmem:[#allocation41_spill] sm:$0xff]  ;;  %v8292_v19 = vunpack.i.l.bf16 %v14959_v11  ;;  %v14960_v14 = vld [vmem:[#allocation74_spill] sm:$0xff]  ;;  %v4087_v47 = vld [vmem:[#allocation2 + $0x240] sm:$0xff] }
 0x49c   :  { %v2894_v44 = vsel %vm2832_vm4, %v2829_v52, %v8448_v35  ;;  %14957 = vst [vmem:[#allocation109_spill] sm:$0xff] %v12709_v10  ;;  %v8132_v53 = vunpack.i.l.bf16 %v14958_v41  ;;  %v14961_v52 = vld [vmem:[#allocation111_spill] sm:$0xff]  ;;  %v8133_v5 = vunpack.i.h.bf16 %v14958_v41 }
 0x49d   :  { %v3830_v25 = vadd.f32 %v11625_v61, %v3726_v20  ;;  %3563 = vmatmul.f32.gmra.mxu0 %v3153_v12  ;;  %v2959_v33 = vsel %vm2897_vm6, %v2894_v44, %v8608_v28  ;;  %v9091_v44 = vpop.permute.xlu1 %9090  ;;  %v4204_v10 = vld [vmem:[#allocation2 + $0x1ba] sm:$0xff] }
 0x49e   :  { %v3024_v32 = vsel %vm2962_vm5, %v2959_v33, %v8768_v2  ;;  %v12724_v12 = vpop.f32.mrf.mxu1  ;;  %v8452_v2 = vunpack.i.l.bf16 %v14960_v14 }
 0x49f   :  { %v3894_v21 = vmax.f32 %v3830_v25, 0.0  ;;  %v3089_v55 = vsel %vm3027_vm7, %v3024_v32, %v8928_v31  ;;  %v8612_v31 = vunpack.i.l.bf16 %v14961_v52 }
 0x4a0   :  { %v3154_v25 = vsel %vm3092_vm8, %v3089_v55, %v9088_v49  ;;  %v9092_v55 = vunpack.i.l.bf16 %v9091_v44 }
 0x4a1   :  { %v3959_v58 = vadd.f32 %v11636_v0, %v3894_v21 }
 0x4a2   :  { %v3519_v18 = vpop.f32.mrf.mxu0  ;;  %v12714_v22 = vld [vmem:[#allocation2 + $0x242] sm:$0xff]  ;;  %v12717_v35 = vld [vmem:[#allocation2 + $0x24a] sm:$0xff] }
 0x4a3   :  { %v4152_v20 = vld [vmem:[#allocation2 + $0x249] sm:$0xff]  ;;  %4023 = vst.msk [vmem:[#allocation2 + $0x259] sm:$0xff] %vm52_vm0, %v3959_v58  ;;  %v3729_v1 = vadd.f32 %v12642_v30, %v3519_v18  ;;  %7937 = vmatmul.msk.f32.gmra.mxu3 %vm52_vm0, %v12714_v22  ;;  %v10259_v30 = vld [vmem:[#allocation2 + $0x318] sm:$0xff]  ;;  %v8932_v18 = vunpack.i.l.bf16 %v11468_v29 }
 0x4a4   :  { %v9204_v28 = vpack.i.bf16 %v4152_v20, %v4151_v4  ;;  %v2765_v33 = vsel %vm52_vm0, %v10259_v30, %v8132_v53  ;;  %v14962_v58 = vld [vmem:[#allocation127_spill] sm:$0xff]  ;;  %v8453_v30 = vunpack.i.h.bf16 %v14960_v14 }
 0x4a5   :  { %v3831_v21 = vadd.f32 %v11625_v61, %v3729_v1  ;;  %3566 = vmatmul.f32.gmra.mxu0 %v3154_v25  ;;  %v8772_v32 = vunpack.i.l.bf16 %v14962_v58  ;;  %v2830_v4 = vsel %vm2767_vm3, %v2765_v33, %v8292_v19  ;;  %v12744_v19 = vpop.f32.mrf.mxu3  ;;  %v10260_v33 = vld [vmem:[#allocation2 + $0x320] sm:$0xff]  ;;  %v8773_v14 = vunpack.i.h.bf16 %v14962_v58 }
 0x4a6   :  { %9205 = vrot.lane.b32.xlu0 %v9204_v28, %s10424_s1  ;;  %v2895_v49 = vsel %vm2832_vm4, %v2830_v4, %v8452_v2  ;;  %v8293_v28 = vunpack.i.h.bf16 %v14959_v11  ;;  %14963 = vst [vmem:[#allocation140_spill] sm:$0xff] %v12744_v19  ;;  %v4198_v19 = vld [vmem:[#allocation2 + $0x142] sm:$0xff] }
 0x4a7   :  { %v3895_v20 = vmax.f32 %v3831_v21, 0.0  ;;  %v2960_v1 = vsel %vm2897_vm6, %v2895_v49, %v8612_v31  ;;  %v3740_v31 = vpop.f32.mrf.mxu1  ;;  %v8613_v21 = vunpack.i.h.bf16 %v14961_v52  ;;  %v9093_v52 = vunpack.i.h.bf16 %v9091_v44 }
 0x4a8   :  { %v3025_v53 = vsel %vm2962_vm5, %v2960_v1, %v8772_v32  ;;  %v2766_v32 = vsel %vm52_vm0, %v10260_v33, %v8133_v5 }
 0x4a9   :  { %v3960_v25 = vadd.f32 %v11636_v0, %v3895_v20  ;;  %v3090_v41 = vsel %vm3027_vm7, %v3025_v53, %v8932_v18 }
 0x4aa   :  { %v3522_v36 = vpop.f32.mrf.mxu0  ;;  %v3155_v11 = vsel %vm3092_vm8, %v3090_v41, %v9092_v55  ;;  %v4153_v5 = vld [vmem:[#allocation2 + $0x259] sm:$0xff] }
 0x4ab   :  { %4024 = vst.msk [vmem:[#allocation2 + $0x261] sm:$0xff] %vm52_vm0, %v3960_v25  ;;  %v3732_v2 = vadd.f32 %v12669_v51, %v3522_v36  ;;  %7938 = vmatmul.msk.f32.gmra.mxu3 %vm52_vm0, %v12717_v35  ;;  %v2831_v36 = vsel %vm2767_vm3, %v2766_v32, %v8293_v28  ;;  %v8933_v51 = vunpack.i.h.bf16 %v11468_v29  ;;  %v4171_v32 = vld [vmem:[#allocation2 + $0x2] sm:$0xff]  ;;  %v4186_v41 = vld [vmem:[#allocation2 + $0xb2] sm:$0xff] }
 0x4ac   :  { %v2896_v20 = vsel %vm2832_vm4, %v2831_v36, %v8453_v30 }
 0x4ad   :  { %v3832_v4 = vadd.f32 %v11625_v61, %v3732_v2  ;;  %3569 = vmatmul.f32.gmra.mxu0 %v3155_v11  ;;  %v2961_v49 = vsel %vm2897_vm6, %v2896_v20, %v8613_v21  ;;  %v12774_v11 = vpop.f32.mrf.mxu3 }
 0x4ae   :  { %v3026_v1 = vsel %vm2962_vm5, %v2961_v49, %v8773_v14  ;;  %14964 = vst [vmem:[#allocation13_spill] sm:$0xff] %v12774_v11  ;;  %v4172_v14 = vld [vmem:[#allocation2 + $0xa] sm:$0xff] }
 0x4af   :  { %v3896_v18 = vmax.f32 %v3832_v4, 0.0  ;;  %v3091_v53 = vsel %vm3027_vm7, %v3026_v1, %v8933_v51  ;;  %v3743_v30 = vpop.f32.mrf.mxu1  ;;  %v9219_v36 = vpack.i.bf16 %v4172_v14, %v4171_v32  ;;  %v4177_v1 = vld [vmem:[#allocation2 + $0x4a] sm:$0xff] }
 0x4b0   :  { %v3156_v21 = vsel %vm3092_vm8, %v3091_v53, %v9093_v52 }
 0x4b1   :  { %v3961_v55 = vadd.f32 %v11636_v0, %v3896_v18 }
 0x4b2   :  { %v3525_v25 = vpop.f32.mrf.mxu0  ;;  %v12762_v58 = vld [vmem:[#allocation2 + $0x25a] sm:$0xff]  ;;  %v12765_v28 = vld [vmem:[#allocation2 + $0x262] sm:$0xff] }
 0x4b3   :  { %v4154_v2 = vld [vmem:[#allocation2 + $0x261] sm:$0xff]  ;;  %4025 = vst.msk [vmem:[#allocation2 + $0x271] sm:$0xff] %vm52_vm0, %v3961_v55  ;;  %v3735_v29 = vadd.f32 %v12697_v62, %v3525_v25  ;;  %7939 = vmatmul.msk.f32.gmra.mxu3 %vm52_vm0, %v12762_v58 }
 0x4b4   :  { %v9209_v44 = vpack.i.bf16 %v4154_v2, %v4153_v5  ;;  %v4178_v5 = vld [vmem:[#allocation2 + $0x52] sm:$0xff] }
 0x4b5   :  { %v3833_v33 = vadd.f32 %v11625_v61, %v3735_v29  ;;  %3572 = vmatmul.f32.gmra.mxu0 %v3156_v21  ;;  %v12785_v52 = vpop.f32.mrf.mxu3 }
 0x4b6   :  { %9210 = vrot.lane.b32.xlu1 %v9209_v44, %s10424_s1  ;;  %14965 = vst [vmem:[#allocation50_spill] sm:$0xff] %v12785_v52 }
 0x4b7   :  { %v3897_v62 = vmax.f32 %v3833_v33, 0.0  ;;  %v3746_v18 = vpop.f32.mrf.mxu1 }
 0x4b9   :  { %v3962_v4 = vadd.f32 %v11636_v0, %v3897_v62 }
 0x4ba   :  { %v3528_v51 = vpop.f32.mrf.mxu0  ;;  %v4155_v53 = vld [vmem:[#allocation2 + $0x271] sm:$0xff] }
 0x4bb   :  { %4026 = vst.msk [vmem:[#allocation2 + $0x279] sm:$0xff] %vm52_vm0, %v3962_v4  ;;  %v3738_v20 = vadd.f32 %v12724_v12, %v3528_v51  ;;  %7940 = vmatmul.msk.f32.gmra.mxu3 %vm52_vm0, %v12765_v28  ;;  %v9239_v12 = vpack.i.bf16 %v4178_v5, %v4177_v1  ;;  %v4173_v51 = vld [vmem:[#allocation2 + $0x1a] sm:$0xff]  ;;  %v4091_v54 = vld [vmem:[#allocation2 + $0x270] sm:$0xff] }
 0x4bd   :  { %v3834_v49 = vadd.f32 %v11625_v61, %v3738_v20  ;;  %v4174_v20 = vld [vmem:[#allocation2 + $0x22] sm:$0xff] }
 0x4be   :  { %9220 = vrot.lane.b32.xlu1 %v9219_v36, %s10425_s26  ;;  %v9224_v5 = vpack.i.bf16 %v4174_v20, %v4173_v51 }
 0x4bf   :  { %v3898_v55 = vmax.f32 %v3834_v49, 0.0  ;;  %v3749_v14 = vpop.f32.mrf.mxu1  ;;  %v12800_v49 = vpop.f32.mrf.mxu3 }
 0x4c0   :  { %14966 = vst [vmem:[#allocation65_spill] sm:$0xff] %v12800_v49 }
 0x4c1   :  { %v3963_v25 = vadd.f32 %v11636_v0, %v3898_v55 }
 0x4c2   :  { %v3531_v2 = vpop.f32.mrf.mxu0  ;;  %v12788_v29 = vld [vmem:[#allocation2 + $0x272] sm:$0xff]  ;;  %v12790_v21 = vld [vmem:[#allocation2 + $0x27a] sm:$0xff] }
 0x4c3   :  { %v4156_v44 = vld [vmem:[#allocation2 + $0x279] sm:$0xff]  ;;  %4027 = vst.msk [vmem:[#allocation2 + $0x289] sm:$0xff] %vm52_vm0, %v3963_v25  ;;  %v3741_v33 = vadd.f32 %v3740_v31, %v3531_v2  ;;  %7941 = vmatmul.msk.f32.gmra.mxu3 %vm52_vm0, %v12788_v29 }
 0x4c4   :  { %v9214_v32 = vpack.i.bf16 %v4156_v44, %v4155_v53  ;;  %v4180_v44 = vld [vmem:[#allocation2 + $0x6a] sm:$0xff] }
 0x4c5   :  { %v3835_v4 = vadd.f32 %v11625_v61, %v3741_v33 }
 0x4c6   :  { %9240 = vrot.lane.b32.xlu1 %v9239_v12, %s10425_s26  ;;  %9215 = vrot.lane.b32.xlu2 %v9214_v32, %s10424_s1  ;;  %v4179_v12 = vld [vmem:[#allocation2 + $0x62] sm:$0xff] }
 0x4c7   :  { %v3899_v36 = vmax.f32 %v3835_v4, 0.0  ;;  %v3752_v25 = vpop.f32.mrf.mxu1  ;;  %v12813_v62 = vpop.f32.mrf.mxu3 }
 0x4c8   :  { %14967 = vst [vmem:[#allocation83_spill] sm:$0xff] %v12813_v62  ;;  %v4194_v62 = vld [vmem:[#allocation2 + $0x112] sm:$0xff] }
 0x4c9   :  { %v3964_v31 = vadd.f32 %v11636_v0, %v3899_v36 }
 0x4ca   :  { %v3534_v55 = vpop.f32.mrf.mxu0  ;;  %v4157_v32 = vld [vmem:[#allocation2 + $0x289] sm:$0xff] }
 0x4cb   :  { %4028 = vst.msk [vmem:[#allocation2 + $0x291] sm:$0xff] %vm52_vm0, %v3964_v31  ;;  %v3744_v1 = vadd.f32 %v3743_v30, %v3534_v55  ;;  %7942 = vmatmul.msk.f32.gmra.mxu3 %vm52_vm0, %v12790_v21  ;;  %v9244_v31 = vpack.i.bf16 %v4180_v44, %v4179_v12  ;;  %v4175_v12 = vld [vmem:[#allocation2 + $0x32] sm:$0xff]  ;;  %v4185_v44 = vld [vmem:[#allocation2 + $0xaa] sm:$0xff] }
 0x4cd   :  { %v3836_v53 = vadd.f32 %v11625_v61, %v3744_v1  ;;  %v4181_v1 = vld [vmem:[#allocation2 + $0x7a] sm:$0xff] }
 0x4ce   :  { %9225 = vrot.lane.b32.xlu2 %v9224_v5, %s10425_s26 }
 0x4cf   :  { %v3900_v2 = vmax.f32 %v3836_v53, 0.0  ;;  %v3755_v53 = vpop.f32.mrf.mxu1 }
 0x4d1   :  { %v3965_v33 = vadd.f32 %v11636_v0, %v3900_v2 }
 0x4d2   :  { %v3537_v4 = vpop.f32.mrf.mxu0  ;;  %v12809_v36 = vld [vmem:[#allocation2 + $0x28a] sm:$0xff]  ;;  %v12811_v55 = vld [vmem:[#allocation2 + $0x292] sm:$0xff] }
 0x4d3   :  { %v4158_v30 = vld [vmem:[#allocation2 + $0x291] sm:$0xff]  ;;  %4029 = vst.msk [vmem:[#allocation2 + $0x2a1] sm:$0xff] %vm52_vm0, %v3965_v33  ;;  %v3747_v51 = vadd.f32 %v3746_v18, %v3537_v4  ;;  %7943 = vmatmul.msk.f32.gmra.mxu3 %vm52_vm0, %v12809_v36  ;;  %v4176_v33 = vld [vmem:[#allocation2 + $0x3a] sm:$0xff] }
 0x4d4   :  { %v9229_v20 = vpack.i.bf16 %v4158_v30, %v4157_v32  ;;  %v9264_v30 = vpack.i.bf16 %v4186_v41, %v4185_v44  ;;  %v9249_v44 = vpack.i.bf16 %v4182_v13, %v4181_v1 }
 0x4d5   :  { %v3837_v5 = vadd.f32 %v11625_v61, %v3747_v51  ;;  %v9234_v51 = vpack.i.bf16 %v4176_v33, %v4175_v12 }
 0x4d6   :  { %9245 = vrot.lane.b32.xlu2 %v9244_v31, %s10425_s26  ;;  %9230 = vrot.lane.b32.xlu0 %v9229_v20, %s10424_s1  ;;  %v12827_v31 = vpop.permute.xlu2 %9095  ;;  %v12829_v20 = vpop.f32.mrf.mxu3 }
 0x4d7   :  { %v3901_v2 = vmax.f32 %v3837_v5, 0.0  ;;  %14968 = vst [vmem:[#allocation120_spill] sm:$0xff] %v12829_v20  ;;  %v4183_v20 = vld [vmem:[#allocation2 + $0x92] sm:$0xff] }
 0x4d9   :  { %v3966_v18 = vadd.f32 %v11636_v0, %v3901_v2 }
 0x4da   :  { %v3540_v4 = vpop.f32.mrf.mxu0  ;;  %v4159_v33 = vld [vmem:[#allocation2 + $0x2a1] sm:$0xff] }
 0x4db   :  { %4030 = vst.msk [vmem:[#allocation2 + $0x2a9] sm:$0xff] %vm52_vm0, %v3966_v18  ;;  %v3750_v32 = vadd.f32 %v3749_v14, %v3540_v4  ;;  %7944 = vmatmul.msk.f32.gmra.mxu3 %vm52_vm0, %v12811_v55  ;;  %v4191_v18 = vld [vmem:[#allocation2 + $0xf2] sm:$0xff]  ;;  %v4192_v14 = vld [vmem:[#allocation2 + $0xfa] sm:$0xff]  ;;  %v3758_v4 = vpop.f32.mrf.mxu1 }
 0x4dd   :  { %v3838_v5 = vadd.f32 %v11625_v61, %v3750_v32 }
 0x4de   :  { %9265 = vrot.lane.b32.xlu2 %v9264_v30, %s10425_s26  ;;  %9235 = vrot.lane.b32.xlu0 %v9234_v51, %s10425_s26  ;;  %v9279_v30 = vpack.i.bf16 %v4192_v14, %v4191_v18  ;;  %v12846_v13 = vpop.f32.mrf.mxu3  ;;  %v4184_v18 = vld [vmem:[#allocation2 + $0x9a] sm:$0xff] }
 0x4df   :  { %v3902_v2 = vmax.f32 %v3838_v5, 0.0  ;;  %14969 = vst [vmem:[#allocation135_spill] sm:$0xff] %v12846_v13  ;;  %v4193_v13 = vld [vmem:[#allocation2 + $0x10a] sm:$0xff] }
 0x4e1   :  { %v3967_v59 = vadd.f32 %v11636_v0, %v3902_v2  ;;  %v12844_v2 = vpop.permute.xlu2 %9110 }
 0x4e2   :  { %v3543_v41 = vpop.f32.mrf.mxu0  ;;  %v12835_v12 = vld [vmem:[#allocation2 + $0x2a2] sm:$0xff]  ;;  %v12849_v14 = vld [vmem:[#allocation2 + $0x2aa] sm:$0xff] }
 0x4e3   :  { %v4160_v6 = vld [vmem:[#allocation2 + $0x2a9] sm:$0xff]  ;;  %4031 = vst.msk [vmem:[#allocation2 + $0x2b9] sm:$0xff] %vm52_vm0, %v3967_v59  ;;  %v3753_v32 = vadd.f32 %v3752_v25, %v3543_v41  ;;  %7945 = vmatmul.msk.f32.gmra.mxu3 %vm52_vm0, %v12835_v12 }
 0x4e4   :  { %v9254_v51 = vpack.i.bf16 %v4160_v6, %v4159_v33  ;;  %v4187_v59 = vld [vmem:[#allocation2 + $0xc2] sm:$0xff]  ;;  %v4188_v25 = vld [vmem:[#allocation2 + $0xca] sm:$0xff]  ;;  %v3761_v33 = vpop.f32.mrf.mxu1 }
 0x4e5   :  { %v3839_v5 = vadd.f32 %v11625_v61, %v3753_v32  ;;  %v9269_v32 = vpack.i.bf16 %v4188_v25, %v4187_v59 }
 0x4e6   :  { %9280 = vrot.lane.b32.xlu2 %v9279_v30, %s10425_s26  ;;  %9250 = vrot.lane.b32.xlu0 %v9249_v44, %s10425_s26  ;;  %v9259_v30 = vpack.i.bf16 %v4184_v18, %v4183_v20  ;;  %v12859_v49 = vpop.f32.mrf.mxu3 }
 0x4e7   :  { %9255 = vrot.lane.b32.xlu1 %v9254_v51, %s10424_s1  ;;  %v3903_v1 = vmax.f32 %v3839_v5, 0.0  ;;  %14970 = vst [vmem:[#allocation18_spill] sm:$0xff] %v12859_v49 }
 0x4e9   :  { %v3968_v41 = vadd.f32 %v11636_v0, %v3903_v1  ;;  %v12857_v5 = vpop.permute.xlu2 %9125 }
 0x4ea   :  { %v3546_v6 = vpop.f32.mrf.mxu0  ;;  %v4161_v20 = vld [vmem:[#allocation2 + $0x2b9] sm:$0xff] }
 0x4eb   :  { %4032 = vst.msk [vmem:[#allocation2 + $0x2c1] sm:$0xff] %vm52_vm0, %v3968_v41  ;;  %v3756_v44 = vadd.f32 %v3755_v53, %v3546_v6  ;;  %7946 = vmatmul.msk.f32.gmra.mxu3 %vm52_vm0, %v12849_v14  ;;  %v4189_v41 = vld [vmem:[#allocation2 + $0xda] sm:$0xff]  ;;  %v4190_v6 = vld [vmem:[#allocation2 + $0xe2] sm:$0xff] }
 0x4ec   :  { %v4097_v3 = vld [vmem:[#allocation2 + $0x2b8] sm:$0xff] }
 0x4ed   :  { %v3840_v51 = vadd.f32 %v11625_v61, %v3756_v44  ;;  %v9284_v44 = vpack.i.bf16 %v4194_v62, %v4193_v13  ;;  %v4195_v13 = vld [vmem:[#allocation2 + $0x122] sm:$0xff] }
 0x4ee   :  { %9270 = vrot.lane.b32.xlu0 %v9269_v32, %s10425_s26 }
 0x4ef   :  { %9260 = vrot.lane.b32.xlu1 %v9259_v30, %s10425_s26  ;;  %v3904_v1 = vmax.f32 %v3840_v51, 0.0  ;;  %v9274_v30 = vpack.i.bf16 %v4190_v6, %v4189_v41  ;;  %v3764_v51 = vpop.f32.mrf.mxu1  ;;  %v4196_v41 = vld [vmem:[#allocation2 + $0x12a] sm:$0xff] }
 0x4f1   :  { %v3969_v53 = vadd.f32 %v11636_v0, %v3904_v1  ;;  %v12871_v1 = vpop.permute.xlu2 %9140 }
 0x4f2   :  { %v3549_v52 = vpop.f32.mrf.mxu0  ;;  %v12862_v59 = vld [vmem:[#allocation2 + $0x2ba] sm:$0xff] }
 0x4f3   :  { %v4162_v25 = vld [vmem:[#allocation2 + $0x2c1] sm:$0xff]  ;;  %4033 = vst.msk [vmem:[#allocation2 + $0x2d1] sm:$0xff] %vm52_vm0, %v3969_v53  ;;  %v3759_v18 = vadd.f32 %v3758_v4, %v3549_v52  ;;  %7947 = vmatmul.msk.f32.gmra.mxu3 %vm52_vm0, %v12862_v59  ;;  %v4199_v52 = vld [vmem:[#allocation2 + $0x152] sm:$0xff] }
 0x4f4   :  { %v9294_v32 = vpack.i.bf16 %v4162_v25, %v4161_v20  ;;  %v4197_v53 = vld [vmem:[#allocation2 + $0x13a] sm:$0xff]  ;;  %v12874_v20 = vld [vmem:[#allocation2 + $0x2c2] sm:$0xff]  ;;  %v12876_v25 = vpop.f32.mrf.mxu3 }
 0x4f5   :  { %v3841_v49 = vadd.f32 %v11625_v61, %v3759_v18  ;;  %v4200_v4 = vld [vmem:[#allocation2 + $0x15a] sm:$0xff]  ;;  %14971 = vst [vmem:[#allocation34_spill] sm:$0xff] %v12876_v25 }
 0x4f6   :  { %9285 = vrot.lane.b32.xlu0 %v9284_v44, %s10425_s26  ;;  %9295 = vrot.lane.b32.xlu2 %v9294_v32, %s10424_s1  ;;  %v9299_v44 = vpack.i.bf16 %v4198_v19, %v4197_v53  ;;  %v9289_v32 = vpack.i.bf16 %v4196_v41, %v4195_v13 }
 0x4f7   :  { %9275 = vrot.lane.b32.xlu1 %v9274_v30, %s10425_s26  ;;  %v3905_v11 = vmax.f32 %v3841_v49, 0.0  ;;  %v9304_v49 = vpack.i.bf16 %v4200_v4, %v4199_v52  ;;  %v3767_v25 = vpop.f32.mrf.mxu1  ;;  %v4202_v52 = vld [vmem:[#allocation2 + $0x172] sm:$0xff] }
 0x4f9   :  { %v3970_v62 = vadd.f32 %v11636_v0, %v3905_v11  ;;  %v4203_v11 = vld [vmem:[#allocation2 + $0x1b2] sm:$0xff]  ;;  %v12885_v63 = vpop.permute.xlu2 %9155 }
 0x4fa   :  { %v3552_v6 = vpop.f32.mrf.mxu0  ;;  %14972 = vst [vmem:[#allocation75_spill] sm:$0xff] %v12885_v63  ;;  %v9314_v19 = vpack.i.bf16 %v4204_v10, %v4203_v11  ;;  %v4163_v13 = vld [vmem:[#allocation2 + $0x2d1] sm:$0xff]  ;;  %v4366_v63 = vld [vmem:[#allocation2 + $0x3a] sm:$0xff] }
 0x4fb   :  { %4034 = vst.msk [vmem:[#allocation2 + $0x2d9] sm:$0xff] %vm52_vm0, %v3970_v62  ;;  %v3762_v18 = vadd.f32 %v3761_v33, %v3552_v6  ;;  %7948 = vmatmul.msk.f32.gmra.mxu3 %vm52_vm0, %v12874_v20  ;;  %v4201_v6 = vld [vmem:[#allocation2 + $0x16a] sm:$0xff] }
 0x4fd   :  { %v3842_v30 = vadd.f32 %v11625_v61, %v3762_v18 }
 0x4fe   :  { %9305 = vrot.lane.b32.xlu0 %v9304_v49, %s10425_s26  ;;  %9300 = vrot.lane.b32.xlu2 %v9299_v44, %s10425_s26  ;;  %v12893_v44 = vpop.permute.xlu1 %9105 }
 0x4ff   :  { %9290 = vrot.lane.b32.xlu1 %v9289_v32, %s10425_s26  ;;  %v3906_v33 = vmax.f32 %v3842_v30, 0.0  ;;  %v9309_v32 = vpack.i.bf16 %v4202_v52, %v4201_v6  ;;  %v12895_v30 = vpop.permute.xlu0 %9100 }
 0x501   :  { %v3971_v62 = vadd.f32 %v11636_v0, %v3906_v33  ;;  %v12897_v33 = vpop.f32.mrf.mxu3 }
 0x502   :  { %v3555_v53 = vpop.f32.mrf.mxu0  ;;  %v12888_v4 = vld [vmem:[#allocation2 + $0x2d2] sm:$0xff]  ;;  %14973 = vst [vmem:[#allocation88_spill] sm:$0xff] %v12897_v33 }
 0x503   :  { %v4164_v41 = vld [vmem:[#allocation2 + $0x2d9] sm:$0xff]  ;;  %4035 = vst.msk [vmem:[#allocation2 + $0x2e9] sm:$0xff] %vm52_vm0, %v3971_v62  ;;  %v3765_v18 = vadd.f32 %v3764_v51, %v3555_v53  ;;  %7949 = vmatmul.msk.f32.gmra.mxu3 %vm52_vm0, %v12888_v4  ;;  %v12903_v51 = vpop.permute.xlu2 %9170  ;;  %v4205_v62 = vld [vmem:[#allocation2 + $0x1ca] sm:$0xff] }
 0x504   :  { %v9319_v49 = vpack.i.bf16 %v4164_v41, %v4163_v13  ;;  %14974 = vst [vmem:[#allocation113_spill] sm:$0xff] %v12903_v51  ;;  %v4206_v53 = vld [vmem:[#allocation2 + $0x1d2] sm:$0xff]  ;;  %v3770_v13 = vpop.f32.mrf.mxu1  ;;  %v12906_v41 = vld [vmem:[#allocation2 + $0x2da] sm:$0xff]  ;;  %v4093_v51 = vld [vmem:[#allocation2 + $0x288] sm:$0xff] }
 0x505   :  { %v3843_v10 = vadd.f32 %v11625_v61, %v3765_v18 }
 0x506   :  { %9315 = vrot.lane.b32.xlu2 %v9314_v19, %s10425_s26  ;;  %9320 = vrot.lane.b32.xlu0 %v9319_v49, %s10424_s1  ;;  %v9324_v19 = vpack.i.bf16 %v4206_v53, %v4205_v62  ;;  %v12911_v49 = vpop.permute.xlu1 %9120 }
 0x507   :  { %9310 = vrot.lane.b32.xlu1 %v9309_v32, %s10425_s26  ;;  %v3907_v11 = vmax.f32 %v3843_v10, 0.0  ;;  %v12913_v32 = vpop.permute.xlu0 %9115 }
 0x509   :  { %v3972_v6 = vadd.f32 %v11636_v0, %v3907_v11  ;;  %v14975_v11 = vpack.i.bf16 %v12554_v48, %v12551_v9  ;;  %v12927_v62 = vpop.f32.mrf.mxu3 }
 0x50a   :  { %v3558_v52 = vpop.f32.mrf.mxu0  ;;  %14978 = vst [vmem:[#allocation26_spill] sm:$0xff] %v12927_v62  ;;  %v4165_v57 = vld [vmem:[#allocation2 + $0x2e9] sm:$0xff] }
 0x50b   :  { %4036 = vst.msk [vmem:[#allocation2 + $0x2f1] sm:$0xff] %vm52_vm0, %v3972_v6  ;;  %v3768_v18 = vadd.f32 %v3767_v25, %v3558_v52  ;;  %7950 = vmatmul.msk.f32.gmra.mxu3 %vm52_vm0, %v12906_v41  ;;  %v14976_v25 = vpack.i.bf16 %v12499_v24, %v12496_v60  ;;  %v12925_v6 = vpop.permute.xlu2 %9185 }
 0x50c   :  { %14977 = vst [vmem:[#allocation144_spill] sm:$0xff] %v12925_v6  ;;  %v3773_v48 = vpop.f32.mrf.mxu1  ;;  %v4262_v6 = vld [vmem:[#allocation2 + $0x158] sm:$0xff] }
 0x50d   :  { %v3844_v10 = vadd.f32 %v11625_v61, %v3768_v18 }
 0x50e   :  { %9335 = vrot.lane.b32.xlu2 %v14975_v11, %s10425_s26  ;;  %9325 = vrot.lane.b32.xlu0 %v9324_v19, %s10425_s26  ;;  %v12935_v24 = vpop.permute.xlu1 %9135 }
 0x50f   :  { %9330 = vrot.lane.b32.xlu1 %v14976_v25, %s10425_s26  ;;  %v3908_v53 = vmax.f32 %v3844_v10, 0.0  ;;  %v12937_v11 = vpop.permute.xlu0 %9130  ;;  %v14979_v25 = vpack.i.bf16 %v12717_v35, %v12714_v22 }
 0x511   :  { %v3973_v52 = vadd.f32 %v11636_v0, %v3908_v53  ;;  %v14980_v53 = vpack.i.bf16 %v12607_v16, %v12604_v40 }
 0x512   :  { %v3561_v18 = vpop.f32.mrf.mxu0  ;;  %v12930_v33 = vld [vmem:[#allocation2 + $0x2ea] sm:$0xff] }
 0x513   :  { %v4166_v9 = vld [vmem:[#allocation2 + $0x2f1] sm:$0xff]  ;;  %4037 = vst.msk [vmem:[#allocation2 + $0x301] sm:$0xff] %vm52_vm0, %v3973_v52  ;;  %v3771_v19 = vadd.f32 %v3770_v13, %v3561_v18  ;;  %7951 = vmatmul.msk.f32.gmra.mxu3 %vm52_vm0, %v12930_v33  ;;  %v12949_v13 = vpop.permute.xlu2 %9200  ;;  %v12951_v52 = vpop.f32.mrf.mxu3 }
 0x514   :  { %v9344_v60 = vpack.i.bf16 %v4166_v9, %v4165_v57  ;;  %14981 = vst [vmem:[#allocation42_spill] sm:$0xff] %v12949_v13  ;;  %v3776_v40 = vpop.f32.mrf.mxu1  ;;  %v4256_v13 = vld [vmem:[#allocation2 + $0x110] sm:$0xff] }
 0x515   :  { %v3845_v10 = vadd.f32 %v11625_v61, %v3771_v19  ;;  %14982 = vst [vmem:[#allocation58_spill] sm:$0xff] %v12951_v52  ;;  %v4610_v19 = vld [vmem:[#allocation2 + $0x2f2] sm:$0xff] }
 0x516   :  { %9355 = vrot.lane.b32.xlu2 %v14979_v25, %s10425_s26  ;;  %9340 = vrot.lane.b32.xlu0 %v14980_v53, %s10425_s26  ;;  %v12956_v35 = vpop.permute.xlu1 %9150  ;;  %v14986_v25 = vpack.i.bf16 %v12765_v28, %v12762_v58 }
 0x517   :  { %9345 = vrot.lane.b32.xlu1 %v9344_v60, %s10424_s1  ;;  %v3909_v57 = vmax.f32 %v3845_v10, 0.0  ;;  %14983 = vst [vmem:[#allocation99_spill] sm:$0xff] %v12956_v35  ;;  %v12958_v16 = vpop.permute.xlu0 %9145  ;;  %v14985_v10 = vpack.i.bf16 %v12811_v55, %v12809_v36 }
 0x518   :  { %14984 = vst [vmem:[#allocation112_spill] sm:$0xff] %v12958_v16 }
 0x519   :  { %v3974_v18 = vadd.f32 %v11636_v0, %v3909_v57 }
 0x51a   :  { %v3564_v9 = vpop.f32.mrf.mxu0  ;;  %v4167_v52 = vld [vmem:[#allocation2 + $0x301] sm:$0xff] }
 0x51b   :  { %4038 = vst.msk [vmem:[#allocation2 + $0x309] sm:$0xff] %vm52_vm0, %v3974_v18  ;;  %v3774_v22 = vadd.f32 %v3773_v48, %v3564_v9  ;;  %7952 = vmatmul.msk.f32.gmra.mxu3 %vm52_vm0, %v4610_v19  ;;  %v14987_v48 = vpack.i.bf16 %v12662_v50, %v12659_v27  ;;  %v12976_v55 = vpop.f32.mrf.mxu3  ;;  %v9374_v27 = vpack.i.bf16 %v12849_v14, %v12835_v12 }
 0x51c   :  { %14989 = vst [vmem:[#allocation14_spill] sm:$0xff] %v12976_v55 }
 0x51d   :  { %v3846_v60 = vadd.f32 %v11625_v61, %v3774_v22 }
 0x51e   :  { %9370 = vrot.lane.b32.xlu2 %v14985_v10, %s10425_s26  ;;  %9360 = vrot.lane.b32.xlu0 %v14986_v25, %s10425_s26  ;;  %v12982_v28 = vpop.permute.xlu1 %9165  ;;  %v3779_v25 = vpop.f32.mrf.mxu1 }
 0x51f   :  { %9350 = vrot.lane.b32.xlu1 %v14987_v48, %s10425_s26  ;;  %v3910_v53 = vmax.f32 %v3846_v60, 0.0  ;;  %14990 = vst [vmem:[#allocation52_spill] sm:$0xff] %v12982_v28  ;;  %v12984_v60 = vpop.permute.xlu0 %9160 }
 0x520   :  { %v12973_v57 = vpop.permute.xlu2 %9215  ;;  %14991 = vst [vmem:[#allocation67_spill] sm:$0xff] %v12984_v60 }
 0x521   :  { %14988 = vst [vmem:[#allocation143_spill] sm:$0xff] %v12973_v57  ;;  %v3975_v18 = vadd.f32 %v11636_v0, %v3910_v53 }
 0x522   :  { %v3567_v9 = vpop.f32.mrf.mxu0  ;;  %v4611_v22 = vld [vmem:[#allocation2 + $0x302] sm:$0xff]  ;;  %v4612_v53 = vld [vmem:[#allocation2 + $0x30a] sm:$0xff] }
 0x523   :  { %v4168_v36 = vld [vmem:[#allocation2 + $0x309] sm:$0xff]  ;;  %4039 = vst.msk [vmem:[#allocation2 + $0x319] sm:$0xff] %vm52_vm0, %v3975_v18  ;;  %v3777_v58 = vadd.f32 %v3776_v40, %v3567_v9  ;;  %7953 = vmatmul.msk.f32.gmra.mxu3 %vm52_vm0, %v4611_v22  ;;  %v14992_v40 = vpack.i.bf16 %v12790_v21, %v12788_v29  ;;  %v9394_v9 = vpack.i.bf16 %v4610_v19, %v12930_v33 }
 0x524   :  { %v9384_v50 = vpack.i.bf16 %v4168_v36, %v4167_v52  ;;  %v9389_v36 = vpack.i.bf16 %v12906_v41, %v12888_v4  ;;  %v9379_v21 = vpack.i.bf16 %v12874_v20, %v12862_v59 }
 0x525   :  { %v3847_v10 = vadd.f32 %v11625_v61, %v3777_v58 }
 0x526   :  { %9375 = vrot.lane.b32.xlu0 %v9374_v27, %s10425_s26  ;;  %9385 = vrot.lane.b32.xlu2 %v9384_v50, %s10424_s1  ;;  %v13001_v29 = vpop.permute.xlu1 %9180  ;;  %v13007_v27 = vpop.f32.mrf.mxu3 }
 0x527   :  { %9365 = vrot.lane.b32.xlu1 %v14992_v40, %s10425_s26  ;;  %v3911_v48 = vmax.f32 %v3847_v10, 0.0  ;;  %14993 = vst [vmem:[#allocation86_spill] sm:$0xff] %v13001_v29  ;;  %v13005_v58 = vpop.permute.xlu0 %9175  ;;  %v3782_v19 = vpop.f32.mrf.mxu1  ;;  %v4269_v29 = vld [vmem:[#allocation2 + $0x1e0] sm:$0xff] }
 0x528   :  { %v12994_v14 = vpop.permute.xlu2 %9225  ;;  %14994 = vst [vmem:[#allocation123_spill] sm:$0xff] %v13005_v58  ;;  %v4085_v58 = vld [vmem:[#allocation2 + $0x228] sm:$0xff] }
 0x529   :  { %v3976_v12 = vadd.f32 %v11636_v0, %v3911_v48  ;;  %14995 = vst [vmem:[#allocation136_spill] sm:$0xff] %v13007_v27  ;;  %v4249_v27 = vld [vmem:[#allocation2 + $0xc0] sm:$0xff] }
 0x52a   :  { %v3570_v52 = vpop.f32.mrf.mxu0  ;;  %v4169_v41 = vld [vmem:[#allocation2 + $0x319] sm:$0xff] }
 0x52b   :  { %4040 = vst.msk [vmem:[#allocation2 + $0x321] sm:$0xff] %vm52_vm0, %v3976_v12  ;;  %v3780_v18 = vadd.f32 %v3779_v25, %v3570_v52  ;;  %7954 = vmatmul.msk.f32.gmra.mxu3 %vm52_vm0, %v4612_v53 }
 0x52d   :  { %v3848_v50 = vadd.f32 %v11625_v61, %v3780_v18 }
 0x52e   :  { %9395 = vrot.lane.b32.xlu0 %v9394_v9, %s10425_s26  ;;  %9390 = vrot.lane.b32.xlu2 %v9389_v36, %s10425_s26  ;;  %v13018_v18 = vpop.permute.xlu1 %9195  ;;  %v9399_v9 = vpack.i.bf16 %v4612_v53, %v4611_v22  ;;  %v4235_v22 = vld [vmem:[#allocation2 + $0x18] sm:$0xff] }
 0x52f   :  { %9380 = vrot.lane.b32.xlu1 %v9379_v21, %s10425_s26  ;;  %v3912_v33 = vmax.f32 %v3848_v50, 0.0  ;;  %14996 = vst [vmem:[#allocation20_spill] sm:$0xff] %v13018_v18  ;;  %v13024_v21 = vpop.permute.xlu0 %9190  ;;  %v13026_v50 = vpop.f32.mrf.mxu3  ;;  %v4264_v18 = vld [vmem:[#allocation2 + $0x170] sm:$0xff] }
 0x530   :  { %v13015_v25 = vpop.permute.xlu2 %9245  ;;  %14997 = vst [vmem:[#allocation36_spill] sm:$0xff] %v13024_v21  ;;  %v4260_v21 = vld [vmem:[#allocation2 + $0x140] sm:$0xff] }
 0x531   :  { %v3977_v4 = vadd.f32 %v11636_v0, %v3912_v33  ;;  %14998 = vst [vmem:[#allocation77_spill] sm:$0xff] %v13026_v50 }
 0x532   :  { %v3573_v10 = vpop.f32.mrf.mxu0  ;;  %v4613_v40 = vld [vmem:[#allocation2 + $0x31a] sm:$0xff]  ;;  %v4234_v59 = vld [vmem:[#allocation2 + $0x322] sm:$0xff] }
 0x533   :  { %v4170_v20 = vld [vmem:[#allocation2 + $0x321] sm:$0xff]  ;;  %4041 = vst.msk [vmem:[#allocation2 + $0x331] sm:$0xff] %vm52_vm0, %v3977_v4  ;;  %v3783_v48 = vadd.f32 %v3782_v19, %v3573_v10  ;;  %7955 = vmatmul.msk.f32.gmra.mxu3 %vm52_vm0, %v4613_v40  ;;  %v9419_v12 = vpack.i.bf16 %v4234_v59, %v4613_v40  ;;  %v4240_v19 = vld [vmem:[#allocation2 + $0x50] sm:$0xff]  ;;  %v4238_v10 = vld [vmem:[#allocation2 + $0x38] sm:$0xff] }
 0x534   :  { %v9404_v52 = vpack.i.bf16 %v4170_v20, %v4169_v41  ;;  %v4236_v4 = vld [vmem:[#allocation2 + $0x20] sm:$0xff]  ;;  %v4239_v40 = vld [vmem:[#allocation2 + $0x48] sm:$0xff] }
 0x535   :  { %v3849_v36 = vadd.f32 %v11625_v61, %v3783_v48  ;;  %v4237_v61 = vld [vmem:[#allocation2 + $0x30] sm:$0xff]  ;;  %v13031_v53 = vpack.i.bf16 %v4240_v19, %v4239_v40  ;;  %v9409_v20 = vpack.i.bf16 %v4236_v4, %v4235_v22 }
 0x536   :  { %9420 = vrot.lane.b32.xlu2 %v9419_v12, %s10425_s26  ;;  %9405 = vrot.lane.b32.xlu0 %v9404_v52, %s10424_s1  ;;  %v13033_v48 = vpop.permute.xlu1 %9210  ;;  %v13035_v12 = vpack.i.bf16 %v4238_v10, %v4237_v61  ;;  %v4245_v4 = vld [vmem:[#allocation2 + $0x90] sm:$0xff]  ;;  %v4243_v10 = vld [vmem:[#allocation2 + $0x78] sm:$0xff] }
 0x537   :  { %9400 = vrot.lane.b32.xlu1 %v9399_v9, %s10425_s26  ;;  %v3913_v33 = vmax.f32 %v3849_v36, 0.0  ;;  %14999 = vst [vmem:[#allocation90_spill] sm:$0xff] %v13033_v48  ;;  %v4242_v9 = vld [vmem:[#allocation2 + $0x68] sm:$0xff]  ;;  %v13046_v36 = vpop.f32.mrf.mxu3 }
 0x538   :  { %v13037_v52 = vpop.permute.xlu2 %9265  ;;  %15001 = vst [vmem:[#allocation147_spill] sm:$0xff] %v13046_v36 }
 0x539   :  { %v3978_v41 = vadd.f32 %v11636_v0, %v3913_v33  ;;  %v13044_v0 = vpop.permute.xlu0 %9205  ;;  %v4244_v33 = vld [vmem:[#allocation2 + $0x80] sm:$0xff] }
 0x53a   :  { %15000 = vst [vmem:[#allocation116_spill] sm:$0xff] %v13044_v0  ;;  %v13053_v61 = vpack.i.bf16 %v4244_v33, %v4243_v10  ;;  %v4247_v10 = vld [vmem:[#allocation2 + $0xa8] sm:$0xff] }
 0x53b   :  { %4042 = vst.msk [vmem:[#allocation2 + $0x339] sm:$0xff] %vm52_vm0, %v3978_v41  ;;  %7956 = vmatmul.msk.f32.gmra.mxu3 %vm52_vm0, %v4234_v59  ;;  %v4246_v59 = vld [vmem:[#allocation2 + $0x98] sm:$0xff]  ;;  %v4241_v41 = vld [vmem:[#allocation2 + $0x60] sm:$0xff] }
 0x53c   :  { %v13049_v40 = vpack.i.bf16 %v4246_v59, %v4245_v4  ;;  %v13051_v22 = vpack.i.bf16 %v4242_v9, %v4241_v41  ;;  %v4252_v59 = vld [vmem:[#allocation2 + $0xe0] sm:$0xff]  ;;  %v4248_v9 = vld [vmem:[#allocation2 + $0xb0] sm:$0xff]  ;;  %v4250_v4 = vld [vmem:[#allocation2 + $0xc8] sm:$0xff] }
 0x53d   :  { %v4251_v41 = vld [vmem:[#allocation2 + $0xd8] sm:$0xff]  ;;  %v13070_v62 = vpack.i.bf16 %v4248_v9, %v4247_v10  ;;  %v9449_v57 = vpack.i.bf16 %v4250_v4, %v4249_v27  ;;  %v4253_v9 = vld [vmem:[#allocation2 + $0xf0] sm:$0xff] }
 0x53e   :  { %9425 = vrot.lane.b32.xlu2 %v13031_v53, %s10426_s27  ;;  %9410 = vrot.lane.b32.xlu0 %v9409_v20, %s10426_s27  ;;  %v13059_v20 = vpop.permute.xlu1 %9220  ;;  %v9454_v55 = vpack.i.bf16 %v4252_v59, %v4251_v41  ;;  %v4257_v59 = vld [vmem:[#allocation2 + $0x120] sm:$0xff]  ;;  %v4255_v41 = vld [vmem:[#allocation2 + $0x108] sm:$0xff] }
 0x53f   :  { %9415 = vrot.lane.b32.xlu1 %v13035_v12, %s10426_s27  ;;  %v13067_v50 = vpop.f32.mrf.mxu3 }
 0x540   :  { %v13063_v36 = vpop.permute.xlu2 %9280  ;;  %15004 = vst [vmem:[#allocation60_spill] sm:$0xff] %v13067_v50  ;;  %v4258_v50 = vld [vmem:[#allocation2 + $0x128] sm:$0xff] }
 0x541   :  { %15002 = vst [vmem:[#allocation28_spill] sm:$0xff] %v13063_v36  ;;  %v9469_v27 = vpack.i.bf16 %v4258_v50, %v4257_v59  ;;  %v4261_v50 = vld [vmem:[#allocation2 + $0x150] sm:$0xff] }
 0x542   :  { %v4615_v19 = vld [vmem:[#allocation2 + $0x332] sm:$0xff]  ;;  %v4616_v33 = vld [vmem:[#allocation2 + $0x33a] sm:$0xff]  ;;  %v9479_v59 = vpack.i.bf16 %v4262_v6, %v4261_v50 }
 0x543   :  { %7957 = vmatmul.msk.f32.gmra.mxu3 %vm52_vm0, %v4615_v19 }
 0x546   :  { %9440 = vrot.lane.b32.xlu2 %v13049_v40, %s10426_s27  ;;  %9430 = vrot.lane.b32.xlu0 %v13051_v22, %s10426_s27  ;;  %v13080_v0 = vpop.permute.xlu1 %9240 }
 0x547   :  { %9435 = vrot.lane.b32.xlu1 %v13053_v61, %s10426_s27 }
 0x548   :  { %v13065_v19 = vpop.permute.xlu0 %9230 }
 0x549   :  { %15003 = vst [vmem:[#allocation44_spill] sm:$0xff] %v13065_v19 }
 0x54b   :  { %7958 = vmatmul.msk.f32.gmra.mxu3 %vm52_vm0, %v4616_v33  ;;  %v4254_v33 = vld [vmem:[#allocation2 + $0xf8] sm:$0xff] }
 0x54c   :  { %v9459_v4 = vpack.i.bf16 %v4254_v33, %v4253_v9  ;;  %v9484_v33 = vpack.i.bf16 %v4264_v18, %v4263_v46  ;;  %v4077_v46 = vld [vmem:[#allocation2 + $0x1c8] sm:$0xff] }
 0x54e   :  { %9455 = vrot.lane.b32.xlu2 %v9454_v55, %s10426_s27  ;;  %9445 = vrot.lane.b32.xlu0 %v13070_v62, %s10426_s27  ;;  %v9464_v55 = vpack.i.bf16 %v4256_v13, %v4255_v41  ;;  %v9474_v13 = vpack.i.bf16 %v4260_v21, %v4259_v38 }
 0x54f   :  { %9450 = vrot.lane.b32.xlu1 %v9449_v57, %s10426_s27 }
 0x550   :  { %v13076_v19 = vpop.permute.xlu0 %9235  ;;  %v13078_v48 = vpop.permute.xlu2 %9295 }
 0x551   :  { %15005 = vst [vmem:[#allocation102_spill] sm:$0xff] %v13078_v48 }
 0x556   :  { %9470 = vrot.lane.b32.xlu2 %v9469_v27, %s10426_s27  ;;  %9460 = vrot.lane.b32.xlu0 %v9459_v4, %s10426_s27  ;;  %v4270_v4 = vld [vmem:[#allocation2 + $0x1e8] sm:$0xff] }
 0x557   :  { %9465 = vrot.lane.b32.xlu1 %v9464_v55, %s10426_s27  ;;  %v4266_v55 = vld [vmem:[#allocation2 + $0x188] sm:$0xff]  ;;  %v9499_v38 = vpack.i.bf16 %v4270_v4, %v4269_v29  ;;  %v4083_v29 = vld [vmem:[#allocation2 + $0x210] sm:$0xff] }
 0x558   :  { %v13085_v57 = vpop.permute.xlu0 %9250  ;;  %v13087_v10 = vpop.permute.xlu2 %9300  ;;  %v9489_v6 = vpack.i.bf16 %v4266_v55, %v4265_v37  ;;  %v9509_v4 = vpack.i.bf16 %v4084_v43, %v4083_v29 }
 0x559   :  { %15006 = vst [vmem:[#allocation114_spill] sm:$0xff] %v13087_v10  ;;  %v13089_v48 = vpop.permute.xlu1 %9255 }
 0x55a   :  { %15007 = vst [vmem:[#allocation146_spill] sm:$0xff] %v13089_v48  ;;  %v4078_v48 = vld [vmem:[#allocation2 + $0x1d0] sm:$0xff] }
 0x55b   :  { %v9494_v18 = vpack.i.bf16 %v4078_v48, %v4077_v46 }
 0x55e   :  { %9485 = vrot.lane.b32.xlu2 %v9484_v33, %s10426_s27  ;;  %9475 = vrot.lane.b32.xlu0 %v9474_v13, %s10426_s27  ;;  %v4082_v33 = vld [vmem:[#allocation2 + $0x200] sm:$0xff]  ;;  %v4086_v13 = vld [vmem:[#allocation2 + $0x230] sm:$0xff] }
 0x55f   :  { %9480 = vrot.lane.b32.xlu1 %v9479_v59, %s10426_s27  ;;  %v9514_v37 = vpack.i.bf16 %v4086_v13, %v4085_v58  ;;  %v4089_v58 = vld [vmem:[#allocation2 + $0x258] sm:$0xff] }
 0x560   :  { %v13094_v9 = vpop.permute.xlu0 %9270  ;;  %v13096_v41 = vpop.permute.xlu2 %9315 }
 0x561   :  { %15008 = vst [vmem:[#allocation15_spill] sm:$0xff] %v13096_v41  ;;  %v13098_v27 = vpop.permute.xlu1 %9260  ;;  %v4081_v41 = vld [vmem:[#allocation2 + $0x1f8] sm:$0xff] }
 0x562   :  { %v9504_v48 = vpack.i.bf16 %v4082_v33, %v4081_v41 }
 0x566   :  { %9500 = vrot.lane.b32.xlu2 %v9499_v38, %s10426_s27  ;;  %9490 = vrot.lane.b32.xlu0 %v9489_v6, %s10426_s27  ;;  %v4088_v38 = vld [vmem:[#allocation2 + $0x248] sm:$0xff]  ;;  %v4092_v6 = vld [vmem:[#allocation2 + $0x278] sm:$0xff] }
 0x567   :  { %9495 = vrot.lane.b32.xlu1 %v9494_v18, %s10426_s27  ;;  %v9529_v41 = vpack.i.bf16 %v4092_v6, %v4091_v54  ;;  %v9519_v43 = vpack.i.bf16 %v4088_v38, %v4087_v47  ;;  %v4095_v54 = vld [vmem:[#allocation2 + $0x2a0] sm:$0xff] }
 0x568   :  { %v13103_v21 = vpop.permute.xlu0 %9285  ;;  %v13105_v50 = vpop.permute.xlu2 %9335 }
 0x569   :  { %15009 = vst [vmem:[#allocation54_spill] sm:$0xff] %v13103_v21  ;;  %v13107_v59 = vpop.permute.xlu1 %9275 }
 0x56a   :  { %15010 = vst [vmem:[#allocation69_spill] sm:$0xff] %v13105_v50  ;;  %v4090_v50 = vld [vmem:[#allocation2 + $0x260] sm:$0xff] }
 0x56b   :  { %v9524_v33 = vpack.i.bf16 %v4090_v50, %v4089_v58 }
 0x56e   :  { %9515 = vrot.lane.b32.xlu2 %v9514_v37, %s10426_s27  ;;  %9505 = vrot.lane.b32.xlu0 %v9504_v48, %s10426_s27  ;;  %v4094_v37 = vld [vmem:[#allocation2 + $0x290] sm:$0xff]  ;;  %v4098_v48 = vld [vmem:[#allocation2 + $0x2c0] sm:$0xff] }
 0x56f   :  { %9510 = vrot.lane.b32.xlu1 %v9509_v4, %s10426_s27  ;;  %v9544_v47 = vpack.i.bf16 %v4098_v48, %v4097_v3  ;;  %v9534_v50 = vpack.i.bf16 %v4094_v37, %v4093_v51  ;;  %v4291_v3 = vld [vmem:[#allocation2 + $0x2e8] sm:$0xff] }
 0x570   :  { %v13112_v55 = vpop.permute.xlu0 %9305  ;;  %v13114_v46 = vpop.permute.xlu2 %9355 }
 0x571   :  { %15011 = vst [vmem:[#allocation89_spill] sm:$0xff] %v13112_v55  ;;  %v13116_v18 = vpop.permute.xlu1 %9290 }
 0x572   :  { %15012 = vst [vmem:[#allocation126_spill] sm:$0xff] %v13114_v46  ;;  %v4096_v46 = vld [vmem:[#allocation2 + $0x2a8] sm:$0xff] }
 0x573   :  { %15013 = vst [vmem:[#allocation137_spill] sm:$0xff] %v13116_v18  ;;  %v9539_v38 = vpack.i.bf16 %v4096_v46, %v4095_v54  ;;  %v4365_v18 = vld [vmem:[#allocation2 + $0x32] sm:$0xff] }
 0x574   :  { %v9659_v7 = vpack.i.bf16 %v4366_v63, %v4365_v18  ;;  %v4369_v18 = vld [vmem:[#allocation2 + $0x62] sm:$0xff] }
 0x576   :  { %9530 = vrot.lane.b32.xlu2 %v9529_v41, %s10426_s27  ;;  %9520 = vrot.lane.b32.xlu0 %v9519_v43, %s10426_s27  ;;  %v4100_v41 = vld [vmem:[#allocation2 + $0x2d8] sm:$0xff] }
 0x577   :  { %9525 = vrot.lane.b32.xlu1 %v9524_v33, %s10426_s27  ;;  %v4104_v33 = vld [vmem:[#allocation2 + $0x308] sm:$0xff] }
 0x578   :  { %v13121_v13 = vpop.permute.xlu2 %9370  ;;  %v13123_v29 = vpop.permute.xlu0 %9320 }
 0x579   :  { %15014 = vst [vmem:[#allocation22_spill] sm:$0xff] %v13121_v13  ;;  %v13125_v4 = vpop.permute.xlu1 %9310  ;;  %v4099_v13 = vld [vmem:[#allocation2 + $0x2d0] sm:$0xff] }
 0x57a   :  { %15015 = vst [vmem:[#allocation38_spill] sm:$0xff] %v13123_v29  ;;  %v4292_v29 = vld [vmem:[#allocation2 + $0x2f0] sm:$0xff]  ;;  %v9549_v46 = vpack.i.bf16 %v4100_v41, %v4099_v13 }
 0x57b   :  { %15016 = vst [vmem:[#allocation79_spill] sm:$0xff] %v13125_v4  ;;  %v4103_v4 = vld [vmem:[#allocation2 + $0x300] sm:$0xff]  ;;  %v9554_v37 = vpack.i.bf16 %v4292_v29, %v4291_v3  ;;  %v4297_v29 = vld [vmem:[#allocation2 + $0x330] sm:$0xff] }
 0x57c   :  { %v9559_v51 = vpack.i.bf16 %v4104_v33, %v4103_v4 }
 0x57e   :  { %9545 = vrot.lane.b32.xlu2 %v9544_v47, %s10426_s27  ;;  %9535 = vrot.lane.b32.xlu0 %v9534_v50, %s10426_s27  ;;  %v4300_v50 = vld [vmem:[#allocation2 + $0x21] sm:$0xff] }
 0x57f   :  { %9540 = vrot.lane.b32.xlu1 %v9539_v38, %s10426_s27  ;;  %v4296_v38 = vld [vmem:[#allocation2 + $0x320] sm:$0xff] }
 0x580   :  { %v13130_v6 = vpop.permute.xlu0 %9325  ;;  %v13132_v58 = vpop.permute.xlu2 %9385 }
 0x581   :  { %15017 = vst [vmem:[#allocation92_spill] sm:$0xff] %v13130_v6  ;;  %v13134_v43 = vpop.permute.xlu1 %9330  ;;  %v4295_v6 = vld [vmem:[#allocation2 + $0x318] sm:$0xff] }
 0x582   :  { %15018 = vst [vmem:[#allocation119_spill] sm:$0xff] %v13132_v58  ;;  %v4298_v58 = vld [vmem:[#allocation2 + $0x338] sm:$0xff]  ;;  %v9564_v13 = vpack.i.bf16 %v4296_v38, %v4295_v6 }
 0x583   :  { %15019 = vst [vmem:[#allocation149_spill] sm:$0xff] %v13134_v43  ;;  %v4299_v43 = vld [vmem:[#allocation2 + $0x19] sm:$0xff]  ;;  %v9569_v41 = vpack.i.bf16 %v4298_v58, %v4297_v29  ;;  %v4312_v29 = vld [vmem:[#allocation2 + $0xb1] sm:$0xff] }
 0x584   :  { %v9574_v4 = vpack.i.bf16 %v4300_v50, %v4299_v43  ;;  %v4301_v43 = vld [vmem:[#allocation2 + $0x31] sm:$0xff]  ;;  %v4303_v50 = vld [vmem:[#allocation2 + $0x49] sm:$0xff] }
 0x586   :  { %9560 = vrot.lane.b32.xlu2 %v9559_v51, %s10426_s27  ;;  %9550 = vrot.lane.b32.xlu0 %v9549_v46, %s10426_s27  ;;  %v4306_v46 = vld [vmem:[#allocation2 + $0x69] sm:$0xff] }
 0x587   :  { %9555 = vrot.lane.b32.xlu1 %v9554_v37, %s10426_s27  ;;  %v4302_v37 = vld [vmem:[#allocation2 + $0x39] sm:$0xff] }
 0x588   :  { %v13139_v48 = vpop.permute.xlu0 %9340  ;;  %v13141_v54 = vpop.permute.xlu2 %9390  ;;  %v13156_v58 = vpack.i.bf16 %v4302_v37, %v4301_v43  ;;  %v4307_v37 = vld [vmem:[#allocation2 + $0x79] sm:$0xff] }
 0x589   :  { %15020 = vst [vmem:[#allocation31_spill] sm:$0xff] %v13139_v48  ;;  %v13143_v47 = vpop.permute.xlu1 %9345 }
 0x58a   :  { %15021 = vst [vmem:[#allocation46_spill] sm:$0xff] %v13141_v54  ;;  %v4305_v54 = vld [vmem:[#allocation2 + $0x61] sm:$0xff] }
 0x58b   :  { %15022 = vst [vmem:[#allocation63_spill] sm:$0xff] %v13143_v47  ;;  %v4304_v47 = vld [vmem:[#allocation2 + $0x51] sm:$0xff]  ;;  %v13154_v6 = vpack.i.bf16 %v4306_v46, %v4305_v54  ;;  %v4310_v46 = vld [vmem:[#allocation2 + $0x99] sm:$0xff] }
 0x58c   :  { %v13158_v38 = vpack.i.bf16 %v4304_v47, %v4303_v50  ;;  %v4311_v47 = vld [vmem:[#allocation2 + $0xa9] sm:$0xff] }
 0x58d   :  { %v13172_v43 = vpack.i.bf16 %v4312_v29, %v4311_v47  ;;  %v4314_v47 = vld [vmem:[#allocation2 + $0xc9] sm:$0xff] }
 0x58e   :  { %9575 = vrot.lane.b32.xlu2 %v9574_v4, %s10427_s28  ;;  %9565 = vrot.lane.b32.xlu0 %v9564_v13, %s10426_s27 }
 0x58f   :  { %9570 = vrot.lane.b32.xlu1 %v9569_v41, %s10426_s27  ;;  %v4308_v41 = vld [vmem:[#allocation2 + $0x81] sm:$0xff] }
 0x590   :  { %v13148_v33 = vpop.permute.xlu0 %9360  ;;  %v13150_v3 = vpop.permute.xlu2 %9420  ;;  %v13174_v50 = vpack.i.bf16 %v4308_v41, %v4307_v37  ;;  %v4318_v41 = vld [vmem:[#allocation2 + $0xf9] sm:$0xff]  ;;  %v4316_v37 = vld [vmem:[#allocation2 + $0xe1] sm:$0xff] }
 0x591   :  { %15023 = vst [vmem:[#allocation104_spill] sm:$0xff] %v13148_v33  ;;  %v13152_v51 = vpop.permute.xlu1 %9350  ;;  %v13194_v55 = vpack.i.bf16 %v4316_v37, %v4315_v56  ;;  %v4323_v56 = vld [vmem:[#allocation2 + $0x139] sm:$0xff]  ;;  %v4319_v37 = vld [vmem:[#allocation2 + $0x109] sm:$0xff] }
 0x592   :  { %15024 = vst [vmem:[#allocation115_spill] sm:$0xff] %v13150_v3  ;;  %v4309_v3 = vld [vmem:[#allocation2 + $0x91] sm:$0xff] }
 0x593   :  { %15025 = vst [vmem:[#allocation17_spill] sm:$0xff] %v13152_v51  ;;  %v13176_v33 = vpack.i.bf16 %v4310_v46, %v4309_v3  ;;  %v4317_v3 = vld [vmem:[#allocation2 + $0xf1] sm:$0xff]  ;;  %v4313_v46 = vld [vmem:[#allocation2 + $0xc1] sm:$0xff] }
 0x594   :  { %v13190_v51 = vpack.i.bf16 %v4318_v41, %v4317_v3  ;;  %v13192_v48 = vpack.i.bf16 %v4314_v47, %v4313_v46  ;;  %v4324_v41 = vld [vmem:[#allocation2 + $0x141] sm:$0xff]  ;;  %v4320_v3 = vld [vmem:[#allocation2 + $0x111] sm:$0xff]  ;;  %v4322_v47 = vld [vmem:[#allocation2 + $0x129] sm:$0xff] }
 0x595   :  { %v13208_v28 = vpack.i.bf16 %v4324_v41, %v4323_v56  ;;  %v13210_v34 = vpack.i.bf16 %v4320_v3, %v4319_v37  ;;  %v13212_v10 = vpack.i.bf16 %v4322_v47, %v4321_v17  ;;  %v4326_v41 = vld [vmem:[#allocation2 + $0x159] sm:$0xff]  ;;  %v4364_v3 = vld [vmem:[#allocation2 + $0x22] sm:$0xff]  ;;  %v4325_v37 = vld [vmem:[#allocation2 + $0x151] sm:$0xff] }
 0x596   :  { %9590 = vrot.lane.b32.xlu2 %v13154_v6, %s10427_s28  ;;  %9580 = vrot.lane.b32.xlu0 %v13156_v58, %s10427_s28  ;;  %v4363_v56 = vld [vmem:[#allocation2 + $0x1a] sm:$0xff]  ;;  %v13224_v60 = vpack.i.bf16 %v4326_v41, %v4325_v37  ;;  %v4368_v37 = vld [vmem:[#allocation2 + $0x52] sm:$0xff] }
 0x597   :  { %9585 = vrot.lane.b32.xlu1 %v13158_v38, %s10427_s28  ;;  %v9644_v47 = vpack.i.bf16 %v4364_v3, %v4363_v56  ;;  %v4367_v3 = vld [vmem:[#allocation2 + $0x4a] sm:$0xff] }
 0x598   :  { %v13166_v4 = vpop.permute.xlu0 %9375  ;;  %v13168_v13 = vpop.permute.xlu2 %9425 }
 0x599   :  { %15026 = vst [vmem:[#allocation57_spill] sm:$0xff] %v13166_v4  ;;  %v13170_v54 = vpop.permute.xlu1 %9365 }
 0x59a   :  { %15027 = vst [vmem:[#allocation71_spill] sm:$0xff] %v13170_v54 }
 0x59e   :  { %9605 = vrot.lane.b32.xlu2 %v13172_v43, %s10427_s28  ;;  %9595 = vrot.lane.b32.xlu0 %v13174_v50, %s10427_s28 }
 0x59f   :  { %9600 = vrot.lane.b32.xlu1 %v13176_v33, %s10427_s28 }
 0x5a0   :  { %v13184_v4 = vpop.permute.xlu0 %9395  ;;  %v13188_v29 = vpop.permute.xlu2 %9440 }
 0x5a1   :  { %15028 = vst [vmem:[#allocation91_spill] sm:$0xff] %v13184_v4  ;;  %v13186_v54 = vpop.permute.xlu1 %9380 }
 0x5a2   :  { %15029 = vst [vmem:[#allocation128_spill] sm:$0xff] %v13186_v54 }
 0x5a6   :  { %9620 = vrot.lane.b32.xlu2 %v13190_v51, %s10427_s28  ;;  %9610 = vrot.lane.b32.xlu0 %v13192_v48, %s10427_s28 }
 0x5a7   :  { %9615 = vrot.lane.b32.xlu1 %v13194_v55, %s10427_s28 }
 0x5a8   :  { %v13202_v4 = vpop.permute.xlu0 %9405  ;;  %v13206_v46 = vpop.permute.xlu2 %9455 }
 0x5a9   :  { %15030 = vst [vmem:[#allocation139_spill] sm:$0xff] %v13202_v4  ;;  %v13204_v54 = vpop.permute.xlu1 %9400 }
 0x5aa   :  { %15031 = vst [vmem:[#allocation25_spill] sm:$0xff] %v13204_v54 }
 0x5ae   :  { %9635 = vrot.lane.b32.xlu2 %v13208_v28, %s10427_s28  ;;  %9625 = vrot.lane.b32.xlu0 %v13210_v34, %s10427_s28 }
 0x5af   :  { %9630 = vrot.lane.b32.xlu1 %v13212_v10, %s10427_s28 }
 0x5b0   :  { %v13220_v4 = vpop.permute.xlu0 %9410  ;;  %v13226_v17 = vpop.permute.xlu2 %9470 }
 0x5b1   :  { %v13222_v54 = vpop.permute.xlu1 %9415  ;;  %15032 = vst [vmem:[#allocation40_spill] sm:$0xff] %v13226_v17  ;;  %v4517_v17 = vld [vmem:[#allocation2 + $0x169] sm:$0xff] }
 0x5b6   :  { %9650 = vrot.lane.b32.xlu2 %v13035_v12, %s10429_s30  ;;  %9640 = vrot.lane.b32.xlu0 %v13224_v60, %s10427_s28 }
 0x5b7   :  { %9645 = vrot.lane.b32.xlu1 %v9644_v47, %s10428_s29  ;;  %v9674_v47 = vpack.i.bf16 %v4368_v37, %v4367_v3  ;;  %v4371_v3 = vld [vmem:[#allocation2 + $0x7a] sm:$0xff]  ;;  %v4372_v37 = vld [vmem:[#allocation2 + $0x82] sm:$0xff] }
 0x5b8   :  { %v13233_v26 = vpop.permute.xlu0 %9430  ;;  %v13241_v41 = vpop.permute.xlu2 %9485 }
 0x5b9   :  { %v13235_v39 = vpop.permute.xlu1 %9435  ;;  %15033 = vst [vmem:[#allocation80_spill] sm:$0xff] %v13241_v41 }
 0x5be   :  { %9665 = vrot.lane.b32.xlu2 %v13031_v53, %s10429_s30  ;;  %9655 = vrot.lane.b32.xlu0 %v13156_v58, %s10430_s5  ;;  %v4370_v58 = vld [vmem:[#allocation2 + $0x6a] sm:$0xff] }
 0x5bf   :  { %9660 = vrot.lane.b32.xlu1 %v9659_v7, %s10428_s29  ;;  %v9689_v41 = vpack.i.bf16 %v4370_v58, %v4369_v18  ;;  %v4374_v18 = vld [vmem:[#allocation2 + $0x9a] sm:$0xff] }
 0x5c0   :  { %v13244_v12 = vpop.permute.xlu0 %9445  ;;  %v13255_v53 = vpop.permute.xlu2 %9500 }
 0x5c1   :  { %v13246_v56 = vpop.permute.xlu1 %9450  ;;  %15034 = vst [vmem:[#allocation94_spill] sm:$0xff] %v13255_v53  ;;  %v9704_v53 = vpack.i.bf16 %v4372_v37, %v4371_v3  ;;  %v4375_v3 = vld [vmem:[#allocation2 + $0xaa] sm:$0xff]  ;;  %v4376_v37 = vld [vmem:[#allocation2 + $0xb2] sm:$0xff] }
 0x5c6   :  { %9680 = vrot.lane.b32.xlu2 %v13051_v22, %s10429_s30  ;;  %9670 = vrot.lane.b32.xlu0 %v13158_v38, %s10430_s5 }
 0x5c7   :  { %9675 = vrot.lane.b32.xlu1 %v9674_v47, %s10428_s29 }
 0x5c8   :  { %v13253_v63 = vpop.permute.xlu0 %9460  ;;  %v13268_v47 = vpop.permute.xlu2 %9515 }
 0x5c9   :  { %v13257_v7 = vpop.permute.xlu1 %9465  ;;  %15038 = vst [vmem:[#allocation66_spill] sm:$0xff] %v13268_v47  ;;  %v4439_v47 = vld [vmem:[#allocation2 + $0xc0] sm:$0xff] }
 0x5ca   :  { %15035 = vst [vmem:[#allocation122_spill] sm:$0xff] %v13257_v7  ;;  %v9098_v7 = vunpack.i.h.bf16 %v12827_v31 }
 0x5ce   :  { %9695 = vrot.lane.b32.xlu2 %v13053_v61, %s10429_s30  ;;  %9685 = vrot.lane.b32.xlu0 %v13154_v6, %s10430_s5 }
 0x5cf   :  { %9690 = vrot.lane.b32.xlu1 %v9689_v41, %s10428_s29  ;;  %v4373_v41 = vld [vmem:[#allocation2 + $0x92] sm:$0xff] }
 0x5d0   :  { %v13264_v22 = vpop.permute.xlu0 %9475  ;;  %v13279_v58 = vpop.permute.xlu2 %9530 }
 0x5d1   :  { %15036 = vst [vmem:[#allocation33_spill] sm:$0xff] %v13264_v22  ;;  %v13266_v38 = vpop.permute.xlu1 %9480 }
 0x5d2   :  { %15037 = vst [vmem:[#allocation49_spill] sm:$0xff] %v13266_v38  ;;  %v9719_v38 = vpack.i.bf16 %v4374_v18, %v4373_v41  ;;  %v4442_v41 = vld [vmem:[#allocation2 + $0xe0] sm:$0xff] }
 0x5d3   :  { %15041 = vst [vmem:[#allocation19_spill] sm:$0xff] %v13279_v58  ;;  %v4377_v18 = vld [vmem:[#allocation2 + $0xc2] sm:$0xff]  ;;  %v4378_v58 = vld [vmem:[#allocation2 + $0xca] sm:$0xff] }
 0x5d6   :  { %9710 = vrot.lane.b32.xlu2 %v13049_v40, %s10429_s30  ;;  %9700 = vrot.lane.b32.xlu0 %v13174_v50, %s10430_s5 }
 0x5d7   :  { %9705 = vrot.lane.b32.xlu1 %v9704_v53, %s10428_s29  ;;  %v4440_v53 = vld [vmem:[#allocation2 + $0xc8] sm:$0xff] }
 0x5d8   :  { %v13275_v61 = vpop.permute.xlu0 %9490 }
 0x5d9   :  { %15039 = vst [vmem:[#allocation105_spill] sm:$0xff] %v13275_v61  ;;  %v13277_v6 = vpop.permute.xlu1 %9495  ;;  %v9734_v61 = vpack.i.bf16 %v4376_v37, %v4375_v3  ;;  %v4379_v3 = vld [vmem:[#allocation2 + $0xda] sm:$0xff]  ;;  %v4380_v37 = vld [vmem:[#allocation2 + $0xe2] sm:$0xff] }
 0x5da   :  { %15040 = vst [vmem:[#allocation118_spill] sm:$0xff] %v13277_v6  ;;  %v9739_v6 = vpack.i.bf16 %v4440_v53, %v4439_v47  ;;  %v9749_v47 = vpack.i.bf16 %v4378_v58, %v4377_v18  ;;  %v4444_v53 = vld [vmem:[#allocation2 + $0xf8] sm:$0xff] }
 0x5db   :  { %v6874_v58 = vld [vmem:[%s14456_s3 + $0x78] sm:$0xff] }
 0x5dc   :  { %7069 = vmatpush.msra.mxu2 %v6874_v58  ;;  %v4381_v18 = vld [vmem:[#allocation2 + $0xf2] sm:$0xff] }
 0x5de   :  { %9725 = vrot.lane.b32.xlu2 %v13070_v62, %s10429_s30  ;;  %9715 = vrot.lane.b32.xlu0 %v13176_v33, %s10430_s5  ;;  %v13293_v62 = vpop.permute.xlu2 %9545 }
 0x5df   :  { %9720 = vrot.lane.b32.xlu1 %v9719_v38, %s10428_s29  ;;  %15044 = vst [vmem:[#allocation95_spill] sm:$0xff] %v13293_v62  ;;  %v4443_v62 = vld [vmem:[#allocation2 + $0xf0] sm:$0xff] }
 0x5e0   :  { %v13286_v40 = vpop.permute.xlu0 %9505 }
 0x5e1   :  { %15042 = vst [vmem:[#allocation59_spill] sm:$0xff] %v13286_v40  ;;  %v13288_v50 = vpop.permute.xlu1 %9510 }
 0x5e2   :  { %15043 = vst [vmem:[#allocation73_spill] sm:$0xff] %v13288_v50  ;;  %v4441_v50 = vld [vmem:[#allocation2 + $0xd8] sm:$0xff] }
 0x5e3   :  { %v9754_v40 = vpack.i.bf16 %v4442_v41, %v4441_v50  ;;  %v4446_v41 = vld [vmem:[#allocation2 + $0x110] sm:$0xff] }
 0x5e6   :  { %9740 = vrot.lane.b32.xlu2 %v9739_v6, %s10429_s30  ;;  %9730 = vrot.lane.b32.xlu0 %v13172_v43, %s10430_s5 }
 0x5e7   :  { %9735 = vrot.lane.b32.xlu1 %v9734_v61, %s10428_s29  ;;  %v13306_v61 = vpop.permute.xlu2 %9560 }
 0x5e8   :  { %v13296_v33 = vpop.permute.xlu0 %9520  ;;  %15048 = vst [vmem:[#allocation43_spill] sm:$0xff] %v13306_v61 }
 0x5e9   :  { %15045 = vst [vmem:[#allocation130_spill] sm:$0xff] %v13296_v33  ;;  %v13298_v38 = vpop.permute.xlu1 %9525  ;;  %v4453_v33 = vld [vmem:[#allocation2 + $0x168] sm:$0xff] }
 0x5ea   :  { %15046 = vst [vmem:[#allocation142_spill] sm:$0xff] %v13298_v38  ;;  %v9769_v38 = vpack.i.bf16 %v4444_v53, %v4443_v62 }
 0x5ee   :  { %9755 = vrot.lane.b32.xlu2 %v9754_v40, %s10429_s30  ;;  %9745 = vrot.lane.b32.xlu0 %v13192_v48, %s10430_s5  ;;  %v9764_v40 = vpack.i.bf16 %v4380_v37, %v4379_v3  ;;  %v6873_v48 = vld [vmem:[%s14456_s3 + $0x70] sm:$0xff]  ;;  %v6871_v37 = vld [vmem:[%s14456_s3 + $0x60] sm:$0xff] }
 0x5ef   :  { %9750 = vrot.lane.b32.xlu1 %v9749_v47, %s10428_s29  ;;  %7070 = vmatpush.msra.mxu2 %v6873_v48  ;;  %v4382_v47 = vld [vmem:[#allocation2 + $0xfa] sm:$0xff]  ;;  %v13324_v53 = vpop.permute.xlu2 %9575 }
 0x5f0   :  { %v13304_v43 = vpop.permute.xlu0 %9535  ;;  %v9779_v58 = vpack.i.bf16 %v4382_v47, %v4381_v18  ;;  %v4448_v47 = vld [vmem:[#allocation2 + $0x128] sm:$0xff] }
 0x5f1   :  { %15047 = vst [vmem:[#allocation27_spill] sm:$0xff] %v13304_v43  ;;  %v13308_v6 = vpop.permute.xlu1 %9540  ;;  %v4390_v43 = vld [vmem:[#allocation2 + $0x15a] sm:$0xff] }
 0x5f2   :  { %15049 = vst [vmem:[#allocation82_spill] sm:$0xff] %v13308_v6 }
 0x5f6   :  { %9770 = vrot.lane.b32.xlu2 %v9769_v38, %s10429_s30  ;;  %9760 = vrot.lane.b32.xlu0 %v13194_v55, %s10430_s5  ;;  %v4445_v38 = vld [vmem:[#allocation2 + $0x108] sm:$0xff] }
 0x5f7   :  { %9765 = vrot.lane.b32.xlu1 %v9764_v40, %s10428_s29  ;;  %v9784_v3 = vpack.i.bf16 %v4446_v41, %v4445_v38  ;;  %v6872_v55 = vld [vmem:[%s14456_s3 + $0x68] sm:$0xff]  ;;  %v6870_v40 = vld [vmem:[%s14456_s3 + $0x58] sm:$0xff]  ;;  %v6869_v41 = vld [vmem:[%s14456_s3 + $0x50] sm:$0xff] }
 0x5f8   :  { %v13320_v50 = vpop.permute.xlu0 %9550  ;;  %7071 = vmatpush.msra.mxu2 %v6872_v55  ;;  %v4383_v38 = vld [vmem:[#allocation2 + $0x10a] sm:$0xff] }
 0x5f9   :  { %15050 = vst [vmem:[#allocation97_spill] sm:$0xff] %v13320_v50  ;;  %v13322_v62 = vpop.permute.xlu1 %9555 }
 0x5fa   :  { %15051 = vst [vmem:[#allocation125_spill] sm:$0xff] %v13322_v62  ;;  %7072 = vmatpush.msra.mxu2 %v6871_v37  ;;  %v6867_v37 = vld [vmem:[%s14456_s3 + $0x40] sm:$0xff]  ;;  %v4451_v62 = vld [vmem:[#allocation2 + $0x150] sm:$0xff] }
 0x5fc   :  { %7073 = vmatpush.msra.mxu2 %v6870_v40  ;;  %v6866_v40 = vld [vmem:[%s14456_s3 + $0x38] sm:$0xff] }
 0x5fe   :  { %9785 = vrot.lane.b32.xlu2 %v9784_v3, %s10429_s30  ;;  %9775 = vrot.lane.b32.xlu0 %v13190_v51, %s10430_s5  ;;  %v4384_v3 = vld [vmem:[#allocation2 + $0x112] sm:$0xff]  ;;  %v4447_v51 = vld [vmem:[#allocation2 + $0x120] sm:$0xff] }
 0x5ff   :  { %9780 = vrot.lane.b32.xlu1 %v9779_v58, %s10428_s29  ;;  %7074 = vmatpush.msra.mxu2 %v6869_v41  ;;  %v9799_v55 = vpack.i.bf16 %v4448_v47, %v4447_v51  ;;  %v6868_v58 = vld [vmem:[%s14456_s3 + $0x48] sm:$0xff]  ;;  %v9794_v61 = vpack.i.bf16 %v4384_v3, %v4383_v38  ;;  %v6865_v47 = vld [vmem:[%s14456_s3 + $0x30] sm:$0xff]  ;;  %v4450_v3 = vld [vmem:[#allocation2 + $0x140] sm:$0xff] }
 0x600   :  { %v13339_v48 = vpop.permute.xlu0 %9565  ;;  %v4385_v51 = vld [vmem:[#allocation2 + $0x122] sm:$0xff] }
 0x601   :  { %15052 = vst [vmem:[#allocation35_spill] sm:$0xff] %v13339_v48  ;;  %v13344_v18 = vpop.permute.xlu1 %9570  ;;  %v13352_v48 = vpop.permute.xlu2 %9590  ;;  %7075 = vmatpush.msra.mxu2 %v6868_v58  ;;  %v6864_v58 = vld [vmem:[%s14456_s3 + $0x28] sm:$0xff] }
 0x602   :  { %15053 = vst [vmem:[#allocation51_spill] sm:$0xff] %v13344_v18 }
 0x603   :  { %7076 = vmatpush.msra.mxu2 %v6867_v37  ;;  %v6863_v37 = vld [vmem:[%s14456_s3 + $0x20] sm:$0xff] }
 0x605   :  { %7077 = vmatpush.msra.mxu2 %v6866_v40  ;;  %v6862_v40 = vld [vmem:[%s14456_s3 + $0x18] sm:$0xff] }
 0x606   :  { %9800 = vrot.lane.b32.xlu2 %v9799_v55, %s10429_s30  ;;  %9790 = vrot.lane.b32.xlu0 %v13210_v34, %s10430_s5  ;;  %v4386_v55 = vld [vmem:[#allocation2 + $0x12a] sm:$0xff]  ;;  %v4449_v34 = vld [vmem:[#allocation2 + $0x138] sm:$0xff] }
 0x607   :  { %9795 = vrot.lane.b32.xlu1 %v9794_v61, %s10428_s29  ;;  %7078 = vmatpush.msra.mxu2 %v6865_v47  ;;  %v9814_v61 = vpack.i.bf16 %v4450_v3, %v4449_v34  ;;  %v9809_v18 = vpack.i.bf16 %v4386_v55, %v4385_v51  ;;  %v6861_v51 = vld [vmem:[%s14456_s3 + $0x10] sm:$0xff]  ;;  %v4452_v34 = vld [vmem:[#allocation2 + $0x158] sm:$0xff] }
 0x608   :  { %v13361_v41 = vpop.permute.xlu0 %9580 }
 0x609   :  { %v13366_v38 = vpop.permute.xlu1 %9585  ;;  %7079 = vmatpush.msra.mxu2 %v6864_v58  ;;  %v13380_v47 = vpop.permute.xlu2 %9605  ;;  %v4388_v58 = vld [vmem:[#allocation2 + $0x142] sm:$0xff] }
 0x60b   :  { %7080 = vmatpush.msra.mxu2 %v6863_v37  ;;  %v6859_v37 = vld [vmem:[%s14456_s3] sm:$0xff] }
 0x60d   :  { %7081 = vmatpush.msra.mxu2 %v6862_v40 }
 0x60e   :  { %9815 = vrot.lane.b32.xlu2 %v9814_v61, %s10429_s30  ;;  %9805 = vrot.lane.b32.xlu0 %v13212_v10, %s10430_s5  ;;  %v4387_v10 = vld [vmem:[#allocation2 + $0x13a] sm:$0xff]  ;;  %v6860_v61 = vld [vmem:[%s14456_s3 + $0x8] sm:$0xff]  ;;  %s7831_s3 = sld [smem:[#allocation3 + $0x3]] }
 0x60f   :  { %9810 = vrot.lane.b32.xlu1 %v9809_v18, %s10428_s29  ;;  %7082 = vmatpush.msra.mxu2 %v6861_v51  ;;  %v9829_v18 = vpack.i.bf16 %v4452_v34, %v4451_v62  ;;  %v9824_v50 = vpack.i.bf16 %v4388_v58, %v4387_v10  ;;  %v4454_v62 = vld [vmem:[#allocation2 + $0x170] sm:$0xff] }
 0x610   :  { %v13383_v3 = vpop.permute.xlu0 %9595  ;;  %v4389_v34 = vld [vmem:[#allocation2 + $0x152] sm:$0xff]  ;;  %v9844_v10 = vpack.i.bf16 %v4454_v62, %v4453_v33  ;;  %v9222_v62 = vunpack.i.l.bf16 %v13059_v20 }
 0x611   :  { %v13388_v55 = vpop.permute.xlu1 %9600  ;;  %7083 = vmatpush.msra.mxu2 %v6860_v61  ;;  %v13402_v6 = vpop.permute.xlu2 %9620  ;;  %v9839_v58 = vpack.i.bf16 %v4390_v43, %v4389_v34  ;;  %v4391_v61 = vld [vmem:[#allocation2 + $0x16a] sm:$0xff]  ;;  %v4043_v43 = vld [vmem:[#allocation2] sm:$0xff] }
 0x612   :  { %15054 = vst [vmem:[#allocation68_spill] sm:$0xff] %v13402_v6 }
 0x613   :  { %7084 = vmatpush.msra.mxu2 %v6859_v37  ;;  %v4518_v37 = vld [vmem:[#allocation2 + $0x171] sm:$0xff] }
 0x614   :  { %v9849_v33 = vpack.i.bf16 %v4518_v37, %v4517_v17  ;;  %v9577_v17 = vunpack.i.l.bf16 %v13324_v53  ;;  %v4455_v37 = vld [vmem:[#allocation2 + $0x180] sm:$0xff] }
 0x616   :  { %9830 = vrot.lane.b32.xlu2 %v9829_v18, %s10429_s30  ;;  %9820 = vrot.lane.b32.xlu0 %v13208_v28, %s10430_s5  ;;  %v4392_v18 = vld [vmem:[#allocation2 + $0x172] sm:$0xff] }
 0x617   :  { %9825 = vrot.lane.b32.xlu1 %v9824_v50, %s10428_s29  ;;  %v9859_v45 = vpack.i.bf16 %v4392_v18, %v4391_v61  ;;  %v4329_v18 = vld [vmem:[#allocation2 + $0x181] sm:$0xff] }
 0x618   :  { %v13400_v40 = vpop.permute.xlu0 %9610 }
 0x619   :  { %v13404_v51 = vpop.permute.xlu1 %9615  ;;  %v13414_v22 = vpop.permute.xlu2 %9635 }
 0x61a   :  { %15057 = vst [vmem:[#allocation21_spill] sm:$0xff] %v13414_v22  ;;  %v4330_v22 = vld [vmem:[#allocation2 + $0x189] sm:$0xff] }
 0x61e   :  { %9845 = vrot.lane.b32.xlu2 %v9844_v10, %s10429_s30  ;;  %9835 = vrot.lane.b32.xlu0 %v13224_v60, %s10430_s5  ;;  %v9097_v60 = vunpack.i.l.bf16 %v12827_v31  ;;  %v9412_v10 = vunpack.i.l.bf16 %v13220_v4  ;;  %v9578_v31 = vunpack.i.h.bf16 %v13324_v53 }
 0x61f   :  { %9840 = vrot.lane.b32.xlu1 %v9839_v58, %s10428_s29 }
 0x620   :  { %v13410_v28 = vpop.permute.xlu0 %9625 }
 0x621   :  { %15055 = vst [vmem:[#allocation106_spill] sm:$0xff] %v13410_v28  ;;  %v13412_v50 = vpop.permute.xlu1 %9630  ;;  %v9651_v28 = vpop.permute.xlu2 %9650 }
 0x622   :  { %15056 = vst [vmem:[#allocation121_spill] sm:$0xff] %v13412_v50  ;;  %v4456_v50 = vld [vmem:[#allocation2 + $0x188] sm:$0xff] }
 0x623   :  { %v9864_v35 = vpack.i.bf16 %v4456_v50, %v4455_v37  ;;  %v9652_v50 = vunpack.i.l.bf16 %v9651_v28 }
 0x626   :  { %9860 = vrot.lane.b32.xlu2 %v9859_v45, %s10428_s29  ;;  %9850 = vrot.lane.b32.xlu0 %v9849_v33, %s10430_s5  ;;  %v6411_v45 = vsel %vm52_vm0, %v4043_v43, %v9097_v60  ;;  %v4521_v43 = vld [vmem:[#allocation2 + $0x199] sm:$0xff] }
 0x627   :  { %9855 = vrot.lane.b32.xlu1 %v9849_v33, %s10427_s28  ;;  %v6475_v21 = vsel %vm2767_vm3, %v6411_v45, %v9222_v62  ;;  %v9874_v33 = vpack.i.bf16 %v4330_v22, %v4329_v18  ;;  %v4044_v62 = vld [vmem:[#allocation2 + $0x8] sm:$0xff]  ;;  %v9223_v22 = vunpack.i.h.bf16 %v13059_v20  ;;  %v4458_v45 = vld [vmem:[#allocation2 + $0x1a0] sm:$0xff] }
 0x628   :  { %v13421_v34 = vpop.permute.xlu0 %9640  ;;  %v6539_v23 = vsel %vm2832_vm4, %v6475_v21, %v9412_v10  ;;  %v4457_v10 = vld [vmem:[#allocation2 + $0x198] sm:$0xff]  ;;  %v4393_v18 = vld [vmem:[#allocation2 + $0x182] sm:$0xff] }
 0x629   :  { %15058 = vst [vmem:[#allocation61_spill] sm:$0xff] %v13421_v34  ;;  %v9646_v58 = vpop.permute.xlu1 %9645  ;;  %v6603_v34 = vsel %vm2897_vm6, %v6539_v23, %v9577_v17  ;;  %v9413_v23 = vunpack.i.h.bf16 %v13220_v4  ;;  %v9884_v20 = vpack.i.bf16 %v4458_v45, %v4457_v10  ;;  %v4395_v10 = vld [vmem:[#allocation2 + $0x1ca] sm:$0xff]  ;;  %v4396_v45 = vld [vmem:[#allocation2 + $0x1d2] sm:$0xff] }
 0x62a   :  { %v9647_v61 = vunpack.i.l.bf16 %v9646_v58 }
 0x62c   :  { %v6667_v60 = vsel %vm2962_vm5, %v6603_v34, %v9647_v61  ;;  %v6412_v34 = vsel %vm52_vm0, %v4044_v62, %v9098_v7  ;;  %v9648_v61 = vunpack.i.h.bf16 %v9646_v58  ;;  %v9227_v58 = vunpack.i.l.bf16 %v12994_v14  ;;  %v4332_v62 = vld [vmem:[#allocation2 + $0x1d1] sm:$0xff] }
 0x62d   :  { %v6731_v37 = vsel %vm3027_vm7, %v6667_v60, %v9652_v50  ;;  %v6476_v16 = vsel %vm2767_vm3, %v6412_v34, %v9223_v22  ;;  %v9653_v60 = vunpack.i.h.bf16 %v9651_v28  ;;  %v4045_v22 = vld [vmem:[#allocation2 + $0x18] sm:$0xff]  ;;  %v9582_v50 = vunpack.i.l.bf16 %v13361_v41  ;;  %v9666_v34 = vpop.permute.xlu2 %9665 }
 0x62e   :  { %9875 = vrot.lane.b32.xlu2 %v9874_v33, %s10427_s28  ;;  %9865 = vrot.lane.b32.xlu0 %v9864_v35, %s10429_s30  ;;  %v4394_v35 = vld [vmem:[#allocation2 + $0x18a] sm:$0xff]  ;;  %v6540_v4 = vsel %vm2832_vm4, %v6476_v16, %v9413_v23 }
 0x62f   :  { %9870 = vrot.lane.b32.xlu1 %v9874_v33, %s10430_s5  ;;  %v9889_v33 = vpack.i.bf16 %v4522_v42, %v4521_v43  ;;  %v9879_v15 = vpack.i.bf16 %v4394_v35, %v4393_v18  ;;  %v6604_v6 = vsel %vm2897_vm6, %v6540_v4, %v9578_v31  ;;  %v9102_v42 = vunpack.i.l.bf16 %v12895_v30  ;;  %v4460_v16 = vld [vmem:[#allocation2 + $0x1e8] sm:$0xff] }
 0x630   :  { %v9656_v21 = vpop.permute.xlu0 %9655  ;;  %v6668_v7 = vsel %vm2962_vm5, %v6604_v6, %v9648_v61  ;;  %v9417_v43 = vunpack.i.l.bf16 %v13222_v54  ;;  %v4331_v18 = vld [vmem:[#allocation2 + $0x1c9] sm:$0xff]  ;;  %v9899_v61 = vpack.i.bf16 %v4396_v45, %v4395_v10  ;;  %v9103_v4 = vunpack.i.h.bf16 %v12895_v30 }
 0x631   :  { %v9657_v17 = vunpack.i.l.bf16 %v9656_v21  ;;  %v9658_v53 = vunpack.i.h.bf16 %v9656_v21  ;;  %v6413_v21 = vsel %vm52_vm0, %v4045_v22, %v9102_v42  ;;  %v4046_v22 = vld [vmem:[#allocation2 + $0x20] sm:$0xff] }
 0x632   :  { %v6477_v28 = vsel %vm2767_vm3, %v6413_v21, %v9227_v58  ;;  %v9667_v58 = vunpack.i.l.bf16 %v9666_v34  ;;  %v6414_v30 = vsel %vm52_vm0, %v4046_v22, %v9103_v4  ;;  %v4523_v21 = vld [vmem:[#allocation2 + $0x1e1] sm:$0xff]  ;;  %v4047_v4 = vld [vmem:[#allocation2 + $0x30] sm:$0xff] }
 0x633   :  { %v6795_v36 = vsel %vm3092_vm8, %v6731_v37, %v9657_v17  ;;  %v4459_v17 = vld [vmem:[#allocation2 + $0x1e0] sm:$0xff]  ;;  %v9894_v37 = vpack.i.bf16 %v4332_v62, %v4331_v18  ;;  %v4524_v62 = vld [vmem:[#allocation2 + $0x1e9] sm:$0xff] }
 0x634   :  { %7085 = vmatmul.f32.vlgmr.msra.gmra.mxu2 %v6795_v36  ;;  %v9661_v36 = vpop.permute.xlu1 %9660  ;;  %v9904_v31 = vpack.i.bf16 %v4460_v16, %v4459_v17  ;;  %v4398_v16 = vld [vmem:[#allocation2 + $0x1ea] sm:$0xff] }
 0x635   :  { %v9662_v23 = vunpack.i.l.bf16 %v9661_v36  ;;  %v9663_v10 = vunpack.i.h.bf16 %v9661_v36 }
 0x636   :  { %9890 = vrot.lane.b32.xlu2 %v9889_v33, %s10430_s5  ;;  %9880 = vrot.lane.b32.xlu0 %v9879_v15, %s10428_s29  ;;  %v6732_v15 = vsel %vm3027_vm7, %v6668_v7, %v9653_v60  ;;  %v6541_v33 = vsel %vm2832_vm4, %v6477_v28, %v9417_v43  ;;  %v9228_v7 = vunpack.i.h.bf16 %v12994_v14  ;;  %v9418_v60 = vunpack.i.h.bf16 %v13222_v54  ;;  %v4397_v43 = vld [vmem:[#allocation2 + $0x1e2] sm:$0xff] }
 0x637   :  { %9885 = vrot.lane.b32.xlu1 %v9884_v20, %s10429_s30  ;;  %v6796_v6 = vsel %vm3092_vm8, %v6732_v15, %v9658_v53  ;;  %v6605_v20 = vsel %vm2897_vm6, %v6541_v33, %v9582_v50  ;;  %v9583_v50 = vunpack.i.h.bf16 %v13361_v41  ;;  %v9919_v14 = vpack.i.bf16 %v4398_v16, %v4397_v43  ;;  %v4461_v43 = vld [vmem:[#allocation2 + $0x1f8] sm:$0xff] }
 0x638   :  { %v9671_v35 = vpop.permute.xlu0 %9670  ;;  %v6669_v53 = vsel %vm2962_vm5, %v6605_v20, %v9662_v23  ;;  %v6478_v23 = vsel %vm2767_vm3, %v6414_v30, %v9228_v7  ;;  %v9107_v41 = vunpack.i.l.bf16 %v12893_v44  ;;  %v9237_v28 = vunpack.i.l.bf16 %v13076_v19  ;;  %v4462_v20 = vld [vmem:[#allocation2 + $0x200] sm:$0xff] }
 0x639   :  { %v9672_v42 = vunpack.i.l.bf16 %v9671_v35  ;;  %v6733_v15 = vsel %vm3027_vm7, %v6669_v53, %v9667_v58  ;;  %v6542_v54 = vsel %vm2832_vm4, %v6478_v23, %v9418_v60  ;;  %v9673_v18 = vunpack.i.h.bf16 %v9671_v35  ;;  %v4335_v60 = vld [vmem:[#allocation2 + $0x1f9] sm:$0xff] }
 0x63a   :  { %v6606_v17 = vsel %vm2897_vm6, %v6542_v54, %v9583_v50  ;;  %v9427_v33 = vunpack.i.l.bf16 %v13168_v13  ;;  %v6415_v7 = vsel %vm52_vm0, %v4047_v4, %v9107_v41  ;;  %v9924_v22 = vpack.i.bf16 %v4462_v20, %v4461_v43  ;;  %v4528_v54 = vld [vmem:[#allocation2 + $0x219] sm:$0xff]  ;;  %v4400_v41 = vld [vmem:[#allocation2 + $0x202] sm:$0xff]  ;;  %v4527_v20 = vld [vmem:[#allocation2 + $0x211] sm:$0xff] }
 0x63b   :  { %v6797_v45 = vsel %vm3092_vm8, %v6733_v15, %v9672_v42  ;;  %v6670_v36 = vsel %vm2962_vm5, %v6606_v17, %v9663_v10  ;;  %v9587_v42 = vunpack.i.l.bf16 %v13366_v38  ;;  %v6479_v16 = vsel %vm2767_vm3, %v6415_v7, %v9237_v28  ;;  %v9681_v15 = vpop.permute.xlu2 %9680  ;;  %v4399_v17 = vld [vmem:[#allocation2 + $0x1fa] sm:$0xff] }
 0x63c   :  { %7088 = vmatmul.f32.gmra.mxu2 %v6796_v6  ;;  %v9909_v6 = vpack.i.bf16 %v4524_v62, %v4523_v21  ;;  %v6543_v50 = vsel %vm2832_vm4, %v6479_v16, %v9427_v33  ;;  %v9108_v10 = vunpack.i.h.bf16 %v12893_v44  ;;  %v9238_v23 = vunpack.i.h.bf16 %v13076_v19 }
 0x63d   :  { %v6607_v30 = vsel %vm2897_vm6, %v6543_v50, %v9587_v42  ;;  %v9949_v4 = vpack.i.bf16 %v4528_v54, %v4527_v20  ;;  %v4463_v42 = vld [vmem:[#allocation2 + $0x210] sm:$0xff]  ;;  %v9683_v43 = vunpack.i.h.bf16 %v9681_v15  ;;  %v4049_v50 = vld [vmem:[#allocation2 + $0x48] sm:$0xff] }
 0x63e   :  { %9905 = vrot.lane.b32.xlu2 %v9904_v31, %s10429_s30  ;;  %9895 = vrot.lane.b32.xlu0 %v9894_v37, %s10427_s28  ;;  %v9668_v31 = vunpack.i.h.bf16 %v9666_v34  ;;  %v9676_v37 = vpop.permute.xlu1 %9675 }
 0x63f   :  { %9900 = vrot.lane.b32.xlu1 %v9899_v61, %s10428_s29  ;;  %v4336_v61 = vld [vmem:[#allocation2 + $0x201] sm:$0xff]  ;;  %v9677_v35 = vunpack.i.l.bf16 %v9676_v37  ;;  %v9678_v33 = vunpack.i.h.bf16 %v9676_v37  ;;  %v9112_v37 = vunpack.i.l.bf16 %v12844_v2 }
 0x640   :  { %v6734_v53 = vsel %vm3027_vm7, %v6670_v36, %v9668_v31  ;;  %v9686_v34 = vpop.permute.xlu0 %9685  ;;  %v9934_v62 = vpack.i.bf16 %v4336_v61, %v4335_v60  ;;  %v9588_v36 = vunpack.i.h.bf16 %v13366_v38  ;;  %v4464_v31 = vld [vmem:[#allocation2 + $0x218] sm:$0xff]  ;;  %v9242_v60 = vunpack.i.l.bf16 %v13080_v0 }
 0x641   :  { %v6798_v58 = vsel %vm3092_vm8, %v6734_v53, %v9673_v18  ;;  %v6671_v21 = vsel %vm2962_vm5, %v6607_v30, %v9677_v35  ;;  %v4048_v18 = vld [vmem:[#allocation2 + $0x38] sm:$0xff]  ;;  %v9944_v7 = vpack.i.bf16 %v4464_v31, %v4463_v42  ;;  %v9688_v35 = vunpack.i.h.bf16 %v9686_v34 }
 0x642   :  { %v6416_v44 = vsel %vm52_vm0, %v4048_v18, %v9108_v10  ;;  %v9592_v30 = vunpack.i.l.bf16 %v13352_v48  ;;  %v9113_v31 = vunpack.i.h.bf16 %v12844_v2  ;;  %v4404_v42 = vld [vmem:[#allocation2 + $0x232] sm:$0xff] }
 0x643   :  { %v6480_v19 = vsel %vm2767_vm3, %v6416_v44, %v9238_v23  ;;  %v9696_v18 = vpop.permute.xlu2 %9695 }
 0x644   :  { %7091 = vmatmul.f32.gmra.mxu2 %v6797_v45  ;;  %v9687_v45 = vunpack.i.l.bf16 %v9686_v34  ;;  %v6417_v34 = vsel %vm52_vm0, %v4049_v50, %v9112_v37  ;;  %v9697_v20 = vunpack.i.l.bf16 %v9696_v18  ;;  %v9247_v50 = vunpack.i.l.bf16 %v13015_v25 }
 0x645   :  { %v6481_v54 = vsel %vm2767_vm3, %v6417_v34, %v9242_v60  ;;  %v4468_v34 = vld [vmem:[#allocation2 + $0x248] sm:$0xff] }
 0x646   :  { %9920 = vrot.lane.b32.xlu2 %v9919_v14, %s10428_s29  ;;  %9910 = vrot.lane.b32.xlu0 %v9909_v6, %s10430_s5  ;;  %v9682_v14 = vunpack.i.l.bf16 %v9681_v15  ;;  %v9691_v16 = vpop.permute.xlu1 %9690 }
 0x647   :  { %9915 = vrot.lane.b32.xlu1 %v9909_v6, %s10427_s28  ;;  %v9428_v6 = vunpack.i.h.bf16 %v13168_v13  ;;  %v9939_v13 = vpack.i.bf16 %v4400_v41, %v4399_v17  ;;  %v9692_v23 = vunpack.i.l.bf16 %v9691_v16  ;;  %v9693_v37 = vunpack.i.h.bf16 %v9691_v16 }
 0x648   :  { %v6735_v28 = vsel %vm3027_vm7, %v6671_v21, %v9682_v14  ;;  %v4402_v21 = vld [vmem:[#allocation2 + $0x21a] sm:$0xff]  ;;  %v9701_v15 = vpop.permute.xlu0 %9700 }
 0x649   :  { %v6799_v61 = vsel %vm3092_vm8, %v6735_v28, %v9687_v45  ;;  %v6544_v53 = vsel %vm2832_vm4, %v6480_v19, %v9428_v6  ;;  %v4401_v45 = vld [vmem:[#allocation2 + $0x212] sm:$0xff]  ;;  %v4465_v6 = vld [vmem:[#allocation2 + $0x228] sm:$0xff]  ;;  %v9702_v44 = vunpack.i.l.bf16 %v9701_v15  ;;  %v9433_v19 = vunpack.i.h.bf16 %v13233_v26 }
 0x64a   :  { %v6608_v38 = vsel %vm2897_vm6, %v6544_v53, %v9588_v36  ;;  %v9959_v36 = vpack.i.bf16 %v4402_v21, %v4401_v45  ;;  %v4530_v53 = vld [vmem:[#allocation2 + $0x231] sm:$0xff]  ;;  %v9437_v45 = vunpack.i.l.bf16 %v13235_v39  ;;  %v4342_v21 = vld [vmem:[#allocation2 + $0x249] sm:$0xff] }
 0x64c   :  { %7094 = vmatmul.f32.gmra.mxu2 %v6798_v58  ;;  %v6672_v58 = vsel %vm2962_vm5, %v6608_v38, %v9678_v33  ;;  %v9593_v38 = vunpack.i.h.bf16 %v13352_v48  ;;  %v9117_v48 = vunpack.i.l.bf16 %v12913_v32 }
 0x64d   :  { %v6736_v10 = vsel %vm3027_vm7, %v6672_v58, %v9683_v43  ;;  %v4529_v58 = vld [vmem:[#allocation2 + $0x229] sm:$0xff] }
 0x64e   :  { %9935 = vrot.lane.b32.xlu2 %v9934_v62, %s10427_s28  ;;  %9925 = vrot.lane.b32.xlu0 %v9924_v22, %s10429_s30  ;;  %v4466_v22 = vld [vmem:[#allocation2 + $0x230] sm:$0xff]  ;;  %v6800_v14 = vsel %vm3092_vm8, %v6736_v10, %v9688_v35  ;;  %v9969_v43 = vpack.i.bf16 %v4530_v53, %v4529_v58  ;;  %v9706_v10 = vpop.permute.xlu1 %9705  ;;  %v9248_v53 = vunpack.i.h.bf16 %v13015_v25  ;;  %v9598_v58 = vunpack.i.h.bf16 %v13383_v3 }
 0x64f   :  { %9930 = vrot.lane.b32.xlu1 %v9934_v62, %s10430_s5  ;;  %v9432_v62 = vunpack.i.l.bf16 %v13233_v26  ;;  %v9964_v17 = vpack.i.bf16 %v4466_v22, %v4465_v6  ;;  %v9703_v22 = vunpack.i.h.bf16 %v9701_v15  ;;  %v9707_v15 = vunpack.i.l.bf16 %v9706_v10 }
 0x651   :  { %v6545_v41 = vsel %vm2832_vm4, %v6481_v54, %v9432_v62 }
 0x652   :  { %v6609_v28 = vsel %vm2897_vm6, %v6545_v41, %v9592_v30  ;;  %v9698_v30 = vunpack.i.h.bf16 %v9696_v18  ;;  %v4341_v41 = vld [vmem:[#allocation2 + $0x241] sm:$0xff]  ;;  %v9716_v18 = vpop.permute.xlu0 %9715 }
 0x653   :  { %v6673_v33 = vsel %vm2962_vm5, %v6609_v28, %v9692_v23  ;;  %v4051_v23 = vld [vmem:[#allocation2 + $0x60] sm:$0xff] }
 0x654   :  { %7097 = vmatmul.f32.gmra.mxu2 %v6799_v61  ;;  %v9243_v61 = vunpack.i.h.bf16 %v13080_v0  ;;  %v6419_v54 = vsel %vm52_vm0, %v4051_v23, %v9117_v48 }
 0x655   :  { %v6483_v28 = vsel %vm2767_vm3, %v6419_v54, %v9247_v50  ;;  %v4053_v54 = vld [vmem:[#allocation2 + $0x78] sm:$0xff] }
 0x656   :  { %9950 = vrot.lane.b32.xlu2 %v9949_v4, %s10430_s5  ;;  %9940 = vrot.lane.b32.xlu0 %v9939_v13, %s10428_s29  ;;  %v4403_v13 = vld [vmem:[#allocation2 + $0x22a] sm:$0xff]  ;;  %v9721_v23 = vpop.permute.xlu1 %9720 }
 0x657   :  { %9945 = vrot.lane.b32.xlu1 %v9944_v7, %s10429_s30  ;;  %v4050_v7 = vld [vmem:[#allocation2 + $0x50] sm:$0xff]  ;;  %v9979_v0 = vpack.i.bf16 %v4404_v42, %v4403_v13  ;;  %v9717_v13 = vunpack.i.l.bf16 %v9716_v18 }
 0x658   :  { %v6418_v2 = vsel %vm52_vm0, %v4050_v7, %v9113_v31  ;;  %v9994_v31 = vpack.i.bf16 %v4342_v21, %v4341_v41  ;;  %v9252_v21 = vunpack.i.l.bf16 %v13085_v57  ;;  %v4407_v41 = vld [vmem:[#allocation2 + $0x25a] sm:$0xff] }
 0x659   :  { %v6482_v60 = vsel %vm2767_vm3, %v6418_v2, %v9243_v61  ;;  %v9711_v61 = vpop.permute.xlu2 %9710  ;;  %v4405_v2 = vld [vmem:[#allocation2 + $0x242] sm:$0xff] }
 0x65a   :  { %v6546_v26 = vsel %vm2832_vm4, %v6482_v60, %v9433_v19  ;;  %v9118_v19 = vunpack.i.h.bf16 %v12913_v32  ;;  %v9712_v7 = vunpack.i.l.bf16 %v9711_v61 }
 0x65b   :  { %v6610_v62 = vsel %vm2897_vm6, %v6546_v26, %v9593_v38  ;;  %v9438_v38 = vunpack.i.h.bf16 %v13235_v39 }
 0x65c   :  { %7100 = vmatmul.f32.gmra.mxu2 %v6800_v14  ;;  %v6674_v16 = vsel %vm2962_vm5, %v6610_v62, %v9693_v37  ;;  %v9597_v14 = vunpack.i.l.bf16 %v13383_v3  ;;  %v4406_v37 = vld [vmem:[#allocation2 + $0x24a] sm:$0xff]  ;;  %v4533_v62 = vld [vmem:[#allocation2 + $0x259] sm:$0xff] }
 0x65d   :  { %v6738_v6 = vsel %vm3027_vm7, %v6674_v16, %v9698_v30  ;;  %v9999_v39 = vpack.i.bf16 %v4406_v37, %v4405_v2  ;;  %v9122_v30 = vunpack.i.l.bf16 %v12911_v49  ;;  %v9253_v2 = vunpack.i.h.bf16 %v13085_v57 }
 0x65e   :  { %9965 = vrot.lane.b32.xlu2 %v9964_v17, %s10429_s30  ;;  %9955 = vrot.lane.b32.xlu0 %v9949_v4, %s10427_s28  ;;  %v6737_v4 = vsel %vm3027_vm7, %v6673_v33, %v9697_v20  ;;  %v6802_v17 = vsel %vm3092_vm8, %v6738_v6, %v9703_v22  ;;  %v6547_v33 = vsel %vm2832_vm4, %v6483_v28, %v9437_v45  ;;  %v4469_v22 = vld [vmem:[#allocation2 + $0x258] sm:$0xff] }
 0x65f   :  { %9960 = vrot.lane.b32.xlu1 %v9959_v36, %s10428_s29  ;;  %v6801_v35 = vsel %vm3092_vm8, %v6737_v4, %v9702_v44  ;;  %v4467_v36 = vld [vmem:[#allocation2 + $0x240] sm:$0xff]  ;;  %v6611_v20 = vsel %vm2897_vm6, %v6547_v33, %v9597_v14  ;;  %v9442_v14 = vunpack.i.l.bf16 %v13188_v29  ;;  %v4472_v6 = vld [vmem:[#allocation2 + $0x278] sm:$0xff]  ;;  %v6421_v28 = vsel %vm52_vm0, %v4053_v54, %v9122_v30 }
 0x660   :  { %v9984_v44 = vpack.i.bf16 %v4468_v34, %v4467_v36  ;;  %v6675_v42 = vsel %vm2962_vm5, %v6611_v20, %v9707_v15  ;;  %v4534_v4 = vld [vmem:[#allocation2 + $0x261] sm:$0xff]  ;;  %v9713_v34 = vunpack.i.h.bf16 %v9711_v61  ;;  %v9602_v15 = vunpack.i.l.bf16 %v13388_v55  ;;  %v9731_v61 = vpop.permute.xlu0 %9730 }
 0x661   :  { %v6739_v60 = vsel %vm3027_vm7, %v6675_v42, %v9712_v7  ;;  %v10009_v48 = vpack.i.bf16 %v4534_v4, %v4533_v62  ;;  %v4408_v36 = vld [vmem:[#allocation2 + $0x262] sm:$0xff]  ;;  %v6485_v33 = vsel %vm2767_vm3, %v6421_v28, %v9252_v21  ;;  %v9123_v7 = vunpack.i.h.bf16 %v12911_v49 }
 0x662   :  { %v6803_v26 = vsel %vm3092_vm8, %v6739_v60, %v9717_v13  ;;  %v9726_v13 = vpop.permute.xlu2 %9725  ;;  %v10019_v42 = vpack.i.bf16 %v4408_v36, %v4407_v41  ;;  %v4410_v60 = vld [vmem:[#allocation2 + $0x27a] sm:$0xff]  ;;  %v9723_v62 = vunpack.i.h.bf16 %v9721_v23  ;;  %v9262_v30 = vunpack.i.l.bf16 %v13098_v27  ;;  %v4347_v36 = vld [vmem:[#allocation2 + $0x289] sm:$0xff] }
 0x663   :  { %v9727_v37 = vunpack.i.l.bf16 %v9726_v13  ;;  %v9447_v21 = vunpack.i.l.bf16 %v13244_v12  ;;  %v4473_v28 = vld [vmem:[#allocation2 + $0x288] sm:$0xff] }
 0x664   :  { %7103 = vmatmul.f32.gmra.mxu2 %v6801_v35  ;;  %v4052_v35 = vld [vmem:[#allocation2 + $0x68] sm:$0xff] }
 0x665   :  { %v6420_v32 = vsel %vm52_vm0, %v4052_v35, %v9118_v19  ;;  %v6549_v19 = vsel %vm2832_vm4, %v6485_v33, %v9442_v14  ;;  %v9443_v35 = vunpack.i.h.bf16 %v13188_v29  ;;  %v4055_v14 = vld [vmem:[#allocation2 + $0x90] sm:$0xff] }
 0x666   :  { %9980 = vrot.lane.b32.xlu2 %v9979_v0, %s10428_s29  ;;  %9970 = vrot.lane.b32.xlu0 %v9969_v43, %s10430_s5  ;;  %v4470_v0 = vld [vmem:[#allocation2 + $0x260] sm:$0xff]  ;;  %v6484_v25 = vsel %vm2767_vm3, %v6420_v32, %v9248_v53  ;;  %v6613_v53 = vsel %vm2897_vm6, %v6549_v19, %v9602_v15 }
 0x667   :  { %9975 = vrot.lane.b32.xlu1 %v9969_v43, %s10427_s28  ;;  %v9708_v43 = vunpack.i.h.bf16 %v9706_v10  ;;  %v6548_v16 = vsel %vm2832_vm4, %v6484_v25, %v9438_v38  ;;  %v10004_v50 = vpack.i.bf16 %v4470_v0, %v4469_v22  ;;  %v9718_v10 = vunpack.i.h.bf16 %v9716_v18  ;;  %v4536_v0 = vld [vmem:[#allocation2 + $0x279] sm:$0xff] }
 0x668   :  { %v6612_v3 = vsel %vm2897_vm6, %v6548_v16, %v9598_v58  ;;  %v9722_v18 = vunpack.i.l.bf16 %v9721_v23  ;;  %v9732_v38 = vunpack.i.l.bf16 %v9731_v61  ;;  %v4409_v58 = vld [vmem:[#allocation2 + $0x272] sm:$0xff]  ;;  %v4054_v32 = vld [vmem:[#allocation2 + $0x80] sm:$0xff] }
 0x669   :  { %v6676_v45 = vsel %vm2962_vm5, %v6612_v3, %v9708_v43  ;;  %v9603_v43 = vunpack.i.h.bf16 %v13388_v55  ;;  %v6422_v49 = vsel %vm52_vm0, %v4054_v32, %v9123_v7  ;;  %v10039_v57 = vpack.i.bf16 %v4410_v60, %v4409_v58  ;;  %v4474_v23 = vld [vmem:[#allocation2 + $0x290] sm:$0xff]  ;;  %v4056_v58 = vld [vmem:[#allocation2 + $0x98] sm:$0xff]  ;;  %v4476_v32 = vld [vmem:[#allocation2 + $0x2a8] sm:$0xff] }
 0x66a   :  { %v6677_v4 = vsel %vm2962_vm5, %v6613_v53, %v9722_v18  ;;  %v9127_v55 = vunpack.i.l.bf16 %v12857_v5  ;;  %v10044_v33 = vpack.i.bf16 %v4474_v23, %v4473_v28  ;;  %v9263_v7 = vunpack.i.h.bf16 %v13098_v27  ;;  %v4414_v23 = vld [vmem:[#allocation2 + $0x2aa] sm:$0xff] }
 0x66b   :  { %v9608_v60 = vunpack.i.h.bf16 %v13380_v47 }
 0x66c   :  { %7106 = vmatmul.f32.gmra.mxu2 %v6802_v17  ;;  %v6740_v17 = vsel %vm3027_vm7, %v6676_v45, %v9713_v34  ;;  %v9736_v45 = vpop.permute.xlu1 %9735  ;;  %v4348_v34 = vld [vmem:[#allocation2 + $0x291] sm:$0xff]  ;;  %v6423_v15 = vsel %vm52_vm0, %v4055_v14, %v9127_v55 }
 0x66d   :  { %v6487_v18 = vsel %vm2767_vm3, %v6423_v15, %v9262_v30  ;;  %v4478_v30 = vld [vmem:[#allocation2 + $0x2c0] sm:$0xff]  ;;  %v4477_v15 = vld [vmem:[#allocation2 + $0x2b8] sm:$0xff] }
 0x66e   :  { %9995 = vrot.lane.b32.xlu2 %v9994_v31, %s10427_s28  ;;  %9985 = vrot.lane.b32.xlu0 %v9984_v44, %s10429_s30  ;;  %v4471_v44 = vld [vmem:[#allocation2 + $0x270] sm:$0xff] }
 0x66f   :  { %9990 = vrot.lane.b32.xlu1 %v9994_v31, %s10430_s5  ;;  %v6804_v31 = vsel %vm3092_vm8, %v6740_v17, %v9718_v10  ;;  %v10024_v20 = vpack.i.bf16 %v4472_v6, %v4471_v44  ;;  %v9728_v10 = vunpack.i.h.bf16 %v9726_v13  ;;  %v9607_v6 = vunpack.i.l.bf16 %v13380_v47 }
 0x670   :  { %v9737_v17 = vunpack.i.l.bf16 %v9736_v45  ;;  %v10054_v44 = vpack.i.bf16 %v4348_v34, %v4347_v36  ;;  %v9128_v13 = vunpack.i.h.bf16 %v12857_v5  ;;  %v4413_v34 = vld [vmem:[#allocation2 + $0x2a2] sm:$0xff]  ;;  %v10084_v36 = vpack.i.bf16 %v4478_v30, %v4477_v15 }
 0x671   :  { %v9273_v15 = vunpack.i.h.bf16 %v13094_v9 }
 0x672   :  { %v6424_v5 = vsel %vm52_vm0, %v4056_v58, %v9128_v13 }
 0x673   :  { %v6488_v27 = vsel %vm2767_vm3, %v6424_v5, %v9263_v7  ;;  %v4416_v7 = vld [vmem:[#allocation2 + $0x2c2] sm:$0xff] }
 0x674   :  { %7109 = vmatmul.f32.gmra.mxu2 %v6803_v26  ;;  %v6741_v26 = vsel %vm3027_vm7, %v6677_v4, %v9727_v37  ;;  %v9448_v4 = vunpack.i.h.bf16 %v13244_v12  ;;  %v4411_v37 = vld [vmem:[#allocation2 + $0x28a] sm:$0xff] }
 0x675   :  { %v6805_v25 = vsel %vm3092_vm8, %v6741_v26, %v9732_v38 }
 0x676   :  { %10010 = vrot.lane.b32.xlu2 %v10009_v48, %s10430_s5  ;;  %10000 = vrot.lane.b32.xlu0 %v9999_v39, %s10428_s29  ;;  %v6486_v39 = vsel %vm2767_vm3, %v6422_v49, %v9253_v2  ;;  %v4540_v2 = vld [vmem:[#allocation2 + $0x2a9] sm:$0xff]  ;;  %v4539_v49 = vld [vmem:[#allocation2 + $0x2a1] sm:$0xff] }
 0x677   :  { %10005 = vrot.lane.b32.xlu1 %v10004_v50, %s10429_s30  ;;  %v6550_v29 = vsel %vm2832_vm4, %v6486_v39, %v9443_v35  ;;  %v9733_v50 = vunpack.i.h.bf16 %v9731_v61  ;;  %v6551_v61 = vsel %vm2832_vm4, %v6487_v18, %v9447_v21  ;;  %v4412_v35 = vld [vmem:[#allocation2 + $0x292] sm:$0xff] }
 0x678   :  { %v6614_v16 = vsel %vm2897_vm6, %v6550_v29, %v9603_v43  ;;  %v6615_v19 = vsel %vm2897_vm6, %v6551_v61, %v9607_v6  ;;  %v9738_v43 = vunpack.i.h.bf16 %v9736_v45  ;;  %v10059_v12 = vpack.i.bf16 %v4412_v35, %v4411_v37 }
 0x679   :  { %v6678_v3 = vsel %vm2962_vm5, %v6614_v16, %v9723_v62  ;;  %v6679_v53 = vsel %vm2962_vm5, %v6615_v19, %v9737_v17  ;;  %v10069_v62 = vpack.i.bf16 %v4540_v2, %v4539_v49  ;;  %v9267_v16 = vunpack.i.l.bf16 %v13037_v52 }
 0x67a   :  { %v6742_v54 = vsel %vm3027_vm7, %v6678_v3, %v9728_v10  ;;  %v9452_v3 = vunpack.i.l.bf16 %v13246_v56  ;;  %v4057_v10 = vld [vmem:[#allocation2 + $0xa8] sm:$0xff]  ;;  %v9612_v45 = vunpack.i.l.bf16 %v13400_v40  ;;  %v9268_v19 = vunpack.i.h.bf16 %v13037_v52 }
 0x67b   :  { %v6806_v41 = vsel %vm3092_vm8, %v6742_v54, %v9733_v50  ;;  %v9751_v50 = vpop.permute.xlu1 %9750  ;;  %v9613_v2 = vunpack.i.h.bf16 %v13400_v40  ;;  %v9137_v40 = vunpack.i.l.bf16 %v12935_v24  ;;  %v9272_v49 = vunpack.i.l.bf16 %v13094_v9 }
 0x67c   :  { %7112 = vmatmul.f32.gmra.mxu2 %v6804_v31  ;;  %v9746_v31 = vpop.permute.xlu0 %9745  ;;  %v9752_v6 = vunpack.i.l.bf16 %v9751_v50  ;;  %v9753_v35 = vunpack.i.h.bf16 %v9751_v50  ;;  %v4479_v50 = vld [vmem:[#allocation2 + $0x2d0] sm:$0xff] }
 0x67e   :  { %10025 = vrot.lane.b32.xlu2 %v10024_v20, %s10429_s30  ;;  %10015 = vrot.lane.b32.xlu0 %v10009_v48, %s10427_s28  ;;  %v4535_v48 = vld [vmem:[#allocation2 + $0x271] sm:$0xff]  ;;  %v9741_v20 = vpop.permute.xlu2 %9740 }
 0x67f   :  { %10020 = vrot.lane.b32.xlu1 %v10019_v42, %s10428_s29  ;;  %v10029_v22 = vpack.i.bf16 %v4536_v0, %v4535_v48  ;;  %v9747_v42 = vunpack.i.l.bf16 %v9746_v31  ;;  %v9742_v38 = vunpack.i.l.bf16 %v9741_v20  ;;  %v6552_v48 = vsel %vm2832_vm4, %v6488_v27, %v9448_v4  ;;  %v4058_v4 = vld [vmem:[#allocation2 + $0xb0] sm:$0xff] }
 0x680   :  { %v6616_v47 = vsel %vm2897_vm6, %v6552_v48, %v9608_v60  ;;  %v9743_v55 = vunpack.i.h.bf16 %v9741_v20  ;;  %v4541_v60 = vld [vmem:[#allocation2 + $0x2b9] sm:$0xff] }
 0x681   :  { %v6743_v0 = vsel %vm3027_vm7, %v6679_v53, %v9742_v38  ;;  %v6680_v29 = vsel %vm2962_vm5, %v6616_v47, %v9738_v43  ;;  %v4415_v53 = vld [vmem:[#allocation2 + $0x2ba] sm:$0xff]  ;;  %v9617_v47 = vunpack.i.l.bf16 %v13404_v51 }
 0x682   :  { %v6807_v26 = vsel %vm3092_vm8, %v6743_v0, %v9747_v42  ;;  %v6744_v21 = vsel %vm3027_vm7, %v6680_v29, %v9743_v55  ;;  %v9453_v42 = vunpack.i.h.bf16 %v13246_v56  ;;  %v4542_v38 = vld [vmem:[#allocation2 + $0x2c1] sm:$0xff]  ;;  %v10099_v52 = vpack.i.bf16 %v4416_v7, %v4415_v53  ;;  %v4480_v48 = vld [vmem:[#allocation2 + $0x2d8] sm:$0xff] }
 0x683   :  { %v4353_v55 = vld [vmem:[#allocation2 + $0x2d1] sm:$0xff]  ;;  %v4481_v53 = vld [vmem:[#allocation2 + $0x2e8] sm:$0xff] }
 0x684   :  { %7115 = vmatmul.f32.gmra.mxu2 %v6805_v25  ;;  %v4475_v25 = vld [vmem:[#allocation2 + $0x2a0] sm:$0xff] }
 0x685   :  { %v10064_v39 = vpack.i.bf16 %v4476_v32, %v4475_v25  ;;  %v10089_v32 = vpack.i.bf16 %v4542_v38, %v4541_v60  ;;  %v4354_v25 = vld [vmem:[#allocation2 + $0x2d9] sm:$0xff] }
 0x686   :  { %10040 = vrot.lane.b32.xlu2 %v10039_v57, %s10428_s29  ;;  %10030 = vrot.lane.b32.xlu0 %v10029_v22, %s10430_s5  ;;  %v9132_v57 = vunpack.i.l.bf16 %v12937_v11  ;;  %v9756_v18 = vpop.permute.xlu2 %9755 }
 0x687   :  { %10035 = vrot.lane.b32.xlu1 %v10029_v22, %s10427_s28  ;;  %v9748_v22 = vunpack.i.h.bf16 %v9746_v31  ;;  %v10079_v31 = vpack.i.bf16 %v4414_v23, %v4413_v34  ;;  %v9757_v13 = vunpack.i.l.bf16 %v9756_v18  ;;  %v9758_v27 = vunpack.i.h.bf16 %v9756_v18  ;;  %v4418_v18 = vld [vmem:[#allocation2 + $0x2da] sm:$0xff] }
 0x688   :  { %v6425_v14 = vsel %vm52_vm0, %v4057_v10, %v9132_v57  ;;  %v10114_v10 = vpack.i.bf16 %v4354_v25, %v4353_v55 }
 0x689   :  { %v6808_v54 = vsel %vm3092_vm8, %v6744_v21, %v9748_v22  ;;  %v6489_v17 = vsel %vm2767_vm3, %v6425_v14, %v9267_v16  ;;  %v9138_v14 = vunpack.i.h.bf16 %v12935_v24 }
 0x68a   :  { %v6553_v28 = vsel %vm2832_vm4, %v6489_v17, %v9452_v3 }
 0x68c   :  { %7118 = vmatmul.f32.gmra.mxu2 %v6806_v41  ;;  %v9761_v41 = vpop.permute.xlu0 %9760 }
 0x68d   :  { %v9762_v61 = vunpack.i.l.bf16 %v9761_v41  ;;  %v9763_v43 = vunpack.i.h.bf16 %v9761_v41  ;;  %v9458_v41 = vunpack.i.h.bf16 %v13206_v46 }
 0x68e   :  { %10055 = vrot.lane.b32.xlu2 %v10054_v44, %s10427_s28  ;;  %10045 = vrot.lane.b32.xlu0 %v10044_v33, %s10429_s30  ;;  %v9133_v33 = vunpack.i.h.bf16 %v12937_v11  ;;  %v9771_v34 = vpop.permute.xlu2 %9770 }
 0x68f   :  { %10050 = vrot.lane.b32.xlu1 %v10054_v44, %s10430_s5  ;;  %v6617_v44 = vsel %vm2897_vm6, %v6553_v28, %v9612_v45  ;;  %v10104_v45 = vpack.i.bf16 %v4480_v48, %v4479_v50  ;;  %v9772_v17 = vunpack.i.l.bf16 %v9771_v34  ;;  %v4417_v28 = vld [vmem:[#allocation2 + $0x2d2] sm:$0xff]  ;;  %v9773_v60 = vunpack.i.h.bf16 %v9771_v34 }
 0x690   :  { %v6681_v20 = vsel %vm2962_vm5, %v6617_v44, %v9752_v6  ;;  %v6426_v11 = vsel %vm52_vm0, %v4058_v4, %v9133_v33  ;;  %v9618_v44 = vunpack.i.h.bf16 %v13404_v51  ;;  %v4482_v33 = vld [vmem:[#allocation2 + $0x2f0] sm:$0xff]  ;;  %v9142_v4 = vunpack.i.l.bf16 %v12871_v1 }
 0x691   :  { %v6745_v37 = vsel %vm3027_vm7, %v6681_v20, %v9757_v13  ;;  %v6490_v0 = vsel %vm2767_vm3, %v6426_v11, %v9268_v19  ;;  %v4545_v13 = vld [vmem:[#allocation2 + $0x2e9] sm:$0xff]  ;;  %v10124_v38 = vpack.i.bf16 %v4482_v33, %v4481_v53  ;;  %v13671_v11 = vstv %s7831_s3 }
 0x692   :  { %v6809_v58 = vsel %vm3092_vm8, %v6745_v37, %v9762_v61  ;;  %v6554_v56 = vsel %vm2832_vm4, %v6490_v0, %v9453_v42  ;;  %v10119_v42 = vpack.i.bf16 %v4418_v18, %v4417_v28  ;;  %v4422_v28 = vld [vmem:[#allocation2 + $0x30a] sm:$0xff] }
 0x693   :  { %v6618_v5 = vsel %vm2897_vm6, %v6554_v56, %v9613_v2  ;;  %v13679_v56 = vstv %s7832_s15  ;;  %v4548_v18 = vld [vmem:[#allocation2 + $0x309] sm:$0xff] }
 0x694   :  { %7121 = vmatmul.f32.gmra.mxu2 %v6807_v26  ;;  %v6682_v26 = vsel %vm2962_vm5, %v6618_v5, %v9753_v35  ;;  %v9776_v30 = vpop.permute.xlu0 %9775  ;;  %v4484_v5 = vld [vmem:[#allocation2 + $0x308] sm:$0xff] }
 0x695   :  { %v6746_v57 = vsel %vm3027_vm7, %v6682_v26, %v9758_v27  ;;  %v9777_v6 = vunpack.i.l.bf16 %v9776_v30  ;;  %v9778_v2 = vunpack.i.h.bf16 %v9776_v30  ;;  %v10261_v30 = vld [vmem:[#allocation7] sm:$0xff]  ;;  %v10262_v53 = vld [vmem:[#allocation7 + $0x8] sm:$0xff] }
 0x696   :  { %10070 = vrot.lane.b32.xlu2 %v10069_v62, %s10430_s5  ;;  %10060 = vrot.lane.b32.xlu0 %v10059_v12, %s10428_s29  ;;  %v9457_v12 = vunpack.i.l.bf16 %v13206_v46  ;;  %v6810_v16 = vsel %vm3092_vm8, %v6746_v57, %v9763_v43  ;;  %v15059_v43 = vld [vmem:[#allocation68_spill] sm:$0xff]  ;;  %v9786_v55 = vpop.permute.xlu2 %9785 }
 0x697   :  { %10065 = vrot.lane.b32.xlu1 %v10064_v39, %s10429_s30  ;;  %v4059_v39 = vld [vmem:[#allocation2 + $0xc0] sm:$0xff]  ;;  %v9622_v26 = vunpack.i.l.bf16 %v15059_v43 }
 0x698   :  { %v6427_v22 = vsel %vm52_vm0, %v4059_v39, %v9137_v40  ;;  %v4061_v40 = vld [vmem:[#allocation2 + $0xd8] sm:$0xff]  ;;  %v4483_v39 = vld [vmem:[#allocation2 + $0x300] sm:$0xff] }
 0x699   :  { %v6491_v3 = vsel %vm2767_vm3, %v6427_v22, %v9272_v49  ;;  %v6429_v25 = vsel %vm52_vm0, %v4061_v40, %v9142_v4  ;;  %v15064_v40 = vld [vmem:[#allocation122_spill] sm:$0xff] }
 0x69a   :  { %v6555_v21 = vsel %vm2832_vm4, %v6491_v3, %v9457_v12  ;;  %v4420_v12 = vld [vmem:[#allocation2 + $0x2f2] sm:$0xff] }
 0x69b   :  { %v6619_v23 = vsel %vm2897_vm6, %v6555_v21, %v9617_v47 }
 0x69c   :  { %7124 = vmatmul.f32.gmra.mxu2 %v6808_v54  ;;  %v13688_v57 = vpop.permute.xlu0 %9790 }
 0x69d   :  { %v9792_v21 = vunpack.i.l.bf16 %v13688_v57  ;;  %v9793_v4 = vunpack.i.h.bf16 %v13688_v57  ;;  %v4359_v57 = vld [vmem:[#allocation2 + $0x319] sm:$0xff] }
 0x69e   :  { %10085 = vrot.lane.b32.xlu2 %v10084_v36, %s10429_s30  ;;  %10075 = vrot.lane.b32.xlu0 %v10069_v62, %s10427_s28  ;;  %v9766_v62 = vpop.permute.xlu1 %9765  ;;  %v4546_v36 = vld [vmem:[#allocation2 + $0x2f1] sm:$0xff] }
 0x69f   :  { %10080 = vrot.lane.b32.xlu1 %v10079_v31, %s10428_s29  ;;  %v9767_v29 = vunpack.i.l.bf16 %v9766_v62  ;;  %v4060_v31 = vld [vmem:[#allocation2 + $0xc8] sm:$0xff]  ;;  %v9768_v20 = vunpack.i.h.bf16 %v9766_v62  ;;  %v10129_v46 = vpack.i.bf16 %v4546_v36, %v4545_v13 }
 0x6a0   :  { %v6428_v61 = vsel %vm52_vm0, %v4060_v31, %v9138_v14  ;;  %v4419_v62 = vld [vmem:[#allocation2 + $0x2ea] sm:$0xff]  ;;  %v9278_v14 = vunpack.i.h.bf16 %v13107_v59  ;;  %v4421_v36 = vld [vmem:[#allocation2 + $0x302] sm:$0xff] }
 0x6a1   :  { %v6683_v54 = vsel %vm2962_vm5, %v6619_v23, %v9767_v29  ;;  %v6492_v9 = vsel %vm2767_vm3, %v6428_v61, %v9273_v15  ;;  %v10144_v29 = vpack.i.bf16 %v4484_v5, %v4483_v39  ;;  %v10139_v50 = vpack.i.bf16 %v4420_v12, %v4419_v62  ;;  %v15060_v15 = vld [vmem:[#allocation93_spill] sm:$0xff]  ;;  %v4062_v31 = vld [vmem:[#allocation2 + $0xe0] sm:$0xff]  ;;  %v15065_v62 = vld [vmem:[#allocation106_spill] sm:$0xff] }
 0x6a2   :  { %v6747_v24 = vsel %vm3027_vm7, %v6683_v54, %v9772_v17  ;;  %v6556_v7 = vsel %vm2832_vm4, %v6492_v9, %v9458_v41  ;;  %v9463_v41 = vunpack.i.h.bf16 %v13253_v63  ;;  %v10159_v13 = vpack.i.bf16 %v4422_v28, %v4421_v36  ;;  %v15066_v36 = vld [vmem:[#allocation138_spill] sm:$0xff] }
 0x6a3   :  { %v6811_v19 = vsel %vm3092_vm8, %v6747_v24, %v9777_v6  ;;  %v6620_v51 = vsel %vm2897_vm6, %v6556_v7, %v9618_v44  ;;  %v9787_v6 = vunpack.i.l.bf16 %v9786_v55  ;;  %v9627_v12 = vunpack.i.l.bf16 %v15065_v62 }
 0x6a4   :  { %7127 = vmatmul.f32.gmra.mxu2 %v6809_v58  ;;  %v6684_v35 = vsel %vm2962_vm5, %v6620_v51, %v9768_v20  ;;  %v9277_v58 = vunpack.i.l.bf16 %v13107_v59  ;;  %v4547_v20 = vld [vmem:[#allocation2 + $0x301] sm:$0xff] }
 0x6a5   :  { %v6748_v27 = vsel %vm3027_vm7, %v6684_v35, %v9773_v60  ;;  %v10149_v9 = vpack.i.bf16 %v4548_v18, %v4547_v20  ;;  %v15062_v35 = vld [vmem:[#allocation28_spill] sm:$0xff]  ;;  %v9788_v60 = vunpack.i.h.bf16 %v9786_v55  ;;  %v9468_v18 = vunpack.i.h.bf16 %v15064_v40  ;;  %v4488_v20 = vld [vmem:[#allocation2 + $0x338] sm:$0xff] }
 0x6a6   :  { %10100 = vrot.lane.b32.xlu2 %v10099_v52, %s10428_s29  ;;  %10090 = vrot.lane.b32.xlu0 %v10089_v32, %s10430_s5  ;;  %v13675_v0 = vpop.permute.xlu1 %9780  ;;  %v6493_v47 = vsel %vm2767_vm3, %v6429_v25, %v9277_v58  ;;  %v9282_v58 = vunpack.i.l.bf16 %v15062_v35 }
 0x6a7   :  { %10095 = vrot.lane.b32.xlu1 %v10089_v32, %s10427_s28  ;;  %v9462_v32 = vunpack.i.l.bf16 %v13253_v63  ;;  %v9782_v48 = vunpack.i.l.bf16 %v13675_v0  ;;  %v9783_v33 = vunpack.i.h.bf16 %v13675_v0 }
 0x6ac   :  { %7130 = vmatmul.f32.gmra.mxu2 %v6810_v16  ;;  %v6557_v16 = vsel %vm2832_vm4, %v6493_v47, %v9462_v32  ;;  %v15063_v32 = vld [vmem:[#allocation107_spill] sm:$0xff] }
 0x6ad   :  { %v6621_v3 = vsel %vm2897_vm6, %v6557_v16, %v9622_v26  ;;  %v4360_v26 = vld [vmem:[#allocation2 + $0x321] sm:$0xff]  ;;  %v13732_v16 = vpop.permute.xlu0 %9805 }
 0x6ae   :  { %10115 = vrot.lane.b32.xlu2 %v10114_v10, %s10427_s28  ;;  %10105 = vrot.lane.b32.xlu0 %v10104_v45, %s10429_s30  ;;  %v9143_v45 = vunpack.i.h.bf16 %v12871_v1  ;;  %v6685_v23 = vsel %vm2962_vm5, %v6621_v3, %v9782_v48  ;;  %v9623_v1 = vunpack.i.h.bf16 %v15059_v43  ;;  %v13720_v0 = vpop.permute.xlu1 %9795  ;;  %v9467_v43 = vunpack.i.l.bf16 %v15064_v40 }
 0x6af   :  { %10110 = vrot.lane.b32.xlu1 %v10114_v10, %s10430_s5  ;;  %v6749_v24 = vsel %vm3027_vm7, %v6685_v23, %v9787_v6  ;;  %v9797_v39 = vunpack.i.l.bf16 %v13720_v0 }
 0x6b0   :  { %v6430_v59 = vsel %vm52_vm0, %v4062_v31, %v9143_v45  ;;  %v6813_v61 = vsel %vm3092_vm8, %v6749_v24, %v9792_v21  ;;  %v10263_v21 = vld [vmem:[#allocation7 + $0x10] sm:$0xff]  ;;  %v4423_v31 = vld [vmem:[#allocation2 + $0x31a] sm:$0xff] }
 0x6b1   :  { %v6494_v63 = vsel %vm2767_vm3, %v6430_v59, %v9278_v14  ;;  %v9807_v14 = vunpack.i.l.bf16 %v13732_v16  ;;  %v4064_v24 = vld [vmem:[#allocation2 + $0xf8] sm:$0xff]  ;;  %v9628_v59 = vunpack.i.h.bf16 %v15065_v62 }
 0x6b4   :  { %7133 = vmatmul.f32.gmra.mxu2 %v6811_v19 }
 0x6b6   :  { %10130 = vrot.lane.b32.xlu2 %v10129_v46, %s10430_s5  ;;  %10120 = vrot.lane.b32.xlu0 %v10119_v42, %s10428_s29 }
 0x6b7   :  { %10125 = vrot.lane.b32.xlu1 %v10124_v38, %s10429_s30  ;;  %v7086_v37 = vpop.f32.mrf.mxu2  ;;  %v15061_v38 = vld [vmem:[#allocation112_spill] sm:$0xff] }
 0x6b8   :  { %v7296_v52 = vadd.f32 %v12134_v8, %v7086_v37  ;;  %v6812_v8 = vsel %vm3092_vm8, %v6748_v27, %v9778_v2  ;;  %v9147_v51 = vunpack.i.l.bf16 %v15061_v38  ;;  %v4063_v27 = vld [vmem:[#allocation2 + $0xf0] sm:$0xff]  ;;  %v9148_v23 = vunpack.i.h.bf16 %v15061_v38 }
 0x6b9   :  { %v4487_v38 = vld [vmem:[#allocation2 + $0x330] sm:$0xff] }
 0x6ba   :  { %v7488_v49 = vmul.f32 %v13671_v11, %v7296_v52 }
 0x6bc   :  { %v7553_v22 = vadd.f32 %v13679_v56, %v7488_v49  ;;  %7136 = vmatmul.f32.gmra.mxu2 %v6812_v8  ;;  %v4486_v49 = vld [vmem:[#allocation2 + $0x320] sm:$0xff]  ;;  %v6431_v8 = vsel %vm52_vm0, %v4063_v27, %v9147_v51 }
 0x6bd   :  { %v15069_v27 = vld [vmem:[#allocation12_spill] sm:$0xff] }
 0x6be   :  { %v7617_v10 = vadd.f32 %v10261_v30, %v7553_v22  ;;  %10145 = vrot.lane.b32.xlu2 %v10144_v29, %s10429_s30  ;;  %10135 = vrot.lane.b32.xlu0 %v10129_v46, %s10427_s28  ;;  %v6558_v46 = vsel %vm2832_vm4, %v6494_v63, %v9463_v41  ;;  %v4485_v22 = vld [vmem:[#allocation2 + $0x318] sm:$0xff]  ;;  %v6495_v29 = vsel %vm2767_vm3, %v6431_v8, %v9282_v58  ;;  %v15071_v8 = vld [vmem:[#allocation121_spill] sm:$0xff] }
 0x6bf   :  { %10140 = vrot.lane.b32.xlu1 %v10139_v50, %s10428_s29  ;;  %v7089_v34 = vpop.f32.mrf.mxu2  ;;  %v6622_v42 = vsel %vm2897_vm6, %v6558_v46, %v9623_v1  ;;  %v10174_v50 = vpack.i.bf16 %v4360_v26, %v4359_v57  ;;  %v10164_v3 = vpack.i.bf16 %v4486_v49, %v4485_v22  ;;  %v6559_v30 = vsel %vm2832_vm4, %v6495_v29, %v9467_v43  ;;  %v4424_v1 = vld [vmem:[#allocation2 + $0x322] sm:$0xff]  ;;  %v15067_v58 = vld [vmem:[#allocation99_spill] sm:$0xff]  ;;  %v9811_v26 = vpop.permute.xlu1 %9810 }
 0x6c0   :  { %v7681_v54 = vmax.f32 %v7617_v10, 0.0  ;;  %v7299_v17 = vadd.f32 %v15060_v15, %v7089_v34  ;;  %v6686_v37 = vsel %vm2962_vm5, %v6622_v42, %v9783_v33  ;;  %v9801_v10 = vpop.permute.xlu2 %9800  ;;  %v6623_v45 = vsel %vm2897_vm6, %v6559_v30, %v9627_v12  ;;  %v15070_v12 = vld [vmem:[#allocation40_spill] sm:$0xff] }
 0x6c1   :  { %v6750_v48 = vsel %vm3027_vm7, %v6686_v37, %v9788_v60  ;;  %v9283_v15 = vunpack.i.h.bf16 %v15062_v35  ;;  %v6432_v63 = vsel %vm52_vm0, %v4064_v24, %v9148_v23  ;;  %v10264_v37 = vld [vmem:[#allocation7 + $0x18] sm:$0xff]  ;;  %v9152_v60 = vunpack.i.l.bf16 %v15067_v58 }
 0x6c2   :  { %7745 = vst.msk [vmem:[#allocation8] sm:$0xff] %vm52_vm0, %v7681_v54  ;;  %v7489_v44 = vmul.f32 %v13671_v11, %v7299_v17  ;;  %v6814_v47 = vsel %vm3092_vm8, %v6750_v48, %v9793_v4  ;;  %v6687_v54 = vsel %vm2962_vm5, %v6623_v45, %v9797_v39  ;;  %v9802_v17 = vunpack.i.l.bf16 %v9801_v10  ;;  %v4065_v48 = vld [vmem:[#allocation2 + $0x108] sm:$0xff] }
 0x6c3   :  { %v6496_v46 = vsel %vm2767_vm3, %v6432_v63, %v9283_v15  ;;  %v10184_v4 = vpack.i.bf16 %v4488_v20, %v4487_v38  ;;  %v9803_v43 = vunpack.i.h.bf16 %v9801_v10  ;;  %v9632_v39 = vunpack.i.l.bf16 %v15071_v8 }
 0x6c4   :  { %v7554_v19 = vadd.f32 %v13679_v56, %v7489_v44  ;;  %7139 = vmatmul.f32.gmra.mxu2 %v6813_v61  ;;  %v4552_v44 = vld [vmem:[#allocation2 + $0x339] sm:$0xff]  ;;  %v6751_v61 = vsel %vm3027_vm7, %v6687_v54, %v9802_v17  ;;  %v6560_v51 = vsel %vm2832_vm4, %v6496_v46, %v9468_v18  ;;  %v6433_v22 = vsel %vm52_vm0, %v4065_v48, %v9152_v60  ;;  %v15074_v60 = vld [vmem:[#allocation137_spill] sm:$0xff] }
 0x6c5   :  { %v9812_v29 = vunpack.i.l.bf16 %v9811_v26  ;;  %v15072_v18 = vld [vmem:[#allocation48_spill] sm:$0xff]  ;;  %v9633_v24 = vunpack.i.h.bf16 %v15071_v8  ;;  %v9813_v20 = vunpack.i.h.bf16 %v9811_v26  ;;  %v15076_v26 = vld [vmem:[#allocation33_spill] sm:$0xff] }
 0x6c6   :  { %v7618_v7 = vadd.f32 %v10262_v53, %v7554_v19  ;;  %10160 = vrot.lane.b32.xlu2 %v10159_v13, %s10428_s29  ;;  %10150 = vrot.lane.b32.xlu0 %v10149_v9, %s10430_s5  ;;  %v9798_v19 = vunpack.i.h.bf16 %v13720_v0  ;;  %v6815_v13 = vsel %vm3092_vm8, %v6751_v61, %v9807_v14  ;;  %v10179_v53 = vpack.i.bf16 %v4424_v1, %v4423_v31  ;;  %v4425_v14 = vld [vmem:[#allocation2 + $0x332] sm:$0xff] }
 0x6c7   :  { %10155 = vrot.lane.b32.xlu1 %v10149_v9, %s10427_s28  ;;  %v7092_v2 = vpop.f32.mrf.mxu2  ;;  %v4551_v9 = vld [vmem:[#allocation2 + $0x331] sm:$0xff]  ;;  %v9808_v0 = vunpack.i.h.bf16 %v13732_v16  ;;  %v9473_v1 = vunpack.i.h.bf16 %v15070_v12 }
 0x6c8   :  { %v7682_v52 = vmax.f32 %v7618_v7, 0.0  ;;  %v7302_v5 = vadd.f32 %v15063_v32, %v7092_v2  ;;  %v10189_v7 = vpack.i.bf16 %v4552_v44, %v4551_v9  ;;  %v6624_v2 = vsel %vm2897_vm6, %v6560_v51, %v9628_v59  ;;  %v9816_v45 = vpop.permute.xlu2 %9815  ;;  %v4066_v44 = vld [vmem:[#allocation2 + $0x110] sm:$0xff]  ;;  %v4426_v51 = vld [vmem:[#allocation2 + $0x33a] sm:$0xff] }
 0x6c9   :  { %v6688_v32 = vsel %vm2962_vm5, %v6624_v2, %v9798_v19  ;;  %v4553_v19 = vld [vmem:[#allocation2 + $0x349] sm:$0xff] }
 0x6ca   :  { %7746 = vst.msk [vmem:[#allocation8 + $0x8] sm:$0xff] %vm52_vm0, %v7682_v52  ;;  %v7490_v25 = vmul.f32 %v13671_v11, %v7302_v5  ;;  %v15068_v5 = vld [vmem:[#allocation54_spill] sm:$0xff]  ;;  %v6752_v57 = vsel %vm3027_vm7, %v6688_v32, %v9803_v43  ;;  %v9826_v32 = vpop.permute.xlu1 %9825 }
 0x6cb   :  { %v9287_v40 = vunpack.i.l.bf16 %v15068_v5  ;;  %v6816_v16 = vsel %vm3092_vm8, %v6752_v57, %v9808_v0  ;;  %v9292_v0 = vunpack.i.l.bf16 %v15074_v60  ;;  %v4554_v57 = vld [vmem:[#allocation2 + $0x351] sm:$0xff] }
 0x6cc   :  { %v7555_v55 = vadd.f32 %v13679_v56, %v7490_v25  ;;  %7142 = vmatmul.f32.gmra.mxu2 %v6814_v47  ;;  %v9472_v25 = vunpack.i.l.bf16 %v15070_v12 }
 0x6ce   :  { %v7619_v34 = vadd.f32 %v10263_v21, %v7555_v55  ;;  %10175 = vrot.lane.b32.xlu2 %v10174_v50, %s10427_s28  ;;  %10165 = vrot.lane.b32.xlu0 %v10164_v3, %s10429_s30  ;;  %v4489_v55 = vld [vmem:[#allocation2 + $0x348] sm:$0xff]  ;;  %v9821_v3 = vpop.permute.xlu0 %9820 }
 0x6cf   :  { %10170 = vrot.lane.b32.xlu1 %v10174_v50, %s10430_s5  ;;  %v7095_v6 = vpop.f32.mrf.mxu2  ;;  %v6497_v50 = vsel %vm2767_vm3, %v6433_v22, %v9287_v40  ;;  %v9822_v54 = vunpack.i.l.bf16 %v9821_v3  ;;  %v15075_v40 = vld [vmem:[#allocation62_spill] sm:$0xff] }
 0x6d0   :  { %v7683_v41 = vmax.f32 %v7619_v34, 0.0  ;;  %v7305_v28 = vadd.f32 %v15066_v36, %v7095_v6  ;;  %v6561_v10 = vsel %vm2832_vm4, %v6497_v50, %v9472_v25  ;;  %v10265_v34 = vld [vmem:[#allocation7 + $0x20] sm:$0xff]  ;;  %v9153_v6 = vunpack.i.h.bf16 %v15067_v58  ;;  %v9831_v50 = vpop.permute.xlu2 %9830 }
 0x6d1   :  { %v6625_v21 = vsel %vm2897_vm6, %v6561_v10, %v9632_v39  ;;  %v9817_v36 = vunpack.i.l.bf16 %v9816_v45  ;;  %v9827_v39 = vunpack.i.l.bf16 %v9826_v32 }
 0x6d2   :  { %7747 = vst.msk [vmem:[#allocation8 + $0x10] sm:$0xff] %vm52_vm0, %v7683_v41  ;;  %v7491_v33 = vmul.f32 %v13671_v11, %v7305_v28  ;;  %v6689_v17 = vsel %vm2962_vm5, %v6625_v21, %v9812_v29  ;;  %v9288_v41 = vunpack.i.h.bf16 %v15068_v5  ;;  %v6434_v61 = vsel %vm52_vm0, %v4066_v44, %v9153_v6 }
 0x6d3   :  { %v9832_v6 = vunpack.i.l.bf16 %v9831_v50  ;;  %v9828_v44 = vunpack.i.h.bf16 %v9826_v32 }
 0x6d4   :  { %v7556_v42 = vadd.f32 %v13679_v56, %v7491_v33  ;;  %7145 = vmatmul.f32.gmra.mxu2 %v6815_v13  ;;  %v6753_v33 = vsel %vm3027_vm7, %v6689_v17, %v9817_v36  ;;  %v4490_v13 = vld [vmem:[#allocation2 + $0x350] sm:$0xff]  ;;  %v6498_v9 = vsel %vm2767_vm3, %v6434_v61, %v9288_v41  ;;  %v9478_v41 = vunpack.i.h.bf16 %v15076_v26  ;;  %v4068_v36 = vld [vmem:[#allocation2 + $0x128] sm:$0xff] }
 0x6d5   :  { %v6817_v63 = vsel %vm3092_vm8, %v6753_v33, %v9822_v54 }
 0x6d6   :  { %v7620_v35 = vadd.f32 %v10264_v37, %v7556_v42  ;;  %10180 = vrot.lane.b32.xlu0 %v10179_v53, %s10428_s29  ;;  %10190 = vrot.lane.b32.xlu2 %v10189_v7, %s10430_s5  ;;  %v6562_v42 = vsel %vm2832_vm4, %v6498_v9, %v9473_v1  ;;  %v9823_v37 = vunpack.i.h.bf16 %v9821_v3  ;;  %v9836_v29 = vpop.permute.xlu0 %9835 }
 0x6d7   :  { %10185 = vrot.lane.b32.xlu1 %v10184_v4, %s10429_s30  ;;  %v7098_v52 = vpop.f32.mrf.mxu2  ;;  %v6626_v53 = vsel %vm2897_vm6, %v6562_v42, %v9633_v24  ;;  %v15073_v4 = vld [vmem:[#allocation75_spill] sm:$0xff]  ;;  %v9837_v21 = vunpack.i.l.bf16 %v9836_v29 }
 0x6d8   :  { %v7684_v49 = vmax.f32 %v7620_v35, 0.0  ;;  %v7308_v62 = vadd.f32 %v15069_v27, %v7098_v52  ;;  %v9157_v2 = vunpack.i.l.bf16 %v15073_v4  ;;  %v6690_v58 = vsel %vm2962_vm5, %v6626_v53, %v9813_v20  ;;  %v4067_v27 = vld [vmem:[#allocation2 + $0x120] sm:$0xff] }
 0x6d9   :  { %v9818_v52 = vunpack.i.h.bf16 %v9816_v45  ;;  %v9158_v45 = vunpack.i.h.bf16 %v15073_v4  ;;  %v9841_v4 = vpop.permute.xlu1 %9840 }
 0x6da   :  { %7748 = vst.msk [vmem:[#allocation8 + $0x18] sm:$0xff] %vm52_vm0, %v7684_v49  ;;  %v7492_v47 = vmul.f32 %v13671_v11, %v7308_v62  ;;  %v9477_v49 = vunpack.i.l.bf16 %v15076_v26  ;;  %v15077_v62 = vld [vmem:[#allocation21_spill] sm:$0xff]  ;;  %v6435_v8 = vsel %vm52_vm0, %v4067_v27, %v9157_v2  ;;  %v9842_v26 = vunpack.i.l.bf16 %v9841_v4 }
 0x6db   :  { %v9637_v12 = vunpack.i.l.bf16 %v15077_v62  ;;  %v6754_v48 = vsel %vm3027_vm7, %v6690_v58, %v9818_v52  ;;  %v6499_v22 = vsel %vm2767_vm3, %v6435_v8, %v9292_v0  ;;  %v6436_v1 = vsel %vm52_vm0, %v4068_v36, %v9158_v45  ;;  %v15082_v58 = vld [vmem:[#allocation49_spill] sm:$0xff]  ;;  %v4069_v0 = vld [vmem:[#allocation2 + $0x138] sm:$0xff] }
 0x6dc   :  { %v7557_v30 = vadd.f32 %v13679_v56, %v7492_v47  ;;  %7148 = vmatmul.f32.gmra.mxu2 %v6816_v16  ;;  %v6818_v47 = vsel %vm3092_vm8, %v6754_v48, %v9823_v37  ;;  %v15081_v37 = vld [vmem:[#allocation117_spill] sm:$0xff]  ;;  %v9846_v48 = vpop.permute.xlu2 %9845  ;;  %v9483_v45 = vunpack.i.h.bf16 %v15082_v58 }
 0x6dd   :  { %v15083_v52 = vld [vmem:[#allocation61_spill] sm:$0xff] }
 0x6de   :  { %v7621_v23 = vadd.f32 %v10265_v34, %v7557_v30  ;;  %10195 = vrot.lane.b32.xlu0 %v10189_v7, %s10427_s28  ;;  %6087 = vrot.lane.b32.xlu2 %v4489_v55, %s10429_s30  ;;  %v10266_v7 = vld [vmem:[#allocation7 + $0x28] sm:$0xff]  ;;  %v6563_v55 = vsel %vm2832_vm4, %v6499_v22, %v9477_v49  ;;  %v10267_v30 = vld [vmem:[#allocation7 + $0x30] sm:$0xff]  ;;  %v9642_v32 = vunpack.i.l.bf16 %v15083_v52  ;;  %s10431_s28 = smov [#allocation8]  }
 0x6df   :  { %5831 = vrot.lane.b32.xlu1 %v4425_v14, %s10428_s29  ;;  %v7101_v15 = vpop.f32.mrf.mxu2  ;;  %v6627_v3 = vsel %vm2897_vm6, %v6563_v55, %v9637_v12  ;;  %v9293_v14 = vunpack.i.h.bf16 %v15074_v60  ;;  %v9482_v60 = vunpack.i.l.bf16 %v15082_v58 }
 0x6e0   :  { %v7685_v28 = vmax.f32 %v7621_v23, 0.0  ;;  %v7311_v31 = vadd.f32 %v15072_v18, %v7101_v15  ;;  %v6691_v23 = vsel %vm2962_vm5, %v6627_v3, %v9827_v39  ;;  %v15078_v15 = vld [vmem:[#allocation81_spill] sm:$0xff]  ;;  %v10269_v39 = vld [vmem:[#allocation7 + $0x40] sm:$0xff] }
 0x6e2   :  { %7749 = vst.msk [vmem:[#allocation8 + $0x20] sm:$0xff] %vm52_vm0, %v7685_v28  ;;  %v7493_v59 = vmul.f32 %v13671_v11, %v7311_v31  ;;  %v9638_v28 = vunpack.i.h.bf16 %v15077_v62  ;;  %v6755_v31 = vsel %vm3027_vm7, %v6691_v23, %v9832_v6  ;;  %v9851_v62 = vpop.permute.xlu0 %9850  ;;  %v9856_v23 = vpop.permute.xlu1 %9855 }
 0x6e3   :  { %v6819_v24 = vsel %vm3092_vm8, %v6755_v31, %v9837_v21  ;;  %v9852_v22 = vunpack.i.l.bf16 %v9851_v62  ;;  %v4070_v21 = vld [vmem:[#allocation2 + $0x140] sm:$0xff] }
 0x6e4   :  { %v7558_v46 = vadd.f32 %v13679_v56, %v7493_v59  ;;  %7151 = vmatmul.f32.gmra.mxu2 %v6817_v63  ;;  %v6500_v59 = vsel %vm2767_vm3, %v6436_v1, %v9293_v14  ;;  %v10268_v63 = vld [vmem:[#allocation7 + $0x38] sm:$0xff]  ;;  %v15086_v1 = vld [vmem:[#allocation89_spill] sm:$0xff] }
 0x6e5   :  { %v6564_v61 = vsel %vm2832_vm4, %v6500_v59, %v9478_v41  ;;  %v10270_v59 = vld [vmem:[#allocation7 + $0x48] sm:$0xff] }
 0x6e6   :  { %v7622_v38 = vadd.f32 %v10266_v7, %v7558_v46  ;;  %6343 = vrot.lane.b32.xlu0 %v4553_v19, %s10430_s5  ;;  %6089 = vrot.lane.b32.xlu2 %v4490_v13, %s10429_s30  ;;  %v6628_v20 = vsel %vm2897_vm6, %v6564_v61, %v9638_v28  ;;  %v15079_v13 = vld [vmem:[#allocation67_spill] sm:$0xff]  ;;  %v9838_v46 = vunpack.i.h.bf16 %v9836_v29  ;;  %v15080_v7 = vld [vmem:[#allocation114_spill] sm:$0xff]  ;;  %v15085_v28 = vld [vmem:[#allocation52_spill] sm:$0xff] }
 0x6e7   :  { %5833 = vrot.lane.b32.xlu1 %v4426_v51, %s10428_s29  ;;  %v7104_v35 = vpop.f32.mrf.mxu2  ;;  %v9162_v9 = vunpack.i.l.bf16 %v15079_v13  ;;  %v6692_v53 = vsel %vm2962_vm5, %v6628_v20, %v9828_v44  ;;  %v9833_v51 = vunpack.i.h.bf16 %v9831_v50  ;;  %v9303_v55 = vunpack.i.h.bf16 %v15080_v7  ;;  %v15087_v61 = vld [vmem:[#allocation80_spill] sm:$0xff]  ;;  %s7813_s29 = sshll.u32 %s10431_s28, 4  ;;  %s7814_s29 = int_to_ptr.vmem [resolvable:$true] %s7813_s29 }
 0x6e8   :  { %v7686_v5 = vmax.f32 %v7622_v38, 0.0  ;;  %v7314_v43 = vadd.f32 %v15075_v40, %v7104_v35  ;;  %v9302_v38 = vunpack.i.l.bf16 %v15080_v7  ;;  %v9847_v50 = vunpack.i.l.bf16 %v9846_v48  ;;  %v15088_v7 = vld [vmem:[#allocation16_spill] sm:$0xff] }
 0x6e9   :  { %v6756_v40 = vsel %vm3027_vm7, %v6692_v53, %v9833_v51  ;;  %v9307_v44 = vunpack.i.l.bf16 %v15086_v1  ;;  %v9487_v20 = vunpack.i.l.bf16 %v15087_v61 }
 0x6ea   :  { %7750 = vst.msk [vmem:[#allocation8 + $0x28] sm:$0xff] %vm52_vm0, %v7686_v5  ;;  %v7494_v25 = vmul.f32 %v13671_v11, %v7314_v43  ;;  %v6437_v43 = vsel %vm52_vm0, %v4069_v0, %v9162_v9  ;;  %v6820_v49 = vsel %vm3092_vm8, %v6756_v40, %v9838_v46  ;;  %v4071_v9 = vld [vmem:[#allocation2 + $0x150] sm:$0xff]  ;;  %v9848_v46 = vunpack.i.h.bf16 %v9846_v48 }
 0x6eb   :  { %v6501_v27 = vsel %vm2767_vm3, %v6437_v43, %v9302_v38  ;;  %v9168_v43 = vunpack.i.h.bf16 %v15085_v28 }
 0x6ec   :  { %v7559_v16 = vadd.f32 %v13679_v56, %v7494_v25  ;;  %7154 = vmatmul.f32.gmra.mxu2 %v6818_v47  ;;  %v6565_v25 = vsel %vm2832_vm4, %v6501_v27, %v9482_v60  ;;  %v10271_v27 = vld [vmem:[#allocation7 + $0x50] sm:$0xff] }
 0x6ed   :  { %v6629_v8 = vsel %vm2897_vm6, %v6565_v25, %v9642_v32 }
 0x6ee   :  { %v7623_v10 = vadd.f32 %v10267_v30, %v7559_v16  ;;  %6345 = vrot.lane.b32.xlu0 %v4554_v57, %s10430_s5  ;;  %v9163_v57 = vunpack.i.h.bf16 %v15079_v13  ;;  %v6693_v16 = vsel %vm2962_vm5, %v6629_v8, %v9842_v26  ;;  %v15084_v30 = vld [vmem:[#allocation133_spill] sm:$0xff] }
 0x6ef   :  { %v7107_v34 = vpop.f32.mrf.mxu2  ;;  %v6757_v6 = vsel %vm3027_vm7, %v6693_v16, %v9847_v50 }
 0x6f0   :  { %v7687_v54 = vmax.f32 %v7623_v10, 0.0  ;;  %v7317_v17 = vadd.f32 %v15078_v15, %v7107_v34  ;;  %v9643_v34 = vunpack.i.h.bf16 %v15083_v52  ;;  %v9843_v15 = vunpack.i.h.bf16 %v9841_v4  ;;  %v9866_v4 = vpop.permute.xlu0 %9865 }
 0x6f1   :  { %v9867_v32 = vunpack.i.l.bf16 %v9866_v4 }
 0x6f2   :  { %7751 = vst.msk [vmem:[#allocation8 + $0x30] sm:$0xff] %vm52_vm0, %v7687_v54  ;;  %v7495_v18 = vmul.f32 %v13671_v11, %v7317_v17  ;;  %v6438_v54 = vsel %vm52_vm0, %v4070_v21, %v9163_v57  ;;  %v6821_v17 = vsel %vm3092_vm8, %v6757_v6, %v9852_v22  ;;  %v15089_v22 = vld [vmem:[#allocation32_spill] sm:$0xff] }
 0x6f3   :  { %v6502_v41 = vsel %vm2767_vm3, %v6438_v54, %v9303_v55 }
 0x6f4   :  { %v7560_v33 = vadd.f32 %v13679_v56, %v7495_v18  ;;  %7157 = vmatmul.f32.gmra.mxu2 %v6819_v24  ;;  %v9167_v18 = vunpack.i.l.bf16 %v15085_v28  ;;  %v6566_v31 = vsel %vm2832_vm4, %v6502_v41, %v9483_v45 }
 0x6f5   :  { %v6630_v24 = vsel %vm2897_vm6, %v6566_v31, %v9643_v34  ;;  %v9868_v34 = vunpack.i.h.bf16 %v9866_v4 }
 0x6f6   :  { %v7624_v19 = vadd.f32 %v10268_v63, %v7560_v33  ;;  %v9853_v63 = vunpack.i.h.bf16 %v9851_v62  ;;  %v6694_v13 = vsel %vm2962_vm5, %v6630_v24, %v9843_v15  ;;  %v6439_v51 = vsel %vm52_vm0, %v4071_v9, %v9167_v18  ;;  %v15091_v15 = vld [vmem:[#allocation79_spill] sm:$0xff]  ;;  %v15092_v18 = vld [vmem:[#allocation105_spill] sm:$0xff] }
 0x6f7   :  { %v7110_v42 = vpop.f32.mrf.mxu2  ;;  %v6758_v58 = vsel %vm3027_vm7, %v6694_v13, %v9848_v46  ;;  %v9492_v31 = vunpack.i.l.bf16 %v15092_v18 }
 0x6f8   :  { %v7688_v2 = vmax.f32 %v7624_v19, 0.0  ;;  %v7320_v35 = vadd.f32 %v15081_v37, %v7110_v42  ;;  %v9857_v42 = vunpack.i.l.bf16 %v9856_v23  ;;  %v9861_v37 = vpop.permute.xlu2 %9860  ;;  %v6822_v0 = vsel %vm3092_vm8, %v6758_v58, %v9853_v63  ;;  %v9881_v41 = vpop.permute.xlu0 %9880 }
 0x6f9   :  { %v9862_v26 = vunpack.i.l.bf16 %v9861_v37  ;;  %v9863_v54 = vunpack.i.h.bf16 %v9861_v37  ;;  %v9882_v9 = vunpack.i.l.bf16 %v9881_v41  ;;  %v9313_v58 = vunpack.i.h.bf16 %v15091_v15 }
 0x6fa   :  { %7752 = vst.msk [vmem:[#allocation8 + $0x38] sm:$0xff] %vm52_vm0, %v7688_v2  ;;  %v7496_v5 = vmul.f32 %v13671_v11, %v7320_v35  ;;  %v6503_v2 = vsel %vm2767_vm3, %v6439_v51, %v9307_v44 }
 0x6fb   :  { %v6567_v60 = vsel %vm2832_vm4, %v6503_v2, %v9487_v20  ;;  %v15093_v20 = vld [vmem:[#allocation72_spill] sm:$0xff] }
 0x6fc   :  { %v7561_v12 = vadd.f32 %v13679_v56, %v7496_v5  ;;  %7160 = vmatmul.f32.gmra.mxu2 %v6820_v49  ;;  %v6631_v52 = vsel %vm2897_vm6, %v6567_v60, %v9857_v42  ;;  %v9871_v5 = vpop.permute.xlu1 %9870  ;;  %v9308_v49 = vunpack.i.h.bf16 %v15086_v1 }
 0x6fd   :  { %v9872_v25 = vunpack.i.l.bf16 %v9871_v5  ;;  %v6695_v8 = vsel %vm2962_vm5, %v6631_v52, %v9862_v26  ;;  %v9873_v1 = vunpack.i.h.bf16 %v9871_v5 }
 0x6fe   :  { %v7625_v47 = vadd.f32 %v10269_v39, %v7561_v12  ;;  %v9488_v12 = vunpack.i.h.bf16 %v15087_v61  ;;  %v4072_v39 = vld [vmem:[#allocation2 + $0x158] sm:$0xff]  ;;  %v6759_v16 = vsel %vm3027_vm7, %v6695_v8, %v9867_v32  ;;  %v9493_v32 = vunpack.i.h.bf16 %v15092_v18 }
 0x6ff   :  { %v7113_v29 = vpop.f32.mrf.mxu2  ;;  %v6440_v55 = vsel %vm52_vm0, %v4072_v39, %v9168_v43  ;;  %v4074_v43 = vld [vmem:[#allocation2 + $0x170] sm:$0xff] }
 0x700   :  { %v7689_v3 = vmax.f32 %v7625_v47, 0.0  ;;  %v7323_v10 = vadd.f32 %v15084_v30, %v7113_v29  ;;  %v9858_v47 = vunpack.i.h.bf16 %v9856_v23  ;;  %v6504_v50 = vsel %vm2767_vm3, %v6440_v55, %v9308_v49  ;;  %v9876_v45 = vpop.permute.xlu2 %9875  ;;  %v9896_v39 = vpop.permute.xlu0 %9895 }
 0x701   :  { %v6568_v30 = vsel %vm2832_vm4, %v6504_v50, %v9488_v12  ;;  %v9878_v26 = vunpack.i.h.bf16 %v9876_v45  ;;  %v15095_v50 = vld [vmem:[#allocation123_spill] sm:$0xff] }
 0x702   :  { %7753 = vst.msk [vmem:[#allocation8 + $0x40] sm:$0xff] %vm52_vm0, %v7689_v3  ;;  %v7497_v14 = vmul.f32 %v13671_v11, %v7323_v10  ;;  %v6823_v10 = vsel %vm3092_vm8, %v6759_v16, %v9872_v25  ;;  %v6632_v21 = vsel %vm2897_vm6, %v6568_v30, %v9858_v47 }
 0x703   :  { %v6696_v24 = vsel %vm2962_vm5, %v6632_v21, %v9863_v54 }
 0x704   :  { %v7562_v36 = vadd.f32 %v13679_v56, %v7497_v14  ;;  %7163 = vmatmul.f32.gmra.mxu2 %v6821_v17  ;;  %v15090_v14 = vld [vmem:[#allocation113_spill] sm:$0xff]  ;;  %v9312_v17 = vunpack.i.l.bf16 %v15091_v15  ;;  %v9886_v46 = vpop.permute.xlu1 %9885 }
 0x705   :  { %v9172_v6 = vunpack.i.l.bf16 %v15090_v14  ;;  %v9887_v4 = vunpack.i.l.bf16 %v9886_v46  ;;  %v9173_v37 = vunpack.i.h.bf16 %v15090_v14  ;;  %v9888_v16 = vunpack.i.h.bf16 %v9886_v46  ;;  %v15097_v14 = vld [vmem:[#allocation118_spill] sm:$0xff]  ;;  %v4076_v46 = vld [vmem:[#allocation2 + $0x1b8] sm:$0xff] }
 0x706   :  { %v7626_v33 = vadd.f32 %v10270_v59, %v7562_v36  ;;  %v10272_v36 = vld [vmem:[#allocation7 + $0x58] sm:$0xff]  ;;  %v4073_v59 = vld [vmem:[#allocation2 + $0x168] sm:$0xff] }
 0x707   :  { %v7116_v19 = vpop.f32.mrf.mxu2  ;;  %v6441_v13 = vsel %vm52_vm0, %v4073_v59, %v9172_v6  ;;  %v6442_v25 = vsel %vm52_vm0, %v4074_v43, %v9173_v37  ;;  %v9497_v6 = vunpack.i.l.bf16 %v15097_v14 }
 0x708   :  { %v7690_v53 = vmax.f32 %v7626_v33, 0.0  ;;  %v7326_v38 = vadd.f32 %v15088_v7, %v7116_v19  ;;  %v9877_v33 = vunpack.i.l.bf16 %v9876_v45  ;;  %v6760_v19 = vsel %vm3027_vm7, %v6696_v24, %v9868_v34  ;;  %v9891_v60 = vpop.permute.xlu2 %9890  ;;  %v15096_v45 = vld [vmem:[#allocation15_spill] sm:$0xff]  ;;  %v10274_v34 = vld [vmem:[#allocation7 + $0x68] sm:$0xff] }
 0x709   :  { %v6505_v42 = vsel %vm2767_vm3, %v6441_v13, %v9312_v17  ;;  %v9892_v5 = vunpack.i.l.bf16 %v9891_v60  ;;  %v6506_v8 = vsel %vm2767_vm3, %v6442_v25, %v9313_v58  ;;  %v9317_v21 = vunpack.i.l.bf16 %v15096_v45  ;;  %v15100_v25 = vld [vmem:[#allocation86_spill] sm:$0xff] }
 0x70a   :  { %7754 = vst.msk [vmem:[#allocation8 + $0x48] sm:$0xff] %vm52_vm0, %v7690_v53  ;;  %v7498_v35 = vmul.f32 %v13671_v11, %v7326_v38  ;;  %v6569_v7 = vsel %vm2832_vm4, %v6505_v42, %v9492_v31  ;;  %v6824_v38 = vsel %vm3092_vm8, %v6760_v19, %v9873_v1  ;;  %v9893_v54 = vunpack.i.h.bf16 %v9891_v60  ;;  %v15099_v60 = vld [vmem:[#allocation141_spill] sm:$0xff] }
 0x70b   :  { %v6633_v51 = vsel %vm2897_vm6, %v6569_v7, %v9877_v33  ;;  %v9897_v17 = vunpack.i.l.bf16 %v9896_v39  ;;  %v9178_v13 = vunpack.i.h.bf16 %v15095_v50  ;;  %v9318_v42 = vunpack.i.h.bf16 %v15096_v45  ;;  %v15103_v45 = vld [vmem:[#allocation23_spill] sm:$0xff] }
 0x70c   :  { %v7563_v40 = vadd.f32 %v13679_v56, %v7498_v35  ;;  %7166 = vmatmul.f32.gmra.mxu2 %v6822_v0  ;;  %v6697_v35 = vsel %vm2962_vm5, %v6633_v51, %v9882_v9  ;;  %v10273_v0 = vld [vmem:[#allocation7 + $0x60] sm:$0xff] }
 0x70d   :  { %v6761_v12 = vsel %vm3027_vm7, %v6697_v35, %v9887_v4  ;;  %v9898_v35 = vunpack.i.h.bf16 %v9896_v39 }
 0x70e   :  { %v7627_v62 = vadd.f32 %v10271_v27, %v7563_v40  ;;  %v15094_v27 = vld [vmem:[#allocation85_spill] sm:$0xff] }
 0x70f   :  { %v7119_v48 = vpop.f32.mrf.mxu2 }
 0x710   :  { %v7691_v57 = vmax.f32 %v7627_v62, 0.0  ;;  %v7329_v29 = vadd.f32 %v15089_v22, %v7119_v48  ;;  %v9883_v48 = vunpack.i.h.bf16 %v9881_v41  ;;  %v6825_v22 = vsel %vm3092_vm8, %v6761_v12, %v9892_v5  ;;  %v9901_v41 = vpop.permute.xlu1 %9900  ;;  %v9906_v9 = vpop.permute.xlu2 %9905 }
 0x711   :  { %v9902_v33 = vunpack.i.l.bf16 %v9901_v41  ;;  %v9907_v37 = vunpack.i.l.bf16 %v9906_v9 }
 0x712   :  { %7755 = vst.msk [vmem:[#allocation8 + $0x50] sm:$0xff] %vm52_vm0, %v7691_v57  ;;  %v7499_v3 = vmul.f32 %v13671_v11, %v7329_v29  ;;  %v6570_v57 = vsel %vm2832_vm4, %v6506_v8, %v9493_v32  ;;  %v15101_v8 = vld [vmem:[#allocation92_spill] sm:$0xff] }
 0x713   :  { %v6634_v29 = vsel %vm2897_vm6, %v6570_v57, %v9878_v26  ;;  %v9327_v39 = vunpack.i.l.bf16 %v15101_v8 }
 0x714   :  { %v7564_v23 = vadd.f32 %v13679_v56, %v7499_v3  ;;  %7169 = vmatmul.f32.gmra.mxu2 %v6823_v10  ;;  %v9177_v3 = vunpack.i.l.bf16 %v15095_v50  ;;  %v6698_v30 = vsel %vm2962_vm5, %v6634_v29, %v9883_v48  ;;  %v4075_v10 = vld [vmem:[#allocation2 + $0x1b0] sm:$0xff]  ;;  %v9182_v48 = vunpack.i.l.bf16 %v15100_v25 }
 0x715   :  { %v6762_v31 = vsel %vm3027_vm7, %v6698_v30, %v9888_v16 }
 0x716   :  { %v7628_v28 = vadd.f32 %v10272_v36, %v7564_v23  ;;  %v6443_v1 = vsel %vm52_vm0, %v4075_v10, %v9177_v3  ;;  %v9908_v3 = vunpack.i.h.bf16 %v9906_v9 }
 0x717   :  { %v7122_v44 = vpop.f32.mrf.mxu2 }
 0x718   :  { %v7692_v61 = vmax.f32 %v7628_v28, 0.0  ;;  %v7332_v63 = vadd.f32 %v15093_v20, %v7122_v44  ;;  %v15098_v28 = vld [vmem:[#allocation110_spill] sm:$0xff]  ;;  %v6507_v44 = vsel %vm2767_vm3, %v6443_v1, %v9317_v21  ;;  %v9916_v5 = vpop.permute.xlu1 %9915 }
 0x719   :  { %v6571_v59 = vsel %vm2832_vm4, %v6507_v44, %v9497_v6  ;;  %v9917_v30 = vunpack.i.l.bf16 %v9916_v5  ;;  %v9183_v44 = vunpack.i.h.bf16 %v15100_v25  ;;  %v9918_v9 = vunpack.i.h.bf16 %v9916_v5 }
 0x71a   :  { %7756 = vst.msk [vmem:[#allocation8 + $0x58] sm:$0xff] %vm52_vm0, %v7692_v61  ;;  %v7500_v53 = vmul.f32 %v13671_v11, %v7332_v63  ;;  %v6826_v61 = vsel %vm3092_vm8, %v6762_v31, %v9893_v54  ;;  %v6635_v20 = vsel %vm2897_vm6, %v6571_v59, %v9897_v17  ;;  %v9911_v63 = vpop.permute.xlu0 %9910  ;;  %v9921_v54 = vpop.permute.xlu2 %9920  ;;  %v9328_v59 = vunpack.i.h.bf16 %v15101_v8 }
 0x71b   :  { %v9912_v51 = vunpack.i.l.bf16 %v9911_v63  ;;  %v9913_v16 = vunpack.i.h.bf16 %v9911_v63 }
 0x71c   :  { %v7565_v2 = vadd.f32 %v13679_v56, %v7500_v53  ;;  %7172 = vmatmul.f32.gmra.mxu2 %v6824_v38  ;;  %v10275_v53 = vld [vmem:[#allocation7 + $0x70] sm:$0xff]  ;;  %v9498_v38 = vunpack.i.h.bf16 %v15097_v14 }
 0x71e   :  { %v7629_v52 = vadd.f32 %v10273_v0, %v7565_v2  ;;  %v6699_v2 = vsel %vm2962_vm5, %v6635_v20, %v9902_v33  ;;  %v10278_v33 = vld [vmem:[#allocation7 + $0x80] sm:$0xff] }
 0x71f   :  { %v7125_v40 = vpop.f32.mrf.mxu2  ;;  %v6763_v43 = vsel %vm3027_vm7, %v6699_v2, %v9907_v37 }
 0x720   :  { %v7693_v49 = vmax.f32 %v7629_v52, 0.0  ;;  %v7335_v62 = vadd.f32 %v15094_v27, %v7125_v40  ;;  %v6444_v52 = vsel %vm52_vm0, %v4076_v46, %v9178_v13  ;;  %v6827_v27 = vsel %vm3092_vm8, %v6763_v43, %v9912_v51  ;;  %v9931_v31 = vpop.permute.xlu1 %9930  ;;  %v15106_v43 = vld [vmem:[#allocation149_spill] sm:$0xff] }
 0x721   :  { %v6508_v32 = vsel %vm2767_vm3, %v6444_v52, %v9318_v42  ;;  %v9932_v63 = vunpack.i.l.bf16 %v9931_v31  ;;  %v15104_v42 = vld [vmem:[#allocation39_spill] sm:$0xff] }
 0x722   :  { %7757 = vst.msk [vmem:[#allocation8 + $0x60] sm:$0xff] %vm52_vm0, %v7693_v49  ;;  %v7501_v47 = vmul.f32 %v13671_v11, %v7335_v62  ;;  %v6572_v26 = vsel %vm2832_vm4, %v6508_v32, %v9498_v38  ;;  %v9903_v49 = vunpack.i.h.bf16 %v9901_v41  ;;  %v9926_v14 = vpop.permute.xlu0 %9925  ;;  %v10279_v38 = vld [vmem:[#allocation2 + $0x1d0] sm:$0xff]  ;;  %v15105_v32 = vld [vmem:[#allocation144_spill] sm:$0xff] }
 0x723   :  { %v6636_v62 = vsel %vm2897_vm6, %v6572_v26, %v9898_v35  ;;  %v6446_v51 = vsel %vm52_vm0, %v10279_v38, %v9183_v44  ;;  %v9187_v5 = vunpack.i.l.bf16 %v15105_v32  ;;  %v9332_v26 = vunpack.i.l.bf16 %v15106_v43 }
 0x724   :  { %v7566_v55 = vadd.f32 %v13679_v56, %v7501_v47  ;;  %7175 = vmatmul.f32.gmra.mxu2 %v6825_v22  ;;  %v10276_v47 = vld [vmem:[#allocation7 + $0x78] sm:$0xff]  ;;  %v15102_v22 = vld [vmem:[#allocation94_spill] sm:$0xff]  ;;  %v6700_v50 = vsel %vm2962_vm5, %v6636_v62, %v9903_v49 }
 0x725   :  { %v9502_v29 = vunpack.i.l.bf16 %v15102_v22  ;;  %v6764_v17 = vsel %vm3027_vm7, %v6700_v50, %v9908_v3  ;;  %v9503_v20 = vunpack.i.h.bf16 %v15102_v22 }
 0x726   :  { %v7630_v23 = vadd.f32 %v10274_v34, %v7566_v55  ;;  %v10277_v34 = vld [vmem:[#allocation2 + $0x1c8] sm:$0xff] }
 0x727   :  { %v7128_v15 = vpop.f32.mrf.mxu2 }
 0x728   :  { %v7694_v36 = vmax.f32 %v7630_v23, 0.0  ;;  %v7338_v18 = vadd.f32 %v15098_v28, %v7128_v15  ;;  %v6445_v23 = vsel %vm52_vm0, %v10277_v34, %v9182_v48  ;;  %v9933_v48 = vunpack.i.h.bf16 %v9931_v31 }
 0x729   :  { %v6509_v6 = vsel %vm2767_vm3, %v6445_v23, %v9327_v39 }
 0x72a   :  { %7758 = vst.msk [vmem:[#allocation8 + $0x68] sm:$0xff] %vm52_vm0, %v7694_v36  ;;  %v7502_v24 = vmul.f32 %v13671_v11, %v7338_v18  ;;  %v6573_v41 = vsel %vm2832_vm4, %v6509_v6, %v9502_v29  ;;  %v6828_v36 = vsel %vm3092_vm8, %v6764_v17, %v9913_v16  ;;  %v9927_v18 = vunpack.i.l.bf16 %v9926_v14  ;;  %v9941_v49 = vpop.permute.xlu0 %9940  ;;  %v15108_v29 = vld [vmem:[#allocation56_spill] sm:$0xff] }
 0x72b   :  { %v6637_v28 = vsel %vm2897_vm6, %v6573_v41, %v9917_v30  ;;  %v9942_v3 = vunpack.i.l.bf16 %v9941_v49  ;;  %v9946_v30 = vpop.permute.xlu1 %9945  ;;  %v9333_v17 = vunpack.i.h.bf16 %v15106_v43 }
 0x72c   :  { %v7567_v19 = vadd.f32 %v13679_v56, %v7502_v24  ;;  %7178 = vmatmul.f32.gmra.mxu2 %v6826_v61  ;;  %v9922_v24 = vunpack.i.l.bf16 %v9921_v54  ;;  %v9948_v38 = vunpack.i.h.bf16 %v9946_v30 }
 0x72e   :  { %v7631_v7 = vadd.f32 %v10275_v53, %v7567_v19  ;;  %v6701_v13 = vsel %vm2962_vm5, %v6637_v28, %v9922_v24 }
 0x72f   :  { %v7131_v4 = vpop.f32.mrf.mxu2 }
 0x730   :  { %v7695_v58 = vmax.f32 %v7631_v7, 0.0  ;;  %v7341_v0 = vadd.f32 %v15099_v60, %v7131_v4  ;;  %v6765_v7 = vsel %vm3027_vm7, %v6701_v13, %v9927_v18  ;;  %v6510_v4 = vsel %vm2767_vm3, %v6446_v51, %v9328_v59  ;;  %v15109_v59 = vld [vmem:[#allocation96_spill] sm:$0xff] }
 0x731   :  { %v6574_v37 = vsel %vm2832_vm4, %v6510_v4, %v9503_v20  ;;  %v6829_v35 = vsel %vm3092_vm8, %v6765_v7, %v9932_v63  ;;  %v15110_v4 = vld [vmem:[#allocation36_spill] sm:$0xff] }
 0x732   :  { %7759 = vst.msk [vmem:[#allocation8 + $0x70] sm:$0xff] %vm52_vm0, %v7695_v58  ;;  %v7503_v40 = vmul.f32 %v13671_v11, %v7341_v0  ;;  %v9936_v58 = vpop.permute.xlu2 %9935  ;;  %v6638_v60 = vsel %vm2897_vm6, %v6574_v37, %v9918_v9  ;;  %v9928_v0 = vunpack.i.h.bf16 %v9926_v14  ;;  %v9947_v14 = vunpack.i.l.bf16 %v9946_v30  ;;  %v9956_v9 = vpop.permute.xlu0 %9955 }
 0x733   :  { %v9938_v44 = vunpack.i.h.bf16 %v9936_v58  ;;  %v9961_v43 = vpop.permute.xlu1 %9960 }
 0x734   :  { %v7568_v12 = vadd.f32 %v13679_v56, %v7503_v40  ;;  %7181 = vmatmul.f32.gmra.mxu2 %v6827_v27  ;;  %v9923_v40 = vunpack.i.h.bf16 %v9921_v54  ;;  %v10280_v27 = vld [vmem:[#allocation7 + $0x88] sm:$0xff]  ;;  %v9188_v54 = vunpack.i.h.bf16 %v15105_v32 }
 0x736   :  { %v7632_v57 = vadd.f32 %v10276_v47, %v7568_v12  ;;  %v15107_v12 = vld [vmem:[#allocation59_spill] sm:$0xff]  ;;  %v6702_v39 = vsel %vm2962_vm5, %v6638_v60, %v9923_v40  ;;  %v4079_v47 = vld [vmem:[#allocation2 + $0x1e0] sm:$0xff]  ;;  %v9957_v40 = vunpack.i.l.bf16 %v9956_v9 }
 0x737   :  { %v7134_v55 = vpop.f32.mrf.mxu2  ;;  %v9507_v25 = vunpack.i.l.bf16 %v15107_v12  ;;  %v6447_v50 = vsel %vm52_vm0, %v4079_v47, %v9187_v5  ;;  %v9508_v18 = vunpack.i.h.bf16 %v15107_v12  ;;  %v10282_v60 = vld [vmem:[#allocation7 + $0x98] sm:$0xff] }
 0x738   :  { %v7696_v10 = vmax.f32 %v7632_v57, 0.0  ;;  %v7344_v21 = vadd.f32 %v15103_v45, %v7134_v55  ;;  %v9937_v57 = vunpack.i.l.bf16 %v9936_v58  ;;  %v6766_v55 = vsel %vm3027_vm7, %v6702_v39, %v9928_v0  ;;  %v10283_v12 = vld [vmem:[#allocation2 + $0x1f8] sm:$0xff] }
 0x739   :  { %v6830_v34 = vsel %vm3092_vm8, %v6766_v55, %v9933_v48 }
 0x73a   :  { %7760 = vst.msk [vmem:[#allocation8 + $0x78] sm:$0xff] %vm52_vm0, %v7696_v10  ;;  %v7504_v15 = vmul.f32 %v13671_v11, %v7344_v21  ;;  %v6511_v10 = vsel %vm2767_vm3, %v6447_v50, %v9332_v26  ;;  %v9951_v41 = vpop.permute.xlu2 %9950  ;;  %v9193_v50 = vunpack.i.h.bf16 %v15110_v4 }
 0x73b   :  { %v6575_v21 = vsel %vm2832_vm4, %v6511_v10, %v9507_v25  ;;  %v9952_v63 = vunpack.i.l.bf16 %v9951_v41  ;;  %v9953_v48 = vunpack.i.h.bf16 %v9951_v41  ;;  %v10284_v10 = vld [vmem:[#allocation7 + $0xa0] sm:$0xff] }
 0x73c   :  { %v7569_v1 = vadd.f32 %v13679_v56, %v7504_v15  ;;  %7184 = vmatmul.f32.gmra.mxu2 %v6828_v36  ;;  %v6639_v23 = vsel %vm2897_vm6, %v6575_v21, %v9937_v57  ;;  %v10281_v36 = vld [vmem:[#allocation7 + $0x90] sm:$0xff]  ;;  %v9962_v57 = vunpack.i.l.bf16 %v9961_v43 }
 0x73d   :  { %v6703_v15 = vsel %vm2962_vm5, %v6639_v23, %v9942_v3 }
 0x73e   :  { %v7633_v61 = vadd.f32 %v10278_v33, %v7569_v1  ;;  %v4080_v1 = vld [vmem:[#allocation2 + $0x1e8] sm:$0xff] }
 0x73f   :  { %v7137_v19 = vpop.f32.mrf.mxu2  ;;  %v6448_v20 = vsel %vm52_vm0, %v4080_v1, %v9188_v54  ;;  %v9958_v54 = vunpack.i.h.bf16 %v9956_v9 }
 0x740   :  { %v7697_v46 = vmax.f32 %v7633_v61, 0.0  ;;  %v7347_v53 = vadd.f32 %v15104_v42, %v7137_v19  ;;  %v6767_v61 = vsel %vm3027_vm7, %v6703_v15, %v9947_v14  ;;  %v9943_v19 = vunpack.i.h.bf16 %v9941_v49  ;;  %v15113_v49 = vld [vmem:[#allocation109_spill] sm:$0xff] }
 0x741   :  { %v6512_v13 = vsel %vm2767_vm3, %v6448_v20, %v9333_v17  ;;  %v15114_v17 = vld [vmem:[#allocation140_spill] sm:$0xff] }
 0x742   :  { %7761 = vst.msk [vmem:[#allocation8 + $0x80] sm:$0xff] %vm52_vm0, %v7697_v46  ;;  %v7505_v2 = vmul.f32 %v13671_v11, %v7347_v53  ;;  %v6576_v42 = vsel %vm2832_vm4, %v6512_v13, %v9508_v18  ;;  %v6831_v53 = vsel %vm3092_vm8, %v6767_v61, %v9952_v63  ;;  %v9966_v3 = vpop.permute.xlu2 %9965  ;;  %v15115_v63 = vld [vmem:[#allocation20_spill] sm:$0xff]  ;;  %v15116_v13 = vld [vmem:[#allocation31_spill] sm:$0xff] }
 0x743   :  { %v6640_v7 = vsel %vm2897_vm6, %v6576_v42, %v9938_v44  ;;  %v9342_v9 = vunpack.i.l.bf16 %v15116_v13 }
 0x744   :  { %v7570_v52 = vadd.f32 %v13679_v56, %v7505_v2  ;;  %7187 = vmatmul.f32.gmra.mxu2 %v6829_v35  ;;  %v9192_v2 = vunpack.i.l.bf16 %v15110_v4  ;;  %v6704_v37 = vsel %vm2962_vm5, %v6640_v7, %v9943_v19  ;;  %v15111_v35 = vld [vmem:[#allocation69_spill] sm:$0xff]  ;;  %v9197_v19 = vunpack.i.l.bf16 %v15115_v63 }
 0x745   :  { %v9337_v58 = vunpack.i.l.bf16 %v15111_v35  ;;  %v9338_v30 = vunpack.i.h.bf16 %v15111_v35 }
 0x746   :  { %v7634_v62 = vadd.f32 %v10280_v27, %v7570_v52  ;;  %v15112_v52 = vld [vmem:[#allocation73_spill] sm:$0xff]  ;;  %v6449_v25 = vsel %vm52_vm0, %v10283_v12, %v9192_v2  ;;  %v9968_v2 = vunpack.i.h.bf16 %v9966_v3 }
 0x747   :  { %v7140_v8 = vpop.f32.mrf.mxu2  ;;  %v9512_v32 = vunpack.i.l.bf16 %v15112_v52  ;;  %v9513_v21 = vunpack.i.h.bf16 %v15112_v52 }
 0x748   :  { %v7698_v22 = vmax.f32 %v7634_v62, 0.0  ;;  %v7350_v16 = vadd.f32 %v15108_v29, %v7140_v8  ;;  %v6768_v62 = vsel %vm3027_vm7, %v6704_v37, %v9948_v38  ;;  %v6513_v8 = vsel %vm2767_vm3, %v6449_v25, %v9337_v58  ;;  %v15118_v58 = vld [vmem:[#allocation13_spill] sm:$0xff] }
 0x749   :  { %v6577_v47 = vsel %vm2832_vm4, %v6513_v8, %v9512_v32  ;;  %v9198_v8 = vunpack.i.h.bf16 %v15115_v63 }
 0x74a   :  { %7762 = vst.msk [vmem:[#allocation8 + $0x88] sm:$0xff] %vm52_vm0, %v7698_v22  ;;  %v7506_v45 = vmul.f32 %v13671_v11, %v7350_v16  ;;  %v6832_v22 = vsel %vm3092_vm8, %v6768_v62, %v9953_v48  ;;  %v6641_v29 = vsel %vm2897_vm6, %v6577_v47, %v9957_v40  ;;  %v9971_v16 = vpop.permute.xlu0 %9970  ;;  %v9981_v40 = vpop.permute.xlu2 %9980  ;;  %v9343_v47 = vunpack.i.h.bf16 %v15116_v13 }
 0x74b   :  { %v6705_v14 = vsel %vm2962_vm5, %v6641_v29, %v9962_v57  ;;  %v9973_v38 = vunpack.i.h.bf16 %v9971_v16  ;;  %v10288_v57 = vld [vmem:[#allocation7 + $0xb0] sm:$0xff] }
 0x74c   :  { %v7571_v6 = vadd.f32 %v13679_v56, %v7506_v45  ;;  %7190 = vmatmul.f32.gmra.mxu2 %v6830_v34  ;;  %v9972_v34 = vunpack.i.l.bf16 %v9971_v16 }
 0x74e   :  { %v7635_v28 = vadd.f32 %v10281_v36, %v7571_v6  ;;  %v9967_v6 = vunpack.i.l.bf16 %v9966_v3  ;;  %v10285_v36 = vld [vmem:[#allocation2 + $0x200] sm:$0xff] }
 0x74f   :  { %v7143_v31 = vpop.f32.mrf.mxu2 }
 0x750   :  { %v7699_v24 = vmax.f32 %v7635_v28, 0.0  ;;  %v7353_v33 = vadd.f32 %v15109_v59, %v7143_v31  ;;  %v6450_v28 = vsel %vm52_vm0, %v10285_v36, %v9193_v50  ;;  %v9976_v31 = vpop.permute.xlu1 %9975  ;;  %v6769_v44 = vsel %vm3027_vm7, %v6705_v14, %v9967_v6 }
 0x751   :  { %v6514_v18 = vsel %vm2767_vm3, %v6450_v28, %v9338_v30  ;;  %v9963_v59 = vunpack.i.h.bf16 %v9961_v43  ;;  %v9977_v37 = vunpack.i.l.bf16 %v9976_v31  ;;  %v9978_v3 = vunpack.i.h.bf16 %v9976_v31 }
 0x752   :  { %7763 = vst.msk [vmem:[#allocation8 + $0x90] sm:$0xff] %vm52_vm0, %v7699_v24  ;;  %v7507_v46 = vmul.f32 %v13671_v11, %v7353_v33  ;;  %v6578_v24 = vsel %vm2832_vm4, %v6514_v18, %v9513_v21  ;;  %v6833_v33 = vsel %vm3092_vm8, %v6769_v44, %v9972_v34  ;;  %v9986_v32 = vpop.permute.xlu0 %9985  ;;  %v10289_v34 = vld [vmem:[#allocation2 + $0x218] sm:$0xff]  ;;  %v15120_v18 = vld [vmem:[#allocation42_spill] sm:$0xff]  ;;  %v15121_v44 = vld [vmem:[#allocation17_spill] sm:$0xff] }
 0x753   :  { %v6642_v61 = vsel %vm2897_vm6, %v6578_v24, %v9958_v54  ;;  %v9987_v12 = vunpack.i.l.bf16 %v9986_v32  ;;  %v9988_v36 = vunpack.i.h.bf16 %v9986_v32  ;;  %v9202_v31 = vunpack.i.l.bf16 %v15120_v18 }
 0x754   :  { %v7572_v51 = vadd.f32 %v13679_v56, %v7507_v46  ;;  %7193 = vmatmul.f32.gmra.mxu2 %v6831_v53  ;;  %v10286_v46 = vld [vmem:[#allocation7 + $0xa8] sm:$0xff]  ;;  %v15117_v53 = vld [vmem:[#allocation66_spill] sm:$0xff]  ;;  %v6706_v4 = vsel %vm2962_vm5, %v6642_v61, %v9963_v59  ;;  %v9352_v24 = vunpack.i.l.bf16 %v15121_v44 }
 0x755   :  { %v9517_v7 = vunpack.i.l.bf16 %v15117_v53  ;;  %v9518_v29 = vunpack.i.h.bf16 %v15117_v53  ;;  %v15123_v53 = vld [vmem:[#allocation65_spill] sm:$0xff] }
 0x756   :  { %v7636_v0 = vadd.f32 %v10282_v60, %v7572_v51 }
 0x757   :  { %v7146_v5 = vpop.f32.mrf.mxu2 }
 0x758   :  { %v7700_v26 = vmax.f32 %v7636_v0, 0.0  ;;  %v7356_v27 = vadd.f32 %v15113_v49, %v7146_v5  ;;  %v10287_v0 = vld [vmem:[#allocation2 + $0x210] sm:$0xff]  ;;  %v9991_v25 = vpop.permute.xlu1 %9990 }
 0x759   :  { %v6451_v52 = vsel %vm52_vm0, %v10287_v0, %v9197_v19  ;;  %v9992_v16 = vunpack.i.l.bf16 %v9991_v25  ;;  %v9993_v19 = vunpack.i.h.bf16 %v9991_v25 }
 0x75a   :  { %7764 = vst.msk [vmem:[#allocation8 + $0x98] sm:$0xff] %vm52_vm0, %v7700_v26  ;;  %v7508_v39 = vmul.f32 %v13671_v11, %v7356_v27  ;;  %v6515_v5 = vsel %vm2767_vm3, %v6451_v52, %v9342_v9  ;;  %v6770_v26 = vsel %vm3027_vm7, %v6706_v4, %v9968_v2  ;;  %v10001_v59 = vpop.permute.xlu0 %10000 }
 0x75b   :  { %v6579_v49 = vsel %vm2832_vm4, %v6515_v5, %v9517_v7  ;;  %v6834_v27 = vsel %vm3092_vm8, %v6770_v26, %v9973_v38  ;;  %v10002_v2 = vunpack.i.l.bf16 %v10001_v59  ;;  %v9353_v26 = vunpack.i.h.bf16 %v15121_v44 }
 0x75c   :  { %v7573_v55 = vadd.f32 %v13679_v56, %v7508_v39  ;;  %7196 = vmatmul.f32.gmra.mxu2 %v6832_v22  ;;  %v6643_v62 = vsel %vm2897_vm6, %v6579_v49, %v9977_v37  ;;  %v9982_v39 = vunpack.i.l.bf16 %v9981_v40 }
 0x75e   :  { %v7637_v45 = vadd.f32 %v10284_v10, %v7573_v55  ;;  %v6707_v50 = vsel %vm2962_vm5, %v6643_v62, %v9982_v39  ;;  %v15119_v10 = vld [vmem:[#allocation50_spill] sm:$0xff]  ;;  %v15124_v39 = vld [vmem:[#allocation83_spill] sm:$0xff] }
 0x75f   :  { %v7149_v23 = vpop.f32.mrf.mxu2  ;;  %v6771_v21 = vsel %vm3027_vm7, %v6707_v50, %v9987_v12 }
 0x760   :  { %v7701_v15 = vmax.f32 %v7637_v45, 0.0  ;;  %v7359_v41 = vadd.f32 %v15114_v17, %v7149_v23  ;;  %v6452_v23 = vsel %vm52_vm0, %v10289_v34, %v9198_v8  ;;  %v9996_v17 = vpop.permute.xlu2 %9995  ;;  %v10006_v37 = vpop.permute.xlu1 %10005 }
 0x761   :  { %v6516_v14 = vsel %vm2767_vm3, %v6452_v23, %v9343_v47  ;;  %v10007_v32 = vunpack.i.l.bf16 %v10006_v37  ;;  %v10008_v34 = vunpack.i.h.bf16 %v10006_v37 }
 0x762   :  { %7765 = vst.msk [vmem:[#allocation8 + $0xa0] sm:$0xff] %vm52_vm0, %v7701_v15  ;;  %v7509_v1 = vmul.f32 %v13671_v11, %v7359_v41  ;;  %v6580_v54 = vsel %vm2832_vm4, %v6516_v14, %v9518_v29  ;;  %v6835_v15 = vsel %vm3092_vm8, %v6771_v21, %v9992_v16  ;;  %v15125_v14 = vld [vmem:[#allocation116_spill] sm:$0xff] }
 0x763   :  { %v6644_v41 = vsel %vm2897_vm6, %v6580_v54, %v9978_v3  ;;  %v10016_v3 = vpop.permute.xlu0 %10015 }
 0x764   :  { %v7574_v20 = vadd.f32 %v13679_v56, %v7509_v1  ;;  %7199 = vmatmul.f32.gmra.mxu2 %v6833_v33  ;;  %v9983_v1 = vunpack.i.h.bf16 %v9981_v40  ;;  %v10290_v33 = vld [vmem:[#allocation7 + $0xb8] sm:$0xff]  ;;  %v9203_v40 = vunpack.i.h.bf16 %v15120_v18 }
 0x766   :  { %v7638_v42 = vadd.f32 %v10286_v46, %v7574_v20  ;;  %v15122_v20 = vld [vmem:[#allocation130_spill] sm:$0xff]  ;;  %v6708_v9 = vsel %vm2962_vm5, %v6644_v41, %v9983_v1  ;;  %v9997_v46 = vunpack.i.l.bf16 %v9996_v17  ;;  %v10294_v41 = vld [vmem:[#allocation7 + $0xc8] sm:$0xff]  ;;  %v10017_v1 = vunpack.i.l.bf16 %v10016_v3 }
 0x767   :  { %v7152_v51 = vpop.f32.mrf.mxu2  ;;  %v9522_v63 = vunpack.i.l.bf16 %v15122_v20  ;;  %v6772_v38 = vsel %vm3027_vm7, %v6708_v9, %v9988_v36  ;;  %v9523_v12 = vunpack.i.h.bf16 %v15122_v20  ;;  %v10295_v20 = vld [vmem:[#allocation2 + $0x240] sm:$0xff] }
 0x768   :  { %v7702_v35 = vmax.f32 %v7638_v42, 0.0  ;;  %v7362_v60 = vadd.f32 %v15118_v58, %v7152_v51  ;;  %v10291_v51 = vld [vmem:[#allocation2 + $0x228] sm:$0xff]  ;;  %v6836_v0 = vsel %vm3092_vm8, %v6772_v38, %v9993_v19  ;;  %v10011_v49 = vpop.permute.xlu2 %10010  ;;  %v10021_v44 = vpop.permute.xlu1 %10020 }
 0x769   :  { %v6453_v4 = vsel %vm52_vm0, %v10291_v51, %v9202_v31  ;;  %v10012_v16 = vunpack.i.l.bf16 %v10011_v49  ;;  %v10013_v19 = vunpack.i.h.bf16 %v10011_v49 }
 0x76a   :  { %7766 = vst.msk [vmem:[#allocation8 + $0xa8] sm:$0xff] %vm52_vm0, %v7702_v35  ;;  %v7510_v43 = vmul.f32 %v13671_v11, %v7362_v60  ;;  %v6517_v35 = vsel %vm2767_vm3, %v6453_v4, %v9352_v24  ;;  %v9208_v4 = vunpack.i.h.bf16 %v15125_v14 }
 0x76b   :  { %v6581_v60 = vsel %vm2832_vm4, %v6517_v35, %v9522_v63  ;;  %v10031_v38 = vpop.permute.xlu0 %10030  ;;  %v10296_v35 = vld [vmem:[#allocation7 + $0xd0] sm:$0xff] }
 0x76c   :  { %v7575_v48 = vadd.f32 %v13679_v56, %v7510_v43  ;;  %7202 = vmatmul.f32.gmra.mxu2 %v6834_v27  ;;  %v6645_v52 = vsel %vm2897_vm6, %v6581_v60, %v9997_v46  ;;  %v10292_v27 = vld [vmem:[#allocation7 + $0xc0] sm:$0xff] }
 0x76d   :  { %v6709_v43 = vsel %vm2962_vm5, %v6645_v52, %v10002_v2 }
 0x76e   :  { %v7639_v22 = vadd.f32 %v10288_v57, %v7575_v48  ;;  %v9998_v48 = vunpack.i.h.bf16 %v9996_v17  ;;  %v6773_v57 = vsel %vm3027_vm7, %v6709_v43, %v10007_v32 }
 0x76f   :  { %v7155_v55 = vpop.f32.mrf.mxu2 }
 0x770   :  { %v7703_v30 = vmax.f32 %v7639_v22, 0.0  ;;  %v7365_v45 = vadd.f32 %v15119_v10, %v7155_v55  ;;  %v10293_v22 = vld [vmem:[#allocation2 + $0x230] sm:$0xff]  ;;  %v10003_v55 = vunpack.i.h.bf16 %v10001_v59  ;;  %v15128_v59 = vld [vmem:[#allocation120_spill] sm:$0xff]  ;;  %v10026_v2 = vpop.permute.xlu2 %10025 }
 0x771   :  { %v6454_v29 = vsel %vm52_vm0, %v10293_v22, %v9203_v40  ;;  %v10018_v40 = vunpack.i.h.bf16 %v10016_v3 }
 0x772   :  { %7767 = vst.msk [vmem:[#allocation8 + $0xb0] sm:$0xff] %vm52_vm0, %v7703_v30  ;;  %v7511_v6 = vmul.f32 %v13671_v11, %v7365_v45  ;;  %v6518_v50 = vsel %vm2767_vm3, %v6454_v29, %v9353_v26  ;;  %v6837_v45 = vsel %vm3092_vm8, %v6773_v57, %v10012_v16  ;;  %v15129_v26 = vld [vmem:[#allocation135_spill] sm:$0xff]  ;;  %v15130_v16 = vld [vmem:[#allocation90_spill] sm:$0xff] }
 0x773   :  { %v6582_v10 = vsel %vm2832_vm4, %v6518_v50, %v9523_v12  ;;  %v15131_v50 = vld [vmem:[#allocation104_spill] sm:$0xff] }
 0x774   :  { %v7576_v28 = vadd.f32 %v13679_v56, %v7511_v6  ;;  %7205 = vmatmul.f32.gmra.mxu2 %v6835_v15  ;;  %v6646_v21 = vsel %vm2897_vm6, %v6582_v10, %v9998_v48  ;;  %v9207_v6 = vunpack.i.l.bf16 %v15125_v14  ;;  %v15126_v15 = vld [vmem:[#allocation126_spill] sm:$0xff]  ;;  %v9362_v3 = vunpack.i.l.bf16 %v15131_v50 }
 0x775   :  { %v6710_v54 = vsel %vm2962_vm5, %v6646_v21, %v10003_v55  ;;  %v9357_v17 = vunpack.i.l.bf16 %v15126_v15  ;;  %v9358_v37 = vunpack.i.h.bf16 %v15126_v15  ;;  %v9212_v55 = vunpack.i.l.bf16 %v15130_v16 }
 0x776   :  { %v7640_v61 = vadd.f32 %v10290_v33, %v7576_v28  ;;  %v15127_v28 = vld [vmem:[#allocation142_spill] sm:$0xff]  ;;  %v6455_v63 = vsel %vm52_vm0, %v10295_v20, %v9207_v6  ;;  %v10028_v6 = vunpack.i.h.bf16 %v10026_v2 }
 0x777   :  { %v7158_v13 = vpop.f32.mrf.mxu2  ;;  %v9527_v18 = vunpack.i.l.bf16 %v15127_v28  ;;  %v9528_v60 = vunpack.i.h.bf16 %v15127_v28 }
 0x778   :  { %v7704_v42 = vmax.f32 %v7640_v61, 0.0  ;;  %v7368_v7 = vadd.f32 %v15123_v53, %v7158_v13  ;;  %v6774_v61 = vsel %vm3027_vm7, %v6710_v54, %v10008_v34  ;;  %v6519_v13 = vsel %vm2767_vm3, %v6455_v63, %v9357_v17  ;;  %v15133_v17 = vld [vmem:[#allocation18_spill] sm:$0xff] }
 0x779   :  { %v6583_v46 = vsel %vm2832_vm4, %v6519_v13, %v9527_v18  ;;  %v6838_v53 = vsel %vm3092_vm8, %v6774_v61, %v10013_v19  ;;  %v10033_v34 = vunpack.i.h.bf16 %v10031_v38  ;;  %v10046_v18 = vpop.permute.xlu0 %10045  ;;  %v9213_v13 = vunpack.i.h.bf16 %v15130_v16 }
 0x77a   :  { %7768 = vst.msk [vmem:[#allocation8 + $0xb8] sm:$0xff] %vm52_vm0, %v7704_v42  ;;  %v7512_v58 = vmul.f32 %v13671_v11, %v7368_v7  ;;  %v10022_v42 = vunpack.i.l.bf16 %v10021_v44  ;;  %v6647_v7 = vsel %vm2897_vm6, %v6583_v46, %v10017_v1  ;;  %v10041_v1 = vpop.permute.xlu2 %10040  ;;  %v10047_v20 = vunpack.i.l.bf16 %v10046_v18 }
 0x77b   :  { %v9363_v46 = vunpack.i.h.bf16 %v15131_v50 }
 0x77c   :  { %v7577_v5 = vadd.f32 %v13679_v56, %v7512_v58  ;;  %7208 = vmatmul.f32.gmra.mxu2 %v6836_v0  ;;  %v10032_v0 = vunpack.i.l.bf16 %v10031_v38  ;;  %v6711_v32 = vsel %vm2962_vm5, %v6647_v7, %v10022_v42  ;;  %v10300_v42 = vld [vmem:[#allocation7 + $0xe0] sm:$0xff] }
 0x77e   :  { %v7641_v62 = vadd.f32 %v10292_v27, %v7577_v5  ;;  %v10027_v5 = vunpack.i.l.bf16 %v10026_v2  ;;  %v10297_v27 = vld [vmem:[#allocation2 + $0x248] sm:$0xff] }
 0x77f   :  { %v7161_v25 = vpop.f32.mrf.mxu2 }
 0x780   :  { %v7705_v8 = vmax.f32 %v7641_v62, 0.0  ;;  %v7371_v47 = vadd.f32 %v15124_v39, %v7161_v25  ;;  %v6456_v62 = vsel %vm52_vm0, %v10297_v27, %v9208_v4  ;;  %v10036_v25 = vpop.permute.xlu1 %10035  ;;  %v10048_v27 = vunpack.i.h.bf16 %v10046_v18 }
 0x781   :  { %v6520_v12 = vsel %vm2767_vm3, %v6456_v62, %v9358_v37  ;;  %v10037_v54 = vunpack.i.l.bf16 %v10036_v25  ;;  %v10038_v2 = vunpack.i.h.bf16 %v10036_v25 }
 0x782   :  { %7769 = vst.msk [vmem:[#allocation8 + $0xc0] sm:$0xff] %vm52_vm0, %v7705_v8  ;;  %v7513_v30 = vmul.f32 %v13671_v11, %v7371_v47  ;;  %v6775_v8 = vsel %vm3027_vm7, %v6711_v32, %v10027_v5  ;;  %v6584_v39 = vsel %vm2832_vm4, %v6520_v12, %v9528_v60  ;;  %v10023_v47 = vunpack.i.h.bf16 %v10021_v44  ;;  %v15135_v12 = vld [vmem:[#allocation143_spill] sm:$0xff] }
 0x783   :  { %v6839_v57 = vsel %vm3092_vm8, %v6775_v8, %v10032_v0  ;;  %v6648_v22 = vsel %vm2897_vm6, %v6584_v39, %v10018_v40  ;;  %v10301_v0 = vld [vmem:[#allocation2 + $0x260] sm:$0xff]  ;;  %v9217_v25 = vunpack.i.l.bf16 %v15135_v12  ;;  %v15136_v8 = vld [vmem:[#allocation71_spill] sm:$0xff] }
 0x784   :  { %v7578_v23 = vadd.f32 %v13679_v56, %v7513_v30  ;;  %7211 = vmatmul.f32.gmra.mxu2 %v6837_v45  ;;  %v10298_v30 = vld [vmem:[#allocation7 + $0xd8] sm:$0xff]  ;;  %v6712_v14 = vsel %vm2962_vm5, %v6648_v22, %v10023_v47  ;;  %v9367_v39 = vunpack.i.l.bf16 %v15136_v8  ;;  %v10061_v47 = vpop.permute.xlu0 %10060 }
 0x785   :  { %v15132_v45 = vld [vmem:[#allocation19_spill] sm:$0xff] }
 0x786   :  { %v7642_v36 = vadd.f32 %v10294_v41, %v7578_v23  ;;  %v9532_v21 = vunpack.i.l.bf16 %v15132_v45  ;;  %v9533_v7 = vunpack.i.h.bf16 %v15132_v45  ;;  %v15138_v45 = vld [vmem:[#allocation88_spill] sm:$0xff] }
 0x787   :  { %v7164_v31 = vpop.f32.mrf.mxu2 }
 0x788   :  { %v7706_v24 = vmax.f32 %v7642_v36, 0.0  ;;  %v7374_v33 = vadd.f32 %v15128_v59, %v7164_v31  ;;  %v10299_v36 = vld [vmem:[#allocation2 + $0x258] sm:$0xff]  ;;  %v10051_v63 = vpop.permute.xlu1 %10050 }
 0x789   :  { %v6457_v28 = vsel %vm52_vm0, %v10299_v36, %v9212_v55  ;;  %v10052_v38 = vunpack.i.l.bf16 %v10051_v63  ;;  %v10053_v55 = vunpack.i.h.bf16 %v10051_v63 }
 0x78a   :  { %7770 = vst.msk [vmem:[#allocation8 + $0xc8] sm:$0xff] %vm52_vm0, %v7706_v24  ;;  %v7514_v9 = vmul.f32 %v13671_v11, %v7374_v33  ;;  %v6521_v31 = vsel %vm2767_vm3, %v6457_v28, %v9362_v3  ;;  %v6776_v24 = vsel %vm3027_vm7, %v6712_v14, %v10028_v6  ;;  %v10062_v6 = vunpack.i.l.bf16 %v10061_v47 }
 0x78b   :  { %v6585_v59 = vsel %vm2832_vm4, %v6521_v31, %v9532_v21  ;;  %v6840_v33 = vsel %vm3092_vm8, %v6776_v24, %v10033_v34  ;;  %v9368_v24 = vunpack.i.h.bf16 %v15136_v8 }
 0x78c   :  { %v7579_v51 = vadd.f32 %v13679_v56, %v7514_v9  ;;  %7214 = vmatmul.f32.gmra.mxu2 %v6838_v53  ;;  %v6649_v61 = vsel %vm2897_vm6, %v6585_v59, %v10037_v54  ;;  %v10042_v9 = vunpack.i.l.bf16 %v10041_v1 }
 0x78e   :  { %v7643_v58 = vadd.f32 %v10296_v35, %v7579_v51  ;;  %v6713_v4 = vsel %vm2962_vm5, %v6649_v61, %v10042_v9  ;;  %v15134_v35 = vld [vmem:[#allocation34_spill] sm:$0xff] }
 0x78f   :  { %v7167_v52 = vpop.f32.mrf.mxu2  ;;  %v6777_v60 = vsel %vm3027_vm7, %v6713_v4, %v10047_v20  ;;  %v15139_v9 = vld [vmem:[#allocation26_spill] sm:$0xff] }
 0x790   :  { %v7707_v43 = vmax.f32 %v7643_v58, 0.0  ;;  %v7377_v49 = vadd.f32 %v15129_v26, %v7167_v52  ;;  %v6458_v52 = vsel %vm52_vm0, %v10301_v0, %v9213_v13  ;;  %v10056_v26 = vpop.permute.xlu2 %10055  ;;  %v10066_v54 = vpop.permute.xlu1 %10065 }
 0x791   :  { %v6522_v32 = vsel %vm2767_vm3, %v6458_v52, %v9363_v46  ;;  %v10067_v18 = vunpack.i.l.bf16 %v10066_v54  ;;  %v10068_v0 = vunpack.i.h.bf16 %v10066_v54 }
 0x792   :  { %7771 = vst.msk [vmem:[#allocation8 + $0xd0] sm:$0xff] %vm52_vm0, %v7707_v43  ;;  %v7515_v48 = vmul.f32 %v13671_v11, %v7377_v49  ;;  %v6586_v40 = vsel %vm2832_vm4, %v6522_v32, %v9533_v7  ;;  %v6841_v43 = vsel %vm3092_vm8, %v6777_v60, %v10052_v38  ;;  %v14166_v32 = vpop.f32.mrf.mxu3 }
 0x793   :  { %v6650_v49 = vsel %vm2897_vm6, %v6586_v40, %v10038_v2  ;;  %v10076_v2 = vpop.permute.xlu0 %10075 }
 0x794   :  { %v7580_v29 = vadd.f32 %v13679_v56, %v7515_v48  ;;  %7217 = vmatmul.f32.gmra.mxu2 %v6839_v57  ;;  %v10043_v48 = vunpack.i.h.bf16 %v10041_v1  ;;  %v10302_v57 = vld [vmem:[#allocation7 + $0xe8] sm:$0xff]  ;;  %v9218_v1 = vunpack.i.h.bf16 %v15135_v12  ;;  %v15142_v12 = vld [vmem:[#allocation82_spill] sm:$0xff]  ;;  %v10077_v8 = vunpack.i.l.bf16 %v10076_v2 }
 0x796   :  { %v7644_v10 = vadd.f32 %v10298_v30, %v7580_v29  ;;  %v15137_v29 = vld [vmem:[#allocation27_spill] sm:$0xff]  ;;  %v6714_v3 = vsel %vm2962_vm5, %v6650_v49, %v10043_v48  ;;  %v10057_v30 = vunpack.i.l.bf16 %v10056_v26 }
 0x797   :  { %v7170_v23 = vpop.f32.mrf.mxu2  ;;  %v9537_v16 = vunpack.i.l.bf16 %v15137_v29  ;;  %v6778_v34 = vsel %vm3027_vm7, %v6714_v3, %v10048_v27  ;;  %v9538_v20 = vunpack.i.h.bf16 %v15137_v29  ;;  %v10306_v27 = vld [vmem:[#allocation7 + $0xf8] sm:$0xff] }
 0x798   :  { %v7708_v15 = vmax.f32 %v7644_v10, 0.0  ;;  %v7380_v41 = vadd.f32 %v15133_v17, %v7170_v23  ;;  %v10303_v23 = vld [vmem:[#allocation2 + $0x270] sm:$0xff]  ;;  %v6842_v36 = vsel %vm3092_vm8, %v6778_v34, %v10053_v55  ;;  %v10071_v59 = vpop.permute.xlu2 %10070 }
 0x799   :  { %v6459_v14 = vsel %vm52_vm0, %v10303_v23, %v9217_v25  ;;  %v10072_v38 = vunpack.i.l.bf16 %v10071_v59  ;;  %v9542_v25 = vunpack.i.l.bf16 %v15142_v12 }
 0x79a   :  { %7772 = vst.msk [vmem:[#allocation8 + $0xd8] sm:$0xff] %vm52_vm0, %v7708_v15  ;;  %v7516_v44 = vmul.f32 %v13671_v11, %v7380_v41  ;;  %v6523_v15 = vsel %vm2767_vm3, %v6459_v14, %v9367_v39  ;;  %v10081_v39 = vpop.permute.xlu1 %10080 }
 0x79b   :  { %v6587_v41 = vsel %vm2832_vm4, %v6523_v15, %v9537_v16  ;;  %v10307_v16 = vld [vmem:[#allocation2 + $0x288] sm:$0xff]  ;;  %v10091_v23 = vpop.permute.xlu0 %10090 }
 0x79c   :  { %v7581_v19 = vadd.f32 %v13679_v56, %v7516_v44  ;;  %7220 = vmatmul.f32.gmra.mxu2 %v6840_v33  ;;  %v6651_v28 = vsel %vm2897_vm6, %v6587_v41, %v10057_v30  ;;  %v10304_v33 = vld [vmem:[#allocation7 + $0xf0] sm:$0xff] }
 0x79d   :  { %v6715_v44 = vsel %vm2962_vm5, %v6651_v28, %v10062_v6  ;;  %v9543_v28 = vunpack.i.h.bf16 %v15142_v12 }
 0x79e   :  { %v7645_v53 = vadd.f32 %v10300_v42, %v7581_v19  ;;  %v10058_v19 = vunpack.i.h.bf16 %v10056_v26  ;;  %v6779_v42 = vsel %vm3027_vm7, %v6715_v44, %v10067_v18  ;;  %v15141_v26 = vld [vmem:[#allocation22_spill] sm:$0xff]  ;;  %v10092_v18 = vunpack.i.l.bf16 %v10091_v23 }
 0x79f   :  { %v7173_v51 = vpop.f32.mrf.mxu2  ;;  %v9372_v49 = vunpack.i.l.bf16 %v15141_v26  ;;  %v9373_v15 = vunpack.i.h.bf16 %v15141_v26 }
 0x7a0   :  { %v7709_v37 = vmax.f32 %v7645_v53, 0.0  ;;  %v7383_v58 = vadd.f32 %v15134_v35, %v7173_v51  ;;  %v10305_v53 = vld [vmem:[#allocation2 + $0x278] sm:$0xff]  ;;  %v10063_v51 = vunpack.i.h.bf16 %v10061_v47  ;;  %v10086_v54 = vpop.permute.xlu2 %10085 }
 0x7a1   :  { %v6460_v7 = vsel %vm52_vm0, %v10305_v53, %v9218_v1  ;;  %v10087_v44 = vunpack.i.l.bf16 %v10086_v54  ;;  %v10083_v53 = vunpack.i.h.bf16 %v10081_v39  ;;  %v10088_v26 = vunpack.i.h.bf16 %v10086_v54 }
 0x7a2   :  { %7773 = vst.msk [vmem:[#allocation8 + $0xe0] sm:$0xff] %vm52_vm0, %v7709_v37  ;;  %v7517_v5 = vmul.f32 %v13671_v11, %v7383_v58  ;;  %v6524_v4 = vsel %vm2767_vm3, %v6460_v7, %v9368_v24  ;;  %v6843_v58 = vsel %vm3092_vm8, %v6779_v42, %v10072_v38  ;;  %v10078_v24 = vunpack.i.h.bf16 %v10076_v2 }
 0x7a3   :  { %v6588_v35 = vsel %vm2832_vm4, %v6524_v4, %v9538_v20  ;;  %v10309_v20 = vld [vmem:[#allocation2 + $0x290] sm:$0xff] }
 0x7a4   :  { %v7582_v62 = vadd.f32 %v13679_v56, %v7517_v5  ;;  %7223 = vmatmul.f32.gmra.mxu2 %v6841_v43  ;;  %v6652_v60 = vsel %vm2897_vm6, %v6588_v35, %v10058_v19  ;;  %v15140_v5 = vld [vmem:[#allocation44_spill] sm:$0xff]  ;;  %v15145_v4 = vld [vmem:[#allocation146_spill] sm:$0xff] }
 0x7a5   :  { %v9232_v40 = vunpack.i.l.bf16 %v15140_v5  ;;  %v6716_v43 = vsel %vm2962_vm5, %v6652_v60, %v10063_v51  ;;  %v9233_v6 = vunpack.i.h.bf16 %v15140_v5  ;;  %v9257_v2 = vunpack.i.l.bf16 %v15145_v4 }
 0x7a6   :  { %v7646_v22 = vadd.f32 %v10302_v57, %v7582_v62  ;;  %v15143_v57 = vld [vmem:[#allocation58_spill] sm:$0xff]  ;;  %v6780_v29 = vsel %vm3027_vm7, %v6716_v43, %v10068_v0  ;;  %v15147_v0 = vld [vmem:[#allocation95_spill] sm:$0xff]  ;;  %v10093_v5 = vunpack.i.h.bf16 %v10091_v23 }
 0x7a7   :  { %v7176_v50 = vpop.f32.mrf.mxu2  ;;  %v6461_v55 = vsel %vm52_vm0, %v10307_v16, %v9232_v40  ;;  %v10312_v23 = vld [vmem:[#allocation7 + $0x110] sm:$0xff] }
 0x7a8   :  { %v7710_v10 = vmax.f32 %v7646_v22, 0.0  ;;  %v7386_v21 = vadd.f32 %v15138_v45, %v7176_v50  ;;  %v10073_v50 = vunpack.i.h.bf16 %v10071_v59  ;;  %v6525_v3 = vsel %vm2767_vm3, %v6461_v55, %v9372_v49 }
 0x7a9   :  { %v10082_v45 = vunpack.i.l.bf16 %v10081_v39  ;;  %v10106_v39 = vpop.permute.xlu0 %10105 }
 0x7aa   :  { %7774 = vst.msk [vmem:[#allocation8 + $0xe8] sm:$0xff] %vm52_vm0, %v7710_v10  ;;  %v7518_v17 = vmul.f32 %v13671_v11, %v7386_v21  ;;  %v6589_v10 = vsel %vm2832_vm4, %v6525_v3, %v9542_v25  ;;  %v6844_v21 = vsel %vm3092_vm8, %v6780_v29, %v10073_v50  ;;  %v10107_v3 = vunpack.i.l.bf16 %v10106_v39 }
 0x7ab   :  { %v6653_v34 = vsel %vm2897_vm6, %v6589_v10, %v10077_v8 }
 0x7ac   :  { %v7583_v31 = vadd.f32 %v13679_v56, %v7518_v17  ;;  %7226 = vmatmul.f32.gmra.mxu2 %v6842_v36  ;;  %v10308_v17 = vld [vmem:[#allocation7 + $0x100] sm:$0xff]  ;;  %v14184_v36 = vpop.f32.mrf.mxu3  ;;  %v6717_v1 = vsel %vm2962_vm5, %v6653_v34, %v10082_v45  ;;  %v9258_v45 = vunpack.i.h.bf16 %v15145_v4 }
 0x7ae   :  { %v7647_v61 = vadd.f32 %v10304_v33, %v7583_v31  ;;  %v15144_v33 = vld [vmem:[#allocation14_spill] sm:$0xff] }
 0x7af   :  { %v7179_v63 = vpop.f32.mrf.mxu2 }
 0x7b0   :  { %v7711_v13 = vmax.f32 %v7647_v61, 0.0  ;;  %v7389_v46 = vadd.f32 %v15139_v9, %v7179_v63  ;;  %v6462_v63 = vsel %vm52_vm0, %v10309_v20, %v9233_v6  ;;  %v9548_v6 = vunpack.i.h.bf16 %v15147_v0 }
 0x7b1   :  { %v6526_v19 = vsel %vm2767_vm3, %v6462_v63, %v9373_v15  ;;  %v10121_v4 = vpop.permute.xlu0 %10120 }
 0x7b2   :  { %7775 = vst.msk [vmem:[#allocation8 + $0xf0] sm:$0xff] %vm52_vm0, %v7711_v13  ;;  %v7519_v37 = vmul.f32 %v13671_v11, %v7389_v46  ;;  %v10096_v13 = vpop.permute.xlu1 %10095  ;;  %v6781_v46 = vsel %vm3027_vm7, %v6717_v1, %v10087_v44  ;;  %v6590_v42 = vsel %vm2832_vm4, %v6526_v19, %v9543_v28  ;;  %v10313_v44 = vld [vmem:[#allocation2 + $0x2a8] sm:$0xff] }
 0x7b3   :  { %v6845_v7 = vsel %vm3092_vm8, %v6781_v46, %v10092_v18  ;;  %v6654_v38 = vsel %vm2897_vm6, %v6590_v42, %v10078_v24  ;;  %v10097_v49 = vunpack.i.l.bf16 %v10096_v13  ;;  %v15149_v18 = vld [vmem:[#allocation77_spill] sm:$0xff]  ;;  %v6464_v24 = vsel %vm52_vm0, %v10313_v44, %v9258_v45  ;;  %v15150_v42 = vld [vmem:[#allocation102_spill] sm:$0xff]  ;;  %v10316_v45 = vld [vmem:[#allocation7 + $0x120] sm:$0xff] }
 0x7b4   :  { %v7584_v52 = vadd.f32 %v13679_v56, %v7519_v37  ;;  %7229 = vmatmul.f32.gmra.mxu2 %v6843_v58  ;;  %v15146_v37 = vld [vmem:[#allocation57_spill] sm:$0xff]  ;;  %v6718_v43 = vsel %vm2962_vm5, %v6654_v38, %v10083_v53  ;;  %v14203_v25 = vpop.f32.mrf.mxu3  ;;  %v9297_v53 = vunpack.i.l.bf16 %v15150_v42  ;;  %v15151_v38 = vld [vmem:[#allocation128_spill] sm:$0xff] }
 0x7b5   :  { %v9377_v35 = vunpack.i.l.bf16 %v15146_v37  ;;  %v10310_v58 = vld [vmem:[#allocation7 + $0x108] sm:$0xff]  ;;  %v6782_v29 = vsel %vm3027_vm7, %v6718_v43, %v10088_v26  ;;  %v9378_v34 = vunpack.i.h.bf16 %v15146_v37  ;;  %v15153_v43 = vld [vmem:[#allocation147_spill] sm:$0xff] }
 0x7b6   :  { %v7648_v62 = vadd.f32 %v10306_v27, %v7584_v52  ;;  %v9547_v52 = vunpack.i.l.bf16 %v15147_v0  ;;  %v6846_v55 = vsel %vm3092_vm8, %v6782_v29, %v10093_v5 }
 0x7b7   :  { %v7182_v48 = vpop.f32.mrf.mxu2 }
 0x7b8   :  { %v7712_v47 = vmax.f32 %v7648_v62, 0.0  ;;  %v7392_v22 = vadd.f32 %v15143_v57, %v7182_v48  ;;  %v15148_v62 = vld [vmem:[#allocation136_spill] sm:$0xff]  ;;  %v10101_v57 = vpop.permute.xlu2 %10100 }
 0x7b9   :  { %v10311_v48 = vld [vmem:[#allocation2 + $0x2a0] sm:$0xff]  ;;  %v10136_v44 = vpop.permute.xlu0 %10135 }
 0x7ba   :  { %7776 = vst.msk [vmem:[#allocation8 + $0xf8] sm:$0xff] %vm52_vm0, %v7712_v47  ;;  %v7520_v30 = vmul.f32 %v13671_v11, %v7392_v22  ;;  %v6463_v8 = vsel %vm52_vm0, %v10311_v48, %v9257_v2  ;;  %v10314_v2 = vld [vmem:[#allocation7 + $0x118] sm:$0xff] }
 0x7bb   :  { %v6527_v47 = vsel %vm2767_vm3, %v6463_v8, %v9377_v35  ;;  %v15152_v35 = vld [vmem:[#allocation97_spill] sm:$0xff] }
 0x7bc   :  { %v7585_v14 = vadd.f32 %v13679_v56, %v7520_v30  ;;  %7232 = vmatmul.f32.gmra.mxu2 %v6844_v21  ;;  %v6591_v16 = vsel %vm2832_vm4, %v6527_v47, %v9547_v52  ;;  %v10111_v30 = vpop.permute.xlu1 %10110  ;;  %v10102_v21 = vunpack.i.l.bf16 %v10101_v57 }
 0x7bd   :  { %v6655_v50 = vsel %vm2897_vm6, %v6591_v16, %v10097_v49  ;;  %v10112_v54 = vunpack.i.l.bf16 %v10111_v30 }
 0x7be   :  { %v7649_v41 = vadd.f32 %v10308_v17, %v7585_v14  ;;  %v6719_v17 = vsel %vm2962_vm5, %v6655_v50, %v10102_v21  ;;  %v9298_v50 = vunpack.i.h.bf16 %v15150_v42  ;;  %v15156_v42 = vld [vmem:[#allocation46_spill] sm:$0xff] }
 0x7bf   :  { %v7185_v31 = vpop.f32.mrf.mxu2  ;;  %v6783_v1 = vsel %vm3027_vm7, %v6719_v17, %v10107_v3 }
 0x7c0   :  { %v7713_v59 = vmax.f32 %v7649_v41, 0.0  ;;  %v7395_v61 = vadd.f32 %v15144_v33, %v7185_v31  ;;  %v10098_v41 = vunpack.i.h.bf16 %v10096_v13  ;;  %v6847_v63 = vsel %vm3092_vm8, %v6783_v1, %v10112_v54  ;;  %v10116_v19 = vpop.permute.xlu2 %10115  ;;  %v15154_v54 = vld [vmem:[#allocation60_spill] sm:$0xff] }
 0x7c1   :  { %v10117_v5 = vunpack.i.l.bf16 %v10116_v19 }
 0x7c2   :  { %7777 = vst.msk [vmem:[#allocation8 + $0x100] sm:$0xff] %vm52_vm0, %v7713_v59  ;;  %v7521_v9 = vmul.f32 %v13671_v11, %v7395_v61  ;;  %v6528_v59 = vsel %vm2767_vm3, %v6464_v24, %v9378_v34  ;;  %v14224_v61 = vpop.f32.mrf.mxu3  ;;  %v9553_v34 = vunpack.i.h.bf16 %v15152_v35 }
 0x7c3   :  { %v6592_v20 = vsel %vm2832_vm4, %v6528_v59, %v9548_v6 }
 0x7c4   :  { %v7586_v51 = vadd.f32 %v13679_v56, %v7521_v9  ;;  %7235 = vmatmul.f32.gmra.mxu2 %v6845_v7  ;;  %v6656_v13 = vsel %vm2897_vm6, %v6592_v20, %v10098_v41  ;;  %v10108_v9 = vunpack.i.h.bf16 %v10106_v39  ;;  %v10103_v7 = vunpack.i.h.bf16 %v10101_v57  ;;  %v10126_v48 = vpop.permute.xlu1 %10125  ;;  %v10317_v41 = vld [vmem:[#allocation2 + $0x2c0] sm:$0xff] }
 0x7c5   :  { %v10127_v29 = vunpack.i.l.bf16 %v10126_v48 }
 0x7c6   :  { %v7650_v60 = vadd.f32 %v10310_v58, %v7586_v51  ;;  %v9382_v51 = vunpack.i.l.bf16 %v15151_v38  ;;  %v9552_v58 = vunpack.i.l.bf16 %v15152_v35  ;;  %v6720_v52 = vsel %vm2962_vm5, %v6656_v13, %v10103_v7  ;;  %v15155_v13 = vld [vmem:[#allocation38_spill] sm:$0xff]  ;;  %v10318_v7 = vld [vmem:[#allocation7 + $0x128] sm:$0xff] }
 0x7c7   :  { %v7188_v40 = vpop.f32.mrf.mxu2  ;;  %v6784_v49 = vsel %vm3027_vm7, %v6720_v52, %v10108_v9  ;;  %v9322_v9 = vunpack.i.l.bf16 %v15155_v13  ;;  %v10137_v35 = vunpack.i.l.bf16 %v10136_v44 }
 0x7c8   :  { %v7714_v27 = vmax.f32 %v7650_v60, 0.0  ;;  %v7398_v12 = vadd.f32 %v15148_v62, %v7188_v40  ;;  %v10113_v60 = vunpack.i.h.bf16 %v10111_v30  ;;  %v9383_v30 = vunpack.i.h.bf16 %v15151_v38 }
 0x7ca   :  { %7778 = vst.msk [vmem:[#allocation8 + $0x108] sm:$0xff] %vm52_vm0, %v7714_v27  ;;  %v7522_v22 = vmul.f32 %v13671_v11, %v7398_v12  ;;  %v10315_v27 = vld [vmem:[#allocation2 + $0x2b8] sm:$0xff]  ;;  %v10122_v12 = vunpack.i.l.bf16 %v10121_v4  ;;  %v6848_v57 = vsel %vm3092_vm8, %v6784_v49, %v10113_v60 }
 0x7cb   :  { %v6465_v62 = vsel %vm52_vm0, %v10315_v27, %v9297_v53  ;;  %v9392_v53 = vunpack.i.l.bf16 %v15156_v42 }
 0x7cc   :  { %v7587_v10 = vadd.f32 %v13679_v56, %v7522_v22  ;;  %7238 = vmatmul.f32.gmra.mxu2 %v6846_v55  ;;  %v6529_v8 = vsel %vm2767_vm3, %v6465_v62, %v9382_v51  ;;  %v14244_v55 = vpop.f32.mrf.mxu3 }
 0x7cd   :  { %v6593_v47 = vsel %vm2832_vm4, %v6529_v8, %v9552_v58  ;;  %v10141_v58 = vpop.permute.xlu1 %10140 }
 0x7ce   :  { %v7651_v14 = vadd.f32 %v10312_v23, %v7587_v10  ;;  %v6657_v22 = vsel %vm2897_vm6, %v6593_v47, %v10117_v5  ;;  %v10131_v10 = vpop.permute.xlu2 %10130  ;;  %v10319_v5 = vld [vmem:[#allocation2 + $0x2d0] sm:$0xff]  ;;  %v10142_v62 = vunpack.i.l.bf16 %v10141_v58 }
 0x7cf   :  { %v7191_v15 = vpop.f32.mrf.mxu2  ;;  %v6721_v3 = vsel %vm2962_vm5, %v6657_v22, %v10122_v12  ;;  %v10320_v22 = vld [vmem:[#allocation7 + $0x130] sm:$0xff] }
 0x7d0   :  { %v7715_v28 = vmax.f32 %v7651_v14, 0.0  ;;  %v7401_v31 = vadd.f32 %v15149_v18, %v7191_v15  ;;  %v10118_v14 = vunpack.i.h.bf16 %v10116_v19  ;;  %v6785_v17 = vsel %vm3027_vm7, %v6721_v3, %v10127_v29 }
 0x7d1   :  { %v10132_v18 = vunpack.i.l.bf16 %v10131_v10 }
 0x7d2   :  { %7779 = vst.msk [vmem:[#allocation8 + $0x110] sm:$0xff] %vm52_vm0, %v7715_v28  ;;  %v7523_v33 = vmul.f32 %v13671_v11, %v7401_v31  ;;  %v6466_v28 = vsel %vm52_vm0, %v10317_v41, %v9298_v50  ;;  %v10123_v31 = vunpack.i.h.bf16 %v10121_v4  ;;  %v15157_v4 = vld [vmem:[#allocation125_spill] sm:$0xff] }
 0x7d3   :  { %v6530_v1 = vsel %vm2767_vm3, %v6466_v28, %v9383_v30 }
 0x7d4   :  { %v7588_v46 = vadd.f32 %v13679_v56, %v7523_v33  ;;  %7241 = vmatmul.f32.gmra.mxu2 %v6847_v63  ;;  %v6594_v59 = vsel %vm2832_vm4, %v6530_v1, %v9553_v34  ;;  %v6849_v33 = vsel %vm3092_vm8, %v6785_v17, %v10132_v18  ;;  %v10128_v63 = vunpack.i.h.bf16 %v10126_v48  ;;  %v14263_v51 = vpop.f32.mrf.mxu3 }
 0x7d5   :  { %v6658_v20 = vsel %vm2897_vm6, %v6594_v59, %v10118_v14  ;;  %v10321_v14 = vld [vmem:[#allocation2 + $0x2d8] sm:$0xff]  ;;  %v10143_v18 = vunpack.i.h.bf16 %v10141_v58 }
 0x7d6   :  { %v7652_v37 = vadd.f32 %v10314_v2, %v7588_v46  ;;  %v6722_v46 = vsel %vm2962_vm5, %v6658_v20, %v10123_v31  ;;  %v9557_v2 = vunpack.i.l.bf16 %v15157_v4  ;;  %v10146_v47 = vpop.permute.xlu2 %10145  ;;  %v15159_v59 = vld [vmem:[#allocation91_spill] sm:$0xff] }
 0x7d7   :  { %v7194_v0 = vpop.f32.mrf.mxu2  ;;  %v6786_v52 = vsel %vm3027_vm7, %v6722_v46, %v10128_v63  ;;  %v10322_v20 = vld [vmem:[#allocation7 + $0x138] sm:$0xff] }
 0x7d8   :  { %v7716_v40 = vmax.f32 %v7652_v37, 0.0  ;;  %v7404_v26 = vadd.f32 %v15153_v43, %v7194_v0  ;;  %v10133_v43 = vunpack.i.h.bf16 %v10131_v10  ;;  %v10147_v10 = vunpack.i.l.bf16 %v10146_v47 }
 0x7da   :  { %7780 = vst.msk [vmem:[#allocation8 + $0x118] sm:$0xff] %vm52_vm0, %v7716_v40  ;;  %v7524_v39 = vmul.f32 %v13671_v11, %v7404_v26  ;;  %v6467_v40 = vsel %vm52_vm0, %v10319_v5, %v9322_v9  ;;  %v6850_v12 = vsel %vm3092_vm8, %v6786_v52, %v10133_v43 }
 0x7db   :  { %v6531_v26 = vsel %vm2767_vm3, %v6467_v40, %v9392_v53  ;;  %v10148_v53 = vunpack.i.h.bf16 %v10146_v47 }
 0x7dc   :  { %v7589_v16 = vadd.f32 %v13679_v56, %v7524_v39  ;;  %7244 = vmatmul.f32.gmra.mxu2 %v6848_v57  ;;  %v6595_v27 = vsel %vm2832_vm4, %v6531_v26, %v9557_v2  ;;  %v9323_v39 = vunpack.i.h.bf16 %v15155_v13  ;;  %v9393_v57 = vunpack.i.h.bf16 %v15156_v42  ;;  %v10323_v2 = vld [vmem:[#allocation2 + $0x2e8] sm:$0xff] }
 0x7dd   :  { %v6659_v48 = vsel %vm2897_vm6, %v6595_v27, %v10137_v35 }
 0x7de   :  { %v7653_v21 = vadd.f32 %v10316_v45, %v7589_v16  ;;  %v9558_v16 = vunpack.i.h.bf16 %v15157_v4  ;;  %v6723_v30 = vsel %vm2962_vm5, %v6659_v48, %v10142_v62  ;;  %v10138_v45 = vunpack.i.h.bf16 %v10136_v44  ;;  %v15158_v44 = vld [vmem:[#allocation63_spill] sm:$0xff] }
 0x7df   :  { %v7197_v23 = vpop.f32.mrf.mxu2  ;;  %v6787_v41 = vsel %vm3027_vm7, %v6723_v30, %v10147_v10  ;;  %v9348_v62 = vunpack.i.h.bf16 %v15158_v44  ;;  %v9398_v48 = vunpack.i.h.bf16 %v15159_v59  ;;  %v10325_v30 = vld [vmem:[#allocation2 + $0x2f0] sm:$0xff] }
 0x7e0   :  { %v7717_v6 = vmax.f32 %v7653_v21, 0.0  ;;  %v7407_v15 = vadd.f32 %v15154_v54, %v7197_v23  ;;  %v14281_v23 = vpop.f32.mrf.mxu3 }
 0x7e1   :  { %v6470_v10 = vsel %vm52_vm0, %v10325_v30, %v9348_v62  ;;  %v4618_v30 = vld [vmem:[#allocation2 + $0x352] sm:$0xff] }
 0x7e2   :  { %7781 = vst.msk [vmem:[#allocation8 + $0x120] sm:$0xff] %vm52_vm0, %v7717_v6  ;;  %v7525_v24 = vmul.f32 %v13671_v11, %v7407_v15  ;;  %v6468_v6 = vsel %vm52_vm0, %v10321_v14, %v9323_v39  ;;  %v10156_v15 = vpop.permute.xlu1 %10155 }
 0x7e3   :  { %v6532_v54 = vsel %vm2767_vm3, %v6468_v6, %v9393_v57 }
 0x7e4   :  { %v7590_v19 = vadd.f32 %v13679_v56, %v7525_v24  ;;  %7247 = vmatmul.f32.gmra.mxu2 %v6849_v33  ;;  %v6596_v28 = vsel %vm2832_vm4, %v6532_v54, %v9558_v16  ;;  %v9347_v24 = vunpack.i.l.bf16 %v15158_v44  ;;  %v9397_v33 = vunpack.i.l.bf16 %v15159_v59  ;;  %v10326_v44 = vld [vmem:[#allocation7 + $0x148] sm:$0xff]  ;;  %v15163_v59 = vld [vmem:[#allocation35_spill] sm:$0xff] }
 0x7e6   :  { %v7654_v38 = vadd.f32 %v10318_v7, %v7590_v19  ;;  %v15160_v19 = vld [vmem:[#allocation43_spill] sm:$0xff]  ;;  %v10157_v7 = vunpack.i.l.bf16 %v10156_v15 }
 0x7e7   :  { %v7200_v37 = vpop.f32.mrf.mxu2  ;;  %v9562_v13 = vunpack.i.l.bf16 %v15160_v19  ;;  %v9563_v39 = vunpack.i.h.bf16 %v15160_v19 }
 0x7e8   :  { %v7718_v60 = vmax.f32 %v7654_v38, 0.0  ;;  %v7410_v0 = vadd.f32 %v14166_v32, %v7200_v37  ;;  %v10151_v32 = vpop.permute.xlu0 %10150  ;;  %v6469_v37 = vsel %vm52_vm0, %v10323_v2, %v9347_v24  ;;  %v14302_v5 = vpop.f32.mrf.mxu3 }
 0x7e9   :  { %v10152_v50 = vunpack.i.l.bf16 %v10151_v32  ;;  %v10153_v9 = vunpack.i.h.bf16 %v10151_v32  ;;  %v6533_v58 = vsel %vm2767_vm3, %v6469_v37, %v9397_v33  ;;  %v10324_v32 = vld [vmem:[#allocation7 + $0x140] sm:$0xff]  ;;  %v9567_v33 = vunpack.i.l.bf16 %v15163_v59 }
 0x7ea   :  { %7782 = vst.msk [vmem:[#allocation8 + $0x128] sm:$0xff] %vm52_vm0, %v7718_v60  ;;  %v7526_v49 = vmul.f32 %v13671_v11, %v7410_v0  ;;  %v10161_v60 = vpop.permute.xlu2 %10160  ;;  %v6597_v40 = vsel %vm2832_vm4, %v6533_v58, %v9562_v13 }
 0x7eb   :  { %v6851_v31 = vsel %vm3092_vm8, %v6787_v41, %v10152_v50  ;;  %v15161_v41 = vld [vmem:[#allocation119_spill] sm:$0xff] }
 0x7ec   :  { %v7591_v8 = vadd.f32 %v13679_v56, %v7526_v49  ;;  %7250 = vmatmul.f32.gmra.mxu2 %v6850_v12  ;;  %v10171_v49 = vpop.permute.xlu1 %10170  ;;  %v10162_v12 = vunpack.i.l.bf16 %v10161_v60 }
 0x7ed   :  { %v10172_v47 = vunpack.i.l.bf16 %v10171_v49 }
 0x7ee   :  { %v7655_v29 = vadd.f32 %v10320_v22, %v7591_v8 }
 0x7ef   :  { %v7203_v3 = vpop.f32.mrf.mxu2 }
 0x7f0   :  { %v7719_v21 = vmax.f32 %v7655_v29, 0.0  ;;  %v7413_v34 = vadd.f32 %v14184_v36, %v7203_v3  ;;  %v6660_v36 = vsel %vm2897_vm6, %v6596_v28, %v10138_v45  ;;  %v10166_v35 = vpop.permute.xlu0 %10165  ;;  %v10158_v29 = vunpack.i.h.bf16 %v10156_v15 }
 0x7f1   :  { %v6724_v42 = vsel %vm2962_vm5, %v6660_v36, %v10143_v18  ;;  %v10167_v26 = vunpack.i.l.bf16 %v10166_v35  ;;  %v6534_v45 = vsel %vm2767_vm3, %v6470_v10, %v9398_v48  ;;  %v10168_v15 = vunpack.i.h.bf16 %v10166_v35  ;;  %v4617_v35 = vld [vmem:[#allocation2 + $0x34a] sm:$0xff]  ;;  %v15164_v10 = vld [vmem:[#allocation139_spill] sm:$0xff] }
 0x7f2   :  { %7783 = vst.msk [vmem:[#allocation8 + $0x130] sm:$0xff] %vm52_vm0, %v7719_v21  ;;  %v7527_v17 = vmul.f32 %v13671_v11, %v7413_v34  ;;  %v6788_v52 = vsel %vm3027_vm7, %v6724_v42, %v10148_v53  ;;  %v6598_v34 = vsel %vm2832_vm4, %v6534_v45, %v9563_v39  ;;  %v10176_v6 = vpop.permute.xlu2 %10175  ;;  %v9387_v28 = vunpack.i.l.bf16 %v15161_v41  ;;  %v10327_v53 = vld [vmem:[#allocation2 + $0x300] sm:$0xff]  ;;  %7959 = vmatmul.msk.f32.gmra.mxu3 %vm52_vm0, %v4617_v35 }
 0x7f3   :  { %v6852_v43 = vsel %vm3092_vm8, %v6788_v52, %v10153_v9  ;;  %v6662_v54 = vsel %vm2897_vm6, %v6598_v34, %v10158_v29  ;;  %v10163_v18 = vunpack.i.h.bf16 %v10161_v60  ;;  %v10177_v13 = vunpack.i.l.bf16 %v10176_v6  ;;  %v10332_v35 = vld [vmem:[#allocation7 + $0x160] sm:$0xff] }
 0x7f4   :  { %v7592_v1 = vadd.f32 %v13679_v56, %v7527_v17  ;;  %7253 = vmatmul.f32.gmra.mxu2 %v6851_v31  ;;  %v14322_v17 = vpop.f32.mrf.mxu3  ;;  %v15162_v31 = vld [vmem:[#allocation25_spill] sm:$0xff]  ;;  %v9407_v45 = vunpack.i.l.bf16 %v15164_v10 }
 0x7f5   :  { %v9402_v36 = vunpack.i.l.bf16 %v15162_v31  ;;  %v6726_v19 = vsel %vm2962_vm5, %v6662_v54, %v10163_v18 }
 0x7f6   :  { %v7656_v63 = vadd.f32 %v10322_v20, %v7592_v1  ;;  %v10173_v20 = vunpack.i.h.bf16 %v10171_v49  ;;  %v6790_v42 = vsel %vm3027_vm7, %v6726_v19, %v10168_v15  ;;  %v10328_v49 = vld [vmem:[#allocation7 + $0x150] sm:$0xff] }
 0x7f7   :  { %v7206_v46 = vpop.f32.mrf.mxu2 }
 0x7f8   :  { %v7720_v38 = vmax.f32 %v7656_v63, 0.0  ;;  %v7416_v4 = vadd.f32 %v14203_v25, %v7206_v46  ;;  %v6661_v25 = vsel %vm2897_vm6, %v6597_v40, %v10157_v7  ;;  %v10181_v1 = vpop.permute.xlu0 %10180  ;;  %v6471_v7 = vsel %vm52_vm0, %v10327_v53, %v9387_v28  ;;  %v15165_v28 = vld [vmem:[#allocation115_spill] sm:$0xff] }
 0x7f9   :  { %v6725_v22 = vsel %vm2962_vm5, %v6661_v25, %v10162_v12  ;;  %v6535_v2 = vsel %vm2767_vm3, %v6471_v7, %v9402_v36  ;;  %v6854_v60 = vsel %vm3092_vm8, %v6790_v42, %v10173_v20  ;;  %v9388_v40 = vunpack.i.h.bf16 %v15161_v41 }
 0x7fa   :  { %7784 = vst.msk [vmem:[#allocation8 + $0x138] sm:$0xff] %vm52_vm0, %v7720_v38  ;;  %v7528_v0 = vmul.f32 %v13671_v11, %v7416_v4  ;;  %v6789_v3 = vsel %vm3027_vm7, %v6725_v22, %v10167_v26  ;;  %v10182_v38 = vunpack.i.l.bf16 %v10181_v1  ;;  %v10186_v4 = vpop.permute.xlu1 %10185  ;;  %v6599_v58 = vsel %vm2832_vm4, %v6535_v2, %v9567_v33  ;;  %v10191_v26 = vpop.permute.xlu2 %10190  ;;  %7960 = vmatmul.msk.f32.gmra.mxu3 %vm52_vm0, %v4618_v30 }
 0x7fb   :  { %v6853_v14 = vsel %vm3092_vm8, %v6789_v3, %v10172_v47  ;;  %v9403_v25 = vunpack.i.h.bf16 %v15162_v31  ;;  %v9568_v12 = vunpack.i.h.bf16 %v15163_v59  ;;  %v10192_v29 = vunpack.i.l.bf16 %v10191_v26  ;;  %v10331_v31 = vld [vmem:[#allocation2 + $0x318] sm:$0xff] }
 0x7fc   :  { %v7593_v27 = vadd.f32 %v13679_v56, %v7528_v0  ;;  %7256 = vmatmul.f32.gmra.mxu2 %v6852_v43  ;;  %v10187_v0 = vunpack.i.l.bf16 %v10186_v4  ;;  %v14342_v62 = vpop.f32.mrf.mxu3  ;;  %v9422_v18 = vunpack.i.l.bf16 %v15165_v28  ;;  %v6473_v36 = vsel %vm52_vm0, %v10331_v31, %v9407_v45  ;;  %v10336_v31 = vld [vmem:[#allocation7 + $0x178] sm:$0xff] }
 0x7fe   :  { %v7657_v8 = vadd.f32 %v10324_v32, %v7593_v27  ;;  %v10178_v32 = vunpack.i.h.bf16 %v10176_v6 }
 0x7ff   :  { %v7209_v57 = vpop.f32.mrf.mxu2 }
 0x800   :  { %v7721_v16 = vmax.f32 %v7657_v8, 0.0  ;;  %v7419_v50 = vadd.f32 %v14224_v61, %v7209_v57  ;;  %v10329_v57 = vld [vmem:[#allocation2 + $0x308] sm:$0xff]  ;;  %v10196_v6 = vpop.permute.xlu0 %10195 }
 0x801   :  { %v6472_v22 = vsel %vm52_vm0, %v10329_v57, %v9388_v40  ;;  %v10197_v59 = vunpack.i.l.bf16 %v10196_v6  ;;  %v10333_v40 = vld [vmem:[#allocation2 + $0x320] sm:$0xff] }
 0x802   :  { %7785 = vst.msk [vmem:[#allocation8 + $0x140] sm:$0xff] %vm52_vm0, %v7721_v16  ;;  %v7529_v21 = vmul.f32 %v13671_v11, %v7419_v50  ;;  %v10183_v16 = vunpack.i.h.bf16 %v10181_v1  ;;  %v6536_v50 = vsel %vm2767_vm3, %v6472_v22, %v9403_v25  ;;  %v15166_v1 = vld [vmem:[#allocation51_spill] sm:$0xff]  ;;  %v6088_v2 = vpop.permute.xlu2 %6087  ;;  %v10334_v22 = vld [vmem:[#allocation7 + $0x168] sm:$0xff] }
 0x803   :  { %v9573_v25 = vunpack.i.h.bf16 %v15166_v1 }
 0x804   :  { %v7594_v61 = vadd.f32 %v13679_v56, %v7529_v21  ;;  %7259 = vmatmul.f32.gmra.mxu2 %v6853_v14  ;;  %v6600_v21 = vsel %vm2832_vm4, %v6536_v50, %v9568_v12  ;;  %v10188_v14 = vunpack.i.h.bf16 %v10186_v4  ;;  %v14363_v19 = vpop.f32.mrf.mxu3  ;;  %v9408_v4 = vunpack.i.h.bf16 %v15164_v10 }
 0x805   :  { %v6664_v34 = vsel %vm2897_vm6, %v6600_v21, %v10178_v32 }
 0x806   :  { %v7658_v24 = vadd.f32 %v10326_v44, %v7594_v61  ;;  %v6728_v15 = vsel %vm2962_vm5, %v6664_v34, %v10183_v16  ;;  %v10330_v61 = vld [vmem:[#allocation7 + $0x158] sm:$0xff]  ;;  %v9572_v44 = vunpack.i.l.bf16 %v15166_v1 }
 0x807   :  { %v7212_v63 = vpop.f32.mrf.mxu2 }
 0x808   :  { %v7722_v9 = vmax.f32 %v7658_v24, 0.0  ;;  %v7422_v46 = vadd.f32 %v14244_v55, %v7212_v63  ;;  %v6663_v55 = vsel %vm2897_vm6, %v6599_v58, %v10177_v13  ;;  %v6792_v63 = vsel %vm3027_vm7, %v6728_v15, %v10188_v14 }
 0x809   :  { %v6727_v43 = vsel %vm2962_vm5, %v6663_v55, %v10182_v38  ;;  %v10193_v13 = vunpack.i.h.bf16 %v10191_v26  ;;  %v9423_v26 = vunpack.i.h.bf16 %v15165_v28 }
 0x80a   :  { %7786 = vst.msk [vmem:[#allocation8 + $0x148] sm:$0xff] %vm52_vm0, %v7722_v9  ;;  %v7530_v37 = vmul.f32 %v13671_v11, %v7422_v46  ;;  %v6791_v47 = vsel %vm3027_vm7, %v6727_v43, %v10187_v0  ;;  %v6537_v9 = vsel %vm2767_vm3, %v6473_v36, %v9422_v18  ;;  %v5832_v46 = vpop.permute.xlu1 %5831  ;;  %v6474_v43 = vsel %vm52_vm0, %v10333_v40, %v9408_v4  ;;  %v6090_v50 = vpop.permute.xlu2 %6089 }
 0x80b   :  { %v6601_v53 = vsel %vm2832_vm4, %v6537_v9, %v9572_v44  ;;  %v6856_v7 = vsel %vm3092_vm8, %v6792_v63, %v10193_v13 }
 0x80c   :  { %v7595_v52 = vadd.f32 %v13679_v56, %v7530_v37  ;;  %7262 = vmatmul.f32.gmra.mxu2 %v6854_v60  ;;  %v6665_v38 = vsel %vm2897_vm6, %v6601_v53, %v10197_v59  ;;  %v6344_v37 = vpop.permute.xlu0 %6343 }
 0x80d   :  { %v6729_v60 = vsel %vm2962_vm5, %v6665_v38, %v5832_v46  ;;  %v10338_v38 = vld [vmem:[#allocation7 + $0x188] sm:$0xff] }
 0x80e   :  { %v7659_v27 = vadd.f32 %v10328_v49, %v7595_v52  ;;  %v10198_v49 = vunpack.i.h.bf16 %v10196_v6 }
 0x80f   :  { %v7215_v48 = vpop.f32.mrf.mxu2 }
 0x810   :  { %v7723_v8 = vmax.f32 %v7659_v27, 0.0  ;;  %v7425_v39 = vadd.f32 %v14263_v51, %v7215_v48  ;;  %v6855_v51 = vsel %vm3092_vm8, %v6791_v47, %v10192_v29  ;;  %v6793_v27 = vsel %vm3027_vm7, %v6729_v60, %v6088_v2  ;;  %v7442_v48 = vpop.f32.mrf.mxu3  ;;  %v10339_v60 = vld [vmem:[#allocation7 + $0x190] sm:$0xff] }
 0x811   :  { %v6857_v32 = vsel %vm3092_vm8, %v6793_v27, %v6344_v37 }
 0x812   :  { %7787 = vst.msk [vmem:[#allocation8 + $0x150] sm:$0xff] %vm52_vm0, %v7723_v8  ;;  %v7531_v3 = vmul.f32 %v13671_v11, %v7425_v39  ;;  %v6538_v8 = vsel %vm2767_vm3, %v6474_v43, %v9423_v26 }
 0x813   :  { %v6602_v47 = vsel %vm2832_vm4, %v6538_v8, %v9573_v25 }
 0x814   :  { %v7596_v54 = vadd.f32 %v13679_v56, %v7531_v3  ;;  %7265 = vmatmul.f32.gmra.mxu2 %v6855_v51  ;;  %v6666_v57 = vsel %vm2897_vm6, %v6602_v47, %v10198_v49  ;;  %v6346_v30 = vpop.permute.xlu0 %6345  ;;  %v10340_v49 = vld [vmem:[#allocation7 + $0x198] sm:$0xff] }
 0x816   :  { %v7660_v41 = vadd.f32 %v10330_v61, %v7596_v54  ;;  %v10335_v54 = vld [vmem:[#allocation7 + $0x170] sm:$0xff] }
 0x817   :  { %v7218_v24 = vpop.f32.mrf.mxu2 }
 0x818   :  { %v7724_v33 = vmax.f32 %v7660_v41, 0.0  ;;  %v7428_v20 = vadd.f32 %v14281_v23, %v7218_v24  ;;  %v7445_v6 = vpop.f32.mrf.mxu3 }
 0x81a   :  { %7788 = vst.msk [vmem:[#allocation8 + $0x158] sm:$0xff] %vm52_vm0, %v7724_v33  ;;  %v7532_v42 = vmul.f32 %v13671_v11, %v7428_v20 }
 0x81c   :  { %v7597_v23 = vadd.f32 %v13679_v56, %v7532_v42  ;;  %7268 = vmatmul.f32.gmra.mxu2 %v6856_v7 }
 0x81e   :  { %v7661_v58 = vadd.f32 %v10332_v35, %v7597_v23 }
 0x81f   :  { %v7221_v55 = vpop.f32.mrf.mxu2 }
 0x820   :  { %v7725_v0 = vmax.f32 %v7661_v58, 0.0  ;;  %v7431_v52 = vadd.f32 %v14302_v5, %v7221_v55  ;;  %v5834_v5 = vpop.permute.xlu1 %5833  ;;  %v7448_v1 = vpop.f32.mrf.mxu3 }
 0x821   :  { %v6730_v16 = vsel %vm2962_vm5, %v6666_v57, %v5834_v5 }
 0x822   :  { %7789 = vst.msk [vmem:[#allocation8 + $0x160] sm:$0xff] %vm52_vm0, %v7725_v0  ;;  %v7533_v12 = vmul.f32 %v13671_v11, %v7431_v52  ;;  %v6794_v21 = vsel %vm3027_vm7, %v6730_v16, %v6090_v50 }
 0x823   :  { %v6858_v34 = vsel %vm3092_vm8, %v6794_v21, %v6346_v30  ;;  %v10342_v30 = vld [vmem:[#allocation7 + $0x1a8] sm:$0xff] }
 0x824   :  { %v7598_v39 = vadd.f32 %v13679_v56, %v7533_v12  ;;  %7271 = vmatmul.f32.gmra.mxu2 %v6857_v32 }
 0x826   :  { %v7662_v29 = vadd.f32 %v10334_v22, %v7598_v39  ;;  %v10341_v39 = vld [vmem:[#allocation7 + $0x1a0] sm:$0xff] }
 0x827   :  { %v7224_v3 = vpop.f32.mrf.mxu2 }
 0x828   :  { %v7726_v10 = vmax.f32 %v7662_v29, 0.0  ;;  %v7434_v45 = vadd.f32 %v14322_v17, %v7224_v3  ;;  %v7451_v42 = vpop.f32.mrf.mxu3 }
 0x82a   :  { %7790 = vst.msk [vmem:[#allocation8 + $0x168] sm:$0xff] %vm52_vm0, %v7726_v10  ;;  %v7534_v51 = vmul.f32 %v13671_v11, %v7434_v45 }
 0x82c   :  { %v7599_v14 = vadd.f32 %v13679_v56, %v7534_v51  ;;  %7274 = vmatmul.f32.gmra.mxu2 %v6858_v34 }
 0x82e   :  { %v7663_v15 = vadd.f32 %v10335_v54, %v7599_v14  ;;  %v10343_v54 = vld [vmem:[#allocation7 + $0x1b0] sm:$0xff] }
 0x82f   :  { %v7227_v61 = vpop.f32.mrf.mxu2 }
 0x830   :  { %v7727_v41 = vmax.f32 %v7663_v15, 0.0  ;;  %v7437_v28 = vadd.f32 %v14342_v62, %v7227_v61  ;;  %v10337_v62 = vld [vmem:[#allocation7 + $0x180] sm:$0xff]  ;;  %v7454_v35 = vpop.f32.mrf.mxu3 }
 0x832   :  { %7791 = vst.msk [vmem:[#allocation8 + $0x170] sm:$0xff] %vm52_vm0, %v7727_v41  ;;  %v7535_v17 = vmul.f32 %v13671_v11, %v7437_v28 }
 0x834   :  { %v7600_v18 = vadd.f32 %v13679_v56, %v7535_v17 }
 0x836   :  { %v7664_v36 = vadd.f32 %v10336_v31, %v7600_v18 }
 0x837   :  { %v7230_v44 = vpop.f32.mrf.mxu2 }
 0x838   :  { %v7728_v24 = vmax.f32 %v7664_v36, 0.0  ;;  %v7440_v59 = vadd.f32 %v14363_v19, %v7230_v44  ;;  %v7457_v26 = vpop.f32.mrf.mxu3  ;;  %v10344_v36 = vld [vmem:[#allocation7 + $0x1b8] sm:$0xff] }
 0x83a   :  { %7792 = vst.msk [vmem:[#allocation8 + $0x178] sm:$0xff] %vm52_vm0, %v7728_v24  ;;  %v7536_v33 = vmul.f32 %v13671_v11, %v7440_v59 }
 0x83c   :  { %v7601_v20 = vadd.f32 %v13679_v56, %v7536_v33 }
 0x83e   :  { %v7665_v63 = vadd.f32 %v10337_v62, %v7601_v20 }
 0x83f   :  { %v7233_v13 = vpop.f32.mrf.mxu2 }
 0x840   :  { %v7729_v9 = vmax.f32 %v7665_v63, 0.0  ;;  %v7443_v46 = vadd.f32 %v7442_v48, %v7233_v13  ;;  %v7460_v57 = vpop.f32.mrf.mxu3  ;;  %v10345_v63 = vld [vmem:[#allocation7 + $0x1c0] sm:$0xff] }
 0x842   :  { %7793 = vst.msk [vmem:[#allocation8 + $0x180] sm:$0xff] %vm52_vm0, %v7729_v9  ;;  %v7537_v53 = vmul.f32 %v13671_v11, %v7443_v46 }
 0x844   :  { %v7602_v7 = vadd.f32 %v13679_v56, %v7537_v53 }
 0x846   :  { %v7666_v19 = vadd.f32 %v10338_v38, %v7602_v7  ;;  %v10346_v38 = vld [vmem:[#allocation7 + $0x1c8] sm:$0xff] }
 0x847   :  { %v7236_v23 = vpop.f32.mrf.mxu2 }
 0x848   :  { %v7730_v4 = vmax.f32 %v7666_v19, 0.0  ;;  %v7446_v2 = vadd.f32 %v7445_v6, %v7236_v23  ;;  %v7463_v34 = vpop.f32.mrf.mxu3 }
 0x84a   :  { %7794 = vst.msk [vmem:[#allocation8 + $0x188] sm:$0xff] %vm52_vm0, %v7730_v4  ;;  %v7538_v37 = vmul.f32 %v13671_v11, %v7446_v2 }
 0x84c   :  { %v7603_v58 = vadd.f32 %v13679_v56, %v7538_v37 }
 0x84e   :  { %v7667_v55 = vadd.f32 %v10339_v60, %v7603_v58  ;;  %v10347_v60 = vld [vmem:[#allocation7 + $0x1d0] sm:$0xff] }
 0x84f   :  { %v7239_v0 = vpop.f32.mrf.mxu2 }
 0x850   :  { %v7731_v52 = vmax.f32 %v7667_v55, 0.0  ;;  %v7449_v40 = vadd.f32 %v7448_v1, %v7239_v0  ;;  %v7466_v18 = vpop.f32.mrf.mxu3 }
 0x852   :  { %7795 = vst.msk [vmem:[#allocation8 + $0x190] sm:$0xff] %vm52_vm0, %v7731_v52  ;;  %v7539_v43 = vmul.f32 %v13671_v11, %v7449_v40 }
 0x854   :  { %v7604_v25 = vadd.f32 %v13679_v56, %v7539_v43 }
 0x856   :  { %v7668_v27 = vadd.f32 %v10340_v49, %v7604_v25  ;;  %v10348_v49 = vld [vmem:[#allocation7 + $0x1d8] sm:$0xff] }
 0x857   :  { %v7242_v12 = vpop.f32.mrf.mxu2 }
 0x858   :  { %v7732_v48 = vmax.f32 %v7668_v27, 0.0  ;;  %v7452_v32 = vadd.f32 %v7451_v42, %v7242_v12  ;;  %v7469_v62 = vpop.f32.mrf.mxu3 }
 0x85a   :  { %7796 = vst.msk [vmem:[#allocation8 + $0x198] sm:$0xff] %vm52_vm0, %v7732_v48  ;;  %v7540_v8 = vmul.f32 %v13671_v11, %v7452_v32 }
 0x85c   :  { %v7605_v5 = vadd.f32 %v13679_v56, %v7540_v8 }
 0x85e   :  { %v7669_v47 = vadd.f32 %v10341_v39, %v7605_v5 }
 0x85f   :  { %v7245_v22 = vpop.f32.mrf.mxu2 }
 0x860   :  { %v7733_v29 = vmax.f32 %v7669_v47, 0.0  ;;  %v7455_v16 = vadd.f32 %v7454_v35, %v7245_v22  ;;  %v7472_v23 = vpop.f32.mrf.mxu3  ;;  %v10349_v47 = vld [vmem:[#allocation7 + $0x1e0] sm:$0xff] }
 0x862   :  { %7797 = vst.msk [vmem:[#allocation8 + $0x1a0] sm:$0xff] %vm52_vm0, %v7733_v29  ;;  %v7541_v50 = vmul.f32 %v13671_v11, %v7455_v16 }
 0x864   :  { %v7606_v3 = vadd.f32 %v13679_v56, %v7541_v50 }
 0x866   :  { %v7670_v10 = vadd.f32 %v10342_v30, %v7606_v3 }
 0x867   :  { %v7248_v45 = vpop.f32.mrf.mxu2 }
 0x868   :  { %v7734_v21 = vmax.f32 %v7670_v10, 0.0  ;;  %v7458_v51 = vadd.f32 %v7457_v26, %v7248_v45  ;;  %v7475_v43 = vpop.f32.mrf.mxu3  ;;  %v10350_v10 = vld [vmem:[#allocation7 + $0x1e8] sm:$0xff] }
 0x86a   :  { %7798 = vst.msk [vmem:[#allocation8 + $0x1a8] sm:$0xff] %vm52_vm0, %v7734_v21  ;;  %v7542_v14 = vmul.f32 %v13671_v11, %v7458_v51 }
 0x86c   :  { %v7607_v6 = vadd.f32 %v13679_v56, %v7542_v14 }
 0x86e   :  { %v7671_v15 = vadd.f32 %v10343_v54, %v7607_v6 }
 0x86f   :  { %v7251_v61 = vpop.f32.mrf.mxu2 }
 0x870   :  { %v7735_v41 = vmax.f32 %v7671_v15, 0.0  ;;  %v7461_v28 = vadd.f32 %v7460_v57, %v7251_v61  ;;  %v7478_v5 = vpop.f32.mrf.mxu3  ;;  %v10351_v15 = vld [vmem:[#allocation7 + $0x1f0] sm:$0xff] }
 0x872   :  { %7799 = vst.msk [vmem:[#allocation8 + $0x1b0] sm:$0xff] %vm52_vm0, %v7735_v41  ;;  %v7543_v17 = vmul.f32 %v13671_v11, %v7461_v28 }
 0x874   :  { %v7608_v31 = vadd.f32 %v13679_v56, %v7543_v17 }
 0x876   :  { %v7672_v1 = vadd.f32 %v10344_v36, %v7608_v31  ;;  %v10352_v36 = vld [vmem:[#allocation7 + $0x1f8] sm:$0xff] }
 0x877   :  { %v7254_v44 = vpop.f32.mrf.mxu2 }
 0x878   :  { %v7736_v24 = vmax.f32 %v7672_v1, 0.0  ;;  %v7464_v59 = vadd.f32 %v7463_v34, %v7254_v44  ;;  %v7481_v3 = vpop.f32.mrf.mxu3 }
 0x87a   :  { %7800 = vst.msk [vmem:[#allocation8 + $0x1b8] sm:$0xff] %vm52_vm0, %v7736_v24  ;;  %v7544_v33 = vmul.f32 %v13671_v11, %v7464_v59 }
 0x87c   :  { %v7609_v20 = vadd.f32 %v13679_v56, %v7544_v33 }
 0x87e   :  { %v7673_v13 = vadd.f32 %v10345_v63, %v7609_v20 }
 0x87f   :  { %v7257_v9 = vpop.f32.mrf.mxu2 }
 0x880   :  { %v7737_v46 = vmax.f32 %v7673_v13, 0.0  ;;  %v7467_v42 = vadd.f32 %v7466_v18, %v7257_v9  ;;  %v7484_v54 = vpop.f32.mrf.mxu3 }
 0x882   :  { %7801 = vst.msk [vmem:[#allocation8 + $0x1c0] sm:$0xff] %vm52_vm0, %v7737_v46  ;;  %v7545_v53 = vmul.f32 %v13671_v11, %v7467_v42 }
 0x884   :  { %v7610_v7 = vadd.f32 %v13679_v56, %v7545_v53 }
 0x886   :  { %v7674_v19 = vadd.f32 %v10346_v38, %v7610_v7 }
 0x887   :  { %v7260_v4 = vpop.f32.mrf.mxu2 }
 0x888   :  { %v7738_v2 = vmax.f32 %v7674_v19, 0.0  ;;  %v7470_v37 = vadd.f32 %v7469_v62, %v7260_v4 }
 0x88a   :  { %7802 = vst.msk [vmem:[#allocation8 + $0x1c8] sm:$0xff] %vm52_vm0, %v7738_v2  ;;  %v7546_v35 = vmul.f32 %v13671_v11, %v7470_v37 }
 0x88c   :  { %v7611_v58 = vadd.f32 %v13679_v56, %v7546_v35 }
 0x88e   :  { %v7675_v55 = vadd.f32 %v10347_v60, %v7611_v58 }
 0x88f   :  { %v7263_v0 = vpop.f32.mrf.mxu2 }
 0x890   :  { %v7739_v52 = vmax.f32 %v7675_v55, 0.0  ;;  %v7473_v40 = vadd.f32 %v7472_v23, %v7263_v0 }
 0x892   :  { %7803 = vst.msk [vmem:[#allocation8 + $0x1d0] sm:$0xff] %vm52_vm0, %v7739_v52  ;;  %v7547_v25 = vmul.f32 %v13671_v11, %v7473_v40 }
 0x894   :  { %v7612_v26 = vadd.f32 %v13679_v56, %v7547_v25 }
 0x896   :  { %v7676_v27 = vadd.f32 %v10348_v49, %v7612_v26 }
 0x897   :  { %v7266_v12 = vpop.f32.mrf.mxu2 }
 0x898   :  { %v7740_v48 = vmax.f32 %v7676_v27, 0.0  ;;  %v7476_v32 = vadd.f32 %v7475_v43, %v7266_v12 }
 0x89a   :  { %7804 = vst.msk [vmem:[#allocation8 + $0x1d8] sm:$0xff] %vm52_vm0, %v7740_v48  ;;  %v7548_v8 = vmul.f32 %v13671_v11, %v7476_v32 }
 0x89c   :  { %v7613_v39 = vadd.f32 %v13679_v56, %v7548_v8 }
 0x89e   :  { %v7677_v57 = vadd.f32 %v10349_v47, %v7613_v39 }
 0x89f   :  { %v7269_v22 = vpop.f32.mrf.mxu2 }
 0x8a0   :  { %v7741_v29 = vmax.f32 %v7677_v57, 0.0  ;;  %v7479_v16 = vadd.f32 %v7478_v5, %v7269_v22 }
 0x8a2   :  { %7805 = vst.msk [vmem:[#allocation8 + $0x1e0] sm:$0xff] %vm52_vm0, %v7741_v29  ;;  %v7549_v50 = vmul.f32 %v13671_v11, %v7479_v16 }
 0x8a4   :  { %v7614_v30 = vadd.f32 %v13679_v56, %v7549_v50 }
 0x8a6   :  { %v7678_v45 = vadd.f32 %v10350_v10, %v7614_v30 }
 0x8a7   :  { %v7272_v21 = vpop.f32.mrf.mxu2 }
 0x8a8   :  { %v7742_v51 = vmax.f32 %v7678_v45, 0.0  ;;  %v7482_v34 = vadd.f32 %v7481_v3, %v7272_v21 }
 0x8aa   :  { %7806 = vst.msk [vmem:[#allocation8 + $0x1e8] sm:$0xff] %vm52_vm0, %v7742_v51  ;;  %v7550_v14 = vmul.f32 %v13671_v11, %v7482_v34 }
 0x8ac   :  { %v7615_v6 = vadd.f32 %v13679_v56, %v7550_v14 }
 0x8ae   :  { %v7679_v61 = vadd.f32 %v10351_v15, %v7615_v6 }
 0x8af   :  { %v7275_v41 = vpop.f32.mrf.mxu2 }
 0x8b0   :  { %v7743_v28 = vmax.f32 %v7679_v61, 0.0  ;;  %v7485_v17 = vadd.f32 %v7484_v54, %v7275_v41 }
 0x8b2   :  { %7807 = vst.msk [vmem:[#allocation8 + $0x1f0] sm:$0xff] %vm52_vm0, %v7743_v28  ;;  %v7551_v18 = vmul.f32 %v13671_v11, %v7485_v17 }
 0x8b4   :  { %v7616_v31 = vadd.f32 %v13679_v56, %v7551_v18 }
 0x8b6   :  { %v7680_v1 = vadd.f32 %v10352_v36, %v7616_v31 }
 0x8b8   :  { %v7744_v44 = vmax.f32 %v7680_v1, 0.0 }
 0x8ba   :  { %7808 = vst.msk [vmem:[#allocation8 + $0x1f8] sm:$0xff] %vm52_vm0, %v7744_v44 }
 0x8bb   :  { %7821 = dma.vmem_to_hbm [thread:$0]  %s7814_s29, 8192, %s7816_s16, [#allocation5], %s10421_s24, %s10421_s24, %s10422_s25  }
 0x8bc   :  { %10417 = dma.done.wait [#allocation5], 8192  }
 0x8bd   :  { %10418 = vsyncadd [#allocation5], 4294959104 }
 0x8be   :  { %7826 = vsyncpa [#allocation4], 1 }
 0x8bf   :  { %7827 = vsyncpa [#allocation5], 1 }
 0x8c0   :  { %7828 = vsyncpa [#allocation6], 1 }

</bundles_post_ra>
